<compile_context>
chip_gen: v5e
topology: v5e:2x2
jax: 0.10.0
libtpu: 0.0.40
codegen_flags: <defaults>
</compile_context>

<pallas_src>
import jax
import jax.numpy as jnp
from jax import lax
from jax.experimental import pallas as pl
from jax.experimental.pallas import tpu as pltpu

# ---------------- small synthetic configuration ----------------
B, T = 4, 16            # batch, padded sequence length (Tmax)
IDIM, ODIM = 16, 8      # input / output feature dims
K = 4                   # conv_bank_layers
CB = 16                 # conv_bank_chans
CP = 32                 # conv_proj_chans
PF = 3                  # conv_proj_filts
LHW = 2                 # highway_layers
HU = 16                 # highway_units
GRU_UNITS = 32
HG = GRU_UNITS // 2     # per-direction GRU hidden size
BN_EPS = 1e-5

# MXU operand dtype for the big row-batched matmuls.  Per perf review: set to
# jnp.bfloat16 on v6e/v7x (bf16-native MXU, halves weight DMA); keep float32
# on v5e or when bit-exactness vs. the f32 reference matters.
MXU_DTYPE = jnp.float32


def _mdot(a, b):
    return jnp.dot(a.astype(MXU_DTYPE), b.astype(MXU_DTYPE),
                   preferred_element_type=jnp.float32)


def cbhg_kernel(xs_ref, lens_ref,
                wbank_ref, bbank_ref,
                wp1_ref, bp1_ref, wp2_ref, bp2_ref,
                whw0_ref, bhw0_ref, whwpg_ref, bhwpg_ref,
                wih_ref, bih_ref,
                whhf_ref, bhhf_ref, whhb_ref, bhhb_ref,
                wout_ref, bout_ref,
                out_ref,
                pad_bank, pad_p1, pad_p2,
                gi_scr, yf_scr, yb_scr, yo_scr):
    BBk, Tk, D = xs_ref.shape
    Kk = wbank_ref.shape[0]                 # conv-bank taps (== conv_bank_layers)
    KCb = wbank_ref.shape[2]                # K * conv_bank_chans
    Pf = wp1_ref.shape[0]                   # conv_proj_filts
    Cp = wp1_ref.shape[2]
    Hu = whw0_ref.shape[1]
    L = whwpg_ref.shape[0]
    Hg = whhf_ref.shape[0]
    PL = (Kk - 1) // 2
    BT = BBk * Tk
    f32 = jnp.float32

    lens_vec = lens_ref[0]                                    # (BB, 1) int32
    x = xs_ref[...]                                           # (BB, T, IDIM)

    # ---- conv bank: K convs (k=1..K, torch per-k padding) fused into one
    #      K-tap conv on a unified padded frame; per-tap MXU dots accumulate
    #      into an f32 value (no read-time im2col lane-concat). ----
    if PL:
        pad_bank[:, 0:PL, :] = jnp.zeros((BBk, PL, D), f32)
    if Kk - 1 - PL:
        pad_bank[:, PL + Tk:Tk + Kk - 1, :] = jnp.zeros((BBk, Kk - 1 - PL, D), f32)
    pad_bank[:, PL:PL + Tk, :] = x
    acc = _mdot(pad_bank[:, 0:Tk, :].reshape(BT, D), wbank_ref[0])
    for j in range(1, Kk):
        acc = acc + _mdot(pad_bank[:, j:j + Tk, :].reshape(BT, D), wbank_ref[j])
    convs = jnp.maximum(acc + bbank_ref[...], 0.0)            # (BB*T, K*CB)

    # ---- max pool (kernel 2, stride 1, right 0-pad == torch ConstantPad1d
    #      with value 0.0), kept zero-padded by 1 on both sides for proj1 ----
    pad_p1[:, 0:1, :] = jnp.zeros((BBk, 1, KCb), f32)
    pad_p1[:, Tk + 1:Tk + 2, :] = jnp.zeros((BBk, 1, KCb), f32)
    pad_p1[:, 1:1 + Tk, :] = convs.reshape(BBk, Tk, KCb)
    pooled = jnp.maximum(pad_p1[:, 1:1 + Tk, :], pad_p1[:, 2:2 + Tk, :])
    pad_p1[:, 1:1 + Tk, :] = pooled

    # ---- projection conv 1 (+ folded BN + ReLU), per-tap dots ----
    acc1 = _mdot(pad_p1[:, 0:Tk, :].reshape(BT, KCb), wp1_ref[0])
    for j in range(1, Pf):
        acc1 = acc1 + _mdot(pad_p1[:, j:j + Tk, :].reshape(BT, KCb), wp1_ref[j])
    p1 = jnp.maximum(acc1 + bp1_ref[...], 0.0)                # (BB*T, CP)

    # ---- projection conv 2 (+ folded BN, no ReLU), per-tap dots ----
    pad_p2[:, 0:1, :] = jnp.zeros((BBk, 1, Cp), f32)
    pad_p2[:, Tk + 1:Tk + 2, :] = jnp.zeros((BBk, 1, Cp), f32)
    pad_p2[:, 1:1 + Tk, :] = p1.reshape(BBk, Tk, Cp)
    acc2 = _mdot(pad_p2[:, 0:Tk, :].reshape(BT, Cp), wp2_ref[0])
    for j in range(1, Pf):
        acc2 = acc2 + _mdot(pad_p2[:, j:j + Tk, :].reshape(BT, Cp), wp2_ref[j])
    proj = acc2 + bp2_ref[...]                                # (BB*T, IDIM)

    # ---- residual + highway stack (P and G lane-packed -> one dot/layer) ----
    res = x.reshape(BT, D) + proj
    h = _mdot(res, whw0_ref[...]) + bhw0_ref[...]
    for l in range(L):
        pg = _mdot(h, whwpg_ref[l]) + bhwpg_ref[l]
        p = jnp.maximum(pg[:, 0:Hu], 0.0)
        g = jax.nn.sigmoid(pg[:, Hu:2 * Hu])
        h = p * g + h * (1.0 - g)

    # ---- bidirectional GRU (gate order r, z, n).  Input projections for
    #      both directions hoisted out of the recurrence as one
    #      (BB*T, HU) @ (HU, 6*HG) dot; the serial loop carries (hf, hb) in
    #      registers and does two independent (BB, HG) @ (HG, 3*HG) dots. ----
    gi_scr[...] = _mdot(h, wih_ref[...]) + bih_ref[...]       # b-major (BB*T, 6*HG)

    whh_f = whhf_ref[...]
    whh_b = whhb_ref[...]
    bhh_f = bhhf_ref[...]
    bhh_b = bhhb_ref[...]

    def gru_step(t, carry):
        hf, hb = carry                                        # (BB, HG) each
        tb = Tk - 1 - t
        # batch rows at time t / tb from the b-major projection slab
        row_f = gi_scr[pl.ds(t, BBk, stride=Tk), :]           # (BB, 6*HG)
        row_b = gi_scr[pl.ds(tb, BBk, stride=Tk), :]
        gi_f = row_f[:, 0:3 * Hg]
        gi_b = row_b[:, 3 * Hg:6 * Hg]
        # per-direction recurrent dots (independent -> overlap in MXU pipeline)
        ghf = jnp.dot(hf, whh_f, preferred_element_type=f32) + bhh_f
        ghb = jnp.dot(hb, whh_b, preferred_element_type=f32) + bhh_b
        # forward cell
        rz_f = jax.nn.sigmoid(gi_f[:, 0:2 * Hg] + ghf[:, 0:2 * Hg])
        n_f = jnp.tanh(gi_f[:, 2 * Hg:3 * Hg]
                       + rz_f[:, 0:Hg] * ghf[:, 2 * Hg:3 * Hg])
        z_f = rz_f[:, Hg:2 * Hg]
        hf_new = (1.0 - z_f) * n_f + z_f * hf
        # backward cell
        rz_b = jax.nn.sigmoid(gi_b[:, 0:2 * Hg] + ghb[:, 0:2 * Hg])
        n_b = jnp.tanh(gi_b[:, 2 * Hg:3 * Hg]
                       + rz_b[:, 0:Hg] * ghb[:, 2 * Hg:3 * Hg])
        z_b = rz_b[:, Hg:2 * Hg]
        hb_new = (1.0 - z_b) * n_b + z_b * hb
        # pack_padded/pad_packed semantics: padded steps emit zeros (mask
        # folded into the store) and the hidden state is frozen.
        valid_f = t < lens_vec
        valid_b = tb < lens_vec
        yf_scr[pl.ds(t * BBk, BBk), :] = jnp.where(valid_f, hf_new, 0.0)
        yb_scr[pl.ds(tb * BBk, BBk), :] = jnp.where(valid_b, hb_new, 0.0)
        hf = jnp.where(valid_f, hf_new, hf)
        hb = jnp.where(valid_b, hb_new, hb)
        return hf, hb

    h0 = jnp.zeros((BBk, Hg), f32)
    lax.fori_loop(0, Tk, gru_step, (h0, h0), unroll=True)

    # ---- output linear on all BB*T rows at once.  The weight is split by
    #      rows (fwd half / bwd half) so no fwd|bwd lane-concat is needed;
    #      output columns are padded to a 128-lane slab (unmasked stores). ----
    yo_scr[...] = (_mdot(yf_scr[...], wout_ref[0:Hg, :])
                   + _mdot(yb_scr[...], wout_ref[Hg:2 * Hg, :])
                   + bout_ref[...])                           # t-major (BB*T, OP)
    for bb in range(BBk):
        out_ref[bb] = yo_scr[pl.ds(bb, Tk, stride=BBk), :]    # contiguous (T, OP) store


def _full_spec(shape):
    nd = len(shape)
    return pl.BlockSpec(shape, lambda b, _nd=nd: (0,) * _nd)


def cbhg_forward(xs, ilens, params, batch_block=None):
    """xs: (B, T, IDIM) f32, ilens: (B,) int -> ((B, T, ODIM) f32, ilens)."""
    Bx, Tx, Dx = xs.shape
    *head, w_out, b_out = params
    odim = w_out.shape[1]

    # Lane-dense output slab: pad ODIM up to a multiple of 128 in-kernel so
    # every output store is a full-width unmasked vst; slice afterwards.
    op = int(pl.cdiv(odim, 128)) * 128
    if op != odim:
        w_out = jnp.pad(w_out, ((0, 0), (0, op - odim)))
        b_out = jnp.pad(b_out, ((0, 0), (0, op - odim)))
    weights = list(head) + [w_out, b_out]

    # Batch blocking: BB sequences per grid step (rows flattened into every
    # matmul).  Default keeps >= 2 grid steps so both v7x TensorCores get
    # work; on v5e pass batch_block=Bx for a single fat step.
    if batch_block is None:
        batch_block = max(1, min(8, Bx // 2))
        while Bx % batch_block:
            batch_block -= 1
    assert Bx % batch_block == 0
    bb = batch_block
    nb = Bx // bb

    lens3 = ilens.astype(jnp.int32).reshape(nb, bb, 1)

    kk, _, kcb = weights[0].shape        # (K, IDIM, K*CB)
    _, _, cp = weights[2].shape          # (PF, K*CB, CP)
    hg = weights[12].shape[0]            # (HG, 3*HG)

    in_specs = ([pl.BlockSpec((bb, Tx, Dx), lambda i: (i, 0, 0)),
                 pl.BlockSpec((1, bb, 1), lambda i: (i, 0, 0))] +
                [_full_spec(w.shape) for w in weights])
    out_spec = pl.BlockSpec((bb, Tx, op), lambda i: (i, 0, 0))

    grid_spec = pltpu.PrefetchScalarGridSpec(
        num_scalar_prefetch=0,
        grid=(nb,),
        in_specs=in_specs,
        out_specs=out_spec,
        scratch_shapes=[
            pltpu.VMEM((bb, Tx + kk - 1, Dx), jnp.float32),   # padded conv-bank input
            pltpu.VMEM((bb, Tx + 2, kcb), jnp.float32),       # pooled, padded for proj1
            pltpu.VMEM((bb, Tx + 2, cp), jnp.float32),        # proj1 out, padded for proj2
            pltpu.VMEM((bb * Tx, 6 * hg), jnp.float32),       # fwd|bwd GRU input projections
            pltpu.VMEM((bb * Tx, hg), jnp.float32),           # fwd GRU outputs (t-major)
            pltpu.VMEM((bb * Tx, hg), jnp.float32),           # bwd GRU outputs (t-major)
            pltpu.VMEM((bb * Tx, op), jnp.float32),           # output-linear slab (t-major)
        ],
    )
    out_pad = pl.pallas_call(
        cbhg_kernel,
        out_shape=jax.ShapeDtypeStruct((Bx, Tx, op), jnp.float32),
        grid_spec=grid_spec,
        compiler_params=pltpu.CompilerParams(
            dimension_semantics=("parallel",),
            vmem_limit_bytes=32 * 1024 * 1024),
    )(xs, lens3, *weights)
    # sort_by_length / revert_sort_by_length is a no-op on the result
    # (each sequence is processed independently with its own length).
    return out_pad[..., :odim], ilens


def make_params(key):
    keys = iter(jax.random.split(key, 64))

    def nrm(shape, scale=0.1):
        return scale * jax.random.normal(next(keys), shape, dtype=jnp.float32)

    def pos(shape):
        return 1.0 + 0.1 * jax.random.uniform(next(keys), shape, dtype=jnp.float32)

    def fold_bn(w, b, gamma, beta, mean, var):
        # w: torch Conv1d weight (Cout, Cin, k); eval-mode BN folded in.
        s = gamma / jnp.sqrt(var + BN_EPS)
        return w * s[:, None, None], (b - mean) * s + beta

    PL = (K - 1) // 2
    # --- conv bank: stack the K convs (kernel sizes 1..K, torch per-k padding)
    #     into one K-tap conv on a unified padded frame, per-tap layout
    #     (K, IDIM, K*CB).  Even-k torch padding ((k-1)//2, (k-1)//2 + 1)
    #     maps to tap offset PL - (k-1)//2 in the unified frame. ---
    w_bank = jnp.zeros((K, IDIM, K * CB), jnp.float32)
    b_bank = jnp.zeros((K * CB,), jnp.float32)
    for ki in range(K):
        k = ki + 1
        w, bcv = nrm((CB, IDIM, k)), nrm((CB,))
        wf, bf = fold_bn(w, bcv, pos((CB,)), nrm((CB,)), nrm((CB,)), pos((CB,)))
        off = PL - (k - 1) // 2
        for m in range(k):
            w_bank = w_bank.at[off + m, :, ki * CB:(ki + 1) * CB].set(wf[:, :, m].T)
        b_bank = b_bank.at[ki * CB:(ki + 1) * CB].set(bf)
    b_bank = b_bank[None, :]

    # --- projection conv 1 (Conv1d + BN + ReLU), per-tap layout ---
    w, bcv = nrm((CP, K * CB, PF)), nrm((CP,))
    wf, bf = fold_bn(w, bcv, pos((CP,)), nrm((CP,)), nrm((CP,)), pos((CP,)))
    w_p1 = jnp.stack([wf[:, :, m].T for m in range(PF)], axis=0)     # (PF, K*CB, CP)
    b_p1 = bf[None, :]

    # --- projection conv 2 (Conv1d + BN, no ReLU), per-tap layout ---
    w, bcv = nrm((IDIM, CP, PF)), nrm((IDIM,))
    wf, bf = fold_bn(w, bcv, pos((IDIM,)), nrm((IDIM,)), nrm((IDIM,)), pos((IDIM,)))
    w_p2 = jnp.stack([wf[:, :, m].T for m in range(PF)], axis=0)     # (PF, CP, IDIM)
    b_p2 = bf[None, :]

    # --- highway stack: per-layer P and G packed along lanes -> one dot/layer ---
    w_hw0 = nrm((IDIM, HU))
    b_hw0 = nrm((HU,))[None, :]
    w_hwp = nrm((LHW, HU, HU))
    b_hwp = nrm((LHW, 1, HU))
    w_hwg = nrm((LHW, HU, HU))
    b_hwg = nrm((LHW, 1, HU))
    w_hwpg = jnp.concatenate([w_hwp, w_hwg], axis=2)          # (L, HU, 2*HU)
    b_hwpg = jnp.concatenate([b_hwp, b_hwg], axis=2)          # (L, 1, 2*HU)

    # --- bidirectional GRU (dir 0 = fwd, dir 1 = bwd; gate order r,z,n).
    #     Input weights lane-packed (HU, 6*HG); recurrent weights kept per
    #     direction (HG, 3*HG) so each step runs two independent dots. ---
    w_ih = nrm((2, HU, 3 * HG))
    w_hh = nrm((2, HG, 3 * HG))
    b_ih = nrm((2, 1, 3 * HG))
    b_hh = nrm((2, 1, 3 * HG))
    w_ih_pk = jnp.concatenate([w_ih[0], w_ih[1]], axis=1)     # (HU, 6*HG)
    b_ih_pk = jnp.concatenate([b_ih[0], b_ih[1]], axis=1)     # (1, 6*HG)
    w_hh_f, w_hh_b = w_hh[0], w_hh[1]
    b_hh_f, b_hh_b = b_hh[0], b_hh[1]

    # --- output linear (rows 0:HG fwd, HG:2*HG bwd) ---
    w_out = nrm((2 * HG, ODIM))
    b_out = nrm((ODIM,))[None, :]

    return [w_bank, b_bank, w_p1, b_p1, w_p2, b_p2,
            w_hw0, b_hw0, w_hwpg, b_hwpg,
            w_ih_pk, b_ih_pk, w_hh_f, b_hh_f, w_hh_b, b_hh_b,
            w_out, b_out]


if __name__ == "__main__":
    key = jax.random.PRNGKey(0)
    kx, kp = jax.random.split(key)
    xs = jax.random.normal(kx, (B, T, IDIM), dtype=jnp.float32)
    ilens = jnp.array([T, T - 5, T, T - 9], dtype=jnp.int32)
    params = make_params(kp)

    out, olens = cbhg_forward(xs, ilens, params)
    out = jax.block_until_ready(out)

    assert out.shape == (B, T, ODIM), out.shape
    assert bool(jnp.all(jnp.isfinite(out)))
    print("KERNEL_OK")
</pallas_src>

<mosaic_0001>
module attributes {stable_mosaic.version = 11 : i64} {
  func.func @cbhg_kernel(%arg0: i32, %arg1: memref<2x16x16xf32, #tpu.memory_space<vmem>>, %arg2: memref<1x2x1xi32, #tpu.memory_space<vmem>>, %arg3: memref<4x16x64xf32, #tpu.memory_space<vmem>>, %arg4: memref<1x64xf32, #tpu.memory_space<vmem>>, %arg5: memref<3x64x32xf32, #tpu.memory_space<vmem>>, %arg6: memref<1x32xf32, #tpu.memory_space<vmem>>, %arg7: memref<3x32x16xf32, #tpu.memory_space<vmem>>, %arg8: memref<1x16xf32, #tpu.memory_space<vmem>>, %arg9: memref<16x16xf32, #tpu.memory_space<vmem>>, %arg10: memref<1x16xf32, #tpu.memory_space<vmem>>, %arg11: memref<2x16x32xf32, #tpu.memory_space<vmem>>, %arg12: memref<2x1x32xf32, #tpu.memory_space<vmem>>, %arg13: memref<16x96xf32, #tpu.memory_space<vmem>>, %arg14: memref<1x96xf32, #tpu.memory_space<vmem>>, %arg15: memref<16x48xf32, #tpu.memory_space<vmem>>, %arg16: memref<1x48xf32, #tpu.memory_space<vmem>>, %arg17: memref<16x48xf32, #tpu.memory_space<vmem>>, %arg18: memref<1x48xf32, #tpu.memory_space<vmem>>, %arg19: memref<32x128xf32, #tpu.memory_space<vmem>>, %arg20: memref<1x128xf32, #tpu.memory_space<vmem>>, %arg21: memref<2x16x128xf32, #tpu.memory_space<vmem>>, %arg22: memref<2x19x16xf32, #tpu.memory_space<vmem>>, %arg23: memref<2x18x64xf32, #tpu.memory_space<vmem>>, %arg24: memref<2x18x32xf32, #tpu.memory_space<vmem>>, %arg25: memref<32x96xf32, #tpu.memory_space<vmem>>, %arg26: memref<32x16xf32, #tpu.memory_space<vmem>>, %arg27: memref<32x16xf32, #tpu.memory_space<vmem>>, %arg28: memref<32x128xf32, #tpu.memory_space<vmem>>) attributes {dimension_semantics = [#tpu.dimension_semantics<parallel>], iteration_bounds = array<i64: 2>, scalar_prefetch = 0 : i64, scratch_operands = 7 : i64, tpu.core_type = #tpu.core_type<tc>, window_params = [{transform_indices = @transform_0, window_bounds = array<i64: 2, 16, 16>}, {transform_indices = @transform_1, window_bounds = array<i64: 1, 2, 1>}, {pipeline_mode = #tpu.pipeline_mode<synchronous>, transform_indices = @transform_2, window_bounds = array<i64: 4, 16, 64>}, {pipeline_mode = #tpu.pipeline_mode<synchronous>, transform_indices = @transform_3, window_bounds = array<i64: 1, 64>}, {pipeline_mode = #tpu.pipeline_mode<synchronous>, transform_indices = @transform_4, window_bounds = array<i64: 3, 64, 32>}, {pipeline_mode = #tpu.pipeline_mode<synchronous>, transform_indices = @transform_5, window_bounds = array<i64: 1, 32>}, {pipeline_mode = #tpu.pipeline_mode<synchronous>, transform_indices = @transform_6, window_bounds = array<i64: 3, 32, 16>}, {pipeline_mode = #tpu.pipeline_mode<synchronous>, transform_indices = @transform_7, window_bounds = array<i64: 1, 16>}, {pipeline_mode = #tpu.pipeline_mode<synchronous>, transform_indices = @transform_8, window_bounds = array<i64: 16, 16>}, {pipeline_mode = #tpu.pipeline_mode<synchronous>, transform_indices = @transform_9, window_bounds = array<i64: 1, 16>}, {pipeline_mode = #tpu.pipeline_mode<synchronous>, transform_indices = @transform_10, window_bounds = array<i64: 2, 16, 32>}, {pipeline_mode = #tpu.pipeline_mode<synchronous>, transform_indices = @transform_11, window_bounds = array<i64: 2, 1, 32>}, {pipeline_mode = #tpu.pipeline_mode<synchronous>, transform_indices = @transform_12, window_bounds = array<i64: 16, 96>}, {pipeline_mode = #tpu.pipeline_mode<synchronous>, transform_indices = @transform_13, window_bounds = array<i64: 1, 96>}, {pipeline_mode = #tpu.pipeline_mode<synchronous>, transform_indices = @transform_14, window_bounds = array<i64: 16, 48>}, {pipeline_mode = #tpu.pipeline_mode<synchronous>, transform_indices = @transform_15, window_bounds = array<i64: 1, 48>}, {pipeline_mode = #tpu.pipeline_mode<synchronous>, transform_indices = @transform_16, window_bounds = array<i64: 16, 48>}, {pipeline_mode = #tpu.pipeline_mode<synchronous>, transform_indices = @transform_17, window_bounds = array<i64: 1, 48>}, {pipeline_mode = #tpu.pipeline_mode<synchronous>, transform_indices = @transform_18, window_bounds = array<i64: 32, 128>}, {pipeline_mode = #tpu.pipeline_mode<synchronous>, transform_indices = @transform_19, window_bounds = array<i64: 1, 128>}, {transform_indices = @transform_20, window_bounds = array<i64: 2, 16, 128>}]} {
    %c0 = arith.constant 0 : index
    %c0_0 = arith.constant 0 : index
    %c0_1 = arith.constant 0 : index
    %0 = vector.load %arg2[%c0, %c0_0, %c0_1] : memref<1x2x1xi32, #tpu.memory_space<vmem>>, vector<1x2x1xi32>
    %1 = vector.shape_cast %0 : vector<1x2x1xi32> to vector<2x1xi32>
    %c0_2 = arith.constant 0 : index
    %c0_3 = arith.constant 0 : index
    %c0_4 = arith.constant 0 : index
    %2 = vector.load %arg1[%c0_2, %c0_3, %c0_4] : memref<2x16x16xf32, #tpu.memory_space<vmem>>, vector<2x16x16xf32>
    %cst = arith.constant 0.000000e+00 : f32
    %3 = vector.broadcast %cst : f32 to vector<2x1x16xf32>
    %c0_5 = arith.constant 0 : index
    %c0_6 = arith.constant 0 : index
    %c0_7 = arith.constant 0 : index
    %4 = vector.load %arg22[%c0_5, %c0_6, %c0_7] : memref<2x19x16xf32, #tpu.memory_space<vmem>>, vector<2x1x16xf32>
    tpu.vector_store %arg22[%c0_5, %c0_6, %c0_7], %3 {strides = array<i32>} : memref<2x19x16xf32, #tpu.memory_space<vmem>>, vector<2x1x16xf32>,
    %cst_8 = arith.constant 0.000000e+00 : f32
    %5 = vector.broadcast %cst_8 : f32 to vector<2x2x16xf32>
    %c0_9 = arith.constant 0 : index
    %c17 = arith.constant 17 : index
    %c0_10 = arith.constant 0 : index
    %6 = vector.load %arg22[%c0_9, %c17, %c0_10] : memref<2x19x16xf32, #tpu.memory_space<vmem>>, vector<2x2x16xf32>
    tpu.vector_store %arg22[%c0_9, %c17, %c0_10], %5 {strides = array<i32>} : memref<2x19x16xf32, #tpu.memory_space<vmem>>, vector<2x2x16xf32>,
    %c0_11 = arith.constant 0 : index
    %c1 = arith.constant 1 : index
    %c0_12 = arith.constant 0 : index
    %7 = vector.load %arg22[%c0_11, %c1, %c0_12] : memref<2x19x16xf32, #tpu.memory_space<vmem>>, vector<2x16x16xf32>
    tpu.vector_store %arg22[%c0_11, %c1, %c0_12], %2 {strides = array<i32>} : memref<2x19x16xf32, #tpu.memory_space<vmem>>, vector<2x16x16xf32>,
    %c0_13 = arith.constant 0 : index
    %c0_14 = arith.constant 0 : index
    %c0_15 = arith.constant 0 : index
    %8 = vector.load %arg22[%c0_13, %c0_14, %c0_15] : memref<2x19x16xf32, #tpu.memory_space<vmem>>, vector<2x16x16xf32>
    %9 = vector.shape_cast %8 : vector<2x16x16xf32> to vector<32x16xf32>
    %c0_16 = arith.constant 0 : index
    %c0_17 = arith.constant 0 : index
    %c0_18 = arith.constant 0 : index
    %10 = vector.load %arg3[%c0_16, %c0_17, %c0_18] : memref<4x16x64xf32, #tpu.memory_space<vmem>>, vector<1x16x64xf32>
    %11 = vector.shape_cast %10 : vector<1x16x64xf32> to vector<16x64xf32>
    %cst_19 = arith.constant dense<0.000000e+00> : vector<32x64xf32>
    %12 = tpu.matmul %9, %11, %cst_19 {dimension_numbers = #tpu.dot_dimension_numbers<[1], [0], [0], [1], [0, 0, 1, 1], [], []>} : vector<32x16xf32>, vector<16x64xf32>, vector<32x64xf32> -> vector<32x64xf32>
    %c0_20 = arith.constant 0 : index
    %c1_21 = arith.constant 1 : index
    %c0_22 = arith.constant 0 : index
    %13 = vector.load %arg22[%c0_20, %c1_21, %c0_22] : memref<2x19x16xf32, #tpu.memory_space<vmem>>, vector<2x16x16xf32>
    %14 = vector.shape_cast %13 : vector<2x16x16xf32> to vector<32x16xf32>
    %c1_23 = arith.constant 1 : index
    %c0_24 = arith.constant 0 : index
    %c0_25 = arith.constant 0 : index
    %15 = vector.load %arg3[%c1_23, %c0_24, %c0_25] : memref<4x16x64xf32, #tpu.memory_space<vmem>>, vector<1x16x64xf32>
    %16 = vector.shape_cast %15 : vector<1x16x64xf32> to vector<16x64xf32>
    %cst_26 = arith.constant dense<0.000000e+00> : vector<32x64xf32>
    %17 = tpu.matmul %14, %16, %cst_26 {dimension_numbers = #tpu.dot_dimension_numbers<[1], [0], [0], [1], [0, 0, 1, 1], [], []>} : vector<32x16xf32>, vector<16x64xf32>, vector<32x64xf32> -> vector<32x64xf32>
    %18 = arith.addf %12, %17 : vector<32x64xf32>
    %c0_27 = arith.constant 0 : index
    %c2 = arith.constant 2 : index
    %c0_28 = arith.constant 0 : index
    %19 = vector.load %arg22[%c0_27, %c2, %c0_28] : memref<2x19x16xf32, #tpu.memory_space<vmem>>, vector<2x16x16xf32>
    %20 = vector.shape_cast %19 : vector<2x16x16xf32> to vector<32x16xf32>
    %c2_29 = arith.constant 2 : index
    %c0_30 = arith.constant 0 : index
    %c0_31 = arith.constant 0 : index
    %21 = vector.load %arg3[%c2_29, %c0_30, %c0_31] : memref<4x16x64xf32, #tpu.memory_space<vmem>>, vector<1x16x64xf32>
    %22 = vector.shape_cast %21 : vector<1x16x64xf32> to vector<16x64xf32>
    %cst_32 = arith.constant dense<0.000000e+00> : vector<32x64xf32>
    %23 = tpu.matmul %20, %22, %cst_32 {dimension_numbers = #tpu.dot_dimension_numbers<[1], [0], [0], [1], [0, 0, 1, 1], [], []>} : vector<32x16xf32>, vector<16x64xf32>, vector<32x64xf32> -> vector<32x64xf32>
    %24 = arith.addf %18, %23 : vector<32x64xf32>
    %c0_33 = arith.constant 0 : index
    %c3 = arith.constant 3 : index
    %c0_34 = arith.constant 0 : index
    %25 = vector.load %arg22[%c0_33, %c3, %c0_34] : memref<2x19x16xf32, #tpu.memory_space<vmem>>, vector<2x16x16xf32>
    %26 = vector.shape_cast %25 : vector<2x16x16xf32> to vector<32x16xf32>
    %c3_35 = arith.constant 3 : index
    %c0_36 = arith.constant 0 : index
    %c0_37 = arith.constant 0 : index
    %27 = vector.load %arg3[%c3_35, %c0_36, %c0_37] : memref<4x16x64xf32, #tpu.memory_space<vmem>>, vector<1x16x64xf32>
    %28 = vector.shape_cast %27 : vector<1x16x64xf32> to vector<16x64xf32>
    %cst_38 = arith.constant dense<0.000000e+00> : vector<32x64xf32>
    %29 = tpu.matmul %26, %28, %cst_38 {dimension_numbers = #tpu.dot_dimension_numbers<[1], [0], [0], [1], [0, 0, 1, 1], [], []>} : vector<32x16xf32>, vector<16x64xf32>, vector<32x64xf32> -> vector<32x64xf32>
    %30 = arith.addf %24, %29 : vector<32x64xf32>
    %c0_39 = arith.constant 0 : index
    %c0_40 = arith.constant 0 : index
    %31 = vector.load %arg4[%c0_39, %c0_40] : memref<1x64xf32, #tpu.memory_space<vmem>>, vector<1x64xf32>
    %32 = vector.broadcast %31 : vector<1x64xf32> to vector<32x64xf32>
    %33 = arith.addf %30, %32 : vector<32x64xf32>
    %cst_41 = arith.constant 0.000000e+00 : f32
    %34 = vector.broadcast %cst_41 : f32 to vector<32x64xf32>
    %35 = arith.maximumf %33, %34 : vector<32x64xf32>
    %cst_42 = arith.constant 0.000000e+00 : f32
    %36 = vector.broadcast %cst_42 : f32 to vector<2x1x64xf32>
    %c0_43 = arith.constant 0 : index
    %c0_44 = arith.constant 0 : index
    %c0_45 = arith.constant 0 : index
    %37 = vector.load %arg23[%c0_43, %c0_44, %c0_45] : memref<2x18x64xf32, #tpu.memory_space<vmem>>, vector<2x1x64xf32>
    tpu.vector_store %arg23[%c0_43, %c0_44, %c0_45], %36 {strides = array<i32>} : memref<2x18x64xf32, #tpu.memory_space<vmem>>, vector<2x1x64xf32>,
    %cst_46 = arith.constant 0.000000e+00 : f32
    %38 = vector.broadcast %cst_46 : f32 to vector<2x1x64xf32>
    %c0_47 = arith.constant 0 : index
    %c17_48 = arith.constant 17 : index
    %c0_49 = arith.constant 0 : index
    %39 = vector.load %arg23[%c0_47, %c17_48, %c0_49] : memref<2x18x64xf32, #tpu.memory_space<vmem>>, vector<2x1x64xf32>
    tpu.vector_store %arg23[%c0_47, %c17_48, %c0_49], %38 {strides = array<i32>} : memref<2x18x64xf32, #tpu.memory_space<vmem>>, vector<2x1x64xf32>,
    %40 = vector.shape_cast %35 : vector<32x64xf32> to vector<2x16x64xf32>
    %c0_50 = arith.constant 0 : index
    %c1_51 = arith.constant 1 : index
    %c0_52 = arith.constant 0 : index
    %41 = vector.load %arg23[%c0_50, %c1_51, %c0_52] : memref<2x18x64xf32, #tpu.memory_space<vmem>>, vector<2x16x64xf32>
    tpu.vector_store %arg23[%c0_50, %c1_51, %c0_52], %40 {strides = array<i32>} : memref<2x18x64xf32, #tpu.memory_space<vmem>>, vector<2x16x64xf32>,
    %c0_53 = arith.constant 0 : index
    %c1_54 = arith.constant 1 : index
    %c0_55 = arith.constant 0 : index
    %42 = vector.load %arg23[%c0_53, %c1_54, %c0_55] : memref<2x18x64xf32, #tpu.memory_space<vmem>>, vector<2x16x64xf32>
    %c0_56 = arith.constant 0 : index
    %c2_57 = arith.constant 2 : index
    %c0_58 = arith.constant 0 : index
    %43 = vector.load %arg23[%c0_56, %c2_57, %c0_58] : memref<2x18x64xf32, #tpu.memory_space<vmem>>, vector<2x16x64xf32>
    %44 = arith.maximumf %42, %43 : vector<2x16x64xf32>
    %c0_59 = arith.constant 0 : index
    %c1_60 = arith.constant 1 : index
    %c0_61 = arith.constant 0 : index
    %45 = vector.load %arg23[%c0_59, %c1_60, %c0_61] : memref<2x18x64xf32, #tpu.memory_space<vmem>>, vector<2x16x64xf32>
    tpu.vector_store %arg23[%c0_59, %c1_60, %c0_61], %44 {strides = array<i32>} : memref<2x18x64xf32, #tpu.memory_space<vmem>>, vector<2x16x64xf32>,
    %c0_62 = arith.constant 0 : index
    %c0_63 = arith.constant 0 : index
    %c0_64 = arith.constant 0 : index
    %46 = vector.load %arg23[%c0_62, %c0_63, %c0_64] : memref<2x18x64xf32, #tpu.memory_space<vmem>>, vector<2x16x64xf32>
    %47 = vector.shape_cast %46 : vector<2x16x64xf32> to vector<32x64xf32>
    %c0_65 = arith.constant 0 : index
    %c0_66 = arith.constant 0 : index
    %c0_67 = arith.constant 0 : index
    %48 = vector.load %arg5[%c0_65, %c0_66, %c0_67] : memref<3x64x32xf32, #tpu.memory_space<vmem>>, vector<1x64x32xf32>
    %49 = vector.shape_cast %48 : vector<1x64x32xf32> to vector<64x32xf32>
    %cst_68 = arith.constant dense<0.000000e+00> : vector<32x32xf32>
    %50 = tpu.matmul %47, %49, %cst_68 {dimension_numbers = #tpu.dot_dimension_numbers<[1], [0], [0], [1], [0, 0, 1, 1], [], []>} : vector<32x64xf32>, vector<64x32xf32>, vector<32x32xf32> -> vector<32x32xf32>
    %c0_69 = arith.constant 0 : index
    %c1_70 = arith.constant 1 : index
    %c0_71 = arith.constant 0 : index
    %51 = vector.load %arg23[%c0_69, %c1_70, %c0_71] : memref<2x18x64xf32, #tpu.memory_space<vmem>>, vector<2x16x64xf32>
    %52 = vector.shape_cast %51 : vector<2x16x64xf32> to vector<32x64xf32>
    %c1_72 = arith.constant 1 : index
    %c0_73 = arith.constant 0 : index
    %c0_74 = arith.constant 0 : index
    %53 = vector.load %arg5[%c1_72, %c0_73, %c0_74] : memref<3x64x32xf32, #tpu.memory_space<vmem>>, vector<1x64x32xf32>
    %54 = vector.shape_cast %53 : vector<1x64x32xf32> to vector<64x32xf32>
    %cst_75 = arith.constant dense<0.000000e+00> : vector<32x32xf32>
    %55 = tpu.matmul %52, %54, %cst_75 {dimension_numbers = #tpu.dot_dimension_numbers<[1], [0], [0], [1], [0, 0, 1, 1], [], []>} : vector<32x64xf32>, vector<64x32xf32>, vector<32x32xf32> -> vector<32x32xf32>
    %56 = arith.addf %50, %55 : vector<32x32xf32>
    %c0_76 = arith.constant 0 : index
    %c2_77 = arith.constant 2 : index
    %c0_78 = arith.constant 0 : index
    %57 = vector.load %arg23[%c0_76, %c2_77, %c0_78] : memref<2x18x64xf32, #tpu.memory_space<vmem>>, vector<2x16x64xf32>
    %58 = vector.shape_cast %57 : vector<2x16x64xf32> to vector<32x64xf32>
    %c2_79 = arith.constant 2 : index
    %c0_80 = arith.constant 0 : index
    %c0_81 = arith.constant 0 : index
    %59 = vector.load %arg5[%c2_79, %c0_80, %c0_81] : memref<3x64x32xf32, #tpu.memory_space<vmem>>, vector<1x64x32xf32>
    %60 = vector.shape_cast %59 : vector<1x64x32xf32> to vector<64x32xf32>
    %cst_82 = arith.constant dense<0.000000e+00> : vector<32x32xf32>
    %61 = tpu.matmul %58, %60, %cst_82 {dimension_numbers = #tpu.dot_dimension_numbers<[1], [0], [0], [1], [0, 0, 1, 1], [], []>} : vector<32x64xf32>, vector<64x32xf32>, vector<32x32xf32> -> vector<32x32xf32>
    %62 = arith.addf %56, %61 : vector<32x32xf32>
    %c0_83 = arith.constant 0 : index
    %c0_84 = arith.constant 0 : index
    %63 = vector.load %arg6[%c0_83, %c0_84] : memref<1x32xf32, #tpu.memory_space<vmem>>, vector<1x32xf32>
    %64 = vector.broadcast %63 : vector<1x32xf32> to vector<32x32xf32>
    %65 = arith.addf %62, %64 : vector<32x32xf32>
    %cst_85 = arith.constant 0.000000e+00 : f32
    %66 = vector.broadcast %cst_85 : f32 to vector<32x32xf32>
    %67 = arith.maximumf %65, %66 : vector<32x32xf32>
    %cst_86 = arith.constant 0.000000e+00 : f32
    %68 = vector.broadcast %cst_86 : f32 to vector<2x1x32xf32>
    %c0_87 = arith.constant 0 : index
    %c0_88 = arith.constant 0 : index
    %c0_89 = arith.constant 0 : index
    %69 = vector.load %arg24[%c0_87, %c0_88, %c0_89] : memref<2x18x32xf32, #tpu.memory_space<vmem>>, vector<2x1x32xf32>
    tpu.vector_store %arg24[%c0_87, %c0_88, %c0_89], %68 {strides = array<i32>} : memref<2x18x32xf32, #tpu.memory_space<vmem>>, vector<2x1x32xf32>,
    %cst_90 = arith.constant 0.000000e+00 : f32
    %70 = vector.broadcast %cst_90 : f32 to vector<2x1x32xf32>
    %c0_91 = arith.constant 0 : index
    %c17_92 = arith.constant 17 : index
    %c0_93 = arith.constant 0 : index
    %71 = vector.load %arg24[%c0_91, %c17_92, %c0_93] : memref<2x18x32xf32, #tpu.memory_space<vmem>>, vector<2x1x32xf32>
    tpu.vector_store %arg24[%c0_91, %c17_92, %c0_93], %70 {strides = array<i32>} : memref<2x18x32xf32, #tpu.memory_space<vmem>>, vector<2x1x32xf32>,
    %72 = vector.shape_cast %67 : vector<32x32xf32> to vector<2x16x32xf32>
    %c0_94 = arith.constant 0 : index
    %c1_95 = arith.constant 1 : index
    %c0_96 = arith.constant 0 : index
    %73 = vector.load %arg24[%c0_94, %c1_95, %c0_96] : memref<2x18x32xf32, #tpu.memory_space<vmem>>, vector<2x16x32xf32>
    tpu.vector_store %arg24[%c0_94, %c1_95, %c0_96], %72 {strides = array<i32>} : memref<2x18x32xf32, #tpu.memory_space<vmem>>, vector<2x16x32xf32>,
    %c0_97 = arith.constant 0 : index
    %c0_98 = arith.constant 0 : index
    %c0_99 = arith.constant 0 : index
    %74 = vector.load %arg24[%c0_97, %c0_98, %c0_99] : memref<2x18x32xf32, #tpu.memory_space<vmem>>, vector<2x16x32xf32>
    %75 = vector.shape_cast %74 : vector<2x16x32xf32> to vector<32x32xf32>
    %c0_100 = arith.constant 0 : index
    %c0_101 = arith.constant 0 : index
    %c0_102 = arith.constant 0 : index
    %76 = vector.load %arg7[%c0_100, %c0_101, %c0_102] : memref<3x32x16xf32, #tpu.memory_space<vmem>>, vector<1x32x16xf32>
    %77 = vector.shape_cast %76 : vector<1x32x16xf32> to vector<32x16xf32>
    %cst_103 = arith.constant dense<0.000000e+00> : vector<32x16xf32>
    %78 = tpu.matmul %75, %77, %cst_103 {dimension_numbers = #tpu.dot_dimension_numbers<[1], [0], [0], [1], [0, 0, 1, 1], [], []>} : vector<32x32xf32>, vector<32x16xf32>, vector<32x16xf32> -> vector<32x16xf32>
    %c0_104 = arith.constant 0 : index
    %c1_105 = arith.constant 1 : index
    %c0_106 = arith.constant 0 : index
    %79 = vector.load %arg24[%c0_104, %c1_105, %c0_106] : memref<2x18x32xf32, #tpu.memory_space<vmem>>, vector<2x16x32xf32>
    %80 = vector.shape_cast %79 : vector<2x16x32xf32> to vector<32x32xf32>
    %c1_107 = arith.constant 1 : index
    %c0_108 = arith.constant 0 : index
    %c0_109 = arith.constant 0 : index
    %81 = vector.load %arg7[%c1_107, %c0_108, %c0_109] : memref<3x32x16xf32, #tpu.memory_space<vmem>>, vector<1x32x16xf32>
    %82 = vector.shape_cast %81 : vector<1x32x16xf32> to vector<32x16xf32>
    %cst_110 = arith.constant dense<0.000000e+00> : vector<32x16xf32>
    %83 = tpu.matmul %80, %82, %cst_110 {dimension_numbers = #tpu.dot_dimension_numbers<[1], [0], [0], [1], [0, 0, 1, 1], [], []>} : vector<32x32xf32>, vector<32x16xf32>, vector<32x16xf32> -> vector<32x16xf32>
    %84 = arith.addf %78, %83 : vector<32x16xf32>
    %c0_111 = arith.constant 0 : index
    %c2_112 = arith.constant 2 : index
    %c0_113 = arith.constant 0 : index
    %85 = vector.load %arg24[%c0_111, %c2_112, %c0_113] : memref<2x18x32xf32, #tpu.memory_space<vmem>>, vector<2x16x32xf32>
    %86 = vector.shape_cast %85 : vector<2x16x32xf32> to vector<32x32xf32>
    %c2_114 = arith.constant 2 : index
    %c0_115 = arith.constant 0 : index
    %c0_116 = arith.constant 0 : index
    %87 = vector.load %arg7[%c2_114, %c0_115, %c0_116] : memref<3x32x16xf32, #tpu.memory_space<vmem>>, vector<1x32x16xf32>
    %88 = vector.shape_cast %87 : vector<1x32x16xf32> to vector<32x16xf32>
    %cst_117 = arith.constant dense<0.000000e+00> : vector<32x16xf32>
    %89 = tpu.matmul %86, %88, %cst_117 {dimension_numbers = #tpu.dot_dimension_numbers<[1], [0], [0], [1], [0, 0, 1, 1], [], []>} : vector<32x32xf32>, vector<32x16xf32>, vector<32x16xf32> -> vector<32x16xf32>
    %90 = arith.addf %84, %89 : vector<32x16xf32>
    %c0_118 = arith.constant 0 : index
    %c0_119 = arith.constant 0 : index
    %91 = vector.load %arg8[%c0_118, %c0_119] : memref<1x16xf32, #tpu.memory_space<vmem>>, vector<1x16xf32>
    %92 = vector.broadcast %91 : vector<1x16xf32> to vector<32x16xf32>
    %93 = arith.addf %90, %92 : vector<32x16xf32>
    %94 = vector.shape_cast %2 : vector<2x16x16xf32> to vector<32x16xf32>
    %95 = arith.addf %94, %93 : vector<32x16xf32>
    %c0_120 = arith.constant 0 : index
    %c0_121 = arith.constant 0 : index
    %96 = vector.load %arg9[%c0_120, %c0_121] : memref<16x16xf32, #tpu.memory_space<vmem>>, vector<16x16xf32>
    %cst_122 = arith.constant dense<0.000000e+00> : vector<32x16xf32>
    %97 = tpu.matmul %95, %96, %cst_122 {dimension_numbers = #tpu.dot_dimension_numbers<[1], [0], [0], [1], [0, 0, 1, 1], [], []>} : vector<32x16xf32>, vector<16x16xf32>, vector<32x16xf32> -> vector<32x16xf32>
    %c0_123 = arith.constant 0 : index
    %c0_124 = arith.constant 0 : index
    %98 = vector.load %arg10[%c0_123, %c0_124] : memref<1x16xf32, #tpu.memory_space<vmem>>, vector<1x16xf32>
    %99 = vector.broadcast %98 : vector<1x16xf32> to vector<32x16xf32>
    %100 = arith.addf %97, %99 : vector<32x16xf32>
    %c0_125 = arith.constant 0 : index
    %c0_126 = arith.constant 0 : index
    %c0_127 = arith.constant 0 : index
    %101 = vector.load %arg11[%c0_125, %c0_126, %c0_127] : memref<2x16x32xf32, #tpu.memory_space<vmem>>, vector<1x16x32xf32>
    %102 = vector.shape_cast %101 : vector<1x16x32xf32> to vector<16x32xf32>
    %cst_128 = arith.constant dense<0.000000e+00> : vector<32x32xf32>
    %103 = tpu.matmul %100, %102, %cst_128 {dimension_numbers = #tpu.dot_dimension_numbers<[1], [0], [0], [1], [0, 0, 1, 1], [], []>} : vector<32x16xf32>, vector<16x32xf32>, vector<32x32xf32> -> vector<32x32xf32>
    %c0_129 = arith.constant 0 : index
    %c0_130 = arith.constant 0 : index
    %c0_131 = arith.constant 0 : index
    %104 = vector.load %arg12[%c0_129, %c0_130, %c0_131] : memref<2x1x32xf32, #tpu.memory_space<vmem>>, vector<1x1x32xf32>
    %105 = vector.shape_cast %104 : vector<1x1x32xf32> to vector<1x32xf32>
    %106 = vector.broadcast %105 : vector<1x32xf32> to vector<32x32xf32>
    %107 = arith.addf %103, %106 : vector<32x32xf32>
    %108 = vector.extract_strided_slice %107 {offsets = [0, 0], sizes = [32, 16], strides = [1, 1]} : vector<32x32xf32> to vector<32x16xf32>
    %cst_132 = arith.constant 0.000000e+00 : f32
    %109 = vector.broadcast %cst_132 : f32 to vector<32x16xf32>
    %110 = arith.maximumf %108, %109 : vector<32x16xf32>
    %111 = vector.extract_strided_slice %107 {offsets = [0, 16], sizes = [32, 16], strides = [1, 1]} : vector<32x32xf32> to vector<32x16xf32>
    %112 = arith.negf %111 : vector<32x16xf32>
    %113 = math.exp %112 : vector<32x16xf32>
    %cst_133 = arith.constant 1.000000e+00 : f32
    %114 = vector.broadcast %cst_133 : f32 to vector<32x16xf32>
    %115 = arith.addf %114, %113 : vector<32x16xf32>
    %116 = arith.divf %114, %115 : vector<32x16xf32>
    %117 = arith.mulf %110, %116 : vector<32x16xf32>
    %cst_134 = arith.constant 1.000000e+00 : f32
    %118 = vector.broadcast %cst_134 : f32 to vector<32x16xf32>
    %119 = arith.subf %118, %116 : vector<32x16xf32>
    %120 = arith.mulf %100, %119 : vector<32x16xf32>
    %121 = arith.addf %117, %120 : vector<32x16xf32>
    %c1_135 = arith.constant 1 : index
    %c0_136 = arith.constant 0 : index
    %c0_137 = arith.constant 0 : index
    %122 = vector.load %arg11[%c1_135, %c0_136, %c0_137] : memref<2x16x32xf32, #tpu.memory_space<vmem>>, vector<1x16x32xf32>
    %123 = vector.shape_cast %122 : vector<1x16x32xf32> to vector<16x32xf32>
    %cst_138 = arith.constant dense<0.000000e+00> : vector<32x32xf32>
    %124 = tpu.matmul %121, %123, %cst_138 {dimension_numbers = #tpu.dot_dimension_numbers<[1], [0], [0], [1], [0, 0, 1, 1], [], []>} : vector<32x16xf32>, vector<16x32xf32>, vector<32x32xf32> -> vector<32x32xf32>
    %c1_139 = arith.constant 1 : index
    %c0_140 = arith.constant 0 : index
    %c0_141 = arith.constant 0 : index
    %125 = vector.load %arg12[%c1_139, %c0_140, %c0_141] : memref<2x1x32xf32, #tpu.memory_space<vmem>>, vector<1x1x32xf32>
    %126 = vector.shape_cast %125 : vector<1x1x32xf32> to vector<1x32xf32>
    %127 = vector.broadcast %126 : vector<1x32xf32> to vector<32x32xf32>
    %128 = arith.addf %124, %127 : vector<32x32xf32>
    %129 = vector.extract_strided_slice %128 {offsets = [0, 0], sizes = [32, 16], strides = [1, 1]} : vector<32x32xf32> to vector<32x16xf32>
    %cst_142 = arith.constant 0.000000e+00 : f32
    %130 = vector.broadcast %cst_142 : f32 to vector<32x16xf32>
    %131 = arith.maximumf %129, %130 : vector<32x16xf32>
    %132 = vector.extract_strided_slice %128 {offsets = [0, 16], sizes = [32, 16], strides = [1, 1]} : vector<32x32xf32> to vector<32x16xf32>
    %133 = arith.negf %132 : vector<32x16xf32>
    %134 = math.exp %133 : vector<32x16xf32>
    %cst_143 = arith.constant 1.000000e+00 : f32
    %135 = vector.broadcast %cst_143 : f32 to vector<32x16xf32>
    %136 = arith.addf %135, %134 : vector<32x16xf32>
    %137 = arith.divf %135, %136 : vector<32x16xf32>
    %138 = arith.mulf %131, %137 : vector<32x16xf32>
    %cst_144 = arith.constant 1.000000e+00 : f32
    %139 = vector.broadcast %cst_144 : f32 to vector<32x16xf32>
    %140 = arith.subf %139, %137 : vector<32x16xf32>
    %141 = arith.mulf %121, %140 : vector<32x16xf32>
    %142 = arith.addf %138, %141 : vector<32x16xf32>
    %c0_145 = arith.constant 0 : index
    %c0_146 = arith.constant 0 : index
    %143 = vector.load %arg13[%c0_145, %c0_146] : memref<16x96xf32, #tpu.memory_space<vmem>>, vector<16x96xf32>
    %cst_147 = arith.constant dense<0.000000e+00> : vector<32x96xf32>
    %144 = tpu.matmul %142, %143, %cst_147 {dimension_numbers = #tpu.dot_dimension_numbers<[1], [0], [0], [1], [0, 0, 1, 1], [], []>} : vector<32x16xf32>, vector<16x96xf32>, vector<32x96xf32> -> vector<32x96xf32>
    %c0_148 = arith.constant 0 : index
    %c0_149 = arith.constant 0 : index
    %145 = vector.load %arg14[%c0_148, %c0_149] : memref<1x96xf32, #tpu.memory_space<vmem>>, vector<1x96xf32>
    %146 = vector.broadcast %145 : vector<1x96xf32> to vector<32x96xf32>
    %147 = arith.addf %144, %146 : vector<32x96xf32>
    %c0_150 = arith.constant 0 : index
    %c0_151 = arith.constant 0 : index
    %148 = vector.load %arg25[%c0_150, %c0_151] : memref<32x96xf32, #tpu.memory_space<vmem>>, vector<32x96xf32>
    tpu.vector_store %arg25[%c0_150, %c0_151], %147 {strides = array<i32>} : memref<32x96xf32, #tpu.memory_space<vmem>>, vector<32x96xf32>,
    %c0_152 = arith.constant 0 : index
    %c0_153 = arith.constant 0 : index
    %149 = vector.load %arg15[%c0_152, %c0_153] : memref<16x48xf32, #tpu.memory_space<vmem>>, vector<16x48xf32>
    %c0_154 = arith.constant 0 : index
    %c0_155 = arith.constant 0 : index
    %150 = vector.load %arg17[%c0_154, %c0_155] : memref<16x48xf32, #tpu.memory_space<vmem>>, vector<16x48xf32>
    %c0_156 = arith.constant 0 : index
    %c0_157 = arith.constant 0 : index
    %151 = vector.load %arg16[%c0_156, %c0_157] : memref<1x48xf32, #tpu.memory_space<vmem>>, vector<1x48xf32>
    %c0_158 = arith.constant 0 : index
    %c0_159 = arith.constant 0 : index
    %152 = vector.load %arg18[%c0_158, %c0_159] : memref<1x48xf32, #tpu.memory_space<vmem>>, vector<1x48xf32>
    %cst_160 = arith.constant 0.000000e+00 : f32
    %153 = vector.broadcast %cst_160 : f32 to vector<2x16xf32>
    %c0_i32 = arith.constant 0 : i32
    %c15_i32 = arith.constant 15 : i32
    %154 = arith.subi %c15_i32, %c0_i32 : i32
    %155 = arith.index_cast %c0_i32 : i32 to index
    %c0_161 = arith.constant 0 : index
    %156 = tpu.strided_load %arg25[%155, %c0_161] {strides = array<i32: 16, 1>} : memref<32x96xf32, #tpu.memory_space<vmem>>, vector<2x96xf32>
    %157 = arith.index_cast %154 : i32 to index
    %c0_162 = arith.constant 0 : index
    %158 = tpu.strided_load %arg25[%157, %c0_162] {strides = array<i32: 16, 1>} : memref<32x96xf32, #tpu.memory_space<vmem>>, vector<2x96xf32>
    %159 = vector.extract_strided_slice %156 {offsets = [0, 0], sizes = [2, 48], strides = [1, 1]} : vector<2x96xf32> to vector<2x48xf32>
    %160 = vector.extract_strided_slice %158 {offsets = [0, 48], sizes = [2, 48], strides = [1, 1]} : vector<2x96xf32> to vector<2x48xf32>
    %cst_163 = arith.constant dense<0.000000e+00> : vector<2x48xf32>
    %161 = tpu.matmul %153, %149, %cst_163 {dimension_numbers = #tpu.dot_dimension_numbers<[1], [0], [0], [1], [0, 0, 1, 1], [], []>} : vector<2x16xf32>, vector<16x48xf32>, vector<2x48xf32> -> vector<2x48xf32>
    %162 = vector.broadcast %151 : vector<1x48xf32> to vector<2x48xf32>
    %163 = arith.addf %161, %162 : vector<2x48xf32>
    %cst_164 = arith.constant dense<0.000000e+00> : vector<2x48xf32>
    %164 = tpu.matmul %153, %150, %cst_164 {dimension_numbers = #tpu.dot_dimension_numbers<[1], [0], [0], [1], [0, 0, 1, 1], [], []>} : vector<2x16xf32>, vector<16x48xf32>, vector<2x48xf32> -> vector<2x48xf32>
    %165 = vector.broadcast %152 : vector<1x48xf32> to vector<2x48xf32>
    %166 = arith.addf %164, %165 : vector<2x48xf32>
    %167 = vector.extract_strided_slice %159 {offsets = [0, 0], sizes = [2, 32], strides = [1, 1]} : vector<2x48xf32> to vector<2x32xf32>
    %168 = vector.extract_strided_slice %163 {offsets = [0, 0], sizes = [2, 32], strides = [1, 1]} : vector<2x48xf32> to vector<2x32xf32>
    %169 = arith.addf %167, %168 : vector<2x32xf32>
    %170 = arith.negf %169 : vector<2x32xf32>
    %171 = math.exp %170 : vector<2x32xf32>
    %cst_165 = arith.constant 1.000000e+00 : f32
    %172 = vector.broadcast %cst_165 : f32 to vector<2x32xf32>
    %173 = arith.addf %172, %171 : vector<2x32xf32>
    %174 = arith.divf %172, %173 : vector<2x32xf32>
    %175 = vector.extract_strided_slice %159 {offsets = [0, 32], sizes = [2, 16], strides = [1, 1]} : vector<2x48xf32> to vector<2x16xf32>
    %176 = vector.extract_strided_slice %174 {offsets = [0, 0], sizes = [2, 16], strides = [1, 1]} : vector<2x32xf32> to vector<2x16xf32>
    %177 = vector.extract_strided_slice %163 {offsets = [0, 32], sizes = [2, 16], strides = [1, 1]} : vector<2x48xf32> to vector<2x16xf32>
    %178 = arith.mulf %176, %177 : vector<2x16xf32>
    %179 = arith.addf %175, %178 : vector<2x16xf32>
    %180 = math.tanh %179 : vector<2x16xf32>
    %181 = vector.extract_strided_slice %174 {offsets = [0, 16], sizes = [2, 16], strides = [1, 1]} : vector<2x32xf32> to vector<2x16xf32>
    %cst_166 = arith.constant 1.000000e+00 : f32
    %182 = vector.broadcast %cst_166 : f32 to vector<2x16xf32>
    %183 = arith.subf %182, %181 : vector<2x16xf32>
    %184 = arith.mulf %183, %180 : vector<2x16xf32>
    %185 = arith.mulf %181, %153 : vector<2x16xf32>
    %186 = arith.addf %184, %185 : vector<2x16xf32>
    %187 = vector.extract_strided_slice %160 {offsets = [0, 0], sizes = [2, 32], strides = [1, 1]} : vector<2x48xf32> to vector<2x32xf32>
    %188 = vector.extract_strided_slice %166 {offsets = [0, 0], sizes = [2, 32], strides = [1, 1]} : vector<2x48xf32> to vector<2x32xf32>
    %189 = arith.addf %187, %188 : vector<2x32xf32>
    %190 = arith.negf %189 : vector<2x32xf32>
    %191 = math.exp %190 : vector<2x32xf32>
    %cst_167 = arith.constant 1.000000e+00 : f32
    %192 = vector.broadcast %cst_167 : f32 to vector<2x32xf32>
    %193 = arith.addf %192, %191 : vector<2x32xf32>
    %194 = arith.divf %192, %193 : vector<2x32xf32>
    %195 = vector.extract_strided_slice %160 {offsets = [0, 32], sizes = [2, 16], strides = [1, 1]} : vector<2x48xf32> to vector<2x16xf32>
    %196 = vector.extract_strided_slice %194 {offsets = [0, 0], sizes = [2, 16], strides = [1, 1]} : vector<2x32xf32> to vector<2x16xf32>
    %197 = vector.extract_strided_slice %166 {offsets = [0, 32], sizes = [2, 16], strides = [1, 1]} : vector<2x48xf32> to vector<2x16xf32>
    %198 = arith.mulf %196, %197 : vector<2x16xf32>
    %199 = arith.addf %195, %198 : vector<2x16xf32>
    %200 = math.tanh %199 : vector<2x16xf32>
    %201 = vector.extract_strided_slice %194 {offsets = [0, 16], sizes = [2, 16], strides = [1, 1]} : vector<2x32xf32> to vector<2x16xf32>
    %cst_168 = arith.constant 1.000000e+00 : f32
    %202 = vector.broadcast %cst_168 : f32 to vector<2x16xf32>
    %203 = arith.subf %202, %201 : vector<2x16xf32>
    %204 = arith.mulf %203, %200 : vector<2x16xf32>
    %205 = arith.mulf %201, %153 : vector<2x16xf32>
    %206 = arith.addf %204, %205 : vector<2x16xf32>
    %207 = vector.broadcast %c0_i32 : i32 to vector<2x1xi32>
    %208 = arith.cmpi slt, %207, %1 : vector<2x1xi32>
    %209 = vector.broadcast %154 : i32 to vector<2x1xi32>
    %210 = arith.cmpi slt, %209, %1 : vector<2x1xi32>
    %cst_169 = arith.constant 0.000000e+00 : f32
    %211 = vector.shape_cast %208 : vector<2x1xi1> to vector<2x1xi1>
    %212 = vector.broadcast %211 : vector<2x1xi1> to vector<2x16xi1>
    %213 = vector.broadcast %cst_169 : f32 to vector<2x16xf32>
    %214 = arith.select %212, %186, %213 : vector<2x16xi1>, vector<2x16xf32>
    %c2_i32 = arith.constant 2 : i32
    %215 = arith.muli %c0_i32, %c2_i32 : i32
    %216 = arith.index_cast %215 : i32 to index
    %c0_170 = arith.constant 0 : index
    %217 = vector.load %arg26[%216, %c0_170] : memref<32x16xf32, #tpu.memory_space<vmem>>, vector<2x16xf32>
    tpu.vector_store %arg26[%216, %c0_170], %214 {strides = array<i32>} : memref<32x16xf32, #tpu.memory_space<vmem>>, vector<2x16xf32>,
    %cst_171 = arith.constant 0.000000e+00 : f32
    %218 = vector.shape_cast %210 : vector<2x1xi1> to vector<2x1xi1>
    %219 = vector.broadcast %218 : vector<2x1xi1> to vector<2x16xi1>
    %220 = vector.broadcast %cst_171 : f32 to vector<2x16xf32>
    %221 = arith.select %219, %206, %220 : vector<2x16xi1>, vector<2x16xf32>
    %c2_i32_172 = arith.constant 2 : i32
    %222 = arith.muli %154, %c2_i32_172 : i32
    %223 = arith.index_cast %222 : i32 to index
    %c0_173 = arith.constant 0 : index
    %224 = vector.load %arg27[%223, %c0_173] : memref<32x16xf32, #tpu.memory_space<vmem>>, vector<2x16xf32>
    tpu.vector_store %arg27[%223, %c0_173], %221 {strides = array<i32>} : memref<32x16xf32, #tpu.memory_space<vmem>>, vector<2x16xf32>,
    %225 = vector.shape_cast %208 : vector<2x1xi1> to vector<2x1xi1>
    %226 = vector.broadcast %225 : vector<2x1xi1> to vector<2x16xi1>
    %227 = arith.select %226, %186, %153 : vector<2x16xi1>, vector<2x16xf32>
    %228 = vector.shape_cast %210 : vector<2x1xi1> to vector<2x1xi1>
    %229 = vector.broadcast %228 : vector<2x1xi1> to vector<2x16xi1>
    %230 = arith.select %229, %206, %153 : vector<2x16xi1>, vector<2x16xf32>
    %c1_i32 = arith.constant 1 : i32
    %c15_i32_174 = arith.constant 15 : i32
    %231 = arith.subi %c15_i32_174, %c1_i32 : i32
    %232 = arith.index_cast %c1_i32 : i32 to index
    %c0_175 = arith.constant 0 : index
    %233 = tpu.strided_load %arg25[%232, %c0_175] {strides = array<i32: 16, 1>} : memref<32x96xf32, #tpu.memory_space<vmem>>, vector<2x96xf32>
    %234 = arith.index_cast %231 : i32 to index
    %c0_176 = arith.constant 0 : index
    %235 = tpu.strided_load %arg25[%234, %c0_176] {strides = array<i32: 16, 1>} : memref<32x96xf32, #tpu.memory_space<vmem>>, vector<2x96xf32>
    %236 = vector.extract_strided_slice %233 {offsets = [0, 0], sizes = [2, 48], strides = [1, 1]} : vector<2x96xf32> to vector<2x48xf32>
    %237 = vector.extract_strided_slice %235 {offsets = [0, 48], sizes = [2, 48], strides = [1, 1]} : vector<2x96xf32> to vector<2x48xf32>
    %cst_177 = arith.constant dense<0.000000e+00> : vector<2x48xf32>
    %238 = tpu.matmul %227, %149, %cst_177 {dimension_numbers = #tpu.dot_dimension_numbers<[1], [0], [0], [1], [0, 0, 1, 1], [], []>} : vector<2x16xf32>, vector<16x48xf32>, vector<2x48xf32> -> vector<2x48xf32>
    %239 = vector.broadcast %151 : vector<1x48xf32> to vector<2x48xf32>
    %240 = arith.addf %238, %239 : vector<2x48xf32>
    %cst_178 = arith.constant dense<0.000000e+00> : vector<2x48xf32>
    %241 = tpu.matmul %230, %150, %cst_178 {dimension_numbers = #tpu.dot_dimension_numbers<[1], [0], [0], [1], [0, 0, 1, 1], [], []>} : vector<2x16xf32>, vector<16x48xf32>, vector<2x48xf32> -> vector<2x48xf32>
    %242 = vector.broadcast %152 : vector<1x48xf32> to vector<2x48xf32>
    %243 = arith.addf %241, %242 : vector<2x48xf32>
    %244 = vector.extract_strided_slice %236 {offsets = [0, 0], sizes = [2, 32], strides = [1, 1]} : vector<2x48xf32> to vector<2x32xf32>
    %245 = vector.extract_strided_slice %240 {offsets = [0, 0], sizes = [2, 32], strides = [1, 1]} : vector<2x48xf32> to vector<2x32xf32>
    %246 = arith.addf %244, %245 : vector<2x32xf32>
    %247 = arith.negf %246 : vector<2x32xf32>
    %248 = math.exp %247 : vector<2x32xf32>
    %cst_179 = arith.constant 1.000000e+00 : f32
    %249 = vector.broadcast %cst_179 : f32 to vector<2x32xf32>
    %250 = arith.addf %249, %248 : vector<2x32xf32>
    %251 = arith.divf %249, %250 : vector<2x32xf32>
    %252 = vector.extract_strided_slice %236 {offsets = [0, 32], sizes = [2, 16], strides = [1, 1]} : vector<2x48xf32> to vector<2x16xf32>
    %253 = vector.extract_strided_slice %251 {offsets = [0, 0], sizes = [2, 16], strides = [1, 1]} : vector<2x32xf32> to vector<2x16xf32>
    %254 = vector.extract_strided_slice %240 {offsets = [0, 32], sizes = [2, 16], strides = [1, 1]} : vector<2x48xf32> to vector<2x16xf32>
    %255 = arith.mulf %253, %254 : vector<2x16xf32>
    %256 = arith.addf %252, %255 : vector<2x16xf32>
    %257 = math.tanh %256 : vector<2x16xf32>
    %258 = vector.extract_strided_slice %251 {offsets = [0, 16], sizes = [2, 16], strides = [1, 1]} : vector<2x32xf32> to vector<2x16xf32>
    %cst_180 = arith.constant 1.000000e+00 : f32
    %259 = vector.broadcast %cst_180 : f32 to vector<2x16xf32>
    %260 = arith.subf %259, %258 : vector<2x16xf32>
    %261 = arith.mulf %260, %257 : vector<2x16xf32>
    %262 = arith.mulf %258, %227 : vector<2x16xf32>
    %263 = arith.addf %261, %262 : vector<2x16xf32>
    %264 = vector.extract_strided_slice %237 {offsets = [0, 0], sizes = [2, 32], strides = [1, 1]} : vector<2x48xf32> to vector<2x32xf32>
    %265 = vector.extract_strided_slice %243 {offsets = [0, 0], sizes = [2, 32], strides = [1, 1]} : vector<2x48xf32> to vector<2x32xf32>
    %266 = arith.addf %264, %265 : vector<2x32xf32>
    %267 = arith.negf %266 : vector<2x32xf32>
    %268 = math.exp %267 : vector<2x32xf32>
    %cst_181 = arith.constant 1.000000e+00 : f32
    %269 = vector.broadcast %cst_181 : f32 to vector<2x32xf32>
    %270 = arith.addf %269, %268 : vector<2x32xf32>
    %271 = arith.divf %269, %270 : vector<2x32xf32>
    %272 = vector.extract_strided_slice %237 {offsets = [0, 32], sizes = [2, 16], strides = [1, 1]} : vector<2x48xf32> to vector<2x16xf32>
    %273 = vector.extract_strided_slice %271 {offsets = [0, 0], sizes = [2, 16], strides = [1, 1]} : vector<2x32xf32> to vector<2x16xf32>
    %274 = vector.extract_strided_slice %243 {offsets = [0, 32], sizes = [2, 16], strides = [1, 1]} : vector<2x48xf32> to vector<2x16xf32>
    %275 = arith.mulf %273, %274 : vector<2x16xf32>
    %276 = arith.addf %272, %275 : vector<2x16xf32>
    %277 = math.tanh %276 : vector<2x16xf32>
    %278 = vector.extract_strided_slice %271 {offsets = [0, 16], sizes = [2, 16], strides = [1, 1]} : vector<2x32xf32> to vector<2x16xf32>
    %cst_182 = arith.constant 1.000000e+00 : f32
    %279 = vector.broadcast %cst_182 : f32 to vector<2x16xf32>
    %280 = arith.subf %279, %278 : vector<2x16xf32>
    %281 = arith.mulf %280, %277 : vector<2x16xf32>
    %282 = arith.mulf %278, %230 : vector<2x16xf32>
    %283 = arith.addf %281, %282 : vector<2x16xf32>
    %284 = vector.broadcast %c1_i32 : i32 to vector<2x1xi32>
    %285 = arith.cmpi slt, %284, %1 : vector<2x1xi32>
    %286 = vector.broadcast %231 : i32 to vector<2x1xi32>
    %287 = arith.cmpi slt, %286, %1 : vector<2x1xi32>
    %cst_183 = arith.constant 0.000000e+00 : f32
    %288 = vector.shape_cast %285 : vector<2x1xi1> to vector<2x1xi1>
    %289 = vector.broadcast %288 : vector<2x1xi1> to vector<2x16xi1>
    %290 = vector.broadcast %cst_183 : f32 to vector<2x16xf32>
    %291 = arith.select %289, %263, %290 : vector<2x16xi1>, vector<2x16xf32>
    %c2_i32_184 = arith.constant 2 : i32
    %292 = arith.muli %c1_i32, %c2_i32_184 : i32
    %293 = arith.index_cast %292 : i32 to index
    %c0_185 = arith.constant 0 : index
    %294 = vector.load %arg26[%293, %c0_185] : memref<32x16xf32, #tpu.memory_space<vmem>>, vector<2x16xf32>
    tpu.vector_store %arg26[%293, %c0_185], %291 {strides = array<i32>} : memref<32x16xf32, #tpu.memory_space<vmem>>, vector<2x16xf32>,
    %cst_186 = arith.constant 0.000000e+00 : f32
    %295 = vector.shape_cast %287 : vector<2x1xi1> to vector<2x1xi1>
    %296 = vector.broadcast %295 : vector<2x1xi1> to vector<2x16xi1>
    %297 = vector.broadcast %cst_186 : f32 to vector<2x16xf32>
    %298 = arith.select %296, %283, %297 : vector<2x16xi1>, vector<2x16xf32>
    %c2_i32_187 = arith.constant 2 : i32
    %299 = arith.muli %231, %c2_i32_187 : i32
    %300 = arith.index_cast %299 : i32 to index
    %c0_188 = arith.constant 0 : index
    %301 = vector.load %arg27[%300, %c0_188] : memref<32x16xf32, #tpu.memory_space<vmem>>, vector<2x16xf32>
    tpu.vector_store %arg27[%300, %c0_188], %298 {strides = array<i32>} : memref<32x16xf32, #tpu.memory_space<vmem>>, vector<2x16xf32>,
    %302 = vector.shape_cast %285 : vector<2x1xi1> to vector<2x1xi1>
    %303 = vector.broadcast %302 : vector<2x1xi1> to vector<2x16xi1>
    %304 = arith.select %303, %263, %227 : vector<2x16xi1>, vector<2x16xf32>
    %305 = vector.shape_cast %287 : vector<2x1xi1> to vector<2x1xi1>
    %306 = vector.broadcast %305 : vector<2x1xi1> to vector<2x16xi1>
    %307 = arith.select %306, %283, %230 : vector<2x16xi1>, vector<2x16xf32>
    %c2_i32_189 = arith.constant 2 : i32
    %c15_i32_190 = arith.constant 15 : i32
    %308 = arith.subi %c15_i32_190, %c2_i32_189 : i32
    %309 = arith.index_cast %c2_i32_189 : i32 to index
    %c0_191 = arith.constant 0 : index
    %310 = tpu.strided_load %arg25[%309, %c0_191] {strides = array<i32: 16, 1>} : memref<32x96xf32, #tpu.memory_space<vmem>>, vector<2x96xf32>
    %311 = arith.index_cast %308 : i32 to index
    %c0_192 = arith.constant 0 : index
    %312 = tpu.strided_load %arg25[%311, %c0_192] {strides = array<i32: 16, 1>} : memref<32x96xf32, #tpu.memory_space<vmem>>, vector<2x96xf32>
    %313 = vector.extract_strided_slice %310 {offsets = [0, 0], sizes = [2, 48], strides = [1, 1]} : vector<2x96xf32> to vector<2x48xf32>
    %314 = vector.extract_strided_slice %312 {offsets = [0, 48], sizes = [2, 48], strides = [1, 1]} : vector<2x96xf32> to vector<2x48xf32>
    %cst_193 = arith.constant dense<0.000000e+00> : vector<2x48xf32>
    %315 = tpu.matmul %304, %149, %cst_193 {dimension_numbers = #tpu.dot_dimension_numbers<[1], [0], [0], [1], [0, 0, 1, 1], [], []>} : vector<2x16xf32>, vector<16x48xf32>, vector<2x48xf32> -> vector<2x48xf32>
    %316 = vector.broadcast %151 : vector<1x48xf32> to vector<2x48xf32>
    %317 = arith.addf %315, %316 : vector<2x48xf32>
    %cst_194 = arith.constant dense<0.000000e+00> : vector<2x48xf32>
    %318 = tpu.matmul %307, %150, %cst_194 {dimension_numbers = #tpu.dot_dimension_numbers<[1], [0], [0], [1], [0, 0, 1, 1], [], []>} : vector<2x16xf32>, vector<16x48xf32>, vector<2x48xf32> -> vector<2x48xf32>
    %319 = vector.broadcast %152 : vector<1x48xf32> to vector<2x48xf32>
    %320 = arith.addf %318, %319 : vector<2x48xf32>
    %321 = vector.extract_strided_slice %313 {offsets = [0, 0], sizes = [2, 32], strides = [1, 1]} : vector<2x48xf32> to vector<2x32xf32>
    %322 = vector.extract_strided_slice %317 {offsets = [0, 0], sizes = [2, 32], strides = [1, 1]} : vector<2x48xf32> to vector<2x32xf32>
    %323 = arith.addf %321, %322 : vector<2x32xf32>
    %324 = arith.negf %323 : vector<2x32xf32>
    %325 = math.exp %324 : vector<2x32xf32>
    %cst_195 = arith.constant 1.000000e+00 : f32
    %326 = vector.broadcast %cst_195 : f32 to vector<2x32xf32>
    %327 = arith.addf %326, %325 : vector<2x32xf32>
    %328 = arith.divf %326, %327 : vector<2x32xf32>
    %329 = vector.extract_strided_slice %313 {offsets = [0, 32], sizes = [2, 16], strides = [1, 1]} : vector<2x48xf32> to vector<2x16xf32>
    %330 = vector.extract_strided_slice %328 {offsets = [0, 0], sizes = [2, 16], strides = [1, 1]} : vector<2x32xf32> to vector<2x16xf32>
    %331 = vector.extract_strided_slice %317 {offsets = [0, 32], sizes = [2, 16], strides = [1, 1]} : vector<2x48xf32> to vector<2x16xf32>
    %332 = arith.mulf %330, %331 : vector<2x16xf32>
    %333 = arith.addf %329, %332 : vector<2x16xf32>
    %334 = math.tanh %333 : vector<2x16xf32>
    %335 = vector.extract_strided_slice %328 {offsets = [0, 16], sizes = [2, 16], strides = [1, 1]} : vector<2x32xf32> to vector<2x16xf32>
    %cst_196 = arith.constant 1.000000e+00 : f32
    %336 = vector.broadcast %cst_196 : f32 to vector<2x16xf32>
    %337 = arith.subf %336, %335 : vector<2x16xf32>
    %338 = arith.mulf %337, %334 : vector<2x16xf32>
    %339 = arith.mulf %335, %304 : vector<2x16xf32>
    %340 = arith.addf %338, %339 : vector<2x16xf32>
    %341 = vector.extract_strided_slice %314 {offsets = [0, 0], sizes = [2, 32], strides = [1, 1]} : vector<2x48xf32> to vector<2x32xf32>
    %342 = vector.extract_strided_slice %320 {offsets = [0, 0], sizes = [2, 32], strides = [1, 1]} : vector<2x48xf32> to vector<2x32xf32>
    %343 = arith.addf %341, %342 : vector<2x32xf32>
    %344 = arith.negf %343 : vector<2x32xf32>
    %345 = math.exp %344 : vector<2x32xf32>
    %cst_197 = arith.constant 1.000000e+00 : f32
    %346 = vector.broadcast %cst_197 : f32 to vector<2x32xf32>
    %347 = arith.addf %346, %345 : vector<2x32xf32>
    %348 = arith.divf %346, %347 : vector<2x32xf32>
    %349 = vector.extract_strided_slice %314 {offsets = [0, 32], sizes = [2, 16], strides = [1, 1]} : vector<2x48xf32> to vector<2x16xf32>
    %350 = vector.extract_strided_slice %348 {offsets = [0, 0], sizes = [2, 16], strides = [1, 1]} : vector<2x32xf32> to vector<2x16xf32>
    %351 = vector.extract_strided_slice %320 {offsets = [0, 32], sizes = [2, 16], strides = [1, 1]} : vector<2x48xf32> to vector<2x16xf32>
    %352 = arith.mulf %350, %351 : vector<2x16xf32>
    %353 = arith.addf %349, %352 : vector<2x16xf32>
    %354 = math.tanh %353 : vector<2x16xf32>
    %355 = vector.extract_strided_slice %348 {offsets = [0, 16], sizes = [2, 16], strides = [1, 1]} : vector<2x32xf32> to vector<2x16xf32>
    %cst_198 = arith.constant 1.000000e+00 : f32
    %356 = vector.broadcast %cst_198 : f32 to vector<2x16xf32>
    %357 = arith.subf %356, %355 : vector<2x16xf32>
    %358 = arith.mulf %357, %354 : vector<2x16xf32>
    %359 = arith.mulf %355, %307 : vector<2x16xf32>
    %360 = arith.addf %358, %359 : vector<2x16xf32>
    %361 = vector.broadcast %c2_i32_189 : i32 to vector<2x1xi32>
    %362 = arith.cmpi slt, %361, %1 : vector<2x1xi32>
    %363 = vector.broadcast %308 : i32 to vector<2x1xi32>
    %364 = arith.cmpi slt, %363, %1 : vector<2x1xi32>
    %cst_199 = arith.constant 0.000000e+00 : f32
    %365 = vector.shape_cast %362 : vector<2x1xi1> to vector<2x1xi1>
    %366 = vector.broadcast %365 : vector<2x1xi1> to vector<2x16xi1>
    %367 = vector.broadcast %cst_199 : f32 to vector<2x16xf32>
    %368 = arith.select %366, %340, %367 : vector<2x16xi1>, vector<2x16xf32>
    %c2_i32_200 = arith.constant 2 : i32
    %369 = arith.muli %c2_i32_189, %c2_i32_200 : i32
    %370 = arith.index_cast %369 : i32 to index
    %c0_201 = arith.constant 0 : index
    %371 = vector.load %arg26[%370, %c0_201] : memref<32x16xf32, #tpu.memory_space<vmem>>, vector<2x16xf32>
    tpu.vector_store %arg26[%370, %c0_201], %368 {strides = array<i32>} : memref<32x16xf32, #tpu.memory_space<vmem>>, vector<2x16xf32>,
    %cst_202 = arith.constant 0.000000e+00 : f32
    %372 = vector.shape_cast %364 : vector<2x1xi1> to vector<2x1xi1>
    %373 = vector.broadcast %372 : vector<2x1xi1> to vector<2x16xi1>
    %374 = vector.broadcast %cst_202 : f32 to vector<2x16xf32>
    %375 = arith.select %373, %360, %374 : vector<2x16xi1>, vector<2x16xf32>
    %c2_i32_203 = arith.constant 2 : i32
    %376 = arith.muli %308, %c2_i32_203 : i32
    %377 = arith.index_cast %376 : i32 to index
    %c0_204 = arith.constant 0 : index
    %378 = vector.load %arg27[%377, %c0_204] : memref<32x16xf32, #tpu.memory_space<vmem>>, vector<2x16xf32>
    tpu.vector_store %arg27[%377, %c0_204], %375 {strides = array<i32>} : memref<32x16xf32, #tpu.memory_space<vmem>>, vector<2x16xf32>,
    %379 = vector.shape_cast %362 : vector<2x1xi1> to vector<2x1xi1>
    %380 = vector.broadcast %379 : vector<2x1xi1> to vector<2x16xi1>
    %381 = arith.select %380, %340, %304 : vector<2x16xi1>, vector<2x16xf32>
    %382 = vector.shape_cast %364 : vector<2x1xi1> to vector<2x1xi1>
    %383 = vector.broadcast %382 : vector<2x1xi1> to vector<2x16xi1>
    %384 = arith.select %383, %360, %307 : vector<2x16xi1>, vector<2x16xf32>
    %c3_i32 = arith.constant 3 : i32
    %c15_i32_205 = arith.constant 15 : i32
    %385 = arith.subi %c15_i32_205, %c3_i32 : i32
    %386 = arith.index_cast %c3_i32 : i32 to index
    %c0_206 = arith.constant 0 : index
    %387 = tpu.strided_load %arg25[%386, %c0_206] {strides = array<i32: 16, 1>} : memref<32x96xf32, #tpu.memory_space<vmem>>, vector<2x96xf32>
    %388 = arith.index_cast %385 : i32 to index
    %c0_207 = arith.constant 0 : index
    %389 = tpu.strided_load %arg25[%388, %c0_207] {strides = array<i32: 16, 1>} : memref<32x96xf32, #tpu.memory_space<vmem>>, vector<2x96xf32>
    %390 = vector.extract_strided_slice %387 {offsets = [0, 0], sizes = [2, 48], strides = [1, 1]} : vector<2x96xf32> to vector<2x48xf32>
    %391 = vector.extract_strided_slice %389 {offsets = [0, 48], sizes = [2, 48], strides = [1, 1]} : vector<2x96xf32> to vector<2x48xf32>
    %cst_208 = arith.constant dense<0.000000e+00> : vector<2x48xf32>
    %392 = tpu.matmul %381, %149, %cst_208 {dimension_numbers = #tpu.dot_dimension_numbers<[1], [0], [0], [1], [0, 0, 1, 1], [], []>} : vector<2x16xf32>, vector<16x48xf32>, vector<2x48xf32> -> vector<2x48xf32>
    %393 = vector.broadcast %151 : vector<1x48xf32> to vector<2x48xf32>
    %394 = arith.addf %392, %393 : vector<2x48xf32>
    %cst_209 = arith.constant dense<0.000000e+00> : vector<2x48xf32>
    %395 = tpu.matmul %384, %150, %cst_209 {dimension_numbers = #tpu.dot_dimension_numbers<[1], [0], [0], [1], [0, 0, 1, 1], [], []>} : vector<2x16xf32>, vector<16x48xf32>, vector<2x48xf32> -> vector<2x48xf32>
    %396 = vector.broadcast %152 : vector<1x48xf32> to vector<2x48xf32>
    %397 = arith.addf %395, %396 : vector<2x48xf32>
    %398 = vector.extract_strided_slice %390 {offsets = [0, 0], sizes = [2, 32], strides = [1, 1]} : vector<2x48xf32> to vector<2x32xf32>
    %399 = vector.extract_strided_slice %394 {offsets = [0, 0], sizes = [2, 32], strides = [1, 1]} : vector<2x48xf32> to vector<2x32xf32>
    %400 = arith.addf %398, %399 : vector<2x32xf32>
    %401 = arith.negf %400 : vector<2x32xf32>
    %402 = math.exp %401 : vector<2x32xf32>
    %cst_210 = arith.constant 1.000000e+00 : f32
    %403 = vector.broadcast %cst_210 : f32 to vector<2x32xf32>
    %404 = arith.addf %403, %402 : vector<2x32xf32>
    %405 = arith.divf %403, %404 : vector<2x32xf32>
    %406 = vector.extract_strided_slice %390 {offsets = [0, 32], sizes = [2, 16], strides = [1, 1]} : vector<2x48xf32> to vector<2x16xf32>
    %407 = vector.extract_strided_slice %405 {offsets = [0, 0], sizes = [2, 16], strides = [1, 1]} : vector<2x32xf32> to vector<2x16xf32>
    %408 = vector.extract_strided_slice %394 {offsets = [0, 32], sizes = [2, 16], strides = [1, 1]} : vector<2x48xf32> to vector<2x16xf32>
    %409 = arith.mulf %407, %408 : vector<2x16xf32>
    %410 = arith.addf %406, %409 : vector<2x16xf32>
    %411 = math.tanh %410 : vector<2x16xf32>
    %412 = vector.extract_strided_slice %405 {offsets = [0, 16], sizes = [2, 16], strides = [1, 1]} : vector<2x32xf32> to vector<2x16xf32>
    %cst_211 = arith.constant 1.000000e+00 : f32
    %413 = vector.broadcast %cst_211 : f32 to vector<2x16xf32>
    %414 = arith.subf %413, %412 : vector<2x16xf32>
    %415 = arith.mulf %414, %411 : vector<2x16xf32>
    %416 = arith.mulf %412, %381 : vector<2x16xf32>
    %417 = arith.addf %415, %416 : vector<2x16xf32>
    %418 = vector.extract_strided_slice %391 {offsets = [0, 0], sizes = [2, 32], strides = [1, 1]} : vector<2x48xf32> to vector<2x32xf32>
    %419 = vector.extract_strided_slice %397 {offsets = [0, 0], sizes = [2, 32], strides = [1, 1]} : vector<2x48xf32> to vector<2x32xf32>
    %420 = arith.addf %418, %419 : vector<2x32xf32>
    %421 = arith.negf %420 : vector<2x32xf32>
    %422 = math.exp %421 : vector<2x32xf32>
    %cst_212 = arith.constant 1.000000e+00 : f32
    %423 = vector.broadcast %cst_212 : f32 to vector<2x32xf32>
    %424 = arith.addf %423, %422 : vector<2x32xf32>
    %425 = arith.divf %423, %424 : vector<2x32xf32>
    %426 = vector.extract_strided_slice %391 {offsets = [0, 32], sizes = [2, 16], strides = [1, 1]} : vector<2x48xf32> to vector<2x16xf32>
    %427 = vector.extract_strided_slice %425 {offsets = [0, 0], sizes = [2, 16], strides = [1, 1]} : vector<2x32xf32> to vector<2x16xf32>
    %428 = vector.extract_strided_slice %397 {offsets = [0, 32], sizes = [2, 16], strides = [1, 1]} : vector<2x48xf32> to vector<2x16xf32>
    %429 = arith.mulf %427, %428 : vector<2x16xf32>
    %430 = arith.addf %426, %429 : vector<2x16xf32>
    %431 = math.tanh %430 : vector<2x16xf32>
    %432 = vector.extract_strided_slice %425 {offsets = [0, 16], sizes = [2, 16], strides = [1, 1]} : vector<2x32xf32> to vector<2x16xf32>
    %cst_213 = arith.constant 1.000000e+00 : f32
    %433 = vector.broadcast %cst_213 : f32 to vector<2x16xf32>
    %434 = arith.subf %433, %432 : vector<2x16xf32>
    %435 = arith.mulf %434, %431 : vector<2x16xf32>
    %436 = arith.mulf %432, %384 : vector<2x16xf32>
    %437 = arith.addf %435, %436 : vector<2x16xf32>
    %438 = vector.broadcast %c3_i32 : i32 to vector<2x1xi32>
    %439 = arith.cmpi slt, %438, %1 : vector<2x1xi32>
    %440 = vector.broadcast %385 : i32 to vector<2x1xi32>
    %441 = arith.cmpi slt, %440, %1 : vector<2x1xi32>
    %cst_214 = arith.constant 0.000000e+00 : f32
    %442 = vector.shape_cast %439 : vector<2x1xi1> to vector<2x1xi1>
    %443 = vector.broadcast %442 : vector<2x1xi1> to vector<2x16xi1>
    %444 = vector.broadcast %cst_214 : f32 to vector<2x16xf32>
    %445 = arith.select %443, %417, %444 : vector<2x16xi1>, vector<2x16xf32>
    %c2_i32_215 = arith.constant 2 : i32
    %446 = arith.muli %c3_i32, %c2_i32_215 : i32
    %447 = arith.index_cast %446 : i32 to index
    %c0_216 = arith.constant 0 : index
    %448 = vector.load %arg26[%447, %c0_216] : memref<32x16xf32, #tpu.memory_space<vmem>>, vector<2x16xf32>
    tpu.vector_store %arg26[%447, %c0_216], %445 {strides = array<i32>} : memref<32x16xf32, #tpu.memory_space<vmem>>, vector<2x16xf32>,
    %cst_217 = arith.constant 0.000000e+00 : f32
    %449 = vector.shape_cast %441 : vector<2x1xi1> to vector<2x1xi1>
    %450 = vector.broadcast %449 : vector<2x1xi1> to vector<2x16xi1>
    %451 = vector.broadcast %cst_217 : f32 to vector<2x16xf32>
    %452 = arith.select %450, %437, %451 : vector<2x16xi1>, vector<2x16xf32>
    %c2_i32_218 = arith.constant 2 : i32
    %453 = arith.muli %385, %c2_i32_218 : i32
    %454 = arith.index_cast %453 : i32 to index
    %c0_219 = arith.constant 0 : index
    %455 = vector.load %arg27[%454, %c0_219] : memref<32x16xf32, #tpu.memory_space<vmem>>, vector<2x16xf32>
    tpu.vector_store %arg27[%454, %c0_219], %452 {strides = array<i32>} : memref<32x16xf32, #tpu.memory_space<vmem>>, vector<2x16xf32>,
    %456 = vector.shape_cast %439 : vector<2x1xi1> to vector<2x1xi1>
    %457 = vector.broadcast %456 : vector<2x1xi1> to vector<2x16xi1>
    %458 = arith.select %457, %417, %381 : vector<2x16xi1>, vector<2x16xf32>
    %459 = vector.shape_cast %441 : vector<2x1xi1> to vector<2x1xi1>
    %460 = vector.broadcast %459 : vector<2x1xi1> to vector<2x16xi1>
    %461 = arith.select %460, %437, %384 : vector<2x16xi1>, vector<2x16xf32>
    %c4_i32 = arith.constant 4 : i32
    %c15_i32_220 = arith.constant 15 : i32
    %462 = arith.subi %c15_i32_220, %c4_i32 : i32
    %463 = arith.index_cast %c4_i32 : i32 to index
    %c0_221 = arith.constant 0 : index
    %464 = tpu.strided_load %arg25[%463, %c0_221] {strides = array<i32: 16, 1>} : memref<32x96xf32, #tpu.memory_space<vmem>>, vector<2x96xf32>
    %465 = arith.index_cast %462 : i32 to index
    %c0_222 = arith.constant 0 : index
    %466 = tpu.strided_load %arg25[%465, %c0_222] {strides = array<i32: 16, 1>} : memref<32x96xf32, #tpu.memory_space<vmem>>, vector<2x96xf32>
    %467 = vector.extract_strided_slice %464 {offsets = [0, 0], sizes = [2, 48], strides = [1, 1]} : vector<2x96xf32> to vector<2x48xf32>
    %468 = vector.extract_strided_slice %466 {offsets = [0, 48], sizes = [2, 48], strides = [1, 1]} : vector<2x96xf32> to vector<2x48xf32>
    %cst_223 = arith.constant dense<0.000000e+00> : vector<2x48xf32>
    %469 = tpu.matmul %458, %149, %cst_223 {dimension_numbers = #tpu.dot_dimension_numbers<[1], [0], [0], [1], [0, 0, 1, 1], [], []>} : vector<2x16xf32>, vector<16x48xf32>, vector<2x48xf32> -> vector<2x48xf32>
    %470 = vector.broadcast %151 : vector<1x48xf32> to vector<2x48xf32>
    %471 = arith.addf %469, %470 : vector<2x48xf32>
    %cst_224 = arith.constant dense<0.000000e+00> : vector<2x48xf32>
    %472 = tpu.matmul %461, %150, %cst_224 {dimension_numbers = #tpu.dot_dimension_numbers<[1], [0], [0], [1], [0, 0, 1, 1], [], []>} : vector<2x16xf32>, vector<16x48xf32>, vector<2x48xf32> -> vector<2x48xf32>
    %473 = vector.broadcast %152 : vector<1x48xf32> to vector<2x48xf32>
    %474 = arith.addf %472, %473 : vector<2x48xf32>
    %475 = vector.extract_strided_slice %467 {offsets = [0, 0], sizes = [2, 32], strides = [1, 1]} : vector<2x48xf32> to vector<2x32xf32>
    %476 = vector.extract_strided_slice %471 {offsets = [0, 0], sizes = [2, 32], strides = [1, 1]} : vector<2x48xf32> to vector<2x32xf32>
    %477 = arith.addf %475, %476 : vector<2x32xf32>
    %478 = arith.negf %477 : vector<2x32xf32>
    %479 = math.exp %478 : vector<2x32xf32>
    %cst_225 = arith.constant 1.000000e+00 : f32
    %480 = vector.broadcast %cst_225 : f32 to vector<2x32xf32>
    %481 = arith.addf %480, %479 : vector<2x32xf32>
    %482 = arith.divf %480, %481 : vector<2x32xf32>
    %483 = vector.extract_strided_slice %467 {offsets = [0, 32], sizes = [2, 16], strides = [1, 1]} : vector<2x48xf32> to vector<2x16xf32>
    %484 = vector.extract_strided_slice %482 {offsets = [0, 0], sizes = [2, 16], strides = [1, 1]} : vector<2x32xf32> to vector<2x16xf32>
    %485 = vector.extract_strided_slice %471 {offsets = [0, 32], sizes = [2, 16], strides = [1, 1]} : vector<2x48xf32> to vector<2x16xf32>
    %486 = arith.mulf %484, %485 : vector<2x16xf32>
    %487 = arith.addf %483, %486 : vector<2x16xf32>
    %488 = math.tanh %487 : vector<2x16xf32>
    %489 = vector.extract_strided_slice %482 {offsets = [0, 16], sizes = [2, 16], strides = [1, 1]} : vector<2x32xf32> to vector<2x16xf32>
    %cst_226 = arith.constant 1.000000e+00 : f32
    %490 = vector.broadcast %cst_226 : f32 to vector<2x16xf32>
    %491 = arith.subf %490, %489 : vector<2x16xf32>
    %492 = arith.mulf %491, %488 : vector<2x16xf32>
    %493 = arith.mulf %489, %458 : vector<2x16xf32>
    %494 = arith.addf %492, %493 : vector<2x16xf32>
    %495 = vector.extract_strided_slice %468 {offsets = [0, 0], sizes = [2, 32], strides = [1, 1]} : vector<2x48xf32> to vector<2x32xf32>
    %496 = vector.extract_strided_slice %474 {offsets = [0, 0], sizes = [2, 32], strides = [1, 1]} : vector<2x48xf32> to vector<2x32xf32>
    %497 = arith.addf %495, %496 : vector<2x32xf32>
    %498 = arith.negf %497 : vector<2x32xf32>
    %499 = math.exp %498 : vector<2x32xf32>
    %cst_227 = arith.constant 1.000000e+00 : f32
    %500 = vector.broadcast %cst_227 : f32 to vector<2x32xf32>
    %501 = arith.addf %500, %499 : vector<2x32xf32>
    %502 = arith.divf %500, %501 : vector<2x32xf32>
    %503 = vector.extract_strided_slice %468 {offsets = [0, 32], sizes = [2, 16], strides = [1, 1]} : vector<2x48xf32> to vector<2x16xf32>
    %504 = vector.extract_strided_slice %502 {offsets = [0, 0], sizes = [2, 16], strides = [1, 1]} : vector<2x32xf32> to vector<2x16xf32>
    %505 = vector.extract_strided_slice %474 {offsets = [0, 32], sizes = [2, 16], strides = [1, 1]} : vector<2x48xf32> to vector<2x16xf32>
    %506 = arith.mulf %504, %505 : vector<2x16xf32>
    %507 = arith.addf %503, %506 : vector<2x16xf32>
    %508 = math.tanh %507 : vector<2x16xf32>
    %509 = vector.extract_strided_slice %502 {offsets = [0, 16], sizes = [2, 16], strides = [1, 1]} : vector<2x32xf32> to vector<2x16xf32>
    %cst_228 = arith.constant 1.000000e+00 : f32
    %510 = vector.broadcast %cst_228 : f32 to vector<2x16xf32>
    %511 = arith.subf %510, %509 : vector<2x16xf32>
    %512 = arith.mulf %511, %508 : vector<2x16xf32>
    %513 = arith.mulf %509, %461 : vector<2x16xf32>
    %514 = arith.addf %512, %513 : vector<2x16xf32>
    %515 = vector.broadcast %c4_i32 : i32 to vector<2x1xi32>
    %516 = arith.cmpi slt, %515, %1 : vector<2x1xi32>
    %517 = vector.broadcast %462 : i32 to vector<2x1xi32>
    %518 = arith.cmpi slt, %517, %1 : vector<2x1xi32>
    %cst_229 = arith.constant 0.000000e+00 : f32
    %519 = vector.shape_cast %516 : vector<2x1xi1> to vector<2x1xi1>
    %520 = vector.broadcast %519 : vector<2x1xi1> to vector<2x16xi1>
    %521 = vector.broadcast %cst_229 : f32 to vector<2x16xf32>
    %522 = arith.select %520, %494, %521 : vector<2x16xi1>, vector<2x16xf32>
    %c2_i32_230 = arith.constant 2 : i32
    %523 = arith.muli %c4_i32, %c2_i32_230 : i32
    %524 = arith.index_cast %523 : i32 to index
    %c0_231 = arith.constant 0 : index
    %525 = vector.load %arg26[%524, %c0_231] : memref<32x16xf32, #tpu.memory_space<vmem>>, vector<2x16xf32>
    tpu.vector_store %arg26[%524, %c0_231], %522 {strides = array<i32>} : memref<32x16xf32, #tpu.memory_space<vmem>>, vector<2x16xf32>,
    %cst_232 = arith.constant 0.000000e+00 : f32
    %526 = vector.shape_cast %518 : vector<2x1xi1> to vector<2x1xi1>
    %527 = vector.broadcast %526 : vector<2x1xi1> to vector<2x16xi1>
    %528 = vector.broadcast %cst_232 : f32 to vector<2x16xf32>
    %529 = arith.select %527, %514, %528 : vector<2x16xi1>, vector<2x16xf32>
    %c2_i32_233 = arith.constant 2 : i32
    %530 = arith.muli %462, %c2_i32_233 : i32
    %531 = arith.index_cast %530 : i32 to index
    %c0_234 = arith.constant 0 : index
    %532 = vector.load %arg27[%531, %c0_234] : memref<32x16xf32, #tpu.memory_space<vmem>>, vector<2x16xf32>
    tpu.vector_store %arg27[%531, %c0_234], %529 {strides = array<i32>} : memref<32x16xf32, #tpu.memory_space<vmem>>, vector<2x16xf32>,
    %533 = vector.shape_cast %516 : vector<2x1xi1> to vector<2x1xi1>
    %534 = vector.broadcast %533 : vector<2x1xi1> to vector<2x16xi1>
    %535 = arith.select %534, %494, %458 : vector<2x16xi1>, vector<2x16xf32>
    %536 = vector.shape_cast %518 : vector<2x1xi1> to vector<2x1xi1>
    %537 = vector.broadcast %536 : vector<2x1xi1> to vector<2x16xi1>
    %538 = arith.select %537, %514, %461 : vector<2x16xi1>, vector<2x16xf32>
    %c5_i32 = arith.constant 5 : i32
    %c15_i32_235 = arith.constant 15 : i32
    %539 = arith.subi %c15_i32_235, %c5_i32 : i32
    %540 = arith.index_cast %c5_i32 : i32 to index
    %c0_236 = arith.constant 0 : index
    %541 = tpu.strided_load %arg25[%540, %c0_236] {strides = array<i32: 16, 1>} : memref<32x96xf32, #tpu.memory_space<vmem>>, vector<2x96xf32>
    %542 = arith.index_cast %539 : i32 to index
    %c0_237 = arith.constant 0 : index
    %543 = tpu.strided_load %arg25[%542, %c0_237] {strides = array<i32: 16, 1>} : memref<32x96xf32, #tpu.memory_space<vmem>>, vector<2x96xf32>
    %544 = vector.extract_strided_slice %541 {offsets = [0, 0], sizes = [2, 48], strides = [1, 1]} : vector<2x96xf32> to vector<2x48xf32>
    %545 = vector.extract_strided_slice %543 {offsets = [0, 48], sizes = [2, 48], strides = [1, 1]} : vector<2x96xf32> to vector<2x48xf32>
    %cst_238 = arith.constant dense<0.000000e+00> : vector<2x48xf32>
    %546 = tpu.matmul %535, %149, %cst_238 {dimension_numbers = #tpu.dot_dimension_numbers<[1], [0], [0], [1], [0, 0, 1, 1], [], []>} : vector<2x16xf32>, vector<16x48xf32>, vector<2x48xf32> -> vector<2x48xf32>
    %547 = vector.broadcast %151 : vector<1x48xf32> to vector<2x48xf32>
    %548 = arith.addf %546, %547 : vector<2x48xf32>
    %cst_239 = arith.constant dense<0.000000e+00> : vector<2x48xf32>
    %549 = tpu.matmul %538, %150, %cst_239 {dimension_numbers = #tpu.dot_dimension_numbers<[1], [0], [0], [1], [0, 0, 1, 1], [], []>} : vector<2x16xf32>, vector<16x48xf32>, vector<2x48xf32> -> vector<2x48xf32>
    %550 = vector.broadcast %152 : vector<1x48xf32> to vector<2x48xf32>
    %551 = arith.addf %549, %550 : vector<2x48xf32>
    %552 = vector.extract_strided_slice %544 {offsets = [0, 0], sizes = [2, 32], strides = [1, 1]} : vector<2x48xf32> to vector<2x32xf32>
    %553 = vector.extract_strided_slice %548 {offsets = [0, 0], sizes = [2, 32], strides = [1, 1]} : vector<2x48xf32> to vector<2x32xf32>
    %554 = arith.addf %552, %553 : vector<2x32xf32>
    %555 = arith.negf %554 : vector<2x32xf32>
    %556 = math.exp %555 : vector<2x32xf32>
    %cst_240 = arith.constant 1.000000e+00 : f32
    %557 = vector.broadcast %cst_240 : f32 to vector<2x32xf32>
    %558 = arith.addf %557, %556 : vector<2x32xf32>
    %559 = arith.divf %557, %558 : vector<2x32xf32>
    %560 = vector.extract_strided_slice %544 {offsets = [0, 32], sizes = [2, 16], strides = [1, 1]} : vector<2x48xf32> to vector<2x16xf32>
    %561 = vector.extract_strided_slice %559 {offsets = [0, 0], sizes = [2, 16], strides = [1, 1]} : vector<2x32xf32> to vector<2x16xf32>
    %562 = vector.extract_strided_slice %548 {offsets = [0, 32], sizes = [2, 16], strides = [1, 1]} : vector<2x48xf32> to vector<2x16xf32>
    %563 = arith.mulf %561, %562 : vector<2x16xf32>
    %564 = arith.addf %560, %563 : vector<2x16xf32>
    %565 = math.tanh %564 : vector<2x16xf32>
    %566 = vector.extract_strided_slice %559 {offsets = [0, 16], sizes = [2, 16], strides = [1, 1]} : vector<2x32xf32> to vector<2x16xf32>
    %cst_241 = arith.constant 1.000000e+00 : f32
    %567 = vector.broadcast %cst_241 : f32 to vector<2x16xf32>
    %568 = arith.subf %567, %566 : vector<2x16xf32>
    %569 = arith.mulf %568, %565 : vector<2x16xf32>
    %570 = arith.mulf %566, %535 : vector<2x16xf32>
    %571 = arith.addf %569, %570 : vector<2x16xf32>
    %572 = vector.extract_strided_slice %545 {offsets = [0, 0], sizes = [2, 32], strides = [1, 1]} : vector<2x48xf32> to vector<2x32xf32>
    %573 = vector.extract_strided_slice %551 {offsets = [0, 0], sizes = [2, 32], strides = [1, 1]} : vector<2x48xf32> to vector<2x32xf32>
    %574 = arith.addf %572, %573 : vector<2x32xf32>
    %575 = arith.negf %574 : vector<2x32xf32>
    %576 = math.exp %575 : vector<2x32xf32>
    %cst_242 = arith.constant 1.000000e+00 : f32
    %577 = vector.broadcast %cst_242 : f32 to vector<2x32xf32>
    %578 = arith.addf %577, %576 : vector<2x32xf32>
    %579 = arith.divf %577, %578 : vector<2x32xf32>
    %580 = vector.extract_strided_slice %545 {offsets = [0, 32], sizes = [2, 16], strides = [1, 1]} : vector<2x48xf32> to vector<2x16xf32>
    %581 = vector.extract_strided_slice %579 {offsets = [0, 0], sizes = [2, 16], strides = [1, 1]} : vector<2x32xf32> to vector<2x16xf32>
    %582 = vector.extract_strided_slice %551 {offsets = [0, 32], sizes = [2, 16], strides = [1, 1]} : vector<2x48xf32> to vector<2x16xf32>
    %583 = arith.mulf %581, %582 : vector<2x16xf32>
    %584 = arith.addf %580, %583 : vector<2x16xf32>
    %585 = math.tanh %584 : vector<2x16xf32>
    %586 = vector.extract_strided_slice %579 {offsets = [0, 16], sizes = [2, 16], strides = [1, 1]} : vector<2x32xf32> to vector<2x16xf32>
    %cst_243 = arith.constant 1.000000e+00 : f32
    %587 = vector.broadcast %cst_243 : f32 to vector<2x16xf32>
    %588 = arith.subf %587, %586 : vector<2x16xf32>
    %589 = arith.mulf %588, %585 : vector<2x16xf32>
    %590 = arith.mulf %586, %538 : vector<2x16xf32>
    %591 = arith.addf %589, %590 : vector<2x16xf32>
    %592 = vector.broadcast %c5_i32 : i32 to vector<2x1xi32>
    %593 = arith.cmpi slt, %592, %1 : vector<2x1xi32>
    %594 = vector.broadcast %539 : i32 to vector<2x1xi32>
    %595 = arith.cmpi slt, %594, %1 : vector<2x1xi32>
    %cst_244 = arith.constant 0.000000e+00 : f32
    %596 = vector.shape_cast %593 : vector<2x1xi1> to vector<2x1xi1>
    %597 = vector.broadcast %596 : vector<2x1xi1> to vector<2x16xi1>
    %598 = vector.broadcast %cst_244 : f32 to vector<2x16xf32>
    %599 = arith.select %597, %571, %598 : vector<2x16xi1>, vector<2x16xf32>
    %c2_i32_245 = arith.constant 2 : i32
    %600 = arith.muli %c5_i32, %c2_i32_245 : i32
    %601 = arith.index_cast %600 : i32 to index
    %c0_246 = arith.constant 0 : index
    %602 = vector.load %arg26[%601, %c0_246] : memref<32x16xf32, #tpu.memory_space<vmem>>, vector<2x16xf32>
    tpu.vector_store %arg26[%601, %c0_246], %599 {strides = array<i32>} : memref<32x16xf32, #tpu.memory_space<vmem>>, vector<2x16xf32>,
    %cst_247 = arith.constant 0.000000e+00 : f32
    %603 = vector.shape_cast %595 : vector<2x1xi1> to vector<2x1xi1>
    %604 = vector.broadcast %603 : vector<2x1xi1> to vector<2x16xi1>
    %605 = vector.broadcast %cst_247 : f32 to vector<2x16xf32>
    %606 = arith.select %604, %591, %605 : vector<2x16xi1>, vector<2x16xf32>
    %c2_i32_248 = arith.constant 2 : i32
    %607 = arith.muli %539, %c2_i32_248 : i32
    %608 = arith.index_cast %607 : i32 to index
    %c0_249 = arith.constant 0 : index
    %609 = vector.load %arg27[%608, %c0_249] : memref<32x16xf32, #tpu.memory_space<vmem>>, vector<2x16xf32>
    tpu.vector_store %arg27[%608, %c0_249], %606 {strides = array<i32>} : memref<32x16xf32, #tpu.memory_space<vmem>>, vector<2x16xf32>,
    %610 = vector.shape_cast %593 : vector<2x1xi1> to vector<2x1xi1>
    %611 = vector.broadcast %610 : vector<2x1xi1> to vector<2x16xi1>
    %612 = arith.select %611, %571, %535 : vector<2x16xi1>, vector<2x16xf32>
    %613 = vector.shape_cast %595 : vector<2x1xi1> to vector<2x1xi1>
    %614 = vector.broadcast %613 : vector<2x1xi1> to vector<2x16xi1>
    %615 = arith.select %614, %591, %538 : vector<2x16xi1>, vector<2x16xf32>
    %c6_i32 = arith.constant 6 : i32
    %c15_i32_250 = arith.constant 15 : i32
    %616 = arith.subi %c15_i32_250, %c6_i32 : i32
    %617 = arith.index_cast %c6_i32 : i32 to index
    %c0_251 = arith.constant 0 : index
    %618 = tpu.strided_load %arg25[%617, %c0_251] {strides = array<i32: 16, 1>} : memref<32x96xf32, #tpu.memory_space<vmem>>, vector<2x96xf32>
    %619 = arith.index_cast %616 : i32 to index
    %c0_252 = arith.constant 0 : index
    %620 = tpu.strided_load %arg25[%619, %c0_252] {strides = array<i32: 16, 1>} : memref<32x96xf32, #tpu.memory_space<vmem>>, vector<2x96xf32>
    %621 = vector.extract_strided_slice %618 {offsets = [0, 0], sizes = [2, 48], strides = [1, 1]} : vector<2x96xf32> to vector<2x48xf32>
    %622 = vector.extract_strided_slice %620 {offsets = [0, 48], sizes = [2, 48], strides = [1, 1]} : vector<2x96xf32> to vector<2x48xf32>
    %cst_253 = arith.constant dense<0.000000e+00> : vector<2x48xf32>
    %623 = tpu.matmul %612, %149, %cst_253 {dimension_numbers = #tpu.dot_dimension_numbers<[1], [0], [0], [1], [0, 0, 1, 1], [], []>} : vector<2x16xf32>, vector<16x48xf32>, vector<2x48xf32> -> vector<2x48xf32>
    %624 = vector.broadcast %151 : vector<1x48xf32> to vector<2x48xf32>
    %625 = arith.addf %623, %624 : vector<2x48xf32>
    %cst_254 = arith.constant dense<0.000000e+00> : vector<2x48xf32>
    %626 = tpu.matmul %615, %150, %cst_254 {dimension_numbers = #tpu.dot_dimension_numbers<[1], [0], [0], [1], [0, 0, 1, 1], [], []>} : vector<2x16xf32>, vector<16x48xf32>, vector<2x48xf32> -> vector<2x48xf32>
    %627 = vector.broadcast %152 : vector<1x48xf32> to vector<2x48xf32>
    %628 = arith.addf %626, %627 : vector<2x48xf32>
    %629 = vector.extract_strided_slice %621 {offsets = [0, 0], sizes = [2, 32], strides = [1, 1]} : vector<2x48xf32> to vector<2x32xf32>
    %630 = vector.extract_strided_slice %625 {offsets = [0, 0], sizes = [2, 32], strides = [1, 1]} : vector<2x48xf32> to vector<2x32xf32>
    %631 = arith.addf %629, %630 : vector<2x32xf32>
    %632 = arith.negf %631 : vector<2x32xf32>
    %633 = math.exp %632 : vector<2x32xf32>
    %cst_255 = arith.constant 1.000000e+00 : f32
    %634 = vector.broadcast %cst_255 : f32 to vector<2x32xf32>
    %635 = arith.addf %634, %633 : vector<2x32xf32>
    %636 = arith.divf %634, %635 : vector<2x32xf32>
    %637 = vector.extract_strided_slice %621 {offsets = [0, 32], sizes = [2, 16], strides = [1, 1]} : vector<2x48xf32> to vector<2x16xf32>
    %638 = vector.extract_strided_slice %636 {offsets = [0, 0], sizes = [2, 16], strides = [1, 1]} : vector<2x32xf32> to vector<2x16xf32>
    %639 = vector.extract_strided_slice %625 {offsets = [0, 32], sizes = [2, 16], strides = [1, 1]} : vector<2x48xf32> to vector<2x16xf32>
    %640 = arith.mulf %638, %639 : vector<2x16xf32>
    %641 = arith.addf %637, %640 : vector<2x16xf32>
    %642 = math.tanh %641 : vector<2x16xf32>
    %643 = vector.extract_strided_slice %636 {offsets = [0, 16], sizes = [2, 16], strides = [1, 1]} : vector<2x32xf32> to vector<2x16xf32>
    %cst_256 = arith.constant 1.000000e+00 : f32
    %644 = vector.broadcast %cst_256 : f32 to vector<2x16xf32>
    %645 = arith.subf %644, %643 : vector<2x16xf32>
    %646 = arith.mulf %645, %642 : vector<2x16xf32>
    %647 = arith.mulf %643, %612 : vector<2x16xf32>
    %648 = arith.addf %646, %647 : vector<2x16xf32>
    %649 = vector.extract_strided_slice %622 {offsets = [0, 0], sizes = [2, 32], strides = [1, 1]} : vector<2x48xf32> to vector<2x32xf32>
    %650 = vector.extract_strided_slice %628 {offsets = [0, 0], sizes = [2, 32], strides = [1, 1]} : vector<2x48xf32> to vector<2x32xf32>
    %651 = arith.addf %649, %650 : vector<2x32xf32>
    %652 = arith.negf %651 : vector<2x32xf32>
    %653 = math.exp %652 : vector<2x32xf32>
    %cst_257 = arith.constant 1.000000e+00 : f32
    %654 = vector.broadcast %cst_257 : f32 to vector<2x32xf32>
    %655 = arith.addf %654, %653 : vector<2x32xf32>
    %656 = arith.divf %654, %655 : vector<2x32xf32>
    %657 = vector.extract_strided_slice %622 {offsets = [0, 32], sizes = [2, 16], strides = [1, 1]} : vector<2x48xf32> to vector<2x16xf32>
    %658 = vector.extract_strided_slice %656 {offsets = [0, 0], sizes = [2, 16], strides = [1, 1]} : vector<2x32xf32> to vector<2x16xf32>
    %659 = vector.extract_strided_slice %628 {offsets = [0, 32], sizes = [2, 16], strides = [1, 1]} : vector<2x48xf32> to vector<2x16xf32>
    %660 = arith.mulf %658, %659 : vector<2x16xf32>
    %661 = arith.addf %657, %660 : vector<2x16xf32>
    %662 = math.tanh %661 : vector<2x16xf32>
    %663 = vector.extract_strided_slice %656 {offsets = [0, 16], sizes = [2, 16], strides = [1, 1]} : vector<2x32xf32> to vector<2x16xf32>
    %cst_258 = arith.constant 1.000000e+00 : f32
    %664 = vector.broadcast %cst_258 : f32 to vector<2x16xf32>
    %665 = arith.subf %664, %663 : vector<2x16xf32>
    %666 = arith.mulf %665, %662 : vector<2x16xf32>
    %667 = arith.mulf %663, %615 : vector<2x16xf32>
    %668 = arith.addf %666, %667 : vector<2x16xf32>
    %669 = vector.broadcast %c6_i32 : i32 to vector<2x1xi32>
    %670 = arith.cmpi slt, %669, %1 : vector<2x1xi32>
    %671 = vector.broadcast %616 : i32 to vector<2x1xi32>
    %672 = arith.cmpi slt, %671, %1 : vector<2x1xi32>
    %cst_259 = arith.constant 0.000000e+00 : f32
    %673 = vector.shape_cast %670 : vector<2x1xi1> to vector<2x1xi1>
    %674 = vector.broadcast %673 : vector<2x1xi1> to vector<2x16xi1>
    %675 = vector.broadcast %cst_259 : f32 to vector<2x16xf32>
    %676 = arith.select %674, %648, %675 : vector<2x16xi1>, vector<2x16xf32>
    %c2_i32_260 = arith.constant 2 : i32
    %677 = arith.muli %c6_i32, %c2_i32_260 : i32
    %678 = arith.index_cast %677 : i32 to index
    %c0_261 = arith.constant 0 : index
    %679 = vector.load %arg26[%678, %c0_261] : memref<32x16xf32, #tpu.memory_space<vmem>>, vector<2x16xf32>
    tpu.vector_store %arg26[%678, %c0_261], %676 {strides = array<i32>} : memref<32x16xf32, #tpu.memory_space<vmem>>, vector<2x16xf32>,
    %cst_262 = arith.constant 0.000000e+00 : f32
    %680 = vector.shape_cast %672 : vector<2x1xi1> to vector<2x1xi1>
    %681 = vector.broadcast %680 : vector<2x1xi1> to vector<2x16xi1>
    %682 = vector.broadcast %cst_262 : f32 to vector<2x16xf32>
    %683 = arith.select %681, %668, %682 : vector<2x16xi1>, vector<2x16xf32>
    %c2_i32_263 = arith.constant 2 : i32
    %684 = arith.muli %616, %c2_i32_263 : i32
    %685 = arith.index_cast %684 : i32 to index
    %c0_264 = arith.constant 0 : index
    %686 = vector.load %arg27[%685, %c0_264] : memref<32x16xf32, #tpu.memory_space<vmem>>, vector<2x16xf32>
    tpu.vector_store %arg27[%685, %c0_264], %683 {strides = array<i32>} : memref<32x16xf32, #tpu.memory_space<vmem>>, vector<2x16xf32>,
    %687 = vector.shape_cast %670 : vector<2x1xi1> to vector<2x1xi1>
    %688 = vector.broadcast %687 : vector<2x1xi1> to vector<2x16xi1>
    %689 = arith.select %688, %648, %612 : vector<2x16xi1>, vector<2x16xf32>
    %690 = vector.shape_cast %672 : vector<2x1xi1> to vector<2x1xi1>
    %691 = vector.broadcast %690 : vector<2x1xi1> to vector<2x16xi1>
    %692 = arith.select %691, %668, %615 : vector<2x16xi1>, vector<2x16xf32>
    %c7_i32 = arith.constant 7 : i32
    %c15_i32_265 = arith.constant 15 : i32
    %693 = arith.subi %c15_i32_265, %c7_i32 : i32
    %694 = arith.index_cast %c7_i32 : i32 to index
    %c0_266 = arith.constant 0 : index
    %695 = tpu.strided_load %arg25[%694, %c0_266] {strides = array<i32: 16, 1>} : memref<32x96xf32, #tpu.memory_space<vmem>>, vector<2x96xf32>
    %696 = arith.index_cast %693 : i32 to index
    %c0_267 = arith.constant 0 : index
    %697 = tpu.strided_load %arg25[%696, %c0_267] {strides = array<i32: 16, 1>} : memref<32x96xf32, #tpu.memory_space<vmem>>, vector<2x96xf32>
    %698 = vector.extract_strided_slice %695 {offsets = [0, 0], sizes = [2, 48], strides = [1, 1]} : vector<2x96xf32> to vector<2x48xf32>
    %699 = vector.extract_strided_slice %697 {offsets = [0, 48], sizes = [2, 48], strides = [1, 1]} : vector<2x96xf32> to vector<2x48xf32>
    %cst_268 = arith.constant dense<0.000000e+00> : vector<2x48xf32>
    %700 = tpu.matmul %689, %149, %cst_268 {dimension_numbers = #tpu.dot_dimension_numbers<[1], [0], [0], [1], [0, 0, 1, 1], [], []>} : vector<2x16xf32>, vector<16x48xf32>, vector<2x48xf32> -> vector<2x48xf32>
    %701 = vector.broadcast %151 : vector<1x48xf32> to vector<2x48xf32>
    %702 = arith.addf %700, %701 : vector<2x48xf32>
    %cst_269 = arith.constant dense<0.000000e+00> : vector<2x48xf32>
    %703 = tpu.matmul %692, %150, %cst_269 {dimension_numbers = #tpu.dot_dimension_numbers<[1], [0], [0], [1], [0, 0, 1, 1], [], []>} : vector<2x16xf32>, vector<16x48xf32>, vector<2x48xf32> -> vector<2x48xf32>
    %704 = vector.broadcast %152 : vector<1x48xf32> to vector<2x48xf32>
    %705 = arith.addf %703, %704 : vector<2x48xf32>
    %706 = vector.extract_strided_slice %698 {offsets = [0, 0], sizes = [2, 32], strides = [1, 1]} : vector<2x48xf32> to vector<2x32xf32>
    %707 = vector.extract_strided_slice %702 {offsets = [0, 0], sizes = [2, 32], strides = [1, 1]} : vector<2x48xf32> to vector<2x32xf32>
    %708 = arith.addf %706, %707 : vector<2x32xf32>
    %709 = arith.negf %708 : vector<2x32xf32>
    %710 = math.exp %709 : vector<2x32xf32>
    %cst_270 = arith.constant 1.000000e+00 : f32
    %711 = vector.broadcast %cst_270 : f32 to vector<2x32xf32>
    %712 = arith.addf %711, %710 : vector<2x32xf32>
    %713 = arith.divf %711, %712 : vector<2x32xf32>
    %714 = vector.extract_strided_slice %698 {offsets = [0, 32], sizes = [2, 16], strides = [1, 1]} : vector<2x48xf32> to vector<2x16xf32>
    %715 = vector.extract_strided_slice %713 {offsets = [0, 0], sizes = [2, 16], strides = [1, 1]} : vector<2x32xf32> to vector<2x16xf32>
    %716 = vector.extract_strided_slice %702 {offsets = [0, 32], sizes = [2, 16], strides = [1, 1]} : vector<2x48xf32> to vector<2x16xf32>
    %717 = arith.mulf %715, %716 : vector<2x16xf32>
    %718 = arith.addf %714, %717 : vector<2x16xf32>
    %719 = math.tanh %718 : vector<2x16xf32>
    %720 = vector.extract_strided_slice %713 {offsets = [0, 16], sizes = [2, 16], strides = [1, 1]} : vector<2x32xf32> to vector<2x16xf32>
    %cst_271 = arith.constant 1.000000e+00 : f32
    %721 = vector.broadcast %cst_271 : f32 to vector<2x16xf32>
    %722 = arith.subf %721, %720 : vector<2x16xf32>
    %723 = arith.mulf %722, %719 : vector<2x16xf32>
    %724 = arith.mulf %720, %689 : vector<2x16xf32>
    %725 = arith.addf %723, %724 : vector<2x16xf32>
    %726 = vector.extract_strided_slice %699 {offsets = [0, 0], sizes = [2, 32], strides = [1, 1]} : vector<2x48xf32> to vector<2x32xf32>
    %727 = vector.extract_strided_slice %705 {offsets = [0, 0], sizes = [2, 32], strides = [1, 1]} : vector<2x48xf32> to vector<2x32xf32>
    %728 = arith.addf %726, %727 : vector<2x32xf32>
    %729 = arith.negf %728 : vector<2x32xf32>
    %730 = math.exp %729 : vector<2x32xf32>
    %cst_272 = arith.constant 1.000000e+00 : f32
    %731 = vector.broadcast %cst_272 : f32 to vector<2x32xf32>
    %732 = arith.addf %731, %730 : vector<2x32xf32>
    %733 = arith.divf %731, %732 : vector<2x32xf32>
    %734 = vector.extract_strided_slice %699 {offsets = [0, 32], sizes = [2, 16], strides = [1, 1]} : vector<2x48xf32> to vector<2x16xf32>
    %735 = vector.extract_strided_slice %733 {offsets = [0, 0], sizes = [2, 16], strides = [1, 1]} : vector<2x32xf32> to vector<2x16xf32>
    %736 = vector.extract_strided_slice %705 {offsets = [0, 32], sizes = [2, 16], strides = [1, 1]} : vector<2x48xf32> to vector<2x16xf32>
    %737 = arith.mulf %735, %736 : vector<2x16xf32>
    %738 = arith.addf %734, %737 : vector<2x16xf32>
    %739 = math.tanh %738 : vector<2x16xf32>
    %740 = vector.extract_strided_slice %733 {offsets = [0, 16], sizes = [2, 16], strides = [1, 1]} : vector<2x32xf32> to vector<2x16xf32>
    %cst_273 = arith.constant 1.000000e+00 : f32
    %741 = vector.broadcast %cst_273 : f32 to vector<2x16xf32>
    %742 = arith.subf %741, %740 : vector<2x16xf32>
    %743 = arith.mulf %742, %739 : vector<2x16xf32>
    %744 = arith.mulf %740, %692 : vector<2x16xf32>
    %745 = arith.addf %743, %744 : vector<2x16xf32>
    %746 = vector.broadcast %c7_i32 : i32 to vector<2x1xi32>
    %747 = arith.cmpi slt, %746, %1 : vector<2x1xi32>
    %748 = vector.broadcast %693 : i32 to vector<2x1xi32>
    %749 = arith.cmpi slt, %748, %1 : vector<2x1xi32>
    %cst_274 = arith.constant 0.000000e+00 : f32
    %750 = vector.shape_cast %747 : vector<2x1xi1> to vector<2x1xi1>
    %751 = vector.broadcast %750 : vector<2x1xi1> to vector<2x16xi1>
    %752 = vector.broadcast %cst_274 : f32 to vector<2x16xf32>
    %753 = arith.select %751, %725, %752 : vector<2x16xi1>, vector<2x16xf32>
    %c2_i32_275 = arith.constant 2 : i32
    %754 = arith.muli %c7_i32, %c2_i32_275 : i32
    %755 = arith.index_cast %754 : i32 to index
    %c0_276 = arith.constant 0 : index
    %756 = vector.load %arg26[%755, %c0_276] : memref<32x16xf32, #tpu.memory_space<vmem>>, vector<2x16xf32>
    tpu.vector_store %arg26[%755, %c0_276], %753 {strides = array<i32>} : memref<32x16xf32, #tpu.memory_space<vmem>>, vector<2x16xf32>,
    %cst_277 = arith.constant 0.000000e+00 : f32
    %757 = vector.shape_cast %749 : vector<2x1xi1> to vector<2x1xi1>
    %758 = vector.broadcast %757 : vector<2x1xi1> to vector<2x16xi1>
    %759 = vector.broadcast %cst_277 : f32 to vector<2x16xf32>
    %760 = arith.select %758, %745, %759 : vector<2x16xi1>, vector<2x16xf32>
    %c2_i32_278 = arith.constant 2 : i32
    %761 = arith.muli %693, %c2_i32_278 : i32
    %762 = arith.index_cast %761 : i32 to index
    %c0_279 = arith.constant 0 : index
    %763 = vector.load %arg27[%762, %c0_279] : memref<32x16xf32, #tpu.memory_space<vmem>>, vector<2x16xf32>
    tpu.vector_store %arg27[%762, %c0_279], %760 {strides = array<i32>} : memref<32x16xf32, #tpu.memory_space<vmem>>, vector<2x16xf32>,
    %764 = vector.shape_cast %747 : vector<2x1xi1> to vector<2x1xi1>
    %765 = vector.broadcast %764 : vector<2x1xi1> to vector<2x16xi1>
    %766 = arith.select %765, %725, %689 : vector<2x16xi1>, vector<2x16xf32>
    %767 = vector.shape_cast %749 : vector<2x1xi1> to vector<2x1xi1>
    %768 = vector.broadcast %767 : vector<2x1xi1> to vector<2x16xi1>
    %769 = arith.select %768, %745, %692 : vector<2x16xi1>, vector<2x16xf32>
    %c8_i32 = arith.constant 8 : i32
    %c15_i32_280 = arith.constant 15 : i32
    %770 = arith.subi %c15_i32_280, %c8_i32 : i32
    %771 = arith.index_cast %c8_i32 : i32 to index
    %c0_281 = arith.constant 0 : index
    %772 = tpu.strided_load %arg25[%771, %c0_281] {strides = array<i32: 16, 1>} : memref<32x96xf32, #tpu.memory_space<vmem>>, vector<2x96xf32>
    %773 = arith.index_cast %770 : i32 to index
    %c0_282 = arith.constant 0 : index
    %774 = tpu.strided_load %arg25[%773, %c0_282] {strides = array<i32: 16, 1>} : memref<32x96xf32, #tpu.memory_space<vmem>>, vector<2x96xf32>
    %775 = vector.extract_strided_slice %772 {offsets = [0, 0], sizes = [2, 48], strides = [1, 1]} : vector<2x96xf32> to vector<2x48xf32>
    %776 = vector.extract_strided_slice %774 {offsets = [0, 48], sizes = [2, 48], strides = [1, 1]} : vector<2x96xf32> to vector<2x48xf32>
    %cst_283 = arith.constant dense<0.000000e+00> : vector<2x48xf32>
    %777 = tpu.matmul %766, %149, %cst_283 {dimension_numbers = #tpu.dot_dimension_numbers<[1], [0], [0], [1], [0, 0, 1, 1], [], []>} : vector<2x16xf32>, vector<16x48xf32>, vector<2x48xf32> -> vector<2x48xf32>
    %778 = vector.broadcast %151 : vector<1x48xf32> to vector<2x48xf32>
    %779 = arith.addf %777, %778 : vector<2x48xf32>
    %cst_284 = arith.constant dense<0.000000e+00> : vector<2x48xf32>
    %780 = tpu.matmul %769, %150, %cst_284 {dimension_numbers = #tpu.dot_dimension_numbers<[1], [0], [0], [1], [0, 0, 1, 1], [], []>} : vector<2x16xf32>, vector<16x48xf32>, vector<2x48xf32> -> vector<2x48xf32>
    %781 = vector.broadcast %152 : vector<1x48xf32> to vector<2x48xf32>
    %782 = arith.addf %780, %781 : vector<2x48xf32>
    %783 = vector.extract_strided_slice %775 {offsets = [0, 0], sizes = [2, 32], strides = [1, 1]} : vector<2x48xf32> to vector<2x32xf32>
    %784 = vector.extract_strided_slice %779 {offsets = [0, 0], sizes = [2, 32], strides = [1, 1]} : vector<2x48xf32> to vector<2x32xf32>
    %785 = arith.addf %783, %784 : vector<2x32xf32>
    %786 = arith.negf %785 : vector<2x32xf32>
    %787 = math.exp %786 : vector<2x32xf32>
    %cst_285 = arith.constant 1.000000e+00 : f32
    %788 = vector.broadcast %cst_285 : f32 to vector<2x32xf32>
    %789 = arith.addf %788, %787 : vector<2x32xf32>
    %790 = arith.divf %788, %789 : vector<2x32xf32>
    %791 = vector.extract_strided_slice %775 {offsets = [0, 32], sizes = [2, 16], strides = [1, 1]} : vector<2x48xf32> to vector<2x16xf32>
    %792 = vector.extract_strided_slice %790 {offsets = [0, 0], sizes = [2, 16], strides = [1, 1]} : vector<2x32xf32> to vector<2x16xf32>
    %793 = vector.extract_strided_slice %779 {offsets = [0, 32], sizes = [2, 16], strides = [1, 1]} : vector<2x48xf32> to vector<2x16xf32>
    %794 = arith.mulf %792, %793 : vector<2x16xf32>
    %795 = arith.addf %791, %794 : vector<2x16xf32>
    %796 = math.tanh %795 : vector<2x16xf32>
    %797 = vector.extract_strided_slice %790 {offsets = [0, 16], sizes = [2, 16], strides = [1, 1]} : vector<2x32xf32> to vector<2x16xf32>
    %cst_286 = arith.constant 1.000000e+00 : f32
    %798 = vector.broadcast %cst_286 : f32 to vector<2x16xf32>
    %799 = arith.subf %798, %797 : vector<2x16xf32>
    %800 = arith.mulf %799, %796 : vector<2x16xf32>
    %801 = arith.mulf %797, %766 : vector<2x16xf32>
    %802 = arith.addf %800, %801 : vector<2x16xf32>
    %803 = vector.extract_strided_slice %776 {offsets = [0, 0], sizes = [2, 32], strides = [1, 1]} : vector<2x48xf32> to vector<2x32xf32>
    %804 = vector.extract_strided_slice %782 {offsets = [0, 0], sizes = [2, 32], strides = [1, 1]} : vector<2x48xf32> to vector<2x32xf32>
    %805 = arith.addf %803, %804 : vector<2x32xf32>
    %806 = arith.negf %805 : vector<2x32xf32>
    %807 = math.exp %806 : vector<2x32xf32>
    %cst_287 = arith.constant 1.000000e+00 : f32
    %808 = vector.broadcast %cst_287 : f32 to vector<2x32xf32>
    %809 = arith.addf %808, %807 : vector<2x32xf32>
    %810 = arith.divf %808, %809 : vector<2x32xf32>
    %811 = vector.extract_strided_slice %776 {offsets = [0, 32], sizes = [2, 16], strides = [1, 1]} : vector<2x48xf32> to vector<2x16xf32>
    %812 = vector.extract_strided_slice %810 {offsets = [0, 0], sizes = [2, 16], strides = [1, 1]} : vector<2x32xf32> to vector<2x16xf32>
    %813 = vector.extract_strided_slice %782 {offsets = [0, 32], sizes = [2, 16], strides = [1, 1]} : vector<2x48xf32> to vector<2x16xf32>
    %814 = arith.mulf %812, %813 : vector<2x16xf32>
    %815 = arith.addf %811, %814 : vector<2x16xf32>
    %816 = math.tanh %815 : vector<2x16xf32>
    %817 = vector.extract_strided_slice %810 {offsets = [0, 16], sizes = [2, 16], strides = [1, 1]} : vector<2x32xf32> to vector<2x16xf32>
    %cst_288 = arith.constant 1.000000e+00 : f32
    %818 = vector.broadcast %cst_288 : f32 to vector<2x16xf32>
    %819 = arith.subf %818, %817 : vector<2x16xf32>
    %820 = arith.mulf %819, %816 : vector<2x16xf32>
    %821 = arith.mulf %817, %769 : vector<2x16xf32>
    %822 = arith.addf %820, %821 : vector<2x16xf32>
    %823 = vector.broadcast %c8_i32 : i32 to vector<2x1xi32>
    %824 = arith.cmpi slt, %823, %1 : vector<2x1xi32>
    %825 = vector.broadcast %770 : i32 to vector<2x1xi32>
    %826 = arith.cmpi slt, %825, %1 : vector<2x1xi32>
    %cst_289 = arith.constant 0.000000e+00 : f32
    %827 = vector.shape_cast %824 : vector<2x1xi1> to vector<2x1xi1>
    %828 = vector.broadcast %827 : vector<2x1xi1> to vector<2x16xi1>
    %829 = vector.broadcast %cst_289 : f32 to vector<2x16xf32>
    %830 = arith.select %828, %802, %829 : vector<2x16xi1>, vector<2x16xf32>
    %c2_i32_290 = arith.constant 2 : i32
    %831 = arith.muli %c8_i32, %c2_i32_290 : i32
    %832 = arith.index_cast %831 : i32 to index
    %c0_291 = arith.constant 0 : index
    %833 = vector.load %arg26[%832, %c0_291] : memref<32x16xf32, #tpu.memory_space<vmem>>, vector<2x16xf32>
    tpu.vector_store %arg26[%832, %c0_291], %830 {strides = array<i32>} : memref<32x16xf32, #tpu.memory_space<vmem>>, vector<2x16xf32>,
    %cst_292 = arith.constant 0.000000e+00 : f32
    %834 = vector.shape_cast %826 : vector<2x1xi1> to vector<2x1xi1>
    %835 = vector.broadcast %834 : vector<2x1xi1> to vector<2x16xi1>
    %836 = vector.broadcast %cst_292 : f32 to vector<2x16xf32>
    %837 = arith.select %835, %822, %836 : vector<2x16xi1>, vector<2x16xf32>
    %c2_i32_293 = arith.constant 2 : i32
    %838 = arith.muli %770, %c2_i32_293 : i32
    %839 = arith.index_cast %838 : i32 to index
    %c0_294 = arith.constant 0 : index
    %840 = vector.load %arg27[%839, %c0_294] : memref<32x16xf32, #tpu.memory_space<vmem>>, vector<2x16xf32>
    tpu.vector_store %arg27[%839, %c0_294], %837 {strides = array<i32>} : memref<32x16xf32, #tpu.memory_space<vmem>>, vector<2x16xf32>,
    %841 = vector.shape_cast %824 : vector<2x1xi1> to vector<2x1xi1>
    %842 = vector.broadcast %841 : vector<2x1xi1> to vector<2x16xi1>
    %843 = arith.select %842, %802, %766 : vector<2x16xi1>, vector<2x16xf32>
    %844 = vector.shape_cast %826 : vector<2x1xi1> to vector<2x1xi1>
    %845 = vector.broadcast %844 : vector<2x1xi1> to vector<2x16xi1>
    %846 = arith.select %845, %822, %769 : vector<2x16xi1>, vector<2x16xf32>
    %c9_i32 = arith.constant 9 : i32
    %c15_i32_295 = arith.constant 15 : i32
    %847 = arith.subi %c15_i32_295, %c9_i32 : i32
    %848 = arith.index_cast %c9_i32 : i32 to index
    %c0_296 = arith.constant 0 : index
    %849 = tpu.strided_load %arg25[%848, %c0_296] {strides = array<i32: 16, 1>} : memref<32x96xf32, #tpu.memory_space<vmem>>, vector<2x96xf32>
    %850 = arith.index_cast %847 : i32 to index
    %c0_297 = arith.constant 0 : index
    %851 = tpu.strided_load %arg25[%850, %c0_297] {strides = array<i32: 16, 1>} : memref<32x96xf32, #tpu.memory_space<vmem>>, vector<2x96xf32>
    %852 = vector.extract_strided_slice %849 {offsets = [0, 0], sizes = [2, 48], strides = [1, 1]} : vector<2x96xf32> to vector<2x48xf32>
    %853 = vector.extract_strided_slice %851 {offsets = [0, 48], sizes = [2, 48], strides = [1, 1]} : vector<2x96xf32> to vector<2x48xf32>
    %cst_298 = arith.constant dense<0.000000e+00> : vector<2x48xf32>
    %854 = tpu.matmul %843, %149, %cst_298 {dimension_numbers = #tpu.dot_dimension_numbers<[1], [0], [0], [1], [0, 0, 1, 1], [], []>} : vector<2x16xf32>, vector<16x48xf32>, vector<2x48xf32> -> vector<2x48xf32>
    %855 = vector.broadcast %151 : vector<1x48xf32> to vector<2x48xf32>
    %856 = arith.addf %854, %855 : vector<2x48xf32>
    %cst_299 = arith.constant dense<0.000000e+00> : vector<2x48xf32>
    %857 = tpu.matmul %846, %150, %cst_299 {dimension_numbers = #tpu.dot_dimension_numbers<[1], [0], [0], [1], [0, 0, 1, 1], [], []>} : vector<2x16xf32>, vector<16x48xf32>, vector<2x48xf32> -> vector<2x48xf32>
    %858 = vector.broadcast %152 : vector<1x48xf32> to vector<2x48xf32>
    %859 = arith.addf %857, %858 : vector<2x48xf32>
    %860 = vector.extract_strided_slice %852 {offsets = [0, 0], sizes = [2, 32], strides = [1, 1]} : vector<2x48xf32> to vector<2x32xf32>
    %861 = vector.extract_strided_slice %856 {offsets = [0, 0], sizes = [2, 32], strides = [1, 1]} : vector<2x48xf32> to vector<2x32xf32>
    %862 = arith.addf %860, %861 : vector<2x32xf32>
    %863 = arith.negf %862 : vector<2x32xf32>
    %864 = math.exp %863 : vector<2x32xf32>
    %cst_300 = arith.constant 1.000000e+00 : f32
    %865 = vector.broadcast %cst_300 : f32 to vector<2x32xf32>
    %866 = arith.addf %865, %864 : vector<2x32xf32>
    %867 = arith.divf %865, %866 : vector<2x32xf32>
    %868 = vector.extract_strided_slice %852 {offsets = [0, 32], sizes = [2, 16], strides = [1, 1]} : vector<2x48xf32> to vector<2x16xf32>
    %869 = vector.extract_strided_slice %867 {offsets = [0, 0], sizes = [2, 16], strides = [1, 1]} : vector<2x32xf32> to vector<2x16xf32>
    %870 = vector.extract_strided_slice %856 {offsets = [0, 32], sizes = [2, 16], strides = [1, 1]} : vector<2x48xf32> to vector<2x16xf32>
    %871 = arith.mulf %869, %870 : vector<2x16xf32>
    %872 = arith.addf %868, %871 : vector<2x16xf32>
    %873 = math.tanh %872 : vector<2x16xf32>
    %874 = vector.extract_strided_slice %867 {offsets = [0, 16], sizes = [2, 16], strides = [1, 1]} : vector<2x32xf32> to vector<2x16xf32>
    %cst_301 = arith.constant 1.000000e+00 : f32
    %875 = vector.broadcast %cst_301 : f32 to vector<2x16xf32>
    %876 = arith.subf %875, %874 : vector<2x16xf32>
    %877 = arith.mulf %876, %873 : vector<2x16xf32>
    %878 = arith.mulf %874, %843 : vector<2x16xf32>
    %879 = arith.addf %877, %878 : vector<2x16xf32>
    %880 = vector.extract_strided_slice %853 {offsets = [0, 0], sizes = [2, 32], strides = [1, 1]} : vector<2x48xf32> to vector<2x32xf32>
    %881 = vector.extract_strided_slice %859 {offsets = [0, 0], sizes = [2, 32], strides = [1, 1]} : vector<2x48xf32> to vector<2x32xf32>
    %882 = arith.addf %880, %881 : vector<2x32xf32>
    %883 = arith.negf %882 : vector<2x32xf32>
    %884 = math.exp %883 : vector<2x32xf32>
    %cst_302 = arith.constant 1.000000e+00 : f32
    %885 = vector.broadcast %cst_302 : f32 to vector<2x32xf32>
    %886 = arith.addf %885, %884 : vector<2x32xf32>
    %887 = arith.divf %885, %886 : vector<2x32xf32>
    %888 = vector.extract_strided_slice %853 {offsets = [0, 32], sizes = [2, 16], strides = [1, 1]} : vector<2x48xf32> to vector<2x16xf32>
    %889 = vector.extract_strided_slice %887 {offsets = [0, 0], sizes = [2, 16], strides = [1, 1]} : vector<2x32xf32> to vector<2x16xf32>
    %890 = vector.extract_strided_slice %859 {offsets = [0, 32], sizes = [2, 16], strides = [1, 1]} : vector<2x48xf32> to vector<2x16xf32>
    %891 = arith.mulf %889, %890 : vector<2x16xf32>
    %892 = arith.addf %888, %891 : vector<2x16xf32>
    %893 = math.tanh %892 : vector<2x16xf32>
    %894 = vector.extract_strided_slice %887 {offsets = [0, 16], sizes = [2, 16], strides = [1, 1]} : vector<2x32xf32> to vector<2x16xf32>
    %cst_303 = arith.constant 1.000000e+00 : f32
    %895 = vector.broadcast %cst_303 : f32 to vector<2x16xf32>
    %896 = arith.subf %895, %894 : vector<2x16xf32>
    %897 = arith.mulf %896, %893 : vector<2x16xf32>
    %898 = arith.mulf %894, %846 : vector<2x16xf32>
    %899 = arith.addf %897, %898 : vector<2x16xf32>
    %900 = vector.broadcast %c9_i32 : i32 to vector<2x1xi32>
    %901 = arith.cmpi slt, %900, %1 : vector<2x1xi32>
    %902 = vector.broadcast %847 : i32 to vector<2x1xi32>
    %903 = arith.cmpi slt, %902, %1 : vector<2x1xi32>
    %cst_304 = arith.constant 0.000000e+00 : f32
    %904 = vector.shape_cast %901 : vector<2x1xi1> to vector<2x1xi1>
    %905 = vector.broadcast %904 : vector<2x1xi1> to vector<2x16xi1>
    %906 = vector.broadcast %cst_304 : f32 to vector<2x16xf32>
    %907 = arith.select %905, %879, %906 : vector<2x16xi1>, vector<2x16xf32>
    %c2_i32_305 = arith.constant 2 : i32
    %908 = arith.muli %c9_i32, %c2_i32_305 : i32
    %909 = arith.index_cast %908 : i32 to index
    %c0_306 = arith.constant 0 : index
    %910 = vector.load %arg26[%909, %c0_306] : memref<32x16xf32, #tpu.memory_space<vmem>>, vector<2x16xf32>
    tpu.vector_store %arg26[%909, %c0_306], %907 {strides = array<i32>} : memref<32x16xf32, #tpu.memory_space<vmem>>, vector<2x16xf32>,
    %cst_307 = arith.constant 0.000000e+00 : f32
    %911 = vector.shape_cast %903 : vector<2x1xi1> to vector<2x1xi1>
    %912 = vector.broadcast %911 : vector<2x1xi1> to vector<2x16xi1>
    %913 = vector.broadcast %cst_307 : f32 to vector<2x16xf32>
    %914 = arith.select %912, %899, %913 : vector<2x16xi1>, vector<2x16xf32>
    %c2_i32_308 = arith.constant 2 : i32
    %915 = arith.muli %847, %c2_i32_308 : i32
    %916 = arith.index_cast %915 : i32 to index
    %c0_309 = arith.constant 0 : index
    %917 = vector.load %arg27[%916, %c0_309] : memref<32x16xf32, #tpu.memory_space<vmem>>, vector<2x16xf32>
    tpu.vector_store %arg27[%916, %c0_309], %914 {strides = array<i32>} : memref<32x16xf32, #tpu.memory_space<vmem>>, vector<2x16xf32>,
    %918 = vector.shape_cast %901 : vector<2x1xi1> to vector<2x1xi1>
    %919 = vector.broadcast %918 : vector<2x1xi1> to vector<2x16xi1>
    %920 = arith.select %919, %879, %843 : vector<2x16xi1>, vector<2x16xf32>
    %921 = vector.shape_cast %903 : vector<2x1xi1> to vector<2x1xi1>
    %922 = vector.broadcast %921 : vector<2x1xi1> to vector<2x16xi1>
    %923 = arith.select %922, %899, %846 : vector<2x16xi1>, vector<2x16xf32>
    %c10_i32 = arith.constant 10 : i32
    %c15_i32_310 = arith.constant 15 : i32
    %924 = arith.subi %c15_i32_310, %c10_i32 : i32
    %925 = arith.index_cast %c10_i32 : i32 to index
    %c0_311 = arith.constant 0 : index
    %926 = tpu.strided_load %arg25[%925, %c0_311] {strides = array<i32: 16, 1>} : memref<32x96xf32, #tpu.memory_space<vmem>>, vector<2x96xf32>
    %927 = arith.index_cast %924 : i32 to index
    %c0_312 = arith.constant 0 : index
    %928 = tpu.strided_load %arg25[%927, %c0_312] {strides = array<i32: 16, 1>} : memref<32x96xf32, #tpu.memory_space<vmem>>, vector<2x96xf32>
    %929 = vector.extract_strided_slice %926 {offsets = [0, 0], sizes = [2, 48], strides = [1, 1]} : vector<2x96xf32> to vector<2x48xf32>
    %930 = vector.extract_strided_slice %928 {offsets = [0, 48], sizes = [2, 48], strides = [1, 1]} : vector<2x96xf32> to vector<2x48xf32>
    %cst_313 = arith.constant dense<0.000000e+00> : vector<2x48xf32>
    %931 = tpu.matmul %920, %149, %cst_313 {dimension_numbers = #tpu.dot_dimension_numbers<[1], [0], [0], [1], [0, 0, 1, 1], [], []>} : vector<2x16xf32>, vector<16x48xf32>, vector<2x48xf32> -> vector<2x48xf32>
    %932 = vector.broadcast %151 : vector<1x48xf32> to vector<2x48xf32>
    %933 = arith.addf %931, %932 : vector<2x48xf32>
    %cst_314 = arith.constant dense<0.000000e+00> : vector<2x48xf32>
    %934 = tpu.matmul %923, %150, %cst_314 {dimension_numbers = #tpu.dot_dimension_numbers<[1], [0], [0], [1], [0, 0, 1, 1], [], []>} : vector<2x16xf32>, vector<16x48xf32>, vector<2x48xf32> -> vector<2x48xf32>
    %935 = vector.broadcast %152 : vector<1x48xf32> to vector<2x48xf32>
    %936 = arith.addf %934, %935 : vector<2x48xf32>
    %937 = vector.extract_strided_slice %929 {offsets = [0, 0], sizes = [2, 32], strides = [1, 1]} : vector<2x48xf32> to vector<2x32xf32>
    %938 = vector.extract_strided_slice %933 {offsets = [0, 0], sizes = [2, 32], strides = [1, 1]} : vector<2x48xf32> to vector<2x32xf32>
    %939 = arith.addf %937, %938 : vector<2x32xf32>
    %940 = arith.negf %939 : vector<2x32xf32>
    %941 = math.exp %940 : vector<2x32xf32>
    %cst_315 = arith.constant 1.000000e+00 : f32
    %942 = vector.broadcast %cst_315 : f32 to vector<2x32xf32>
    %943 = arith.addf %942, %941 : vector<2x32xf32>
    %944 = arith.divf %942, %943 : vector<2x32xf32>
    %945 = vector.extract_strided_slice %929 {offsets = [0, 32], sizes = [2, 16], strides = [1, 1]} : vector<2x48xf32> to vector<2x16xf32>
    %946 = vector.extract_strided_slice %944 {offsets = [0, 0], sizes = [2, 16], strides = [1, 1]} : vector<2x32xf32> to vector<2x16xf32>
    %947 = vector.extract_strided_slice %933 {offsets = [0, 32], sizes = [2, 16], strides = [1, 1]} : vector<2x48xf32> to vector<2x16xf32>
    %948 = arith.mulf %946, %947 : vector<2x16xf32>
    %949 = arith.addf %945, %948 : vector<2x16xf32>
    %950 = math.tanh %949 : vector<2x16xf32>
    %951 = vector.extract_strided_slice %944 {offsets = [0, 16], sizes = [2, 16], strides = [1, 1]} : vector<2x32xf32> to vector<2x16xf32>
    %cst_316 = arith.constant 1.000000e+00 : f32
    %952 = vector.broadcast %cst_316 : f32 to vector<2x16xf32>
    %953 = arith.subf %952, %951 : vector<2x16xf32>
    %954 = arith.mulf %953, %950 : vector<2x16xf32>
    %955 = arith.mulf %951, %920 : vector<2x16xf32>
    %956 = arith.addf %954, %955 : vector<2x16xf32>
    %957 = vector.extract_strided_slice %930 {offsets = [0, 0], sizes = [2, 32], strides = [1, 1]} : vector<2x48xf32> to vector<2x32xf32>
    %958 = vector.extract_strided_slice %936 {offsets = [0, 0], sizes = [2, 32], strides = [1, 1]} : vector<2x48xf32> to vector<2x32xf32>
    %959 = arith.addf %957, %958 : vector<2x32xf32>
    %960 = arith.negf %959 : vector<2x32xf32>
    %961 = math.exp %960 : vector<2x32xf32>
    %cst_317 = arith.constant 1.000000e+00 : f32
    %962 = vector.broadcast %cst_317 : f32 to vector<2x32xf32>
    %963 = arith.addf %962, %961 : vector<2x32xf32>
    %964 = arith.divf %962, %963 : vector<2x32xf32>
    %965 = vector.extract_strided_slice %930 {offsets = [0, 32], sizes = [2, 16], strides = [1, 1]} : vector<2x48xf32> to vector<2x16xf32>
    %966 = vector.extract_strided_slice %964 {offsets = [0, 0], sizes = [2, 16], strides = [1, 1]} : vector<2x32xf32> to vector<2x16xf32>
    %967 = vector.extract_strided_slice %936 {offsets = [0, 32], sizes = [2, 16], strides = [1, 1]} : vector<2x48xf32> to vector<2x16xf32>
    %968 = arith.mulf %966, %967 : vector<2x16xf32>
    %969 = arith.addf %965, %968 : vector<2x16xf32>
    %970 = math.tanh %969 : vector<2x16xf32>
    %971 = vector.extract_strided_slice %964 {offsets = [0, 16], sizes = [2, 16], strides = [1, 1]} : vector<2x32xf32> to vector<2x16xf32>
    %cst_318 = arith.constant 1.000000e+00 : f32
    %972 = vector.broadcast %cst_318 : f32 to vector<2x16xf32>
    %973 = arith.subf %972, %971 : vector<2x16xf32>
    %974 = arith.mulf %973, %970 : vector<2x16xf32>
    %975 = arith.mulf %971, %923 : vector<2x16xf32>
    %976 = arith.addf %974, %975 : vector<2x16xf32>
    %977 = vector.broadcast %c10_i32 : i32 to vector<2x1xi32>
    %978 = arith.cmpi slt, %977, %1 : vector<2x1xi32>
    %979 = vector.broadcast %924 : i32 to vector<2x1xi32>
    %980 = arith.cmpi slt, %979, %1 : vector<2x1xi32>
    %cst_319 = arith.constant 0.000000e+00 : f32
    %981 = vector.shape_cast %978 : vector<2x1xi1> to vector<2x1xi1>
    %982 = vector.broadcast %981 : vector<2x1xi1> to vector<2x16xi1>
    %983 = vector.broadcast %cst_319 : f32 to vector<2x16xf32>
    %984 = arith.select %982, %956, %983 : vector<2x16xi1>, vector<2x16xf32>
    %c2_i32_320 = arith.constant 2 : i32
    %985 = arith.muli %c10_i32, %c2_i32_320 : i32
    %986 = arith.index_cast %985 : i32 to index
    %c0_321 = arith.constant 0 : index
    %987 = vector.load %arg26[%986, %c0_321] : memref<32x16xf32, #tpu.memory_space<vmem>>, vector<2x16xf32>
    tpu.vector_store %arg26[%986, %c0_321], %984 {strides = array<i32>} : memref<32x16xf32, #tpu.memory_space<vmem>>, vector<2x16xf32>,
    %cst_322 = arith.constant 0.000000e+00 : f32
    %988 = vector.shape_cast %980 : vector<2x1xi1> to vector<2x1xi1>
    %989 = vector.broadcast %988 : vector<2x1xi1> to vector<2x16xi1>
    %990 = vector.broadcast %cst_322 : f32 to vector<2x16xf32>
    %991 = arith.select %989, %976, %990 : vector<2x16xi1>, vector<2x16xf32>
    %c2_i32_323 = arith.constant 2 : i32
    %992 = arith.muli %924, %c2_i32_323 : i32
    %993 = arith.index_cast %992 : i32 to index
    %c0_324 = arith.constant 0 : index
    %994 = vector.load %arg27[%993, %c0_324] : memref<32x16xf32, #tpu.memory_space<vmem>>, vector<2x16xf32>
    tpu.vector_store %arg27[%993, %c0_324], %991 {strides = array<i32>} : memref<32x16xf32, #tpu.memory_space<vmem>>, vector<2x16xf32>,
    %995 = vector.shape_cast %978 : vector<2x1xi1> to vector<2x1xi1>
    %996 = vector.broadcast %995 : vector<2x1xi1> to vector<2x16xi1>
    %997 = arith.select %996, %956, %920 : vector<2x16xi1>, vector<2x16xf32>
    %998 = vector.shape_cast %980 : vector<2x1xi1> to vector<2x1xi1>
    %999 = vector.broadcast %998 : vector<2x1xi1> to vector<2x16xi1>
    %1000 = arith.select %999, %976, %923 : vector<2x16xi1>, vector<2x16xf32>
    %c11_i32 = arith.constant 11 : i32
    %c15_i32_325 = arith.constant 15 : i32
    %1001 = arith.subi %c15_i32_325, %c11_i32 : i32
    %1002 = arith.index_cast %c11_i32 : i32 to index
    %c0_326 = arith.constant 0 : index
    %1003 = tpu.strided_load %arg25[%1002, %c0_326] {strides = array<i32: 16, 1>} : memref<32x96xf32, #tpu.memory_space<vmem>>, vector<2x96xf32>
    %1004 = arith.index_cast %1001 : i32 to index
    %c0_327 = arith.constant 0 : index
    %1005 = tpu.strided_load %arg25[%1004, %c0_327] {strides = array<i32: 16, 1>} : memref<32x96xf32, #tpu.memory_space<vmem>>, vector<2x96xf32>
    %1006 = vector.extract_strided_slice %1003 {offsets = [0, 0], sizes = [2, 48], strides = [1, 1]} : vector<2x96xf32> to vector<2x48xf32>
    %1007 = vector.extract_strided_slice %1005 {offsets = [0, 48], sizes = [2, 48], strides = [1, 1]} : vector<2x96xf32> to vector<2x48xf32>
    %cst_328 = arith.constant dense<0.000000e+00> : vector<2x48xf32>
    %1008 = tpu.matmul %997, %149, %cst_328 {dimension_numbers = #tpu.dot_dimension_numbers<[1], [0], [0], [1], [0, 0, 1, 1], [], []>} : vector<2x16xf32>, vector<16x48xf32>, vector<2x48xf32> -> vector<2x48xf32>
    %1009 = vector.broadcast %151 : vector<1x48xf32> to vector<2x48xf32>
    %1010 = arith.addf %1008, %1009 : vector<2x48xf32>
    %cst_329 = arith.constant dense<0.000000e+00> : vector<2x48xf32>
    %1011 = tpu.matmul %1000, %150, %cst_329 {dimension_numbers = #tpu.dot_dimension_numbers<[1], [0], [0], [1], [0, 0, 1, 1], [], []>} : vector<2x16xf32>, vector<16x48xf32>, vector<2x48xf32> -> vector<2x48xf32>
    %1012 = vector.broadcast %152 : vector<1x48xf32> to vector<2x48xf32>
    %1013 = arith.addf %1011, %1012 : vector<2x48xf32>
    %1014 = vector.extract_strided_slice %1006 {offsets = [0, 0], sizes = [2, 32], strides = [1, 1]} : vector<2x48xf32> to vector<2x32xf32>
    %1015 = vector.extract_strided_slice %1010 {offsets = [0, 0], sizes = [2, 32], strides = [1, 1]} : vector<2x48xf32> to vector<2x32xf32>
    %1016 = arith.addf %1014, %1015 : vector<2x32xf32>
    %1017 = arith.negf %1016 : vector<2x32xf32>
    %1018 = math.exp %1017 : vector<2x32xf32>
    %cst_330 = arith.constant 1.000000e+00 : f32
    %1019 = vector.broadcast %cst_330 : f32 to vector<2x32xf32>
    %1020 = arith.addf %1019, %1018 : vector<2x32xf32>
    %1021 = arith.divf %1019, %1020 : vector<2x32xf32>
    %1022 = vector.extract_strided_slice %1006 {offsets = [0, 32], sizes = [2, 16], strides = [1, 1]} : vector<2x48xf32> to vector<2x16xf32>
    %1023 = vector.extract_strided_slice %1021 {offsets = [0, 0], sizes = [2, 16], strides = [1, 1]} : vector<2x32xf32> to vector<2x16xf32>
    %1024 = vector.extract_strided_slice %1010 {offsets = [0, 32], sizes = [2, 16], strides = [1, 1]} : vector<2x48xf32> to vector<2x16xf32>
    %1025 = arith.mulf %1023, %1024 : vector<2x16xf32>
    %1026 = arith.addf %1022, %1025 : vector<2x16xf32>
    %1027 = math.tanh %1026 : vector<2x16xf32>
    %1028 = vector.extract_strided_slice %1021 {offsets = [0, 16], sizes = [2, 16], strides = [1, 1]} : vector<2x32xf32> to vector<2x16xf32>
    %cst_331 = arith.constant 1.000000e+00 : f32
    %1029 = vector.broadcast %cst_331 : f32 to vector<2x16xf32>
    %1030 = arith.subf %1029, %1028 : vector<2x16xf32>
    %1031 = arith.mulf %1030, %1027 : vector<2x16xf32>
    %1032 = arith.mulf %1028, %997 : vector<2x16xf32>
    %1033 = arith.addf %1031, %1032 : vector<2x16xf32>
    %1034 = vector.extract_strided_slice %1007 {offsets = [0, 0], sizes = [2, 32], strides = [1, 1]} : vector<2x48xf32> to vector<2x32xf32>
    %1035 = vector.extract_strided_slice %1013 {offsets = [0, 0], sizes = [2, 32], strides = [1, 1]} : vector<2x48xf32> to vector<2x32xf32>
    %1036 = arith.addf %1034, %1035 : vector<2x32xf32>
    %1037 = arith.negf %1036 : vector<2x32xf32>
    %1038 = math.exp %1037 : vector<2x32xf32>
    %cst_332 = arith.constant 1.000000e+00 : f32
    %1039 = vector.broadcast %cst_332 : f32 to vector<2x32xf32>
    %1040 = arith.addf %1039, %1038 : vector<2x32xf32>
    %1041 = arith.divf %1039, %1040 : vector<2x32xf32>
    %1042 = vector.extract_strided_slice %1007 {offsets = [0, 32], sizes = [2, 16], strides = [1, 1]} : vector<2x48xf32> to vector<2x16xf32>
    %1043 = vector.extract_strided_slice %1041 {offsets = [0, 0], sizes = [2, 16], strides = [1, 1]} : vector<2x32xf32> to vector<2x16xf32>
    %1044 = vector.extract_strided_slice %1013 {offsets = [0, 32], sizes = [2, 16], strides = [1, 1]} : vector<2x48xf32> to vector<2x16xf32>
    %1045 = arith.mulf %1043, %1044 : vector<2x16xf32>
    %1046 = arith.addf %1042, %1045 : vector<2x16xf32>
    %1047 = math.tanh %1046 : vector<2x16xf32>
    %1048 = vector.extract_strided_slice %1041 {offsets = [0, 16], sizes = [2, 16], strides = [1, 1]} : vector<2x32xf32> to vector<2x16xf32>
    %cst_333 = arith.constant 1.000000e+00 : f32
    %1049 = vector.broadcast %cst_333 : f32 to vector<2x16xf32>
    %1050 = arith.subf %1049, %1048 : vector<2x16xf32>
    %1051 = arith.mulf %1050, %1047 : vector<2x16xf32>
    %1052 = arith.mulf %1048, %1000 : vector<2x16xf32>
    %1053 = arith.addf %1051, %1052 : vector<2x16xf32>
    %1054 = vector.broadcast %c11_i32 : i32 to vector<2x1xi32>
    %1055 = arith.cmpi slt, %1054, %1 : vector<2x1xi32>
    %1056 = vector.broadcast %1001 : i32 to vector<2x1xi32>
    %1057 = arith.cmpi slt, %1056, %1 : vector<2x1xi32>
    %cst_334 = arith.constant 0.000000e+00 : f32
    %1058 = vector.shape_cast %1055 : vector<2x1xi1> to vector<2x1xi1>
    %1059 = vector.broadcast %1058 : vector<2x1xi1> to vector<2x16xi1>
    %1060 = vector.broadcast %cst_334 : f32 to vector<2x16xf32>
    %1061 = arith.select %1059, %1033, %1060 : vector<2x16xi1>, vector<2x16xf32>
    %c2_i32_335 = arith.constant 2 : i32
    %1062 = arith.muli %c11_i32, %c2_i32_335 : i32
    %1063 = arith.index_cast %1062 : i32 to index
    %c0_336 = arith.constant 0 : index
    %1064 = vector.load %arg26[%1063, %c0_336] : memref<32x16xf32, #tpu.memory_space<vmem>>, vector<2x16xf32>
    tpu.vector_store %arg26[%1063, %c0_336], %1061 {strides = array<i32>} : memref<32x16xf32, #tpu.memory_space<vmem>>, vector<2x16xf32>,
    %cst_337 = arith.constant 0.000000e+00 : f32
    %1065 = vector.shape_cast %1057 : vector<2x1xi1> to vector<2x1xi1>
    %1066 = vector.broadcast %1065 : vector<2x1xi1> to vector<2x16xi1>
    %1067 = vector.broadcast %cst_337 : f32 to vector<2x16xf32>
    %1068 = arith.select %1066, %1053, %1067 : vector<2x16xi1>, vector<2x16xf32>
    %c2_i32_338 = arith.constant 2 : i32
    %1069 = arith.muli %1001, %c2_i32_338 : i32
    %1070 = arith.index_cast %1069 : i32 to index
    %c0_339 = arith.constant 0 : index
    %1071 = vector.load %arg27[%1070, %c0_339] : memref<32x16xf32, #tpu.memory_space<vmem>>, vector<2x16xf32>
    tpu.vector_store %arg27[%1070, %c0_339], %1068 {strides = array<i32>} : memref<32x16xf32, #tpu.memory_space<vmem>>, vector<2x16xf32>,
    %1072 = vector.shape_cast %1055 : vector<2x1xi1> to vector<2x1xi1>
    %1073 = vector.broadcast %1072 : vector<2x1xi1> to vector<2x16xi1>
    %1074 = arith.select %1073, %1033, %997 : vector<2x16xi1>, vector<2x16xf32>
    %1075 = vector.shape_cast %1057 : vector<2x1xi1> to vector<2x1xi1>
    %1076 = vector.broadcast %1075 : vector<2x1xi1> to vector<2x16xi1>
    %1077 = arith.select %1076, %1053, %1000 : vector<2x16xi1>, vector<2x16xf32>
    %c12_i32 = arith.constant 12 : i32
    %c15_i32_340 = arith.constant 15 : i32
    %1078 = arith.subi %c15_i32_340, %c12_i32 : i32
    %1079 = arith.index_cast %c12_i32 : i32 to index
    %c0_341 = arith.constant 0 : index
    %1080 = tpu.strided_load %arg25[%1079, %c0_341] {strides = array<i32: 16, 1>} : memref<32x96xf32, #tpu.memory_space<vmem>>, vector<2x96xf32>
    %1081 = arith.index_cast %1078 : i32 to index
    %c0_342 = arith.constant 0 : index
    %1082 = tpu.strided_load %arg25[%1081, %c0_342] {strides = array<i32: 16, 1>} : memref<32x96xf32, #tpu.memory_space<vmem>>, vector<2x96xf32>
    %1083 = vector.extract_strided_slice %1080 {offsets = [0, 0], sizes = [2, 48], strides = [1, 1]} : vector<2x96xf32> to vector<2x48xf32>
    %1084 = vector.extract_strided_slice %1082 {offsets = [0, 48], sizes = [2, 48], strides = [1, 1]} : vector<2x96xf32> to vector<2x48xf32>
    %cst_343 = arith.constant dense<0.000000e+00> : vector<2x48xf32>
    %1085 = tpu.matmul %1074, %149, %cst_343 {dimension_numbers = #tpu.dot_dimension_numbers<[1], [0], [0], [1], [0, 0, 1, 1], [], []>} : vector<2x16xf32>, vector<16x48xf32>, vector<2x48xf32> -> vector<2x48xf32>
    %1086 = vector.broadcast %151 : vector<1x48xf32> to vector<2x48xf32>
    %1087 = arith.addf %1085, %1086 : vector<2x48xf32>
    %cst_344 = arith.constant dense<0.000000e+00> : vector<2x48xf32>
    %1088 = tpu.matmul %1077, %150, %cst_344 {dimension_numbers = #tpu.dot_dimension_numbers<[1], [0], [0], [1], [0, 0, 1, 1], [], []>} : vector<2x16xf32>, vector<16x48xf32>, vector<2x48xf32> -> vector<2x48xf32>
    %1089 = vector.broadcast %152 : vector<1x48xf32> to vector<2x48xf32>
    %1090 = arith.addf %1088, %1089 : vector<2x48xf32>
    %1091 = vector.extract_strided_slice %1083 {offsets = [0, 0], sizes = [2, 32], strides = [1, 1]} : vector<2x48xf32> to vector<2x32xf32>
    %1092 = vector.extract_strided_slice %1087 {offsets = [0, 0], sizes = [2, 32], strides = [1, 1]} : vector<2x48xf32> to vector<2x32xf32>
    %1093 = arith.addf %1091, %1092 : vector<2x32xf32>
    %1094 = arith.negf %1093 : vector<2x32xf32>
    %1095 = math.exp %1094 : vector<2x32xf32>
    %cst_345 = arith.constant 1.000000e+00 : f32
    %1096 = vector.broadcast %cst_345 : f32 to vector<2x32xf32>
    %1097 = arith.addf %1096, %1095 : vector<2x32xf32>
    %1098 = arith.divf %1096, %1097 : vector<2x32xf32>
    %1099 = vector.extract_strided_slice %1083 {offsets = [0, 32], sizes = [2, 16], strides = [1, 1]} : vector<2x48xf32> to vector<2x16xf32>
    %1100 = vector.extract_strided_slice %1098 {offsets = [0, 0], sizes = [2, 16], strides = [1, 1]} : vector<2x32xf32> to vector<2x16xf32>
    %1101 = vector.extract_strided_slice %1087 {offsets = [0, 32], sizes = [2, 16], strides = [1, 1]} : vector<2x48xf32> to vector<2x16xf32>
    %1102 = arith.mulf %1100, %1101 : vector<2x16xf32>
    %1103 = arith.addf %1099, %1102 : vector<2x16xf32>
    %1104 = math.tanh %1103 : vector<2x16xf32>
    %1105 = vector.extract_strided_slice %1098 {offsets = [0, 16], sizes = [2, 16], strides = [1, 1]} : vector<2x32xf32> to vector<2x16xf32>
    %cst_346 = arith.constant 1.000000e+00 : f32
    %1106 = vector.broadcast %cst_346 : f32 to vector<2x16xf32>
    %1107 = arith.subf %1106, %1105 : vector<2x16xf32>
    %1108 = arith.mulf %1107, %1104 : vector<2x16xf32>
    %1109 = arith.mulf %1105, %1074 : vector<2x16xf32>
    %1110 = arith.addf %1108, %1109 : vector<2x16xf32>
    %1111 = vector.extract_strided_slice %1084 {offsets = [0, 0], sizes = [2, 32], strides = [1, 1]} : vector<2x48xf32> to vector<2x32xf32>
    %1112 = vector.extract_strided_slice %1090 {offsets = [0, 0], sizes = [2, 32], strides = [1, 1]} : vector<2x48xf32> to vector<2x32xf32>
    %1113 = arith.addf %1111, %1112 : vector<2x32xf32>
    %1114 = arith.negf %1113 : vector<2x32xf32>
    %1115 = math.exp %1114 : vector<2x32xf32>
    %cst_347 = arith.constant 1.000000e+00 : f32
    %1116 = vector.broadcast %cst_347 : f32 to vector<2x32xf32>
    %1117 = arith.addf %1116, %1115 : vector<2x32xf32>
    %1118 = arith.divf %1116, %1117 : vector<2x32xf32>
    %1119 = vector.extract_strided_slice %1084 {offsets = [0, 32], sizes = [2, 16], strides = [1, 1]} : vector<2x48xf32> to vector<2x16xf32>
    %1120 = vector.extract_strided_slice %1118 {offsets = [0, 0], sizes = [2, 16], strides = [1, 1]} : vector<2x32xf32> to vector<2x16xf32>
    %1121 = vector.extract_strided_slice %1090 {offsets = [0, 32], sizes = [2, 16], strides = [1, 1]} : vector<2x48xf32> to vector<2x16xf32>
    %1122 = arith.mulf %1120, %1121 : vector<2x16xf32>
    %1123 = arith.addf %1119, %1122 : vector<2x16xf32>
    %1124 = math.tanh %1123 : vector<2x16xf32>
    %1125 = vector.extract_strided_slice %1118 {offsets = [0, 16], sizes = [2, 16], strides = [1, 1]} : vector<2x32xf32> to vector<2x16xf32>
    %cst_348 = arith.constant 1.000000e+00 : f32
    %1126 = vector.broadcast %cst_348 : f32 to vector<2x16xf32>
    %1127 = arith.subf %1126, %1125 : vector<2x16xf32>
    %1128 = arith.mulf %1127, %1124 : vector<2x16xf32>
    %1129 = arith.mulf %1125, %1077 : vector<2x16xf32>
    %1130 = arith.addf %1128, %1129 : vector<2x16xf32>
    %1131 = vector.broadcast %c12_i32 : i32 to vector<2x1xi32>
    %1132 = arith.cmpi slt, %1131, %1 : vector<2x1xi32>
    %1133 = vector.broadcast %1078 : i32 to vector<2x1xi32>
    %1134 = arith.cmpi slt, %1133, %1 : vector<2x1xi32>
    %cst_349 = arith.constant 0.000000e+00 : f32
    %1135 = vector.shape_cast %1132 : vector<2x1xi1> to vector<2x1xi1>
    %1136 = vector.broadcast %1135 : vector<2x1xi1> to vector<2x16xi1>
    %1137 = vector.broadcast %cst_349 : f32 to vector<2x16xf32>
    %1138 = arith.select %1136, %1110, %1137 : vector<2x16xi1>, vector<2x16xf32>
    %c2_i32_350 = arith.constant 2 : i32
    %1139 = arith.muli %c12_i32, %c2_i32_350 : i32
    %1140 = arith.index_cast %1139 : i32 to index
    %c0_351 = arith.constant 0 : index
    %1141 = vector.load %arg26[%1140, %c0_351] : memref<32x16xf32, #tpu.memory_space<vmem>>, vector<2x16xf32>
    tpu.vector_store %arg26[%1140, %c0_351], %1138 {strides = array<i32>} : memref<32x16xf32, #tpu.memory_space<vmem>>, vector<2x16xf32>,
    %cst_352 = arith.constant 0.000000e+00 : f32
    %1142 = vector.shape_cast %1134 : vector<2x1xi1> to vector<2x1xi1>
    %1143 = vector.broadcast %1142 : vector<2x1xi1> to vector<2x16xi1>
    %1144 = vector.broadcast %cst_352 : f32 to vector<2x16xf32>
    %1145 = arith.select %1143, %1130, %1144 : vector<2x16xi1>, vector<2x16xf32>
    %c2_i32_353 = arith.constant 2 : i32
    %1146 = arith.muli %1078, %c2_i32_353 : i32
    %1147 = arith.index_cast %1146 : i32 to index
    %c0_354 = arith.constant 0 : index
    %1148 = vector.load %arg27[%1147, %c0_354] : memref<32x16xf32, #tpu.memory_space<vmem>>, vector<2x16xf32>
    tpu.vector_store %arg27[%1147, %c0_354], %1145 {strides = array<i32>} : memref<32x16xf32, #tpu.memory_space<vmem>>, vector<2x16xf32>,
    %1149 = vector.shape_cast %1132 : vector<2x1xi1> to vector<2x1xi1>
    %1150 = vector.broadcast %1149 : vector<2x1xi1> to vector<2x16xi1>
    %1151 = arith.select %1150, %1110, %1074 : vector<2x16xi1>, vector<2x16xf32>
    %1152 = vector.shape_cast %1134 : vector<2x1xi1> to vector<2x1xi1>
    %1153 = vector.broadcast %1152 : vector<2x1xi1> to vector<2x16xi1>
    %1154 = arith.select %1153, %1130, %1077 : vector<2x16xi1>, vector<2x16xf32>
    %c13_i32 = arith.constant 13 : i32
    %c15_i32_355 = arith.constant 15 : i32
    %1155 = arith.subi %c15_i32_355, %c13_i32 : i32
    %1156 = arith.index_cast %c13_i32 : i32 to index
    %c0_356 = arith.constant 0 : index
    %1157 = tpu.strided_load %arg25[%1156, %c0_356] {strides = array<i32: 16, 1>} : memref<32x96xf32, #tpu.memory_space<vmem>>, vector<2x96xf32>
    %1158 = arith.index_cast %1155 : i32 to index
    %c0_357 = arith.constant 0 : index
    %1159 = tpu.strided_load %arg25[%1158, %c0_357] {strides = array<i32: 16, 1>} : memref<32x96xf32, #tpu.memory_space<vmem>>, vector<2x96xf32>
    %1160 = vector.extract_strided_slice %1157 {offsets = [0, 0], sizes = [2, 48], strides = [1, 1]} : vector<2x96xf32> to vector<2x48xf32>
    %1161 = vector.extract_strided_slice %1159 {offsets = [0, 48], sizes = [2, 48], strides = [1, 1]} : vector<2x96xf32> to vector<2x48xf32>
    %cst_358 = arith.constant dense<0.000000e+00> : vector<2x48xf32>
    %1162 = tpu.matmul %1151, %149, %cst_358 {dimension_numbers = #tpu.dot_dimension_numbers<[1], [0], [0], [1], [0, 0, 1, 1], [], []>} : vector<2x16xf32>, vector<16x48xf32>, vector<2x48xf32> -> vector<2x48xf32>
    %1163 = vector.broadcast %151 : vector<1x48xf32> to vector<2x48xf32>
    %1164 = arith.addf %1162, %1163 : vector<2x48xf32>
    %cst_359 = arith.constant dense<0.000000e+00> : vector<2x48xf32>
    %1165 = tpu.matmul %1154, %150, %cst_359 {dimension_numbers = #tpu.dot_dimension_numbers<[1], [0], [0], [1], [0, 0, 1, 1], [], []>} : vector<2x16xf32>, vector<16x48xf32>, vector<2x48xf32> -> vector<2x48xf32>
    %1166 = vector.broadcast %152 : vector<1x48xf32> to vector<2x48xf32>
    %1167 = arith.addf %1165, %1166 : vector<2x48xf32>
    %1168 = vector.extract_strided_slice %1160 {offsets = [0, 0], sizes = [2, 32], strides = [1, 1]} : vector<2x48xf32> to vector<2x32xf32>
    %1169 = vector.extract_strided_slice %1164 {offsets = [0, 0], sizes = [2, 32], strides = [1, 1]} : vector<2x48xf32> to vector<2x32xf32>
    %1170 = arith.addf %1168, %1169 : vector<2x32xf32>
    %1171 = arith.negf %1170 : vector<2x32xf32>
    %1172 = math.exp %1171 : vector<2x32xf32>
    %cst_360 = arith.constant 1.000000e+00 : f32
    %1173 = vector.broadcast %cst_360 : f32 to vector<2x32xf32>
    %1174 = arith.addf %1173, %1172 : vector<2x32xf32>
    %1175 = arith.divf %1173, %1174 : vector<2x32xf32>
    %1176 = vector.extract_strided_slice %1160 {offsets = [0, 32], sizes = [2, 16], strides = [1, 1]} : vector<2x48xf32> to vector<2x16xf32>
    %1177 = vector.extract_strided_slice %1175 {offsets = [0, 0], sizes = [2, 16], strides = [1, 1]} : vector<2x32xf32> to vector<2x16xf32>
    %1178 = vector.extract_strided_slice %1164 {offsets = [0, 32], sizes = [2, 16], strides = [1, 1]} : vector<2x48xf32> to vector<2x16xf32>
    %1179 = arith.mulf %1177, %1178 : vector<2x16xf32>
    %1180 = arith.addf %1176, %1179 : vector<2x16xf32>
    %1181 = math.tanh %1180 : vector<2x16xf32>
    %1182 = vector.extract_strided_slice %1175 {offsets = [0, 16], sizes = [2, 16], strides = [1, 1]} : vector<2x32xf32> to vector<2x16xf32>
    %cst_361 = arith.constant 1.000000e+00 : f32
    %1183 = vector.broadcast %cst_361 : f32 to vector<2x16xf32>
    %1184 = arith.subf %1183, %1182 : vector<2x16xf32>
    %1185 = arith.mulf %1184, %1181 : vector<2x16xf32>
    %1186 = arith.mulf %1182, %1151 : vector<2x16xf32>
    %1187 = arith.addf %1185, %1186 : vector<2x16xf32>
    %1188 = vector.extract_strided_slice %1161 {offsets = [0, 0], sizes = [2, 32], strides = [1, 1]} : vector<2x48xf32> to vector<2x32xf32>
    %1189 = vector.extract_strided_slice %1167 {offsets = [0, 0], sizes = [2, 32], strides = [1, 1]} : vector<2x48xf32> to vector<2x32xf32>
    %1190 = arith.addf %1188, %1189 : vector<2x32xf32>
    %1191 = arith.negf %1190 : vector<2x32xf32>
    %1192 = math.exp %1191 : vector<2x32xf32>
    %cst_362 = arith.constant 1.000000e+00 : f32
    %1193 = vector.broadcast %cst_362 : f32 to vector<2x32xf32>
    %1194 = arith.addf %1193, %1192 : vector<2x32xf32>
    %1195 = arith.divf %1193, %1194 : vector<2x32xf32>
    %1196 = vector.extract_strided_slice %1161 {offsets = [0, 32], sizes = [2, 16], strides = [1, 1]} : vector<2x48xf32> to vector<2x16xf32>
    %1197 = vector.extract_strided_slice %1195 {offsets = [0, 0], sizes = [2, 16], strides = [1, 1]} : vector<2x32xf32> to vector<2x16xf32>
    %1198 = vector.extract_strided_slice %1167 {offsets = [0, 32], sizes = [2, 16], strides = [1, 1]} : vector<2x48xf32> to vector<2x16xf32>
    %1199 = arith.mulf %1197, %1198 : vector<2x16xf32>
    %1200 = arith.addf %1196, %1199 : vector<2x16xf32>
    %1201 = math.tanh %1200 : vector<2x16xf32>
    %1202 = vector.extract_strided_slice %1195 {offsets = [0, 16], sizes = [2, 16], strides = [1, 1]} : vector<2x32xf32> to vector<2x16xf32>
    %cst_363 = arith.constant 1.000000e+00 : f32
    %1203 = vector.broadcast %cst_363 : f32 to vector<2x16xf32>
    %1204 = arith.subf %1203, %1202 : vector<2x16xf32>
    %1205 = arith.mulf %1204, %1201 : vector<2x16xf32>
    %1206 = arith.mulf %1202, %1154 : vector<2x16xf32>
    %1207 = arith.addf %1205, %1206 : vector<2x16xf32>
    %1208 = vector.broadcast %c13_i32 : i32 to vector<2x1xi32>
    %1209 = arith.cmpi slt, %1208, %1 : vector<2x1xi32>
    %1210 = vector.broadcast %1155 : i32 to vector<2x1xi32>
    %1211 = arith.cmpi slt, %1210, %1 : vector<2x1xi32>
    %cst_364 = arith.constant 0.000000e+00 : f32
    %1212 = vector.shape_cast %1209 : vector<2x1xi1> to vector<2x1xi1>
    %1213 = vector.broadcast %1212 : vector<2x1xi1> to vector<2x16xi1>
    %1214 = vector.broadcast %cst_364 : f32 to vector<2x16xf32>
    %1215 = arith.select %1213, %1187, %1214 : vector<2x16xi1>, vector<2x16xf32>
    %c2_i32_365 = arith.constant 2 : i32
    %1216 = arith.muli %c13_i32, %c2_i32_365 : i32
    %1217 = arith.index_cast %1216 : i32 to index
    %c0_366 = arith.constant 0 : index
    %1218 = vector.load %arg26[%1217, %c0_366] : memref<32x16xf32, #tpu.memory_space<vmem>>, vector<2x16xf32>
    tpu.vector_store %arg26[%1217, %c0_366], %1215 {strides = array<i32>} : memref<32x16xf32, #tpu.memory_space<vmem>>, vector<2x16xf32>,
    %cst_367 = arith.constant 0.000000e+00 : f32
    %1219 = vector.shape_cast %1211 : vector<2x1xi1> to vector<2x1xi1>
    %1220 = vector.broadcast %1219 : vector<2x1xi1> to vector<2x16xi1>
    %1221 = vector.broadcast %cst_367 : f32 to vector<2x16xf32>
    %1222 = arith.select %1220, %1207, %1221 : vector<2x16xi1>, vector<2x16xf32>
    %c2_i32_368 = arith.constant 2 : i32
    %1223 = arith.muli %1155, %c2_i32_368 : i32
    %1224 = arith.index_cast %1223 : i32 to index
    %c0_369 = arith.constant 0 : index
    %1225 = vector.load %arg27[%1224, %c0_369] : memref<32x16xf32, #tpu.memory_space<vmem>>, vector<2x16xf32>
    tpu.vector_store %arg27[%1224, %c0_369], %1222 {strides = array<i32>} : memref<32x16xf32, #tpu.memory_space<vmem>>, vector<2x16xf32>,
    %1226 = vector.shape_cast %1209 : vector<2x1xi1> to vector<2x1xi1>
    %1227 = vector.broadcast %1226 : vector<2x1xi1> to vector<2x16xi1>
    %1228 = arith.select %1227, %1187, %1151 : vector<2x16xi1>, vector<2x16xf32>
    %1229 = vector.shape_cast %1211 : vector<2x1xi1> to vector<2x1xi1>
    %1230 = vector.broadcast %1229 : vector<2x1xi1> to vector<2x16xi1>
    %1231 = arith.select %1230, %1207, %1154 : vector<2x16xi1>, vector<2x16xf32>
    %c14_i32 = arith.constant 14 : i32
    %c15_i32_370 = arith.constant 15 : i32
    %1232 = arith.subi %c15_i32_370, %c14_i32 : i32
    %1233 = arith.index_cast %c14_i32 : i32 to index
    %c0_371 = arith.constant 0 : index
    %1234 = tpu.strided_load %arg25[%1233, %c0_371] {strides = array<i32: 16, 1>} : memref<32x96xf32, #tpu.memory_space<vmem>>, vector<2x96xf32>
    %1235 = arith.index_cast %1232 : i32 to index
    %c0_372 = arith.constant 0 : index
    %1236 = tpu.strided_load %arg25[%1235, %c0_372] {strides = array<i32: 16, 1>} : memref<32x96xf32, #tpu.memory_space<vmem>>, vector<2x96xf32>
    %1237 = vector.extract_strided_slice %1234 {offsets = [0, 0], sizes = [2, 48], strides = [1, 1]} : vector<2x96xf32> to vector<2x48xf32>
    %1238 = vector.extract_strided_slice %1236 {offsets = [0, 48], sizes = [2, 48], strides = [1, 1]} : vector<2x96xf32> to vector<2x48xf32>
    %cst_373 = arith.constant dense<0.000000e+00> : vector<2x48xf32>
    %1239 = tpu.matmul %1228, %149, %cst_373 {dimension_numbers = #tpu.dot_dimension_numbers<[1], [0], [0], [1], [0, 0, 1, 1], [], []>} : vector<2x16xf32>, vector<16x48xf32>, vector<2x48xf32> -> vector<2x48xf32>
    %1240 = vector.broadcast %151 : vector<1x48xf32> to vector<2x48xf32>
    %1241 = arith.addf %1239, %1240 : vector<2x48xf32>
    %cst_374 = arith.constant dense<0.000000e+00> : vector<2x48xf32>
    %1242 = tpu.matmul %1231, %150, %cst_374 {dimension_numbers = #tpu.dot_dimension_numbers<[1], [0], [0], [1], [0, 0, 1, 1], [], []>} : vector<2x16xf32>, vector<16x48xf32>, vector<2x48xf32> -> vector<2x48xf32>
    %1243 = vector.broadcast %152 : vector<1x48xf32> to vector<2x48xf32>
    %1244 = arith.addf %1242, %1243 : vector<2x48xf32>
    %1245 = vector.extract_strided_slice %1237 {offsets = [0, 0], sizes = [2, 32], strides = [1, 1]} : vector<2x48xf32> to vector<2x32xf32>
    %1246 = vector.extract_strided_slice %1241 {offsets = [0, 0], sizes = [2, 32], strides = [1, 1]} : vector<2x48xf32> to vector<2x32xf32>
    %1247 = arith.addf %1245, %1246 : vector<2x32xf32>
    %1248 = arith.negf %1247 : vector<2x32xf32>
    %1249 = math.exp %1248 : vector<2x32xf32>
    %cst_375 = arith.constant 1.000000e+00 : f32
    %1250 = vector.broadcast %cst_375 : f32 to vector<2x32xf32>
    %1251 = arith.addf %1250, %1249 : vector<2x32xf32>
    %1252 = arith.divf %1250, %1251 : vector<2x32xf32>
    %1253 = vector.extract_strided_slice %1237 {offsets = [0, 32], sizes = [2, 16], strides = [1, 1]} : vector<2x48xf32> to vector<2x16xf32>
    %1254 = vector.extract_strided_slice %1252 {offsets = [0, 0], sizes = [2, 16], strides = [1, 1]} : vector<2x32xf32> to vector<2x16xf32>
    %1255 = vector.extract_strided_slice %1241 {offsets = [0, 32], sizes = [2, 16], strides = [1, 1]} : vector<2x48xf32> to vector<2x16xf32>
    %1256 = arith.mulf %1254, %1255 : vector<2x16xf32>
    %1257 = arith.addf %1253, %1256 : vector<2x16xf32>
    %1258 = math.tanh %1257 : vector<2x16xf32>
    %1259 = vector.extract_strided_slice %1252 {offsets = [0, 16], sizes = [2, 16], strides = [1, 1]} : vector<2x32xf32> to vector<2x16xf32>
    %cst_376 = arith.constant 1.000000e+00 : f32
    %1260 = vector.broadcast %cst_376 : f32 to vector<2x16xf32>
    %1261 = arith.subf %1260, %1259 : vector<2x16xf32>
    %1262 = arith.mulf %1261, %1258 : vector<2x16xf32>
    %1263 = arith.mulf %1259, %1228 : vector<2x16xf32>
    %1264 = arith.addf %1262, %1263 : vector<2x16xf32>
    %1265 = vector.extract_strided_slice %1238 {offsets = [0, 0], sizes = [2, 32], strides = [1, 1]} : vector<2x48xf32> to vector<2x32xf32>
    %1266 = vector.extract_strided_slice %1244 {offsets = [0, 0], sizes = [2, 32], strides = [1, 1]} : vector<2x48xf32> to vector<2x32xf32>
    %1267 = arith.addf %1265, %1266 : vector<2x32xf32>
    %1268 = arith.negf %1267 : vector<2x32xf32>
    %1269 = math.exp %1268 : vector<2x32xf32>
    %cst_377 = arith.constant 1.000000e+00 : f32
    %1270 = vector.broadcast %cst_377 : f32 to vector<2x32xf32>
    %1271 = arith.addf %1270, %1269 : vector<2x32xf32>
    %1272 = arith.divf %1270, %1271 : vector<2x32xf32>
    %1273 = vector.extract_strided_slice %1238 {offsets = [0, 32], sizes = [2, 16], strides = [1, 1]} : vector<2x48xf32> to vector<2x16xf32>
    %1274 = vector.extract_strided_slice %1272 {offsets = [0, 0], sizes = [2, 16], strides = [1, 1]} : vector<2x32xf32> to vector<2x16xf32>
    %1275 = vector.extract_strided_slice %1244 {offsets = [0, 32], sizes = [2, 16], strides = [1, 1]} : vector<2x48xf32> to vector<2x16xf32>
    %1276 = arith.mulf %1274, %1275 : vector<2x16xf32>
    %1277 = arith.addf %1273, %1276 : vector<2x16xf32>
    %1278 = math.tanh %1277 : vector<2x16xf32>
    %1279 = vector.extract_strided_slice %1272 {offsets = [0, 16], sizes = [2, 16], strides = [1, 1]} : vector<2x32xf32> to vector<2x16xf32>
    %cst_378 = arith.constant 1.000000e+00 : f32
    %1280 = vector.broadcast %cst_378 : f32 to vector<2x16xf32>
    %1281 = arith.subf %1280, %1279 : vector<2x16xf32>
    %1282 = arith.mulf %1281, %1278 : vector<2x16xf32>
    %1283 = arith.mulf %1279, %1231 : vector<2x16xf32>
    %1284 = arith.addf %1282, %1283 : vector<2x16xf32>
    %1285 = vector.broadcast %c14_i32 : i32 to vector<2x1xi32>
    %1286 = arith.cmpi slt, %1285, %1 : vector<2x1xi32>
    %1287 = vector.broadcast %1232 : i32 to vector<2x1xi32>
    %1288 = arith.cmpi slt, %1287, %1 : vector<2x1xi32>
    %cst_379 = arith.constant 0.000000e+00 : f32
    %1289 = vector.shape_cast %1286 : vector<2x1xi1> to vector<2x1xi1>
    %1290 = vector.broadcast %1289 : vector<2x1xi1> to vector<2x16xi1>
    %1291 = vector.broadcast %cst_379 : f32 to vector<2x16xf32>
    %1292 = arith.select %1290, %1264, %1291 : vector<2x16xi1>, vector<2x16xf32>
    %c2_i32_380 = arith.constant 2 : i32
    %1293 = arith.muli %c14_i32, %c2_i32_380 : i32
    %1294 = arith.index_cast %1293 : i32 to index
    %c0_381 = arith.constant 0 : index
    %1295 = vector.load %arg26[%1294, %c0_381] : memref<32x16xf32, #tpu.memory_space<vmem>>, vector<2x16xf32>
    tpu.vector_store %arg26[%1294, %c0_381], %1292 {strides = array<i32>} : memref<32x16xf32, #tpu.memory_space<vmem>>, vector<2x16xf32>,
    %cst_382 = arith.constant 0.000000e+00 : f32
    %1296 = vector.shape_cast %1288 : vector<2x1xi1> to vector<2x1xi1>
    %1297 = vector.broadcast %1296 : vector<2x1xi1> to vector<2x16xi1>
    %1298 = vector.broadcast %cst_382 : f32 to vector<2x16xf32>
    %1299 = arith.select %1297, %1284, %1298 : vector<2x16xi1>, vector<2x16xf32>
    %c2_i32_383 = arith.constant 2 : i32
    %1300 = arith.muli %1232, %c2_i32_383 : i32
    %1301 = arith.index_cast %1300 : i32 to index
    %c0_384 = arith.constant 0 : index
    %1302 = vector.load %arg27[%1301, %c0_384] : memref<32x16xf32, #tpu.memory_space<vmem>>, vector<2x16xf32>
    tpu.vector_store %arg27[%1301, %c0_384], %1299 {strides = array<i32>} : memref<32x16xf32, #tpu.memory_space<vmem>>, vector<2x16xf32>,
    %1303 = vector.shape_cast %1286 : vector<2x1xi1> to vector<2x1xi1>
    %1304 = vector.broadcast %1303 : vector<2x1xi1> to vector<2x16xi1>
    %1305 = arith.select %1304, %1264, %1228 : vector<2x16xi1>, vector<2x16xf32>
    %1306 = vector.shape_cast %1288 : vector<2x1xi1> to vector<2x1xi1>
    %1307 = vector.broadcast %1306 : vector<2x1xi1> to vector<2x16xi1>
    %1308 = arith.select %1307, %1284, %1231 : vector<2x16xi1>, vector<2x16xf32>
    %c15_i32_385 = arith.constant 15 : i32
    %c15_i32_386 = arith.constant 15 : i32
    %1309 = arith.subi %c15_i32_386, %c15_i32_385 : i32
    %1310 = arith.index_cast %c15_i32_385 : i32 to index
    %c0_387 = arith.constant 0 : index
    %1311 = tpu.strided_load %arg25[%1310, %c0_387] {strides = array<i32: 16, 1>} : memref<32x96xf32, #tpu.memory_space<vmem>>, vector<2x96xf32>
    %1312 = arith.index_cast %1309 : i32 to index
    %c0_388 = arith.constant 0 : index
    %1313 = tpu.strided_load %arg25[%1312, %c0_388] {strides = array<i32: 16, 1>} : memref<32x96xf32, #tpu.memory_space<vmem>>, vector<2x96xf32>
    %1314 = vector.extract_strided_slice %1311 {offsets = [0, 0], sizes = [2, 48], strides = [1, 1]} : vector<2x96xf32> to vector<2x48xf32>
    %1315 = vector.extract_strided_slice %1313 {offsets = [0, 48], sizes = [2, 48], strides = [1, 1]} : vector<2x96xf32> to vector<2x48xf32>
    %cst_389 = arith.constant dense<0.000000e+00> : vector<2x48xf32>
    %1316 = tpu.matmul %1305, %149, %cst_389 {dimension_numbers = #tpu.dot_dimension_numbers<[1], [0], [0], [1], [0, 0, 1, 1], [], []>} : vector<2x16xf32>, vector<16x48xf32>, vector<2x48xf32> -> vector<2x48xf32>
    %1317 = vector.broadcast %151 : vector<1x48xf32> to vector<2x48xf32>
    %1318 = arith.addf %1316, %1317 : vector<2x48xf32>
    %cst_390 = arith.constant dense<0.000000e+00> : vector<2x48xf32>
    %1319 = tpu.matmul %1308, %150, %cst_390 {dimension_numbers = #tpu.dot_dimension_numbers<[1], [0], [0], [1], [0, 0, 1, 1], [], []>} : vector<2x16xf32>, vector<16x48xf32>, vector<2x48xf32> -> vector<2x48xf32>
    %1320 = vector.broadcast %152 : vector<1x48xf32> to vector<2x48xf32>
    %1321 = arith.addf %1319, %1320 : vector<2x48xf32>
    %1322 = vector.extract_strided_slice %1314 {offsets = [0, 0], sizes = [2, 32], strides = [1, 1]} : vector<2x48xf32> to vector<2x32xf32>
    %1323 = vector.extract_strided_slice %1318 {offsets = [0, 0], sizes = [2, 32], strides = [1, 1]} : vector<2x48xf32> to vector<2x32xf32>
    %1324 = arith.addf %1322, %1323 : vector<2x32xf32>
    %1325 = arith.negf %1324 : vector<2x32xf32>
    %1326 = math.exp %1325 : vector<2x32xf32>
    %cst_391 = arith.constant 1.000000e+00 : f32
    %1327 = vector.broadcast %cst_391 : f32 to vector<2x32xf32>
    %1328 = arith.addf %1327, %1326 : vector<2x32xf32>
    %1329 = arith.divf %1327, %1328 : vector<2x32xf32>
    %1330 = vector.extract_strided_slice %1314 {offsets = [0, 32], sizes = [2, 16], strides = [1, 1]} : vector<2x48xf32> to vector<2x16xf32>
    %1331 = vector.extract_strided_slice %1329 {offsets = [0, 0], sizes = [2, 16], strides = [1, 1]} : vector<2x32xf32> to vector<2x16xf32>
    %1332 = vector.extract_strided_slice %1318 {offsets = [0, 32], sizes = [2, 16], strides = [1, 1]} : vector<2x48xf32> to vector<2x16xf32>
    %1333 = arith.mulf %1331, %1332 : vector<2x16xf32>
    %1334 = arith.addf %1330, %1333 : vector<2x16xf32>
    %1335 = math.tanh %1334 : vector<2x16xf32>
    %1336 = vector.extract_strided_slice %1329 {offsets = [0, 16], sizes = [2, 16], strides = [1, 1]} : vector<2x32xf32> to vector<2x16xf32>
    %cst_392 = arith.constant 1.000000e+00 : f32
    %1337 = vector.broadcast %cst_392 : f32 to vector<2x16xf32>
    %1338 = arith.subf %1337, %1336 : vector<2x16xf32>
    %1339 = arith.mulf %1338, %1335 : vector<2x16xf32>
    %1340 = arith.mulf %1336, %1305 : vector<2x16xf32>
    %1341 = arith.addf %1339, %1340 : vector<2x16xf32>
    %1342 = vector.extract_strided_slice %1315 {offsets = [0, 0], sizes = [2, 32], strides = [1, 1]} : vector<2x48xf32> to vector<2x32xf32>
    %1343 = vector.extract_strided_slice %1321 {offsets = [0, 0], sizes = [2, 32], strides = [1, 1]} : vector<2x48xf32> to vector<2x32xf32>
    %1344 = arith.addf %1342, %1343 : vector<2x32xf32>
    %1345 = arith.negf %1344 : vector<2x32xf32>
    %1346 = math.exp %1345 : vector<2x32xf32>
    %cst_393 = arith.constant 1.000000e+00 : f32
    %1347 = vector.broadcast %cst_393 : f32 to vector<2x32xf32>
    %1348 = arith.addf %1347, %1346 : vector<2x32xf32>
    %1349 = arith.divf %1347, %1348 : vector<2x32xf32>
    %1350 = vector.extract_strided_slice %1315 {offsets = [0, 32], sizes = [2, 16], strides = [1, 1]} : vector<2x48xf32> to vector<2x16xf32>
    %1351 = vector.extract_strided_slice %1349 {offsets = [0, 0], sizes = [2, 16], strides = [1, 1]} : vector<2x32xf32> to vector<2x16xf32>
    %1352 = vector.extract_strided_slice %1321 {offsets = [0, 32], sizes = [2, 16], strides = [1, 1]} : vector<2x48xf32> to vector<2x16xf32>
    %1353 = arith.mulf %1351, %1352 : vector<2x16xf32>
    %1354 = arith.addf %1350, %1353 : vector<2x16xf32>
    %1355 = math.tanh %1354 : vector<2x16xf32>
    %1356 = vector.extract_strided_slice %1349 {offsets = [0, 16], sizes = [2, 16], strides = [1, 1]} : vector<2x32xf32> to vector<2x16xf32>
    %cst_394 = arith.constant 1.000000e+00 : f32
    %1357 = vector.broadcast %cst_394 : f32 to vector<2x16xf32>
    %1358 = arith.subf %1357, %1356 : vector<2x16xf32>
    %1359 = arith.mulf %1358, %1355 : vector<2x16xf32>
    %1360 = arith.mulf %1356, %1308 : vector<2x16xf32>
    %1361 = arith.addf %1359, %1360 : vector<2x16xf32>
    %1362 = vector.broadcast %c15_i32_385 : i32 to vector<2x1xi32>
    %1363 = arith.cmpi slt, %1362, %1 : vector<2x1xi32>
    %1364 = vector.broadcast %1309 : i32 to vector<2x1xi32>
    %1365 = arith.cmpi slt, %1364, %1 : vector<2x1xi32>
    %cst_395 = arith.constant 0.000000e+00 : f32
    %1366 = vector.shape_cast %1363 : vector<2x1xi1> to vector<2x1xi1>
    %1367 = vector.broadcast %1366 : vector<2x1xi1> to vector<2x16xi1>
    %1368 = vector.broadcast %cst_395 : f32 to vector<2x16xf32>
    %1369 = arith.select %1367, %1341, %1368 : vector<2x16xi1>, vector<2x16xf32>
    %c2_i32_396 = arith.constant 2 : i32
    %1370 = arith.muli %c15_i32_385, %c2_i32_396 : i32
    %1371 = arith.index_cast %1370 : i32 to index
    %c0_397 = arith.constant 0 : index
    %1372 = vector.load %arg26[%1371, %c0_397] : memref<32x16xf32, #tpu.memory_space<vmem>>, vector<2x16xf32>
    tpu.vector_store %arg26[%1371, %c0_397], %1369 {strides = array<i32>} : memref<32x16xf32, #tpu.memory_space<vmem>>, vector<2x16xf32>,
    %cst_398 = arith.constant 0.000000e+00 : f32
    %1373 = vector.shape_cast %1365 : vector<2x1xi1> to vector<2x1xi1>
    %1374 = vector.broadcast %1373 : vector<2x1xi1> to vector<2x16xi1>
    %1375 = vector.broadcast %cst_398 : f32 to vector<2x16xf32>
    %1376 = arith.select %1374, %1361, %1375 : vector<2x16xi1>, vector<2x16xf32>
    %c2_i32_399 = arith.constant 2 : i32
    %1377 = arith.muli %1309, %c2_i32_399 : i32
    %1378 = arith.index_cast %1377 : i32 to index
    %c0_400 = arith.constant 0 : index
    %1379 = vector.load %arg27[%1378, %c0_400] : memref<32x16xf32, #tpu.memory_space<vmem>>, vector<2x16xf32>
    tpu.vector_store %arg27[%1378, %c0_400], %1376 {strides = array<i32>} : memref<32x16xf32, #tpu.memory_space<vmem>>, vector<2x16xf32>,
    %1380 = vector.shape_cast %1363 : vector<2x1xi1> to vector<2x1xi1>
    %1381 = vector.broadcast %1380 : vector<2x1xi1> to vector<2x16xi1>
    %1382 = arith.select %1381, %1341, %1305 : vector<2x16xi1>, vector<2x16xf32>
    %1383 = vector.shape_cast %1365 : vector<2x1xi1> to vector<2x1xi1>
    %1384 = vector.broadcast %1383 : vector<2x1xi1> to vector<2x16xi1>
    %1385 = arith.select %1384, %1361, %1308 : vector<2x16xi1>, vector<2x16xf32>
    %c16_i32 = arith.constant 16 : i32
    %c0_401 = arith.constant 0 : index
    %c0_402 = arith.constant 0 : index
    %1386 = vector.load %arg26[%c0_401, %c0_402] : memref<32x16xf32, #tpu.memory_space<vmem>>, vector<32x16xf32>
    %c0_403 = arith.constant 0 : index
    %c0_404 = arith.constant 0 : index
    %1387 = vector.load %arg19[%c0_403, %c0_404] : memref<32x128xf32, #tpu.memory_space<vmem>>, vector<16x128xf32>
    %cst_405 = arith.constant dense<0.000000e+00> : vector<32x128xf32>
    %1388 = tpu.matmul %1386, %1387, %cst_405 {dimension_numbers = #tpu.dot_dimension_numbers<[1], [0], [0], [1], [0, 0, 1, 1], [], []>} : vector<32x16xf32>, vector<16x128xf32>, vector<32x128xf32> -> vector<32x128xf32>
    %c0_406 = arith.constant 0 : index
    %c0_407 = arith.constant 0 : index
    %1389 = vector.load %arg27[%c0_406, %c0_407] : memref<32x16xf32, #tpu.memory_space<vmem>>, vector<32x16xf32>
    %c16 = arith.constant 16 : index
    %c0_408 = arith.constant 0 : index
    %1390 = vector.load %arg19[%c16, %c0_408] : memref<32x128xf32, #tpu.memory_space<vmem>>, vector<16x128xf32>
    %cst_409 = arith.constant dense<0.000000e+00> : vector<32x128xf32>
    %1391 = tpu.matmul %1389, %1390, %cst_409 {dimension_numbers = #tpu.dot_dimension_numbers<[1], [0], [0], [1], [0, 0, 1, 1], [], []>} : vector<32x16xf32>, vector<16x128xf32>, vector<32x128xf32> -> vector<32x128xf32>
    %1392 = arith.addf %1388, %1391 : vector<32x128xf32>
    %c0_410 = arith.constant 0 : index
    %c0_411 = arith.constant 0 : index
    %1393 = vector.load %arg20[%c0_410, %c0_411] : memref<1x128xf32, #tpu.memory_space<vmem>>, vector<1x128xf32>
    %1394 = vector.broadcast %1393 : vector<1x128xf32> to vector<32x128xf32>
    %1395 = arith.addf %1392, %1394 : vector<32x128xf32>
    %c0_412 = arith.constant 0 : index
    %c0_413 = arith.constant 0 : index
    %1396 = vector.load %arg28[%c0_412, %c0_413] : memref<32x128xf32, #tpu.memory_space<vmem>>, vector<32x128xf32>
    tpu.vector_store %arg28[%c0_412, %c0_413], %1395 {strides = array<i32>} : memref<32x128xf32, #tpu.memory_space<vmem>>, vector<32x128xf32>,
    %c0_414 = arith.constant 0 : index
    %c0_415 = arith.constant 0 : index
    %1397 = tpu.strided_load %arg28[%c0_414, %c0_415] {strides = array<i32: 2, 1>} : memref<32x128xf32, #tpu.memory_space<vmem>>, vector<16x128xf32>
    %c0_416 = arith.constant 0 : index
    %c0_417 = arith.constant 0 : index
    %c0_418 = arith.constant 0 : index
    %1398 = vector.load %arg21[%c0_416, %c0_417, %c0_418] : memref<2x16x128xf32, #tpu.memory_space<vmem>>, vector<1x16x128xf32>
    %1399 = vector.shape_cast %1398 : vector<1x16x128xf32> to vector<16x128xf32>
    %1400 = vector.shape_cast %1397 : vector<16x128xf32> to vector<1x16x128xf32>
    tpu.vector_store %arg21[%c0_416, %c0_417, %c0_418], %1400 {strides = array<i32>} : memref<2x16x128xf32, #tpu.memory_space<vmem>>, vector<1x16x128xf32>,
    %c1_419 = arith.constant 1 : index
    %c0_420 = arith.constant 0 : index
    %1401 = tpu.strided_load %arg28[%c1_419, %c0_420] {strides = array<i32: 2, 1>} : memref<32x128xf32, #tpu.memory_space<vmem>>, vector<16x128xf32>
    %c1_421 = arith.constant 1 : index
    %c0_422 = arith.constant 0 : index
    %c0_423 = arith.constant 0 : index
    %1402 = vector.load %arg21[%c1_421, %c0_422, %c0_423] : memref<2x16x128xf32, #tpu.memory_space<vmem>>, vector<1x16x128xf32>
    %1403 = vector.shape_cast %1402 : vector<1x16x128xf32> to vector<16x128xf32>
    %1404 = vector.shape_cast %1401 : vector<16x128xf32> to vector<1x16x128xf32>
    tpu.vector_store %arg21[%c1_421, %c0_422, %c0_423], %1404 {strides = array<i32>} : memref<2x16x128xf32, #tpu.memory_space<vmem>>, vector<1x16x128xf32>,
    return
  }
  func.func @transform_0(%arg0: i32) -> (i32, i32, i32) {
    %c0_i32 = arith.constant 0 : i32
    %c0_i32_0 = arith.constant 0 : i32
    %c0_i32_1 = arith.constant 0 : i32
    return %arg0, %c0_i32, %c0_i32_0 : i32, i32, i32
  }
  func.func @transform_1(%arg0: i32) -> (i32, i32, i32) {
    %c0_i32 = arith.constant 0 : i32
    %c0_i32_0 = arith.constant 0 : i32
    %c0_i32_1 = arith.constant 0 : i32
    return %arg0, %c0_i32, %c0_i32_0 : i32, i32, i32
  }
  func.func @transform_2(%arg0: i32) -> (i32, i32, i32) {
    %c0_i32 = arith.constant 0 : i32
    %c0_i32_0 = arith.constant 0 : i32
    %c0_i32_1 = arith.constant 0 : i32
    %c0_i32_2 = arith.constant 0 : i32
    return %c0_i32, %c0_i32_0, %c0_i32_1 : i32, i32, i32
  }
  func.func @transform_3(%arg0: i32) -> (i32, i32) {
    %c0_i32 = arith.constant 0 : i32
    %c0_i32_0 = arith.constant 0 : i32
    %c0_i32_1 = arith.constant 0 : i32
    return %c0_i32, %c0_i32_0 : i32, i32
  }
  func.func @transform_4(%arg0: i32) -> (i32, i32, i32) {
    %c0_i32 = arith.constant 0 : i32
    %c0_i32_0 = arith.constant 0 : i32
    %c0_i32_1 = arith.constant 0 : i32
    %c0_i32_2 = arith.constant 0 : i32
    return %c0_i32, %c0_i32_0, %c0_i32_1 : i32, i32, i32
  }
  func.func @transform_5(%arg0: i32) -> (i32, i32) {
    %c0_i32 = arith.constant 0 : i32
    %c0_i32_0 = arith.constant 0 : i32
    %c0_i32_1 = arith.constant 0 : i32
    return %c0_i32, %c0_i32_0 : i32, i32
  }
  func.func @transform_6(%arg0: i32) -> (i32, i32, i32) {
    %c0_i32 = arith.constant 0 : i32
    %c0_i32_0 = arith.constant 0 : i32
    %c0_i32_1 = arith.constant 0 : i32
    %c0_i32_2 = arith.constant 0 : i32
    return %c0_i32, %c0_i32_0, %c0_i32_1 : i32, i32, i32
  }
  func.func @transform_7(%arg0: i32) -> (i32, i32) {
    %c0_i32 = arith.constant 0 : i32
    %c0_i32_0 = arith.constant 0 : i32
    %c0_i32_1 = arith.constant 0 : i32
    return %c0_i32, %c0_i32_0 : i32, i32
  }
  func.func @transform_8(%arg0: i32) -> (i32, i32) {
    %c0_i32 = arith.constant 0 : i32
    %c0_i32_0 = arith.constant 0 : i32
    %c0_i32_1 = arith.constant 0 : i32
    return %c0_i32, %c0_i32_0 : i32, i32
  }
  func.func @transform_9(%arg0: i32) -> (i32, i32) {
    %c0_i32 = arith.constant 0 : i32
    %c0_i32_0 = arith.constant 0 : i32
    %c0_i32_1 = arith.constant 0 : i32
    return %c0_i32, %c0_i32_0 : i32, i32
  }
  func.func @transform_10(%arg0: i32) -> (i32, i32, i32) {
    %c0_i32 = arith.constant 0 : i32
    %c0_i32_0 = arith.constant 0 : i32
    %c0_i32_1 = arith.constant 0 : i32
    %c0_i32_2 = arith.constant 0 : i32
    return %c0_i32, %c0_i32_0, %c0_i32_1 : i32, i32, i32
  }
  func.func @transform_11(%arg0: i32) -> (i32, i32, i32) {
    %c0_i32 = arith.constant 0 : i32
    %c0_i32_0 = arith.constant 0 : i32
    %c0_i32_1 = arith.constant 0 : i32
    %c0_i32_2 = arith.constant 0 : i32
    return %c0_i32, %c0_i32_0, %c0_i32_1 : i32, i32, i32
  }
  func.func @transform_12(%arg0: i32) -> (i32, i32) {
    %c0_i32 = arith.constant 0 : i32
    %c0_i32_0 = arith.constant 0 : i32
    %c0_i32_1 = arith.constant 0 : i32
    return %c0_i32, %c0_i32_0 : i32, i32
  }
  func.func @transform_13(%arg0: i32) -> (i32, i32) {
    %c0_i32 = arith.constant 0 : i32
    %c0_i32_0 = arith.constant 0 : i32
    %c0_i32_1 = arith.constant 0 : i32
    return %c0_i32, %c0_i32_0 : i32, i32
  }
  func.func @transform_14(%arg0: i32) -> (i32, i32) {
    %c0_i32 = arith.constant 0 : i32
    %c0_i32_0 = arith.constant 0 : i32
    %c0_i32_1 = arith.constant 0 : i32
    return %c0_i32, %c0_i32_0 : i32, i32
  }
  func.func @transform_15(%arg0: i32) -> (i32, i32) {
    %c0_i32 = arith.constant 0 : i32
    %c0_i32_0 = arith.constant 0 : i32
    %c0_i32_1 = arith.constant 0 : i32
    return %c0_i32, %c0_i32_0 : i32, i32
  }
  func.func @transform_16(%arg0: i32) -> (i32, i32) {
    %c0_i32 = arith.constant 0 : i32
    %c0_i32_0 = arith.constant 0 : i32
    %c0_i32_1 = arith.constant 0 : i32
    return %c0_i32, %c0_i32_0 : i32, i32
  }
  func.func @transform_17(%arg0: i32) -> (i32, i32) {
    %c0_i32 = arith.constant 0 : i32
    %c0_i32_0 = arith.constant 0 : i32
    %c0_i32_1 = arith.constant 0 : i32
    return %c0_i32, %c0_i32_0 : i32, i32
  }
  func.func @transform_18(%arg0: i32) -> (i32, i32) {
    %c0_i32 = arith.constant 0 : i32
    %c0_i32_0 = arith.constant 0 : i32
    %c0_i32_1 = arith.constant 0 : i32
    return %c0_i32, %c0_i32_0 : i32, i32
  }
  func.func @transform_19(%arg0: i32) -> (i32, i32) {
    %c0_i32 = arith.constant 0 : i32
    %c0_i32_0 = arith.constant 0 : i32
    %c0_i32_1 = arith.constant 0 : i32
    return %c0_i32, %c0_i32_0 : i32, i32
  }
  func.func @transform_20(%arg0: i32) -> (i32, i32, i32) {
    %c0_i32 = arith.constant 0 : i32
    %c0_i32_0 = arith.constant 0 : i32
    %c0_i32_1 = arith.constant 0 : i32
    return %arg0, %c0_i32, %c0_i32_0 : i32, i32, i32
  }
}

</mosaic_0001>

<bundles_post_ra>
// kernel: tpu_custom_call.1
= control target key start
LH: loop header
LB: loop body
LE: loop exit
PB: predicated region body
PF: predicated region fallthrough
CT: control target
= control target key end

     0   :  { %s6429_s0 = inlined_call_operand.vmem [shape: f32[4,16,16], index: 0, kind: input, shape index: {}]   ;;  %s6430_s1 = inlined_call_operand.vmem [shape: s32[2,2,1], index: 1, kind: input, shape index: {}]   ;;  %s6431_s2 = inlined_call_operand.vmem [shape: f32[4,16,64], index: 2, kind: input, shape index: {}]   ;;  %s6432_s3 = inlined_call_operand.vmem [shape: f32[1,64], index: 3, kind: input, shape index: {}]   ;;  %s6433_s4 = inlined_call_operand.vmem [shape: f32[3,64,32], index: 4, kind: input, shape index: {}]   ;;  %s6434_s5 = inlined_call_operand.vmem [shape: f32[1,32], index: 5, kind: input, shape index: {}]   ;;  %s6435_s6 = inlined_call_operand.vmem [shape: f32[3,32,16], index: 6, kind: input, shape index: {}]   ;;  %s6436_s7 = inlined_call_operand.vmem [shape: f32[1,16], index: 7, kind: input, shape index: {}]   ;;  %s6437_s8 = inlined_call_operand.vmem [shape: f32[16,16], index: 8, kind: input, shape index: {}]   ;;  %s6438_s9 = inlined_call_operand.vmem [shape: f32[1,16], index: 9, kind: input, shape index: {}]   ;;  %s6439_s10 = inlined_call_operand.vmem [shape: f32[2,16,32], index: 10, kind: input, shape index: {}]   ;;  %s6440_s11 = inlined_call_operand.vmem [shape: f32[2,1,32], index: 11, kind: input, shape index: {}]   ;;  %s6441_s12 = inlined_call_operand.vmem [shape: f32[16,96], index: 12, kind: input, shape index: {}]   ;;  %s6442_s13 = inlined_call_operand.vmem [shape: f32[1,96], index: 13, kind: input, shape index: {}]   ;;  %s6443_s14 = inlined_call_operand.vmem [shape: f32[16,48], index: 14, kind: input, shape index: {}]   ;;  %s6444_s15 = inlined_call_operand.vmem [shape: f32[1,48], index: 15, kind: input, shape index: {}]   ;;  %s6445_s16 = inlined_call_operand.vmem [shape: f32[16,48], index: 16, kind: input, shape index: {}]   ;;  %s6446_s17 = inlined_call_operand.vmem [shape: f32[1,48], index: 17, kind: input, shape index: {}]   ;;  %s6447_s18 = inlined_call_operand.vmem [shape: f32[32,128], index: 18, kind: input, shape index: {}]   ;;  %s6448_s19 = inlined_call_operand.vmem [shape: f32[1,128], index: 19, kind: input, shape index: {}]   ;;  %s6449_s20 = inlined_call_operand.hbm [shape: f32[4,16,128], index: 20, kind: output, shape index: {}]  }
   0x1   :  { %6471 = sst [smem:[#allocation17_spill]] %s6429_s0 }
   0x2   :  { %6472 = sst [smem:[#allocation18_spill]] %s6430_s1 }
   0x3   :  { %6473 = sst [smem:[#allocation19_spill]] %s6431_s2 }
   0x4   :  { %6474 = sst [smem:[#allocation20_spill]] %s6432_s3 }
   0x5   :  { %6475 = sst [smem:[#allocation21_spill]] %s6433_s4 }
   0x6   :  { %6476 = sst [smem:[#allocation22_spill]] %s6434_s5 }
   0x7   :  { %6477 = sst [smem:[#allocation23_spill]] %s6435_s6 }
   0x8   :  { %6478 = sst [smem:[#allocation24_spill]] %s6436_s7 }
   0x9   :  { %25 = vsyncpa [#allocation10], 0 }
   0xa   :  { %27 = vsyncpa [#allocation10 + $0x1], 0  ;;  %s5043_s1 = smov 0   ;;  %s5045_s22 = smov 0  }
   0xb   :  { %s5047_s23 = smov 0   ;;  %s5049_s24 = smov 0  }
   0xc LB: > { %6479 = sst [smem:[#allocation12_spill]] %s4914_s1  ;;  %s5064_s2 = sadd.s32 4294967295, %s4926_s24   ;;  %s4926_s24 = sphi %s5049_s24, %s6540_s24   ;;  %s4922_s23 = sphi %s5047_s23, %s6542_s23   ;;  %s4918_s22 = sphi %s5045_s22, %s6544_s22   ;;  %s4914_s1 = sphi %s5043_s1, %s6543_s1  }
   0xd   : > { %6480 = sst [smem:[#allocation13_spill]] %s4922_s23  ;;  %s4374_s25 = sadd.s32 4294967294, %s4926_s24  }
   0xe   : > { %s5068_s3 = sadd.s32 1, %s4926_s24   ;;  %s470_s26 = sadd.s32 1, %s4922_s23 }
   0xf   : > { %6481 = sst [smem:[#allocation14_spill]] %s5068_s3  ;;  %s467_s27 = ssub.s32 %s4926_s24, %s5068_s3 }
  0x10   : > { %p480_p0 = scmp.ne.s32.totalorder %s4922_s23, %s4918_s22  ;;  %p468_p1 = scmp.eq.s32.totalorder %s467_s27, 0 }
  0x11   : > { %p481_p2 = scmp.eq.s32.totalorder %s5064_s2, 1  ;;  %p486_p3 = scmp.ne.s32.totalorder %s4918_s22, %s4914_s1 }
  0x12   : > { %p487_p4 = scmp.eq.s32.totalorder %s4374_s25, 1  ;;  %p4377_p7 = scmp.ge.s32.totalorder %s4926_s24, 1 }
  0x13   : > { %s5079_s28 = scalar_select %p468_p1, %s4922_s23, %s470_s26  }
  0x14   : > { %p5081_p5 = por %p481_p2, %p480_p0  ;;  %p5085_p6 = por %p487_p4, %p486_p3 }
  0x15   : > { %6482 = sst [smem:[#allocation15_spill]] %s5079_s28  ;;  %p576_p8 = scmp.lt.s32.totalorder %s4926_s24, 3 }
  0x16   : > { %s6484_s29 = scalar_select %p5085_p6, 1, 0 }
  0x17   : > { %p577_p9 = pnand %p4377_p7, %p576_p8 }
  0x18   : > { %6485 = sst [smem:[#allocation16_spill]] %s6484_s29  ;;  %s4379_s23 = sshll.u32 (!%p577_p9), %s5064_s2, 1 }
  0x19   : > { %580 = sbr.rel (%p577_p9) target bundleno = 11297 (0x2c21), region = 100  ;;  %s6486_s21 = sld [smem:[#allocation19_spill]] (!%p577_p9) }
  0x1a   : > { %p640_p10 = scmp.lt.s32.totalorder (!%p577_p9), %s4379_s23, 3  ;;  %s6487_s0 = sld [smem:[#allocation17_spill]] (!%p577_p9) }
  0x1b   : > { %s6488_s26 = sld [smem:[#allocation21_spill]] (!%p577_p9)  ;;  %s4931_s30 = smov (!%p577_p9), 16  }
  0x1c   : > { %s6489_s27 = sld [smem:[#allocation20_spill]] (!%p577_p9)  ;;  %p646_p11 = scmp.lt.s32.totalorder (!%p577_p9), %s5064_s2, 1 }
  0x1d   : > { %s6490_s6 = sld [smem:[#allocation23_spill]] (!%p577_p9)  ;;  %s4935_s1 = smov (!%p577_p9), 96  }
  0x1e   : > { %vm656_vm0 = vcmask 122880   ;;  %vm6466_vm1 = vcmask 123904   ;;  %v4928_v6 = vmov 0.0   ;;  %s6546_s23 = smov (!%p640_p10, %s4379_s23), 3  ;;  %vm662_vm2 = vcmask 130048   ;;  %s6491_s5 = sld [smem:[#allocation22_spill]] }
  0x1f   : > { %v4384_v0 = vld [vmem:[%s6486_s21 + $0x18] sm:$0xff]  ;;  %v672_v1 = vld [vmem:[%s6486_s21 + $0x8] sm:$0xff]  ;;  %v4383_v2 = vld [vmem:[%s6486_s21 + $0x10] sm:$0xff]  ;;  %658 = vst.msk [vmem:[#allocation2 + $0x18] sm:$0x1] %vm656_vm0, %v4928_v6  ;;  %s4558_s29 = sshll.u32 %s6546_s23, 4 }
  0x20   : > { %4561 = vmatpush.msra.mxu2 %v4384_v0  ;;  %4563 = vmatpush.msra.mxu3 %v672_v1  ;;  %v671_v3 = vld [vmem:[%s6486_s21] sm:$0xff]  ;;  %v4394_v4 = vld [vmem:[%s6486_s21 + $0x28] sm:$0xff]  ;;  %v4400_v5 = vld [vmem:[%s6486_s21 + $0x38] sm:$0xff]  ;;  %657 = vst.msk [vmem:[#allocation2] sm:$0x1] %vm656_vm0, %v4928_v6  ;;  %s644_s25 = scalar_lea.vmem %s6487_s0, %s4558_s29  ;;  %vm878_vm3 = vcmask 516096  }
  0x21   : > { %v4393_v7 = vld [vmem:[%s6486_s21 + $0x20] sm:$0xff]  ;;  %706 = vmatpush.msra.mxu0 %v4384_v0  ;;  %747 = vmatpush.msra.mxu1 %v672_v1  ;;  %v4399_v8 = vld [vmem:[%s6486_s21 + $0x30] sm:$0xff]  ;;  %660 = vst.msk [vmem:[#allocation2 + $0x11] sm:$0x3] %vm6466_vm1, %v4928_v6  ;;  %v5129_v10 = vld [vmem:[%s644_s25 + $0x18] sm:$0xff]  ;;  %vm883_vm4 = vcmask 523264  }
  0x22   : > { %4562 = vmatpush.msra.mxu2 %v4383_v2  ;;  %4564 = vmatpush.msra.mxu3 %v671_v3  ;;  %661 = vst.msk [vmem:[#allocation2 + $0x29] sm:$0x3] %vm6466_vm1, %v4928_v6  ;;  %v5127_v9 = vld [vmem:[%s644_s25 + $0x10] sm:$0xff]  ;;  %v5131_v11 = vld [vmem:[%s644_s25] sm:$0xff]  ;;  %v5135_v12 = vld [vmem:[%s644_s25 + $0x8] sm:$0xff]  ;;  %vm1081_vm5 = vcmask 253952  }
  0x23   : > { %707 = vmatpush.msra.mxu0 %v4383_v2  ;;  %748 = vmatpush.msra.mxu1 %v671_v3  ;;  %665 = vst.msk [vmem:[#allocation2 + $0x19] sm:$0xff] %vm662_vm2, %v5127_v9  ;;  %v4428_v29 = vld [vmem:[%s6488_s26 + $0xb8] sm:$0xff]  ;;  %v4427_v30 = vld [vmem:[%s6488_s26 + $0xb0] sm:$0xff]  ;;  %v4426_v41 = vld [vmem:[%s6488_s26 + $0xa8] sm:$0xff]  ;;  %vm1086_vm6 = vcmask 261120   ;;  %s6492_s7 = sld [smem:[#allocation24_spill]] }
  0x24   : > { %795 = vmatpush.msrb.mxu2 %v4394_v4  ;;  %847 = vmatpush.msrb.mxu3 %v4400_v5  ;;  %666 = vst.msk [vmem:[#allocation2 + $0x21] sm:$0xff] %vm662_vm2, %v5129_v10  ;;  %v4412_v33 = vld [vmem:[%s6488_s26 + $0x78] sm:$0xff]  ;;  %v4411_v35 = vld [vmem:[%s6488_s26 + $0x70] sm:$0xff]  ;;  %v4410_v42 = vld [vmem:[%s6488_s26 + $0x68] sm:$0xff]  ;;  %s6460_s29 = smov 112   ;;  %s6462_s23 = smov 32  }
  0x25   : > { %663 = vst.msk [vmem:[#allocation2 + $0x1] sm:$0xff] %vm662_vm2, %v5131_v11  ;;  %v915_v34 = vld [vmem:[%s6488_s26 + $0x38] sm:$0xff]  ;;  %949 = vmatpush.msrb.mxu0 %v4412_v33  ;;  %v914_v36 = vld [vmem:[%s6488_s26 + $0x30] sm:$0xff]  ;;  %v913_v43 = vld [vmem:[%s6488_s26 + $0x28] sm:$0xff]  ;;  %s647_s28 = scalar_select %p646_p11, %s5064_s2, 1 }
  0x26   : > { %796 = vmatpush.msrb.mxu2 %v4393_v7  ;;  %848 = vmatpush.msrb.mxu3 %v4399_v8  ;;  %664 = vst.msk [vmem:[#allocation2 + $0x9] sm:$0xff] %vm662_vm2, %v5135_v12  ;;  %v4425_v44 = vld [vmem:[%s6488_s26 + $0xa0] sm:$0xff]  ;;  %v4424_v47 = vld [vmem:[%s6488_s26 + $0x98] sm:$0xff]  ;;  %v4423_v48 = vld [vmem:[%s6488_s26 + $0x90] sm:$0xff]  ;;  %s6493_s0 = sld [smem:[#allocation18_spill]] }
  0x27   : > { %881 = vst.msk [vmem:[#allocation3 + $0x11] sm:$0x1] %vm878_vm3, %v4928_v6  ;;  %990 = vmatpush.msrb.mxu1 %v915_v34  ;;  %950 = vmatpush.msrb.mxu0 %v4411_v35  ;;  %v4409_v45 = vld [vmem:[%s6488_s26 + $0x60] sm:$0xff]  ;;  %v4408_v49 = vld [vmem:[%s6488_s26 + $0x58] sm:$0xff]  ;;  %v4407_v52 = vld [vmem:[%s6488_s26 + $0x50] sm:$0xff]  ;;  %s4382_s21 = sshll.u32 %s647_s28, 1 }
  0x28   : > { %879 = vst.msk [vmem:[#allocation3] sm:$0x1] %vm878_vm3, %v4928_v6  ;;  %v912_v46 = vld [vmem:[%s6488_s26 + $0x20] sm:$0xff]  ;;  %v911_v51 = vld [vmem:[%s6488_s26 + $0x18] sm:$0xff]  ;;  %v910_v53 = vld [vmem:[%s6488_s26 + $0x10] sm:$0xff]  ;;  %s6458_s28 = smov 64  }
  0x29   : > { %880 = vst.msk [vmem:[#allocation3 + $0x18] sm:$0x1] %vm878_vm3, %v4928_v6  ;;  %991 = vmatpush.msrb.mxu1 %v914_v36  ;;  %951 = vmatpush.msrb.mxu0 %v4410_v42  ;;  %v4422_v56 = vld [vmem:[%s6488_s26 + $0x88] sm:$0xff]  ;;  %v4617_v60 = vld [vmem:[%s6489_s27] ss:$0 sm:$0xff]  ;;  %v4436_v35 = vld [vmem:[%s6490_s6 + $0x38] sm:$0xff] }
  0x2a   : > { %v675_v13 = vld [vmem:[#allocation2 + $0x19] sm:$0xff]  ;;  %882 = vst.msk [vmem:[#allocation3 + $0x29] sm:$0x1] %vm878_vm3, %v4928_v6  ;;  %v4406_v57 = vld [vmem:[%s6488_s26 + $0x48] sm:$0xff]  ;;  %s4930_s27 = smov 48  }
  0x2b   : > { %v669_v14 = vld [vmem:[#allocation2 + $0x18] sm:$0xff]  ;;  %4387 = vmatmul.msk.f32.vlgmr.msra.gmra.mxu2 %vm662_vm2, %v675_v13  ;;  %v676_v17 = vld [vmem:[#allocation2 + $0x21] sm:$0xff]  ;;  %992 = vmatpush.msrb.mxu1 %v913_v43  ;;  %1082 = vst.msk [vmem:[#allocation4] sm:$0x1] %vm1081_vm5, %v4928_v6 }
  0x2c   : > { %4391 = vmatmul.msk.f32.vlgmr.msra.gmra.mxu3 %vm662_vm2, %v669_v14  ;;  %v673_v15 = vld [vmem:[#allocation2 + $0x1] sm:$0xff]  ;;  %1044 = vmatpush.msra.mxu2 %v4428_v29  ;;  %v1098_v36 = vld [vmem:[%s6490_s6 + $0x18] sm:$0xff]  ;;  %1083 = vst.msk [vmem:[#allocation4 + $0x18] sm:$0x1] %vm1081_vm5, %v4928_v6  ;;  %s5524_s25 = scalar_lea.vmem %s6493_s0, %s4382_s21 }
  0x2d   : > { %v667_v16 = vld [vmem:[#allocation2] sm:$0xff]  ;;  %4385 = vmatmul.msk.f32.vlgmr.msra.gmra.mxu0 %vm662_vm2, %v673_v15  ;;  %v674_v19 = vld [vmem:[#allocation2 + $0x9] sm:$0xff]  ;;  %993 = vmatpush.msrb.mxu1 %v912_v46  ;;  %1084 = vst.msk [vmem:[#allocation4 + $0x11] sm:$0x1] %vm1081_vm5, %v4928_v6 }
  0x2e   : > { %4389 = vmatmul.msk.f32.vlgmr.msra.gmra.mxu1 %vm662_vm2, %v667_v16  ;;  %v670_v18 = vld [vmem:[#allocation2 + $0x20] sm:$0xff]  ;;  %v668_v20 = vld [vmem:[#allocation2 + $0x8] sm:$0xff]  ;;  %1045 = vmatpush.msra.mxu2 %v4427_v30  ;;  %1085 = vst.msk [vmem:[#allocation4 + $0x29] sm:$0x1] %vm1081_vm5, %v4928_v6 }
  0x2f   : > { %v762_v21 = vld [vmem:[#allocation2 + $0x2] sm:$0xff]  ;;  %v763_v23 = vld [vmem:[#allocation2 + $0xa] sm:$0xff]  ;;  %v764_v25 = vld [vmem:[#allocation2 + $0x1a] sm:$0xff]  ;;  %952 = vmatpush.msrb.mxu0 %v4409_v45  ;;  %994 = vmatpush.msrb.mxu1 %v911_v51 }
  0x30   : > { %v814_v22 = vld [vmem:[#allocation2 + $0x3] sm:$0xff]  ;;  %v815_v24 = vld [vmem:[#allocation2 + $0xb] sm:$0xff]  ;;  %v816_v26 = vld [vmem:[#allocation2 + $0x1b] sm:$0xff]  ;;  %1046 = vmatpush.msra.mxu2 %v4426_v41  ;;  %1132 = vmatpush.msra.mxu3 %v4436_v35 }
  0x31   : > { %v765_v27 = vld [vmem:[#allocation2 + $0x22] sm:$0xff]  ;;  %953 = vmatpush.msrb.mxu0 %v4408_v49  ;;  %995 = vmatpush.msrb.mxu1 %v910_v53 }
  0x32   : > { %v817_v28 = vld [vmem:[#allocation2 + $0x23] sm:$0xff]  ;;  %1047 = vmatpush.msra.mxu2 %v4425_v44 }
  0x33   : > { %4388 = vmatmul.msk.f32.gmra.mxu2 %vm662_vm2, %v676_v17  ;;  %954 = vmatpush.msrb.mxu0 %v4407_v52  ;;  %v909_v58 = vld [vmem:[%s6488_s26 + $0x8] sm:$0xff]  ;;  %v4421_v63 = vld [vmem:[%s6488_s26 + $0x80] sm:$0xff] }
  0x34   : > { %4392 = vmatmul.msk.f32.gmra.mxu3 %vm662_vm2, %v670_v18  ;;  %1048 = vmatpush.msra.mxu2 %v4424_v47  ;;  %v4405_v0 = vld [vmem:[%s6488_s26 + $0x40] sm:$0xff] }
  0x35   : > { %4386 = vmatmul.msk.f32.gmra.mxu0 %vm662_vm2, %v674_v19  ;;  %996 = vmatpush.msrb.mxu1 %v909_v58  ;;  %v908_v1 = vld [vmem:[%s6488_s26] sm:$0xff] }
  0x36   : > { %4390 = vmatmul.msk.f32.gmra.mxu1 %vm662_vm2, %v668_v20  ;;  %1049 = vmatpush.msra.mxu2 %v4423_v48 }
  0x37   : > { %955 = vmatpush.msrb.mxu0 %v4406_v57  ;;  %997 = vmatpush.msrb.mxu1 %v908_v1  ;;  %v1095_v1 = vld [vmem:[%s6490_s6] sm:$0xff] }
  0x38   : > { %1050 = vmatpush.msra.mxu2 %v4422_v56 }
  0x39   : > { %956 = vmatpush.msrb.mxu0 %v4405_v0  ;;  %v4446_v0 = vld [vmem:[%s6490_s6 + $0x48] sm:$0xff] }
  0x3a   : > { %1051 = vmatpush.msra.mxu2 %v4421_v63  ;;  %v4433_v63 = vld [vmem:[%s6490_s6 + $0x20] sm:$0xff] }
  0x3b   : > { %4395 = vmatmul.msk.f32.vlgmr.msrb.gmra.mxu2 %vm662_vm2, %v762_v21  ;;  %1173 = vmatpush.msra.mxu0 %v1098_v36 }
  0x3c   : > { %4401 = vmatmul.msk.f32.vlgmr.msrb.gmra.mxu3 %vm662_vm2, %v814_v22 }
  0x43   : > { %4396 = vmatmul.msk.f32.gmra.mxu2 %vm662_vm2, %v763_v23 }
  0x44   : > { %4402 = vmatmul.msk.f32.gmra.mxu3 %vm662_vm2, %v815_v24 }
  0x4b   : > { %4397 = vmatmul.msk.f32.gmra.mxu2 %vm662_vm2, %v764_v25 }
  0x4c   : > { %4403 = vmatmul.msk.f32.gmra.mxu3 %vm662_vm2, %v816_v26 }
  0x53   : > { %4398 = vmatmul.msk.f32.gmra.mxu2 %vm662_vm2, %v765_v27 }
  0x54   : > { %4404 = vmatmul.msk.f32.gmra.mxu3 %vm662_vm2, %v817_v28 }
  0xaa   : > { %v709_v37 = vpop.f32.mrf.mxu0 }
  0xab   : > { %v750_v38 = vpop.f32.mrf.mxu1 }
  0xac   : > { %v751_v50 = vadd.f32 %v750_v38, %v709_v37  ;;  %v4435_v37 = vld [vmem:[%s6490_s6 + $0x30] sm:$0xff] }
  0xad   : > { %1133 = vmatpush.msra.mxu3 %v4435_v37 }
  0xae   : > { %v5165_v31 = vpop.f32.mrf.mxu2 }
  0xaf   : > { %v5167_v32 = vpop.f32.mrf.mxu3 }
  0xb0   : > { %v757_v16 = vadd.f32 %v5167_v32, %v5165_v31 }
  0xb2   : > { %v712_v61 = vpop.f32.mrf.mxu0 }
  0xb3   : > { %v753_v62 = vpop.f32.mrf.mxu1 }
  0xb4   : > { %v754_v4 = vadd.f32 %v753_v62, %v712_v61  ;;  %v4447_v61 = vld [vmem:[%s6490_s6 + $0x50] sm:$0xff]  ;;  %v1096_v62 = vld [vmem:[%s6490_s6 + $0x8] sm:$0xff] }
  0xb6   : > { %v5185_v39 = vpop.f32.mrf.mxu2 }
  0xb7   : > { %v5187_v40 = vpop.f32.mrf.mxu3 }
  0xb8   : > { %v760_v23 = vadd.f32 %v5187_v40, %v5185_v39  ;;  %v4448_v39 = vld [vmem:[%s6490_s6 + $0x58] sm:$0xff] }
  0xb9   : > { %1223 = vmatpush.msra.mxu1 %v4448_v39 }
  0xbb   : > { %1224 = vmatpush.msra.mxu1 %v4447_v61 }
  0xbd   : > { %1225 = vmatpush.msra.mxu1 %v4446_v0 }
  0xbe   : > { %v798_v54 = vpop.f32.mrf.mxu2 }
  0xbf   : > { %v850_v55 = vpop.f32.mrf.mxu3  ;;  %v810_v59 = vadd.f32 %v798_v54, %v751_v50 }
  0xc1   : > { %v862_v2 = vadd.f32 %v850_v55, %v810_v59  ;;  %v1097_v59 = vld [vmem:[%s6490_s6 + $0x10] sm:$0xff] }
  0xc2   : > { %1174 = vmatpush.msra.mxu0 %v1097_v59 }
  0xc3   : > { %v870_v3 = vadd.f32 %v4617_v60, %v862_v2  ;;  %v4445_v2 = vld [vmem:[%s6490_s6 + $0x40] sm:$0xff] }
  0xc4   : > { %1175 = vmatpush.msra.mxu0 %v1096_v62  ;;  %1226 = vmatpush.msra.mxu1 %v4445_v2 }
  0xc5   : > { %v874_v5 = vmax.f32 %v870_v3, 0.0 }
  0xc6   : > { %v801_v7 = vpop.f32.mrf.mxu2  ;;  %1176 = vmatpush.msra.mxu0 %v1095_v1 }
  0xc7   : > { %v853_v8 = vpop.f32.mrf.mxu3  ;;  %884 = vst.msk [vmem:[#allocation3 + $0x1] sm:$0xff] %vm883_vm4, %v874_v5  ;;  %v811_v13 = vadd.f32 %v801_v7, %v754_v4  ;;  %v4618_v7 = vld [vmem:[%s6491_s5] ss:$0 sm:$0xff] }
  0xc9   : > { %v863_v14 = vadd.f32 %v853_v8, %v811_v13 }
  0xcb   : > { %v871_v15 = vadd.f32 %v4617_v60, %v863_v14 }
  0xcd   : > { %v875_v17 = vmax.f32 %v871_v15, 0.0 }
  0xce   : > { %v804_v18 = vpop.f32.mrf.mxu2  ;;  %v888_v24 = vld [vmem:[#allocation3 + $0x1] sm:$0xff] }
  0xcf   : > { %v856_v19 = vpop.f32.mrf.mxu3  ;;  %885 = vst.msk [vmem:[#allocation3 + $0x9] sm:$0xff] %vm883_vm4, %v875_v17  ;;  %v812_v20 = vadd.f32 %v804_v18, %v757_v16 }
  0xd1   : > { %v864_v21 = vadd.f32 %v856_v19, %v812_v20 }
  0xd3   : > { %v872_v22 = vadd.f32 %v4617_v60, %v864_v21 }
  0xd5   : > { %v876_v25 = vmax.f32 %v872_v22, 0.0 }
  0xd6   : > { %v889_v26 = vld [vmem:[#allocation3 + $0x9] sm:$0xff]  ;;  %v807_v29 = vpop.f32.mrf.mxu2 }
  0xd7   : > { %v892_v27 = vld [vmem:[#allocation3 + $0x2] sm:$0xff]  ;;  %v893_v28 = vld [vmem:[#allocation3 + $0xa] sm:$0xff]  ;;  %v859_v30 = vpop.f32.mrf.mxu3  ;;  %886 = vst.msk [vmem:[#allocation3 + $0x19] sm:$0xff] %vm883_vm4, %v876_v25  ;;  %v813_v32 = vadd.f32 %v807_v29, %v760_v23  ;;  %v1257_v29 = vld [vmem:[%s6437_s8 + $0x8] sm:$0xff] }
  0xd8   : > { %v896_v33 = vmax.f32 %v888_v24, %v892_v27  ;;  %v897_v31 = vmax.f32 %v889_v26, %v893_v28  ;;  %1288 = vmatpush.msrb.mxu2 %v1257_v29 }
  0xd9   : > { %v865_v34 = vadd.f32 %v859_v30, %v813_v32  ;;  %v1256_v30 = vld [vmem:[%s6437_s8] sm:$0xff] }
  0xda   : > { %900 = vst.msk [vmem:[#allocation3 + $0x1] sm:$0xff] %vm883_vm4, %v896_v33  ;;  %1289 = vmatpush.msrb.mxu2 %v1256_v30 }
  0xdb   : > { %901 = vst.msk [vmem:[#allocation3 + $0x9] sm:$0xff] %vm883_vm4, %v897_v31  ;;  %v873_v38 = vadd.f32 %v4617_v60, %v865_v34  ;;  %v4434_v60 = vld [vmem:[%s6490_s6 + $0x28] sm:$0xff] }
  0xdc   : > { %1134 = vmatpush.msra.mxu3 %v4434_v60 }
  0xdd   : > { %v877_v40 = vmax.f32 %v873_v38, 0.0 }
  0xde   : > { %v890_v44 = vld [vmem:[#allocation3 + $0x19] sm:$0xff]  ;;  %1135 = vmatpush.msra.mxu3 %v4433_v63 }
  0xdf   : > { %887 = vst.msk [vmem:[#allocation3 + $0x21] sm:$0xff] %vm883_vm4, %v877_v40 }
  0xe1   : > { %v916_v41 = vld [vmem:[#allocation3 + $0x1] sm:$0xff] }
  0xe2   : > { %v904_v42 = vld [vmem:[#allocation3] sm:$0xff]  ;;  %4413 = vmatmul.msk.f32.vlgmr.msrb.gmra.mxu0 %vm883_vm4, %v916_v41  ;;  %v917_v50 = vld [vmem:[#allocation3 + $0x9] sm:$0xff] }
  0xe3   : > { %4417 = vmatmul.msk.f32.vlgmr.msrb.gmra.mxu1 %vm883_vm4, %v904_v42  ;;  %v1011_v43 = vld [vmem:[#allocation3 + $0x2] sm:$0xff]  ;;  %v1012_v52 = vld [vmem:[#allocation3 + $0xa] sm:$0xff] }
  0xe4   : > { %4429 = vmatmul.msk.f32.vlgmr.msra.gmra.mxu2 %vm883_vm4, %v1011_v43  ;;  %v905_v51 = vld [vmem:[#allocation3 + $0x8] sm:$0xff] }
  0xe6   : > { %v891_v45 = vld [vmem:[#allocation3 + $0x21] sm:$0xff] }
  0xe7   : > { %v894_v46 = vld [vmem:[#allocation3 + $0x1a] sm:$0xff]  ;;  %v895_v47 = vld [vmem:[#allocation3 + $0x22] sm:$0xff] }
  0xe8   : > { %v898_v48 = vmax.f32 %v890_v44, %v894_v46  ;;  %v899_v49 = vmax.f32 %v891_v45, %v895_v47 }
  0xea   : > { %902 = vst.msk [vmem:[#allocation3 + $0x19] sm:$0xff] %vm883_vm4, %v898_v48  ;;  %4414 = vmatmul.msk.f32.gmra.mxu0 %vm883_vm4, %v917_v50 }
  0xeb   : > { %4418 = vmatmul.msk.f32.gmra.mxu1 %vm883_vm4, %v905_v51  ;;  %903 = vst.msk [vmem:[#allocation3 + $0x21] sm:$0xff] %vm883_vm4, %v899_v49 }
  0xec   : > { %4430 = vmatmul.msk.f32.gmra.mxu2 %vm883_vm4, %v1012_v52 }
  0xf1   : > { %v918_v53 = vld [vmem:[#allocation3 + $0x19] sm:$0xff] }
  0xf2   : > { %v906_v54 = vld [vmem:[#allocation3 + $0x18] sm:$0xff]  ;;  %4415 = vmatmul.msk.f32.gmra.mxu0 %vm883_vm4, %v918_v53  ;;  %v919_v56 = vld [vmem:[#allocation3 + $0x21] sm:$0xff] }
  0xf3   : > { %4419 = vmatmul.msk.f32.gmra.mxu1 %vm883_vm4, %v906_v54  ;;  %v1013_v55 = vld [vmem:[#allocation3 + $0x1a] sm:$0xff]  ;;  %v1014_v58 = vld [vmem:[#allocation3 + $0x22] sm:$0xff]  ;;  %v4619_v54 = vld [vmem:[%s6492_s7] ss:$0 sm:$0xff] }
  0xf4   : > { %4431 = vmatmul.msk.f32.gmra.mxu2 %vm883_vm4, %v1013_v55  ;;  %v907_v57 = vld [vmem:[#allocation3 + $0x20] sm:$0xff]  ;;  %v1304_v55 = vld [vmem:[%s6439_s10 + $0x8] sm:$0xff] }
  0xf5   : > { %1335 = vmatpush.msrb.mxu3 %v1304_v55 }
  0xfa   : > { %4416 = vmatmul.msk.f32.gmra.mxu0 %vm883_vm4, %v919_v56  ;;  %v1303_v56 = vld [vmem:[%s6439_s10] sm:$0xff] }
  0xfb   : > { %4420 = vmatmul.msk.f32.gmra.mxu1 %vm883_vm4, %v907_v57  ;;  %1336 = vmatpush.msrb.mxu3 %v1303_v56 }
  0xfc   : > { %4432 = vmatmul.msk.f32.gmra.mxu2 %vm883_vm4, %v1014_v58 }
 0x15f   : > { %v958_v3 = vpop.f32.mrf.mxu0 }
 0x160   : > { %v999_v4 = vpop.f32.mrf.mxu1 }
 0x161   : > { %v1000_v5 = vadd.f32 %v999_v4, %v958_v3 }
 0x167   : > { %v1053_v8 = vpop.f32.mrf.mxu2  ;;  %v961_v14 = vpop.f32.mrf.mxu0 }
 0x168   : > { %v1065_v13 = vadd.f32 %v1053_v8, %v1000_v5  ;;  %v1002_v15 = vpop.f32.mrf.mxu1 }
 0x169   : > { %v1003_v18 = vadd.f32 %v1002_v15, %v961_v14 }
 0x16a   : > { %v1073_v16 = vadd.f32 %v4618_v7, %v1065_v13 }
 0x16c   : > { %v1077_v17 = vmax.f32 %v1073_v16, 0.0 }
 0x16e   : > { %1087 = vst.msk [vmem:[#allocation4 + $0x1] sm:$0xff] %vm1086_vm6, %v1077_v17 }
 0x16f   : > { %v1056_v19 = vpop.f32.mrf.mxu2  ;;  %v964_v21 = vpop.f32.mrf.mxu0 }
 0x170   : > { %v1066_v20 = vadd.f32 %v1056_v19, %v1003_v18  ;;  %v1005_v22 = vpop.f32.mrf.mxu1 }
 0x171   : > { %v1006_v27 = vadd.f32 %v1005_v22, %v964_v21 }
 0x172   : > { %v1074_v23 = vadd.f32 %v4618_v7, %v1066_v20 }
 0x174   : > { %v1078_v24 = vmax.f32 %v1074_v23, 0.0 }
 0x175   : > { %v1099_v25 = vld [vmem:[#allocation4 + $0x1] sm:$0xff] }
 0x176   : > { %v1091_v26 = vld [vmem:[#allocation4] sm:$0xff]  ;;  %1088 = vst.msk [vmem:[#allocation4 + $0x9] sm:$0xff] %vm1086_vm6, %v1078_v24  ;;  %4437 = vmatmul.msk.f32.vlgmr.msra.gmra.mxu3 %vm1086_vm6, %v1099_v25 }
 0x177   : > { %4441 = vmatmul.msk.f32.vlgmr.msra.gmra.mxu0 %vm1086_vm6, %v1091_v26  ;;  %v1059_v28 = vpop.f32.mrf.mxu2  ;;  %v967_v32 = vpop.f32.mrf.mxu0 }
 0x178   : > { %v1067_v33 = vadd.f32 %v1059_v28, %v1006_v27  ;;  %v1008_v34 = vpop.f32.mrf.mxu1  ;;  %v4621_v28 = vld [vmem:[%s6440_s11] ss:$0 sm:$0xff] }
 0x179   : > { %v1009_v39 = vadd.f32 %v1008_v34, %v967_v32 }
 0x17a   : > { %v1075_v31 = vadd.f32 %v4618_v7, %v1067_v33 }
 0x17c   : > { %v1079_v35 = vmax.f32 %v1075_v31, 0.0 }
 0x17d   : > { %v1100_v36 = vld [vmem:[#allocation4 + $0x9] sm:$0xff] }
 0x17e   : > { %v1092_v37 = vld [vmem:[#allocation4 + $0x8] sm:$0xff]  ;;  %1089 = vst.msk [vmem:[#allocation4 + $0x19] sm:$0xff] %vm1086_vm6, %v1079_v35  ;;  %4438 = vmatmul.msk.f32.gmra.mxu3 %vm1086_vm6, %v1100_v36 }
 0x17f   : > { %v1190_v38 = vld [vmem:[#allocation4 + $0x2] sm:$0xff]  ;;  %4442 = vmatmul.msk.f32.gmra.mxu0 %vm1086_vm6, %v1092_v37  ;;  %v1062_v40 = vpop.f32.mrf.mxu2  ;;  %v1191_v46 = vld [vmem:[#allocation4 + $0xa] sm:$0xff] }
 0x180   : > { %4449 = vmatmul.msk.f32.vlgmr.msra.gmra.mxu1 %vm1086_vm6, %v1190_v38  ;;  %v1068_v41 = vadd.f32 %v1062_v40, %v1009_v39 }
 0x182   : > { %v1076_v42 = vadd.f32 %v4618_v7, %v1068_v41 }
 0x184   : > { %v1080_v43 = vmax.f32 %v1076_v42, 0.0 }
 0x185   : > { %v1101_v44 = vld [vmem:[#allocation4 + $0x19] sm:$0xff] }
 0x186   : > { %v1093_v45 = vld [vmem:[#allocation4 + $0x18] sm:$0xff]  ;;  %1090 = vst.msk [vmem:[#allocation4 + $0x21] sm:$0xff] %vm1086_vm6, %v1080_v43  ;;  %4439 = vmatmul.msk.f32.gmra.mxu3 %vm1086_vm6, %v1101_v44 }
 0x187   : > { %4443 = vmatmul.msk.f32.gmra.mxu0 %vm1086_vm6, %v1093_v45 }
 0x188   : > { %4450 = vmatmul.msk.f32.gmra.mxu1 %vm1086_vm6, %v1191_v46 }
 0x18d   : > { %v1102_v47 = vld [vmem:[#allocation4 + $0x21] sm:$0xff] }
 0x18e   : > { %v1094_v48 = vld [vmem:[#allocation4 + $0x20] sm:$0xff]  ;;  %4440 = vmatmul.msk.f32.gmra.mxu3 %vm1086_vm6, %v1102_v47 }
 0x18f   : > { %v1192_v49 = vld [vmem:[#allocation4 + $0x1a] sm:$0xff]  ;;  %4444 = vmatmul.msk.f32.gmra.mxu0 %vm1086_vm6, %v1094_v48  ;;  %v1193_v50 = vld [vmem:[#allocation4 + $0x22] sm:$0xff] }
 0x190   : > { %4451 = vmatmul.msk.f32.gmra.mxu1 %vm1086_vm6, %v1192_v49 }
 0x198   : > { %4452 = vmatmul.msk.f32.gmra.mxu1 %vm1086_vm6, %v1193_v50  ;;  %v4466_v50 = vld [vmem:[%s6439_s10 + $0x18] sm:$0xff] }
 0x199   : > { %1512 = vmatpush.msrb.mxu0 %v4466_v50 }
 0x1f4   : > { %v1178_v51 = vpop.f32.mrf.mxu0 }
 0x1f9   : > { %v1137_v52 = vpop.f32.mrf.mxu3 }
 0x1fa   : > { %v1179_v53 = vadd.f32 %v1178_v51, %v1137_v52 }
 0x1fc   : > { %v1181_v58 = vpop.f32.mrf.mxu0 }
 0x1fd   : > { %v1228_v57 = vpop.f32.mrf.mxu1 }
 0x1fe   : > { %v1240_v59 = vadd.f32 %v1228_v57, %v1179_v53 }
 0x200   : > { %v1248_v60 = vadd.f32 %v4619_v54, %v1240_v59 }
 0x201   : > { %v1140_v62 = vpop.f32.mrf.mxu3 }
 0x202   : > { %v1252_v61 = vadd.f32 %v1248_v60, %v5131_v11  ;;  %v1182_v63 = vadd.f32 %v1181_v58, %v1140_v62 }
 0x204   : > { %4453 = vmatmul.msk.f32.vlgmr.msrb.gmra.mxu2 %vm662_vm2, %v1252_v61  ;;  %v1184_v2 = vpop.f32.mrf.mxu0 }
 0x205   : > { %v1231_v0 = vpop.f32.mrf.mxu1 }
 0x206   : > { %v1241_v1 = vadd.f32 %v1231_v0, %v1182_v63 }
 0x208   : > { %v1249_v3 = vadd.f32 %v4619_v54, %v1241_v1 }
 0x209   : > { %v1143_v4 = vpop.f32.mrf.mxu3 }
 0x20a   : > { %v1253_v5 = vadd.f32 %v1249_v3, %v5135_v12  ;;  %v1185_v7 = vadd.f32 %v1184_v2, %v1143_v4  ;;  %v4620_v12 = vld [vmem:[%s6438_s9] ss:$0 sm:$0xff] }
 0x20c   : > { %4454 = vmatmul.msk.f32.gmra.mxu2 %vm662_vm2, %v1253_v5  ;;  %v1187_v15 = vpop.f32.mrf.mxu0 }
 0x20d   : > { %v1234_v8 = vpop.f32.mrf.mxu1 }
 0x20e   : > { %v1242_v13 = vadd.f32 %v1234_v8, %v1185_v7 }
 0x210   : > { %v1250_v14 = vadd.f32 %v4619_v54, %v1242_v13 }
 0x211   : > { %v1146_v16 = vpop.f32.mrf.mxu3 }
 0x212   : > { %v1254_v11 = vadd.f32 %v1250_v14, %v5127_v9  ;;  %v1188_v17 = vadd.f32 %v1187_v15, %v1146_v16 }
 0x214   : > { %4455 = vmatmul.msk.f32.gmra.mxu2 %vm662_vm2, %v1254_v11 }
 0x215   : > { %v1237_v18 = vpop.f32.mrf.mxu1 }
 0x216   : > { %v1243_v19 = vadd.f32 %v1237_v18, %v1188_v17 }
 0x218   : > { %v1251_v20 = vadd.f32 %v4619_v54, %v1243_v19 }
 0x21a   : > { %v1255_v21 = vadd.f32 %v1251_v20, %v5129_v10 }
 0x21c   : > { %4456 = vmatmul.msk.f32.gmra.mxu2 %vm662_vm2, %v1255_v21 }
 0x287   : > { %v1291_v22 = vpop.f32.mrf.mxu2 }
 0x288   : > { %v5355_v23 = vadd.f32 %v4620_v12, %v1291_v22 }
 0x28a   : > { %4457 = vmatmul.msk.f32.vlgmr.msrb.gmra.mxu3 %vm662_vm2, %v5355_v23 }
 0x28f   : > { %v1294_v9 = vpop.f32.mrf.mxu2 }
 0x290   : > { %v5359_v24 = vadd.f32 %v4620_v12, %v1294_v9 }
 0x292   : > { %4458 = vmatmul.msk.f32.gmra.mxu3 %vm662_vm2, %v5359_v24 }
 0x297   : > { %v1297_v25 = vpop.f32.mrf.mxu2 }
 0x298   : > { %v5363_v10 = vadd.f32 %v4620_v12, %v1297_v25 }
 0x29a   : > { %4459 = vmatmul.msk.f32.gmra.mxu3 %vm662_vm2, %v5363_v10 }
 0x29f   : > { %v1300_v26 = vpop.f32.mrf.mxu2 }
 0x2a0   : > { %v5367_v27 = vadd.f32 %v4620_v12, %v1300_v26 }
 0x2a2   : > { %4460 = vmatmul.msk.f32.gmra.mxu3 %vm662_vm2, %v5367_v27 }
 0x30d   : > { %v1338_v29 = vpop.f32.mrf.mxu3 }
 0x30e   : > { %v5374_v30 = vadd.f32 %v4621_v28, %v1338_v29 }
 0x310   : > { %v4461_v33 = vmul.f32 -1.442695, %v5374_v30 }
 0x312   : > { %4627 = vpow2.f32 %v4461_v33 }
 0x315   : > { %v1341_v31 = vpop.f32.mrf.mxu3 }
 0x316   : > { %v5377_v32 = vadd.f32 %v4621_v28, %v1341_v31 }
 0x318   : > { %v4628_v34 = vpop.eup %4627  ;;  %v4462_v35 = vmul.f32 -1.442695, %v5377_v32 }
 0x319   : > { %v1366_v36 = vadd.f32 1.0, %v4628_v34 }
 0x31a   : > { %4629 = vpow2.f32 %v4462_v35 }
 0x31b   : > { %4631 = vrcp.f32 %v1366_v36  ;;  %v1381_v46 = vand.u32 2147483648, %v1366_v36  ;;  %v1379_v49 = vand.u32 2147483647, %v1366_v36  ;;  %vm1375_vm8 = vweird.f32 %v1366_v36 }
 0x31d   : > { %v1344_v37 = vpop.f32.mrf.mxu3  ;;  %v1382_v56 = vor.u32 1.1754944e-38, %v1381_v46  ;;  %vm1380_vm10 = vcmp.eq.f32.partialorder %v1379_v49, 8.507059e+37 }
 0x31e   : > { %v5380_v38 = vadd.f32 %v4621_v28, %v1344_v37  ;;  %v4465_v37 = vld [vmem:[%s6439_s10 + $0x10] sm:$0xff] }
 0x31f   : > { %1513 = vmatpush.msrb.mxu0 %v4465_v37 }
 0x320   : > { %v4630_v39 = vpop.eup %4629  ;;  %v4463_v40 = vmul.f32 -1.442695, %v5380_v38 }
 0x321   : > { %v4632_v41 = vpop.eup %4631  ;;  %v1367_v42 = vadd.f32 1.0, %v4630_v39 }
 0x322   : > { %4633 = vpow2.f32 %v4463_v40  ;;  %v1371_v43 = vmul.f32 %v4632_v41, %v1366_v36  ;;  %vm1376_vm7 = vweird.f32 %v4632_v41  ;;  %v1350_v40 = vmax.f32 %v5374_v30, 0.0 }
 0x323   : > { %4635 = vrcp.f32 %v1367_v42  ;;  %vm1377_vm9 = vmor %vm1375_vm8, %vm1376_vm7  ;;  %v1396_v61 = vand.u32 2147483648, %v1367_v42  ;;  %v1394_v63 = vand.u32 2147483647, %v1367_v42  ;;  %vm1390_vm12 = vweird.f32 %v1367_v42 }
 0x324   : > { %v1372_v44 = vsub.f32 1.0, %v1371_v43 }
 0x325   : > { %v1347_v45 = vpop.f32.mrf.mxu3  ;;  %v1397_v4 = vor.u32 1.1754944e-38, %v1396_v61  ;;  %vm1395_vm14 = vcmp.eq.f32.partialorder %v1394_v63, 8.507059e+37  ;;  %v5441_v63 = vld [vmem:[%s6445_s16] sm:$0xff] }
 0x326   : > { %v5383_v47 = vadd.f32 %v4621_v28, %v1347_v45  ;;  %v1373_v48 = vmul.f32 %v4632_v41, %v1372_v44 }
 0x328   : > { %v4634_v51 = vpop.eup %4633  ;;  %v4464_v52 = vmul.f32 -1.442695, %v5383_v47  ;;  %v1374_v53 = vadd.f32 %v4632_v41, %v1373_v48  ;;  %v1351_v48 = vmax.f32 %v5377_v32, 0.0 }
 0x329   : > { %v4636_v54 = vpop.eup %4635  ;;  %v1368_v55 = vadd.f32 1.0, %v4634_v51 }
 0x32a   : > { %4637 = vpow2.f32 %v4464_v52  ;;  %v1378_v57 = vsel %vm1377_vm9, %v4632_v41, %v1374_v53  ;;  %v1386_v58 = vmul.f32 %v4636_v54, %v1367_v42  ;;  %vm1391_vm11 = vweird.f32 %v4636_v54 }
 0x32b   : > { %4639 = vrcp.f32 %v1368_v55  ;;  %v1383_v59 = vsel %vm1380_vm10, %v1382_v56, %v1378_v57  ;;  %vm1392_vm13 = vmor %vm1390_vm12, %vm1391_vm11  ;;  %v1411_v15 = vand.u32 2147483648, %v1368_v55  ;;  %v1409_v11 = vand.u32 2147483647, %v1368_v55 }
 0x32c   : > { %1434 = vrot.lane.b32.xlu0 %v1383_v59, %s6460_s29  ;;  %v1387_v60 = vsub.f32 1.0, %v1386_v58  ;;  %v1450_v5 = vsub.f32 1.0, %v1383_v59  ;;  %vm1405_vm0 = vweird.f32 %v1368_v55 }
 0x32d   : > { %v1412_v19 = vor.u32 1.1754944e-38, %v1411_v15  ;;  %vm1410_vm4 = vcmp.eq.f32.partialorder %v1409_v11, 8.507059e+37 }
 0x32e   : > { %v1388_v62 = vmul.f32 %v4636_v54, %v1387_v60 }
 0x330   : > { %v4638_v0 = vpop.eup %4637  ;;  %v1389_v1 = vadd.f32 %v4636_v54, %v1388_v62 }
 0x331   : > { %v4640_v2 = vpop.eup %4639  ;;  %v1369_v3 = vadd.f32 1.0, %v4638_v0 }
 0x332   : > { %v1393_v7 = vsel %vm1392_vm13, %v4636_v54, %v1389_v1  ;;  %v1401_v8 = vmul.f32 %v4640_v2, %v1368_v55  ;;  %vm1406_vm15 = vweird.f32 %v4640_v2 }
 0x333   : > { %4641 = vrcp.f32 %v1369_v3  ;;  %v1398_v13 = vsel %vm1395_vm14, %v1397_v4, %v1393_v7  ;;  %vm1407_vm3 = vmor %vm1405_vm0, %vm1406_vm15  ;;  %v1426_v25 = vand.u32 2147483648, %v1369_v3  ;;  %v1424_v28 = vand.u32 2147483647, %v1369_v3 }
 0x334   : > { %1436 = vrot.lane.b32.xlu1 %v1398_v13, %s6460_s29  ;;  %1458 = vrot.lane.b32.xlu0 %v1450_v5, %s6460_s29  ;;  %v1402_v14 = vsub.f32 1.0, %v1401_v8  ;;  %v1451_v20 = vsub.f32 1.0, %v1398_v13  ;;  %vm1420_vm6 = vweird.f32 %v1369_v3 }
 0x335   : > { %v1427_v33 = vor.u32 1.1754944e-38, %v1426_v25  ;;  %vm1425_vm8 = vcmp.eq.f32.partialorder %v1424_v28, 8.507059e+37 }
 0x336   : > { %v1403_v16 = vmul.f32 %v4640_v2, %v1402_v14 }
 0x338   : > { %v1404_v17 = vadd.f32 %v4640_v2, %v1403_v16 }
 0x339   : > { %v4642_v18 = vpop.eup %4641 }
 0x33a   : > { %v1408_v21 = vsel %vm1407_vm3, %v4640_v2, %v1404_v17  ;;  %v1416_v12 = vmul.f32 %v4642_v18, %v1369_v3  ;;  %vm1421_vm5 = vweird.f32 %v4642_v18 }
 0x33b   : > { %v1413_v22 = vsel %vm1410_vm4, %v1412_v19, %v1408_v21  ;;  %vm1422_vm7 = vmor %vm1420_vm6, %vm1421_vm5 }
 0x33c   : > { %1438 = vrot.lane.b32.xlu2 %v1413_v22, %s6460_s29  ;;  %1460 = vrot.lane.b32.xlu1 %v1451_v20, %s6460_s29  ;;  %v1417_v9 = vsub.f32 1.0, %v1416_v12  ;;  %v1452_v31 = vsub.f32 1.0, %v1413_v22  ;;  %v1656_v20 = vld [vmem:[%s6441_s12 + $0x8] sm:$0xff] }
 0x33d   : > { %1687 = vmatpush.msrb.mxu1 %v1656_v20 }
 0x33e   : > { %v1418_v26 = vmul.f32 %v4642_v18, %v1417_v9 }
 0x340   : > { %v1419_v29 = vadd.f32 %v4642_v18, %v1418_v26 }
 0x342   : > { %v1423_v34 = vsel %vm1422_vm7, %v4642_v18, %v1419_v29 }
 0x343   : > { %v1428_v35 = vsel %vm1425_vm8, %v1427_v33, %v1423_v34 }
 0x344   : > { %1462 = vrot.lane.b32.xlu2 %v1452_v31, %s6460_s29  ;;  %v1453_v36 = vsub.f32 1.0, %v1428_v35  ;;  %1440 = vrot.lane.b32.xlu0 %v1428_v35, %s6460_s29 }
 0x346   : > { %1464 = vrot.lane.b32.xlu1 %v1453_v36, %s6460_s29 }
 0x396   : > { %v1439_v45 = vpop.permute.xlu2 %1438 }
 0x39e   : > { %v1435_v39 = vpop.permute.xlu0 %1434  ;;  %v1463_v30 = vpop.permute.xlu2 %1462 }
 0x39f   : > { %v1446_v43 = vmul.f32 %v1435_v39, %v1350_v40  ;;  %v1472_v53 = vmul.f32 %v1463_v30, %v5363_v10  ;;  %v4622_v10 = vld [vmem:[%s6440_s11 + $0x1] ss:$0 sm:$0xff] }
 0x3a6   : > { %v1437_v41 = vpop.permute.xlu1 %1436  ;;  %v1459_v42 = vpop.permute.xlu0 %1458 }
 0x3a7   : > { %v1470_v44 = vmul.f32 %v1459_v42, %v5355_v23  ;;  %v1447_v50 = vmul.f32 %v1437_v41, %v1351_v48  ;;  %v1352_v23 = vmax.f32 %v5380_v38, 0.0 }
 0x3a9   : > { %v5402_v46 = vadd.f32 %v1470_v44, %v1446_v43  ;;  %v1448_v54 = vmul.f32 %v1439_v45, %v1352_v23 }
 0x3ab   : > { %4468 = vmatmul.msk.f32.vlgmr.msrb.gmra.mxu0 %vm662_vm2, %v5402_v46  ;;  %v5414_v55 = vadd.f32 %v1472_v53, %v1448_v54 }
 0x3ae   : > { %v1461_v49 = vpop.permute.xlu1 %1460 }
 0x3af   : > { %v1471_v51 = vmul.f32 %v1461_v49, %v5359_v24  ;;  %v1353_v24 = vmax.f32 %v5383_v47, 0.0 }
 0x3b1   : > { %v5408_v52 = vadd.f32 %v1471_v51, %v1447_v50 }
 0x3b3   : > { %4469 = vmatmul.msk.f32.gmra.mxu0 %vm662_vm2, %v5408_v52 }
 0x3b6   : > { %v1441_v32 = vpop.permute.xlu0 %1440 }
 0x3b7   : > { %v1449_v58 = vmul.f32 %v1441_v32, %v1353_v24 }
 0x3b8   : > { %v1465_v56 = vpop.permute.xlu1 %1464 }
 0x3b9   : > { %v1473_v57 = vmul.f32 %v1465_v56, %v5367_v27  ;;  %v5433_v27 = vld [vmem:[%s6445_s16 + $0x8] sm:$0xff] }
 0x3ba   : > { %1759 = vmatpush.msra.mxu3 %v5433_v27 }
 0x3bb   : > { %4470 = vmatmul.msk.f32.gmra.mxu0 %vm662_vm2, %v5414_v55  ;;  %v5420_v59 = vadd.f32 %v1473_v57, %v1449_v58 }
 0x3bc   : > { %1760 = vmatpush.msra.mxu3 %v5441_v63 }
 0x3bd   : > { %1761 = vmatmul.f32.vlgmr.msra.gmra.mxu3 %v4928_v6 }
 0x3be   : > { %1912 = vmatpush.msrb.mxu3 %v5433_v27 }
 0x3c0   : > { %1913 = vmatpush.msrb.mxu3 %v5441_v63 }
 0x3c2   : > { %2073 = vmatpush.msra.mxu3 %v5433_v27 }
 0x3c3   : > { %4471 = vmatmul.msk.f32.gmra.mxu0 %vm662_vm2, %v5420_v59 }
 0x3c4   : > { %2074 = vmatpush.msra.mxu3 %v5441_v63 }
 0x428   : > { %v1515_v38 = vpop.f32.mrf.mxu0 }
 0x429   : > { %v5427_v60 = vadd.f32 %v4622_v10, %v1515_v38 }
 0x42b   : > { %v4472_v61 = vmul.f32 -1.442695, %v5427_v60 }
 0x42d   : > { %4643 = vpow2.f32 %v4472_v61 }
 0x430   : > { %v1518_v47 = vpop.f32.mrf.mxu0 }
 0x431   : > { %v5436_v62 = vadd.f32 %v4622_v10, %v1518_v47 }
 0x433   : > { %v4644_v0 = vpop.eup %4643  ;;  %v4473_v1 = vmul.f32 -1.442695, %v5436_v62 }
 0x434   : > { %v1543_v2 = vadd.f32 1.0, %v4644_v0 }
 0x435   : > { %4645 = vpow2.f32 %v4473_v1 }
 0x436   : > { %4647 = vrcp.f32 %v1543_v2  ;;  %v1558_v11 = vand.u32 2147483648, %v1543_v2  ;;  %v1556_v19 = vand.u32 2147483647, %v1543_v2  ;;  %vm1552_vm10 = vweird.f32 %v1543_v2 }
 0x438   : > { %v1521_v3 = vpop.f32.mrf.mxu0  ;;  %v1559_v26 = vor.u32 1.1754944e-38, %v1558_v11  ;;  %vm1557_vm12 = vcmp.eq.f32.partialorder %v1556_v19, 8.507059e+37 }
 0x439   : > { %v5449_v4 = vadd.f32 %v4622_v10, %v1521_v3 }
 0x43b   : > { %v4646_v5 = vpop.eup %4645  ;;  %v4474_v7 = vmul.f32 -1.442695, %v5449_v4 }
 0x43c   : > { %v4648_v8 = vpop.eup %4647  ;;  %v1544_v13 = vadd.f32 1.0, %v4646_v5 }
 0x43d   : > { %4649 = vpow2.f32 %v4474_v7  ;;  %v1548_v14 = vmul.f32 %v4648_v8, %v1543_v2  ;;  %vm1553_vm9 = vweird.f32 %v4648_v8  ;;  %v1655_v7 = vld [vmem:[%s6441_s12] sm:$0xff] }
 0x43e   : > { %4651 = vrcp.f32 %v1544_v13  ;;  %vm1554_vm11 = vmor %vm1552_vm10, %vm1553_vm9  ;;  %v1573_v35 = vand.u32 2147483648, %v1544_v13  ;;  %v1571_v37 = vand.u32 2147483647, %v1544_v13  ;;  %vm1567_vm14 = vweird.f32 %v1544_v13  ;;  %1688 = vmatpush.msrb.mxu1 %v1655_v7 }
 0x43f   : > { %v1549_v15 = vsub.f32 1.0, %v1548_v14  ;;  %v5495_v14 = vld [vmem:[%s6446_s17] ss:$0 sm:$0xff] }
 0x440   : > { %v1524_v16 = vpop.f32.mrf.mxu0  ;;  %v1574_v43 = vor.u32 1.1754944e-38, %v1573_v35  ;;  %vm1572_vm0 = vcmp.eq.f32.partialorder %v1571_v37, 8.507059e+37  ;;  %2395 = vmatpush.msra.mxu1 %v5433_v27 }
 0x441   : > { %v5453_v17 = vadd.f32 %v4622_v10, %v1524_v16  ;;  %v1550_v18 = vmul.f32 %v4648_v8, %v1549_v15  ;;  %v1762_v15 = vpop.f32.mrf.mxu3 }
 0x442   : > { %2396 = vmatpush.msra.mxu1 %v5441_v63  ;;  %v1763_v11 = vadd.f32 %v5495_v14, %v1762_v15 }
 0x443   : > { %v4650_v21 = vpop.eup %4649  ;;  %v4475_v12 = vmul.f32 -1.442695, %v5453_v17  ;;  %v1551_v22 = vadd.f32 %v4648_v8, %v1550_v18  ;;  %v1530_v35 = vmax.f32 %v5453_v17, 0.0 }
 0x444   : > { %v4652_v9 = vpop.eup %4651  ;;  %v1545_v25 = vadd.f32 1.0, %v4650_v21 }
 0x445   : > { %4653 = vpow2.f32 %v4475_v12  ;;  %v1555_v28 = vsel %vm1554_vm11, %v4648_v8, %v1551_v22  ;;  %v1563_v29 = vmul.f32 %v4652_v9, %v1544_v13  ;;  %vm1568_vm13 = vweird.f32 %v4652_v9  ;;  %v5475_v8 = vld [vmem:[%s6443_s14 + $0x8] sm:$0xff]  ;;  %v5482_v13 = vld [vmem:[%s6443_s14] sm:$0xff] }
 0x446   : > { %4655 = vrcp.f32 %v1545_v25  ;;  %v1560_v33 = vsel %vm1557_vm12, %v1559_v26, %v1555_v28  ;;  %vm1569_vm15 = vmor %vm1567_vm14, %vm1568_vm13  ;;  %v1588_v51 = vand.u32 2147483648, %v1545_v25  ;;  %v1586_v23 = vand.u32 2147483647, %v1545_v25  ;;  %1736 = vmatpush.msra.mxu2 %v5475_v8  ;;  %2370 = vmatpush.msra.mxu0 %v5475_v8 }
 0x447   : > { %1611 = vrot.lane.b32.xlu2 %v1560_v33, %s6460_s29  ;;  %v1627_v31 = vsub.f32 1.0, %v1560_v33  ;;  %v1564_v34 = vsub.f32 1.0, %v1563_v29  ;;  %vm1582_vm4 = vweird.f32 %v1545_v25  ;;  %v1528_v12 = vmax.f32 %v5436_v62, 0.0 }
 0x448   : > { %v1589_v56 = vor.u32 1.1754944e-38, %v1588_v51  ;;  %vm1587_vm6 = vcmp.eq.f32.partialorder %v1586_v23, 8.507059e+37  ;;  %1737 = vmatpush.msra.mxu2 %v5482_v13  ;;  %2371 = vmatpush.msra.mxu0 %v5482_v13  ;;  %v1529_v28 = vmax.f32 %v5449_v4, 0.0  ;;  %v4624_v4 = vld [vmem:[%s6442_s13] ss:$0 sm:$0xff]  ;;  %vm1702_vm11 = vcmask 785408  }
 0x449   : > { %1635 = vrot.lane.b32.xlu0 %v1627_v31, %s6460_s29  ;;  %v1565_v36 = vmul.f32 %v4652_v9, %v1564_v34  ;;  %1738 = vmatmul.f32.vlgmr.msra.gmra.mxu2 %v4928_v6  ;;  %v1527_v6 = vmax.f32 %v5427_v60, 0.0 }
 0x44a   : > { %2692 = vmatpush.msrb.mxu0 %v5475_v8  ;;  %1890 = vmatpush.msrb.mxu2 %v5475_v8 }
 0x44b   : > { %v4654_v39 = vpop.eup %4653  ;;  %v1566_v40 = vadd.f32 %v4652_v9, %v1565_v36 }
 0x44c   : > { %v4656_v41 = vpop.eup %4655  ;;  %v1546_v42 = vadd.f32 1.0, %v4654_v39  ;;  %2693 = vmatpush.msrb.mxu0 %v5482_v13  ;;  %1891 = vmatpush.msrb.mxu2 %v5482_v13 }
 0x44d   : > { %v1570_v44 = vsel %vm1569_vm15, %v4652_v9, %v1566_v40  ;;  %v1578_v45 = vmul.f32 %v4656_v41, %v1545_v25  ;;  %vm1583_vm3 = vweird.f32 %v4656_v41 }
 0x44e   : > { %4657 = vrcp.f32 %v1546_v42  ;;  %v1575_v48 = vsel %vm1572_vm0, %v1574_v43, %v1570_v44  ;;  %vm1584_vm5 = vmor %vm1582_vm4, %vm1583_vm3  ;;  %v1603_v38 = vand.u32 2147483648, %v1546_v42  ;;  %v1601_v47 = vand.u32 2147483647, %v1546_v42  ;;  %2048 = vmatpush.msra.mxu2 %v5475_v8 }
 0x44f   : > { %1613 = vrot.lane.b32.xlu1 %v1575_v48, %s6460_s29  ;;  %v1628_v49 = vsub.f32 1.0, %v1575_v48  ;;  %v1579_v50 = vsub.f32 1.0, %v1578_v45  ;;  %vm1597_vm8 = vweird.f32 %v1546_v42 }
 0x450   : > { %v1604_v1 = vor.u32 1.1754944e-38, %v1603_v38  ;;  %vm1602_vm10 = vcmp.eq.f32.partialorder %v1601_v47, 8.507059e+37  ;;  %2049 = vmatpush.msra.mxu2 %v5482_v13 }
 0x451   : > { %1637 = vrot.lane.b32.xlu2 %v1628_v49, %s6460_s29  ;;  %v1580_v30 = vmul.f32 %v4656_v41, %v1579_v50 }
 0x453   : > { %v1581_v53 = vadd.f32 %v4656_v41, %v1580_v30 }
 0x454   : > { %v4658_v54 = vpop.eup %4657 }
 0x455   : > { %v1585_v32 = vsel %vm1584_vm5, %v4656_v41, %v1581_v53  ;;  %v1593_v24 = vmul.f32 %v4658_v54, %v1546_v42  ;;  %vm1598_vm7 = vweird.f32 %v4658_v54 }
 0x456   : > { %v1590_v57 = vsel %vm1587_vm6, %v1589_v56, %v1585_v32  ;;  %vm1599_vm9 = vmor %vm1597_vm8, %vm1598_vm7 }
 0x457   : > { %v1629_v58 = vsub.f32 1.0, %v1590_v57  ;;  %1615 = vrot.lane.b32.xlu0 %v1590_v57, %s6460_s29  ;;  %v1594_v10 = vsub.f32 1.0, %v1593_v24 }
 0x459   : > { %1639 = vrot.lane.b32.xlu1 %v1629_v58, %s6460_s29  ;;  %v1595_v61 = vmul.f32 %v4658_v54, %v1594_v10 }
 0x45b   : > { %v1596_v0 = vadd.f32 %v4658_v54, %v1595_v61 }
 0x45d   : > { %v1600_v2 = vsel %vm1599_vm9, %v4658_v54, %v1596_v0  ;;  %v5527_v0 = vld [vmem:[%s5524_s25] sm:$0x3] }
 0x45e   : > { %v1605_v3 = vsel %vm1602_vm10, %v1604_v1, %v1600_v2  ;;  %v4933_v1 = vmov 0   ;;  %vm1847_vm0 = vcmp.gt.s32.totalorder %v5527_v0, 15  ;;  %vm2000_vm4 = vcmp.gt.s32.totalorder %v5527_v0, 14 }
 0x45f   : > { %v1630_v5 = vsub.f32 1.0, %v1605_v3  ;;  %1617 = vrot.lane.b32.xlu2 %v1605_v3, %s6460_s29  ;;  %4615 = vset.pattern.permute.xlu1 %v4933_v1  ;;  %v1859_v2 = vsel %vm1847_vm0, 1, %v4933_v1  ;;  %vm2161_vm0 = vcmp.gt.s32.totalorder %v5527_v0, 13 }
 0x460   : > { %4614 = vset.pattern.permute.xlu2 %v4933_v1  ;;  %4616 = vset.pattern.permute.xlu0 %v4933_v1 }
 0x461   : > { %1641 = vrot.lane.b32.xlu0 %v1630_v5, %s6460_s29  ;;  %1805 = vrot.lane.b32.xlu1 %v1763_v11, %s4930_s27 }
 0x467   : > { %1828 = vrot.lane.b32.xlu2 %v1763_v11, %s4931_s30 }
 0x46f   : > { %1861 = vperm.xlu2 %4614, %v1859_v2  }
 0x4a1   : > { %v1612_v16 = vpop.permute.xlu2 %1611 }
 0x4a2   : > { %v1623_v19 = vmul.f32 %v1612_v16, %v1527_v6 }
 0x4ab   : > { %v1638_v22 = vpop.permute.xlu2 %1637 }
 0x4b9   : > { %v1618_v34 = vpop.permute.xlu2 %1617 }
 0x4ba   : > { %v1626_v37 = vmul.f32 %v1618_v34, %v1530_v35 }
 0x4bb   : > { %v1636_v18 = vpop.permute.xlu0 %1635 }
 0x4bc   : > { %v1647_v20 = vmul.f32 %v1636_v18, %v5402_v46  ;;  %v1648_v46 = vmul.f32 %v1638_v22, %v5408_v52 }
 0x4be   : > { %v1651_v21 = vadd.f32 %v1647_v20, %v1623_v19 }
 0x4c0   : > { %4476 = vmatmul.msk.f32.vlgmr.msrb.gmra.mxu1 %vm662_vm2, %v1651_v21 }
 0x4c1   : > { %v1614_v9 = vpop.permute.xlu1 %1613  ;;  %2717 = vmatpush.msrb.mxu1 %v5433_v27  ;;  %v1829_v38 = vpop.permute.xlu2 %1828 }
 0x4c2   : > { %v1624_v60 = vmul.f32 %v1614_v9, %v1528_v12  ;;  %v2012_v9 = vsel %vm2000_vm4, 1, %v4933_v1 }
 0x4c3   : > { %2718 = vmatpush.msrb.mxu1 %v5441_v63 }
 0x4c4   : > { %v1652_v25 = vadd.f32 %v1648_v46, %v1624_v60 }
 0x4c8   : > { %4477 = vmatmul.msk.f32.gmra.mxu1 %vm662_vm2, %v1652_v25 }
 0x4c9   : > { %v1616_v26 = vpop.permute.xlu0 %1615  ;;  %v5535_v16 = vpop.permute.xlu2 %1861 }
 0x4ca   : > { %v1625_v33 = vmul.f32 %v1616_v26, %v1529_v28  ;;  %vm6464_vm3 = vcmp.eq.s32.totalorder %v5535_v16, 1 }
 0x4cb   : > { %v1640_v29 = vpop.permute.xlu1 %1639 }
 0x4cc   : > { %v1649_v62 = vmul.f32 %v1640_v29, %v5414_v55 }
 0x4ce   : > { %v1653_v31 = vadd.f32 %v1649_v62, %v1625_v33 }
 0x4d0   : > { %4478 = vmatmul.msk.f32.gmra.mxu1 %vm662_vm2, %v1653_v31 }
 0x4d3   : > { %v1642_v36 = vpop.permute.xlu0 %1641 }
 0x4d4   : > { %v1650_v52 = vmul.f32 %v1642_v36, %v5420_v59  ;;  %v1806_v59 = vpop.permute.xlu1 %1805 }
 0x4d6   : > { %v1654_v39 = vadd.f32 %v1650_v52, %v1626_v37 }
 0x4d8   : > { %4479 = vmatmul.msk.f32.gmra.mxu1 %vm662_vm2, %v1654_v39 }
 0x53d   : > { %v1690_v40 = vpop.f32.mrf.mxu1 }
 0x53e   : > { %v1691_v55 = vadd.f32 %v4624_v4, %v1690_v40 }
 0x540   : > { %1703 = vst.msk [vmem:[#allocation5] sm:$0xff] %vm1702_vm11, %v1691_v55 }
 0x545   : > { %v1693_v41 = vpop.f32.mrf.mxu1 }
 0x546   : > { %v1694_v42 = vadd.f32 %v4624_v4, %v1693_v41 }
 0x548   : > { %1704 = vst.msk [vmem:[#allocation5 + $0x8] sm:$0xff] %vm1702_vm11, %v1694_v42 }
 0x54d   : > { %v1696_v43 = vpop.f32.mrf.mxu1 }
 0x54e   : > { %v1697_v17 = vadd.f32 %v4624_v4, %v1696_v43 }
 0x550   : > { %1705 = vst.msk [vmem:[#allocation5 + $0x10] sm:$0xff] %vm1702_vm11, %v1697_v17  ;;  %v5558_v17 = vld [vmem:[%s6444_s15] ss:$0 sm:$0xff] }
 0x555   : > { %v1699_v44 = vpop.f32.mrf.mxu1 }
 0x556   : > { %v1700_v45 = vadd.f32 %v4624_v4, %v1699_v44  ;;  %v1739_v44 = vpop.f32.mrf.mxu2 }
 0x558   : > { %1706 = vst.msk [vmem:[#allocation5 + $0x18] sm:$0xff] %vm1702_vm11, %v1700_v45  ;;  %v1740_v45 = vadd.f32 %v5558_v17, %v1739_v44 }
 0x55f   : > { %v1715_v48 = vld [vmem:[#allocation5 + $0xf] ss:$16 sm:$0x3]  ;;  %v1873_v60 = vld [vmem:[#allocation5 + $0xe] ss:$16 sm:$0x3] }
 0x560   : > { %v1808_v49 = vadd.f32 %v1806_v59, %v1715_v48  ;;  %v1713_v59 = vld [vmem:[#allocation5] ss:$16 sm:$0x3] }
 0x562   : > { %v4481_v50 = vmul.f32 -1.442695, %v1808_v49 }
 0x564   : > { %4659 = vpow2.f32 %v4481_v50 }
 0x56a   : > { %v4660_v51 = vpop.eup %4659 }
 0x56b   : > { %v1812_v30 = vadd.f32 1.0, %v4660_v51 }
 0x56d   : > { %4661 = vrcp.f32 %v1812_v30  ;;  %v1824_v56 = vand.u32 2147483648, %v1812_v30  ;;  %v1822_v24 = vand.u32 2147483647, %v1812_v30  ;;  %vm1818_vm13 = vweird.f32 %v1812_v30 }
 0x56f   : > { %v1825_v58 = vor.u32 1.1754944e-38, %v1824_v56  ;;  %vm1823_vm15 = vcmp.eq.f32.partialorder %v1822_v24, 8.507059e+37 }
 0x573   : > { %v4662_v23 = vpop.eup %4661 }
 0x574   : > { %v1814_v53 = vmul.f32 %v4662_v23, %v1812_v30  ;;  %vm1819_vm12 = vweird.f32 %v4662_v23 }
 0x575   : > { %vm1820_vm14 = vmor %vm1818_vm13, %vm1819_vm12 }
 0x576   : > { %v1815_v54 = vsub.f32 1.0, %v1814_v53 }
 0x578   : > { %v1816_v32 = vmul.f32 %v4662_v23, %v1815_v54 }
 0x57a   : > { %v1817_v57 = vadd.f32 %v4662_v23, %v1816_v32 }
 0x57c   : > { %v1821_v10 = vsel %vm1820_vm14, %v4662_v23, %v1817_v57  ;;  %vm1846_vm14 = vcmp.gt.s32.totalorder %v5527_v0, 0 }
 0x57d   : > { %v1826_v61 = vsel %vm1823_vm15, %v1825_v58, %v1821_v10 }
 0x57e   : > { %v1831_v47 = vmul.f32 %v1829_v38, %v1826_v61  ;;  %v1838_v15 = vsub.f32 1.0, %v1826_v61  ;;  %v1844_v18 = vmul.f32 0.0, %v1826_v61 }
 0x580   : > { %1833 = vrot.lane.b32.xlu0 %v1831_v47, %s6462_s23 }
 0x5f2   : > { %v1834_v3 = vpop.permute.xlu0 %1833 }
 0x5f3   : > { %v1836_v5 = vadd.f32 %v1834_v3, %v1715_v48  ;;  %v1765_v48 = vadd.f32 %v1740_v45, %v1713_v59 }
 0x5f5   : > { %4663 = vtanh.f32 %v1836_v5  ;;  %v4480_v49 = vmul.f32 -1.442695, %v1765_v48 }
 0x5fb   : > { %v4664_v7 = vpop.eup %4663 }
 0x5fc   : > { %1840 = vrot.lane.b32.xlu1 %v4664_v7, %s6460_s29 }
 0x66e   : > { %v1841_v6 = vpop.permute.xlu1 %1840 }
 0x66f   : > { %v1843_v11 = vmul.f32 %v1841_v6, %v1838_v15 }
 0x671   : > { %v1845_v19 = vadd.f32 %v1844_v18, %v1843_v11  ;;  %v1848_v11 = vsel %vm1846_vm14, 1, %v4933_v1  ;;  %vm1999_vm14 = vcmp.gt.s32.totalorder %v5527_v0, 1 }
 0x673   : > { %v5540_v20 = vsel %vm6464_vm3, %v1845_v19, 0.0 }
 0x674   : > { %1866 = vrot.lane.b32.xlu0 %v5540_v20, %s6458_s28 }
 0x6e6   : > { %v1867_v21 = vpop.permute.xlu0 %1866 }
 0x6e7   : > { %1869 = vst.msk [vmem:[#allocation7 + $0x1e] sm:$0x3] %vm6466_vm1, %v1867_v21  ;;  %4483 = vmatmul.msk.f32.vlgmr.msrb.gmra.mxu3 %vm662_vm2, %v1867_v21 }
 0x6e8   : > { %2234 = vmatpush.msrb.mxu3 %v5433_v27 }
 0x6ea   : > { %2235 = vmatpush.msrb.mxu3 %v5441_v63 }
 0x76a   : > { %v1915_v12 = vpop.f32.mrf.mxu3 }
 0x76b   : > { %v1916_v22 = vadd.f32 %v5495_v14, %v1915_v12 }
 0x76d   : > { %1981 = vrot.lane.b32.xlu2 %v1916_v22, %s4931_s30  ;;  %1958 = vrot.lane.b32.xlu1 %v1916_v22, %s4930_s27 }
 0x775   : > { %2014 = vperm.xlu2 %4614, %v2012_v9  }
 0x7c7   : > { %v1982_v4 = vpop.permute.xlu2 %1981 }
 0x7cf   : > { %v5562_v24 = vpop.permute.xlu2 %2014 }
 0x7d0   : > { %vm6467_vm11 = vcmp.eq.s32.totalorder %v5562_v24, 1 }
 0x7df   : > { %v1959_v46 = vpop.permute.xlu1 %1958 }
 0x7e0   : > { %v1961_v25 = vadd.f32 %v1959_v46, %v1873_v60 }
 0x7e2   : > { %v4485_v26 = vmul.f32 -1.442695, %v1961_v25 }
 0x7e4   : > { %4665 = vpow2.f32 %v4485_v26 }
 0x7ea   : > { %v4666_v28 = vpop.eup %4665 }
 0x7eb   : > { %v1965_v29 = vadd.f32 1.0, %v4666_v28 }
 0x7ed   : > { %4667 = vrcp.f32 %v1965_v29  ;;  %v1977_v34 = vand.u32 2147483648, %v1965_v29  ;;  %v1975_v36 = vand.u32 2147483647, %v1965_v29  ;;  %vm1971_vm6 = vweird.f32 %v1965_v29 }
 0x7ef   : > { %v1978_v52 = vor.u32 1.1754944e-38, %v1977_v34  ;;  %vm1976_vm8 = vcmp.eq.f32.partialorder %v1975_v36, 8.507059e+37 }
 0x7f3   : > { %v4668_v33 = vpop.eup %4667 }
 0x7f4   : > { %v1967_v62 = vmul.f32 %v4668_v33, %v1965_v29  ;;  %vm1972_vm5 = vweird.f32 %v4668_v33 }
 0x7f5   : > { %vm1973_vm7 = vmor %vm1971_vm6, %vm1972_vm5 }
 0x7f6   : > { %v1968_v31 = vsub.f32 1.0, %v1967_v62 }
 0x7f8   : > { %v1969_v35 = vmul.f32 %v4668_v33, %v1968_v31  ;;  %v2028_v31 = vld [vmem:[#allocation5 + $0xd] ss:$16 sm:$0x3] }
 0x7fa   : > { %v1970_v37 = vadd.f32 %v4668_v33, %v1969_v35 }
 0x7fc   : > { %v1974_v39 = vsel %vm1973_vm7, %v4668_v33, %v1970_v37  ;;  %v2173_v33 = vsel %vm2161_vm0, 1, %v4933_v1 }
 0x7fd   : > { %v1979_v40 = vsel %vm1976_vm8, %v1978_v52, %v1974_v39 }
 0x7fe   : > { %v1984_v55 = vmul.f32 %v1982_v4, %v1979_v40  ;;  %v1991_v56 = vsub.f32 1.0, %v1979_v40  ;;  %v1997_v57 = vmul.f32 %v1979_v40, %v5540_v20 }
 0x800   : > { %1986 = vrot.lane.b32.xlu0 %v1984_v55, %s6462_s23 }
 0x872   : > { %v1987_v41 = vpop.permute.xlu0 %1986 }
 0x873   : > { %v1989_v42 = vadd.f32 %v1987_v41, %v1873_v60 }
 0x875   : > { %4669 = vtanh.f32 %v1989_v42 }
 0x876   : > { %4671 = vpow2.f32 %v4480_v49 }
 0x87b   : > { %v4670_v43 = vpop.eup %4669 }
 0x87c   : > { %1993 = vrot.lane.b32.xlu1 %v4670_v43, %s6460_s29  ;;  %v4672_v50 = vpop.eup %4671 }
 0x87d   : > { %v1769_v51 = vadd.f32 1.0, %v4672_v50 }
 0x87f   : > { %4673 = vrcp.f32 %v1769_v51  ;;  %v1781_v38 = vand.u32 2147483648, %v1769_v51  ;;  %vm1775_vm10 = vweird.f32 %v1769_v51  ;;  %v1779_v47 = vand.u32 2147483647, %v1769_v51 }
 0x881   : > { %v1782_v5 = vor.u32 1.1754944e-38, %v1781_v38  ;;  %vm1780_vm13 = vcmp.eq.f32.partialorder %v1779_v47, 8.507059e+37 }
 0x884   : > { %1786 = vrot.lane.b32.xlu1 %v1740_v45, %s4935_s1 }
 0x885   : > { %v4674_v30 = vpop.eup %4673 }
 0x886   : > { %v1771_v23 = vmul.f32 %v4674_v30, %v1769_v51  ;;  %vm1776_vm9 = vweird.f32 %v4674_v30 }
 0x887   : > { %vm1777_vm12 = vmor %vm1775_vm10, %vm1776_vm9 }
 0x888   : > { %v1772_v53 = vsub.f32 1.0, %v1771_v23 }
 0x88a   : > { %v1773_v54 = vmul.f32 %v4674_v30, %v1772_v53  ;;  %v1871_v53 = vld [vmem:[#allocation5 + $0x1] ss:$16 sm:$0x3] }
 0x88c   : > { %v1774_v10 = vadd.f32 %v4674_v30, %v1773_v54  ;;  %1850 = vperm.xlu1 %4615, %v1848_v11  }
 0x88e   : > { %v1778_v3 = vsel %vm1777_vm12, %v4674_v30, %v1774_v10 }
 0x88f   : > { %v1783_v15 = vsel %vm1780_vm13, %v1782_v5, %v1778_v3 }
 0x890   : > { %v1796_v12 = vsub.f32 1.0, %v1783_v15  ;;  %v1802_v46 = vmul.f32 0.0, %v1783_v15 }
 0x8ee   : > { %v1994_v32 = vpop.permute.xlu1 %1993 }
 0x8ef   : > { %v1996_v58 = vmul.f32 %v1994_v32, %v1991_v56 }
 0x8f1   : > { %v5565_v61 = vadd.f32 %v1997_v57, %v1996_v58 }
 0x8f3   : > { %v5572_v2 = vsel %vm6467_vm11, %v5565_v61, %v5540_v20 }
 0x8f4   : > { %2055 = vrot.lane.b32.xlu0 %v5572_v2, %s6458_s28 }
 0x8f6   : > { %v1787_v7 = vpop.permute.xlu1 %1786 }
 0x8f7   : > { %v1789_v6 = vmul.f32 %v1787_v7, %v1783_v15 }
 0x8f9   : > { %1791 = vrot.lane.b32.xlu2 %v1789_v6, %s6462_s23 }
 0x8fe   : > { %v5583_v22 = vpop.permute.xlu1 %1850 }
 0x8ff   : > { %vm6465_vm15 = vcmp.eq.s32.totalorder %v5583_v22, 1 }
 0x953   : > { %v1792_v18 = vpop.permute.xlu2 %1791 }
 0x954   : > { %v1794_v19 = vadd.f32 %v1792_v18, %v1713_v59 }
 0x956   : > { %4675 = vtanh.f32 %v1794_v19 }
 0x95c   : > { %v4676_v20 = vpop.eup %4675 }
 0x95d   : > { %1798 = vrot.lane.b32.xlu0 %v4676_v20, %s6460_s29 }
 0x966   : > { %v2056_v21 = vpop.permute.xlu0 %2055 }
 0x967   : > { %4487 = vmatmul.msk.f32.vlgmr.msra.gmra.mxu3 %vm662_vm2, %v2056_v21 }
 0x968   : > { %2556 = vmatpush.msra.mxu3 %v5433_v27 }
 0x96a   : > { %2557 = vmatpush.msra.mxu3 %v5441_v63 }
 0x9cf   : > { %v1799_v9 = vpop.permute.xlu0 %1798 }
 0x9d0   : > { %v1801_v60 = vmul.f32 %v1799_v9, %v1796_v12 }
 0x9d2   : > { %v1803_v25 = vadd.f32 %v1802_v46, %v1801_v60 }
 0x9d4   : > { %v5588_v26 = vsel %vm6465_vm15, %v1803_v25, 0.0 }
 0x9d5   : > { %1855 = vrot.lane.b32.xlu2 %v5588_v26, %s6460_s29 }
 0x9ea   : > { %v2076_v28 = vpop.f32.mrf.mxu3 }
 0x9eb   : > { %v2077_v29 = vadd.f32 %v5495_v14, %v2076_v28 }
 0x9ed   : > { %2142 = vrot.lane.b32.xlu1 %v2077_v29, %s4931_s30  ;;  %2119 = vrot.lane.b32.xlu0 %v2077_v29, %s4930_s27  ;;  %v2001_v29 = vsel %vm1999_vm14, 1, %v4933_v1 }
 0x9f5   : > { %2175 = vperm.xlu1 %4615, %v2173_v33  }
 0xa2f   : > { %v1856_v62 = vpop.permute.xlu2 %1855 }
 0xa30   : > { %1858 = vst.msk [vmem:[#allocation6] sm:$0x3] %vm6466_vm1, %v1856_v62  ;;  %4482 = vmatmul.msk.f32.vlgmr.msrb.gmra.mxu2 %vm662_vm2, %v1856_v62 }
 0xa31   : > { %2209 = vmatpush.msrb.mxu2 %v5475_v8 }
 0xa33   : > { %2210 = vmatpush.msrb.mxu2 %v5482_v13 }
 0xa5f   : > { %v2120_v34 = vpop.permute.xlu0 %2119  ;;  %v2143_v59 = vpop.permute.xlu1 %2142 }
 0xa60   : > { %v2122_v35 = vadd.f32 %v2120_v34, %v2028_v31 }
 0xa62   : > { %v4489_v36 = vmul.f32 -1.442695, %v2122_v35 }
 0xa64   : > { %4677 = vpow2.f32 %v4489_v36 }
 0xa67   : > { %v5606_v9 = vpop.permute.xlu1 %2175 }
 0xa68   : > { %vm6469_vm13 = vcmp.eq.s32.totalorder %v5606_v9, 1 }
 0xa6a   : > { %v4678_v37 = vpop.eup %4677 }
 0xa6b   : > { %v2126_v52 = vadd.f32 1.0, %v4678_v37 }
 0xa6d   : > { %4679 = vrcp.f32 %v2126_v52  ;;  %v2138_v55 = vand.u32 2147483648, %v2126_v52  ;;  %v2136_v42 = vand.u32 2147483647, %v2126_v52  ;;  %vm2132_vm5 = vweird.f32 %v2126_v52 }
 0xa6f   : > { %v2139_v44 = vor.u32 1.1754944e-38, %v2138_v55  ;;  %vm2137_vm7 = vcmp.eq.f32.partialorder %v2136_v42, 8.507059e+37  ;;  %v2189_v42 = vld [vmem:[#allocation5 + $0xc] ss:$16 sm:$0x3] }
 0xa73   : > { %v4680_v39 = vpop.eup %4679 }
 0xa74   : > { %v2128_v4 = vmul.f32 %v4680_v39, %v2126_v52  ;;  %vm2133_vm4 = vweird.f32 %v4680_v39 }
 0xa75   : > { %vm2134_vm6 = vmor %vm2132_vm5, %vm2133_vm4 }
 0xa76   : > { %v2129_v40 = vsub.f32 1.0, %v2128_v4 }
 0xa78   : > { %v2130_v41 = vmul.f32 %v4680_v39, %v2129_v40 }
 0xa7a   : > { %v2131_v43 = vadd.f32 %v4680_v39, %v2130_v41 }
 0xa7c   : > { %v2135_v45 = vsel %vm2134_vm6, %v4680_v39, %v2131_v43 }
 0xa7d   : > { %v2140_v48 = vsel %vm2137_vm7, %v2139_v44, %v2135_v45 }
 0xa7e   : > { %v2145_v49 = vmul.f32 %v2143_v59, %v2140_v48  ;;  %v2152_v21 = vsub.f32 1.0, %v2140_v48  ;;  %v2158_v60 = vmul.f32 %v2140_v48, %v5572_v2 }
 0xa80   : > { %2147 = vrot.lane.b32.xlu2 %v2145_v49, %s6462_s23 }
 0xab3   : > { %v1893_v50 = vpop.f32.mrf.mxu2 }
 0xab4   : > { %v1894_v51 = vadd.f32 %v5558_v17, %v1893_v50 }
 0xab6   : > { %1939 = vrot.lane.b32.xlu2 %v1894_v51, %s4935_s1  ;;  %v1918_v54 = vadd.f32 %v1894_v51, %v1871_v53 }
 0xab8   : > { %v4484_v32 = vmul.f32 -1.442695, %v1918_v54 }
 0xada   : > { %v2148_v30 = vpop.permute.xlu2 %2147 }
 0xadb   : > { %v2150_v23 = vadd.f32 %v2148_v30, %v2028_v31 }
 0xadd   : > { %4681 = vtanh.f32 %v2150_v23 }
 0xade   : > { %4683 = vpow2.f32 %v4484_v32 }
 0xae3   : > { %v4682_v56 = vpop.eup %4681 }
 0xae4   : > { %2154 = vrot.lane.b32.xlu0 %v4682_v56, %s6460_s29  ;;  %v4684_v57 = vpop.eup %4683 }
 0xae5   : > { %v1922_v58 = vadd.f32 1.0, %v4684_v57 }
 0xae7   : > { %4685 = vrcp.f32 %v1922_v58  ;;  %v1934_v7 = vand.u32 2147483648, %v1922_v58  ;;  %vm1928_vm9 = vweird.f32 %v1922_v58  ;;  %v1932_v15 = vand.u32 2147483647, %v1922_v58 }
 0xae9   : > { %v1935_v11 = vor.u32 1.1754944e-38, %v1934_v7  ;;  %vm1933_vm12 = vcmp.eq.f32.partialorder %v1932_v15, 8.507059e+37 }
 0xaed   : > { %v4686_v10 = vpop.eup %4685 }
 0xaee   : > { %v1924_v38 = vmul.f32 %v4686_v10, %v1922_v58  ;;  %vm1929_vm8 = vweird.f32 %v4686_v10 }
 0xaef   : > { %vm1930_vm10 = vmor %vm1928_vm9, %vm1929_vm8  ;;  %vm2322_vm8 = vcmp.gt.s32.totalorder %v5527_v0, 12 }
 0xaf0   : > { %v1925_v47 = vsub.f32 1.0, %v1924_v38 }
 0xaf2   : > { %v1926_v3 = vmul.f32 %v4686_v10, %v1925_v47 }
 0xaf4   : > { %v1927_v5 = vadd.f32 %v4686_v10, %v1926_v3  ;;  %v2026_v3 = vld [vmem:[#allocation5 + $0x2] ss:$16 sm:$0x3] }
 0xaf6   : > { %v1931_v6 = vsel %vm1930_vm10, %v4686_v10, %v1927_v5  ;;  %v2334_v10 = vsel %vm2322_vm8, 1, %v4933_v1 }
 0xaf7   : > { %v1936_v18 = vsel %vm1933_vm12, %v1935_v11, %v1931_v6 }
 0xaf8   : > { %v1955_v37 = vmul.f32 %v1936_v18, %v5588_v26 }
 0xb10   : > { %v1940_v19 = vpop.permute.xlu2 %1939 }
 0xb11   : > { %v1942_v20 = vmul.f32 %v1940_v19, %v1936_v18 }
 0xb13   : > { %1944 = vrot.lane.b32.xlu1 %v1942_v20, %s6462_s23 }
 0xb56   : > { %v2155_v12 = vpop.permute.xlu0 %2154 }
 0xb57   : > { %v2157_v46 = vmul.f32 %v2155_v12, %v2152_v21 }
 0xb59   : > { %v5609_v25 = vadd.f32 %v2158_v60, %v2157_v46 }
 0xb5b   : > { %v5616_v28 = vsel %vm6469_vm13, %v5609_v25, %v5572_v2  ;;  %v1949_v2 = vsub.f32 1.0, %v1936_v18 }
 0xb5c   : > { %2216 = vrot.lane.b32.xlu0 %v5616_v28, %s6458_s28 }
 0xb64   : > { %2003 = vperm.xlu0 %4616, %v2001_v29  }
 0xb85   : > { %v1945_v33 = vpop.permute.xlu1 %1944 }
 0xb86   : > { %v1947_v62 = vadd.f32 %v1945_v33, %v1871_v53 }
 0xb88   : > { %4687 = vtanh.f32 %v1947_v62 }
 0xb8e   : > { %v4688_v31 = vpop.eup %4687 }
 0xb8f   : > { %1951 = vrot.lane.b32.xlu2 %v4688_v31, %s6460_s29 }
 0xbce   : > { %v2217_v34 = vpop.permute.xlu0 %2216 }
 0xbcf   : > { %4491 = vmatmul.msk.f32.vlgmr.msrb.gmra.mxu3 %vm662_vm2, %v2217_v34 }
 0xbd0   : > { %2878 = vmatpush.msrb.mxu3 %v5433_v27 }
 0xbd2   : > { %2879 = vmatpush.msrb.mxu3 %v5441_v63 }
 0xbd6   : > { %v5626_v35 = vpop.permute.xlu0 %2003 }
 0xbd7   : > { %vm6468_vm0 = vcmp.eq.s32.totalorder %v5626_v35, 1 }
 0xbe9   : > { %v1952_v36 = vpop.permute.xlu2 %1951 }
 0xbea   : > { %v1954_v52 = vmul.f32 %v1952_v36, %v1949_v2 }
 0xbec   : > { %v5630_v39 = vadd.f32 %v1955_v37, %v1954_v52 }
 0xbee   : > { %v5636_v4 = vsel %vm6468_vm0, %v5630_v39, %v5588_v26 }
 0xbef   : > { %2030 = vrot.lane.b32.xlu1 %v5636_v4, %s6460_s29 }
 0xc52   : > { %v2237_v40 = vpop.f32.mrf.mxu3 }
 0xc53   : > { %v2238_v55 = vadd.f32 %v5495_v14, %v2237_v40 }
 0xc55   : > { %2280 = vrot.lane.b32.xlu2 %v2238_v55, %s4930_s27  ;;  %2303 = vrot.lane.b32.xlu1 %v2238_v55, %s4931_s30 }
 0xc61   : > { %v2031_v41 = vpop.permute.xlu1 %2030 }
 0xc62   : > { %4486 = vmatmul.msk.f32.vlgmr.msra.gmra.mxu2 %vm662_vm2, %v2031_v41 }
 0xc63   : > { %2531 = vmatpush.msra.mxu2 %v5475_v8 }
 0xc65   : > { %2532 = vmatpush.msra.mxu2 %v5482_v13 }
 0xcaf   : > { %v2281_v26 = vpop.permute.xlu2 %2280 }
 0xcb0   : > { %v2283_v43 = vadd.f32 %v2281_v26, %v2189_v42 }
 0xcb2   : > { %v4493_v44 = vmul.f32 -1.442695, %v2283_v43 }
 0xcb4   : > { %4689 = vpow2.f32 %v4493_v44 }
 0xcba   : > { %v4690_v45 = vpop.eup %4689 }
 0xcbb   : > { %v2287_v59 = vadd.f32 1.0, %v4690_v45 }
 0xcbd   : > { %4691 = vrcp.f32 %v2287_v59  ;;  %v2299_v51 = vand.u32 2147483648, %v2287_v59  ;;  %v2297_v23 = vand.u32 2147483647, %v2287_v59  ;;  %vm2293_vm5 = vweird.f32 %v2287_v59 }
 0xcbf   : > { %v2300_v54 = vor.u32 1.1754944e-38, %v2299_v51  ;;  %vm2298_vm7 = vcmp.eq.f32.partialorder %v2297_v23, 8.507059e+37 }
 0xcc3   : > { %v4692_v48 = vpop.eup %4691 }
 0xcc4   : > { %v2289_v49 = vmul.f32 %v4692_v48, %v2287_v59  ;;  %vm2294_vm4 = vweird.f32 %v4692_v48 }
 0xcc5   : > { %vm2295_vm6 = vmor %vm2293_vm5, %vm2294_vm4  ;;  %vm2160_vm4 = vcmp.gt.s32.totalorder %v5527_v0, 2 }
 0xcc6   : > { %v2290_v50 = vsub.f32 1.0, %v2289_v49  ;;  %v2162_v37 = vsel %vm2160_vm4, 1, %v4933_v1 }
 0xcc7   : > { %v2304_v32 = vpop.permute.xlu1 %2303 }
 0xcc8   : > { %v2291_v30 = vmul.f32 %v4692_v48, %v2290_v50 }
 0xcca   : > { %v2292_v53 = vadd.f32 %v4692_v48, %v2291_v30 }
 0xccc   : > { %v2296_v56 = vsel %vm2295_vm6, %v4692_v48, %v2292_v53 }
 0xccd   : > { %v2301_v57 = vsel %vm2298_vm7, %v2300_v54, %v2296_v56  ;;  %v2350_v56 = vld [vmem:[#allocation5 + $0xb] ss:$16 sm:$0x3] }
 0xcce   : > { %v2306_v58 = vmul.f32 %v2304_v32, %v2301_v57  ;;  %v2313_v52 = vsub.f32 1.0, %v2301_v57  ;;  %v2319_v41 = vmul.f32 %v2301_v57, %v5616_v28 }
 0xcd0   : > { %2308 = vrot.lane.b32.xlu2 %v2306_v58, %s6462_s23 }
 0xcd8   : > { %2336 = vperm.xlu2 %4614, %v2334_v10  }
 0xce5   : > { %v2051_v38 = vpop.f32.mrf.mxu2 }
 0xce6   : > { %v2052_v47 = vadd.f32 %v5558_v17, %v2051_v38 }
 0xce8   : > { %2100 = vrot.lane.b32.xlu0 %v2052_v47, %s4935_s1  ;;  %v2079_v5 = vadd.f32 %v2052_v47, %v2026_v3 }
 0xcea   : > { %v4488_v6 = vmul.f32 -1.442695, %v2079_v5 }
 0xd2a   : > { %v2309_v7 = vpop.permute.xlu2 %2308 }
 0xd2b   : > { %v2311_v15 = vadd.f32 %v2309_v7, %v2189_v42 }
 0xd2d   : > { %4693 = vtanh.f32 %v2311_v15 }
 0xd2e   : > { %4695 = vpow2.f32 %v4488_v6 }
 0xd32   : > { %v5655_v55 = vpop.permute.xlu2 %2336 }
 0xd33   : > { %v4694_v11 = vpop.eup %4693  ;;  %vm2338_vm5 = vcmp.eq.s32.totalorder %v5655_v55, 1  ;;  %v4176_v55 = vld [vmem:[%s6447_s18 + $0x18] sm:$0xff] }
 0xd34   : > { %2315 = vrot.lane.b32.xlu1 %v4694_v11, %s6460_s29  ;;  %v4696_v18 = vpop.eup %4695 }
 0xd35   : > { %v2083_v19 = vadd.f32 1.0, %v4696_v18 }
 0xd37   : > { %4697 = vrcp.f32 %v2083_v19  ;;  %v2095_v29 = vand.u32 2147483648, %v2083_v19  ;;  %vm2089_vm10 = vweird.f32 %v2083_v19  ;;  %v2093_v33 = vand.u32 2147483647, %v2083_v19 }
 0xd39   : > { %v2096_v31 = vor.u32 1.1754944e-38, %v2095_v29  ;;  %vm2094_vm14 = vcmp.eq.f32.partialorder %v2093_v33, 8.507059e+37 }
 0xd3d   : > { %v4698_v20 = vpop.eup %4697 }
 0xd3e   : > { %v2085_v21 = vmul.f32 %v4698_v20, %v2083_v19  ;;  %vm2090_vm9 = vweird.f32 %v4698_v20 }
 0xd3f   : > { %vm2091_vm12 = vmor %vm2089_vm10, %vm2090_vm9 }
 0xd40   : > { %v2086_v12 = vsub.f32 1.0, %v2085_v21 }
 0xd42   : > { %v2087_v60 = vmul.f32 %v4698_v20, %v2086_v12 }
 0xd44   : > { %v2088_v46 = vadd.f32 %v4698_v20, %v2087_v60  ;;  %v2187_v60 = vld [vmem:[#allocation5 + $0x3] ss:$16 sm:$0x3] }
 0xd46   : > { %v2092_v62 = vsel %vm2091_vm12, %v4698_v20, %v2088_v46  ;;  %vm2483_vm12 = vcmp.gt.s32.totalorder %v5527_v0, 11 }
 0xd47   : > { %v2097_v2 = vsel %vm2094_vm14, %v2096_v31, %v2092_v62  ;;  %v2495_v20 = vsel %vm2483_vm12, 1, %v4933_v1 }
 0xd48   : > { %v2110_v49 = vsub.f32 1.0, %v2097_v2  ;;  %v2116_v51 = vmul.f32 %v2097_v2, %v5636_v4 }
 0xd5a   : > { %v2101_v34 = vpop.permute.xlu0 %2100 }
 0xd5b   : > { %v2103_v36 = vmul.f32 %v2101_v34, %v2097_v2 }
 0xd5d   : > { %2105 = vrot.lane.b32.xlu0 %v2103_v36, %s6462_s23 }
 0xd65   : > { %2164 = vperm.xlu0 %4616, %v2162_v37  }
 0xda6   : > { %v2316_v40 = vpop.permute.xlu1 %2315 }
 0xda7   : > { %v2318_v42 = vmul.f32 %v2316_v40, %v2313_v52 }
 0xda9   : > { %v5658_v26 = vadd.f32 %v2319_v41, %v2318_v42 }
 0xdab   : > { %v5665_v43 = vsel %vm2338_vm5, %v5658_v26, %v5616_v28 }
 0xdac   : > { %2377 = vrot.lane.b32.xlu1 %v5665_v43, %s6458_s28 }
 0xdcf   : > { %v2106_v44 = vpop.permute.xlu0 %2105 }
 0xdd0   : > { %v2108_v45 = vadd.f32 %v2106_v44, %v2026_v3 }
 0xdd2   : > { %4699 = vtanh.f32 %v2108_v45 }
 0xdd7   : > { %v5673_v28 = vpop.permute.xlu0 %2164 }
 0xdd8   : > { %v4700_v59 = vpop.eup %4699  ;;  %vm2166_vm6 = vcmp.eq.s32.totalorder %v5673_v28, 1 }
 0xdd9   : > { %2112 = vrot.lane.b32.xlu2 %v4700_v59, %s6460_s29 }
 0xe1e   : > { %v2378_v48 = vpop.permute.xlu1 %2377 }
 0xe1f   : > { %4495 = vmatmul.msk.f32.vlgmr.msra.gmra.mxu1 %vm662_vm2, %v2378_v48 }
 0xe20   : > { %3037 = vmatpush.msra.mxu1 %v5433_v27 }
 0xe22   : > { %3038 = vmatpush.msra.mxu1 %v5441_v63 }
 0xe33   : > { %v2113_v50 = vpop.permute.xlu2 %2112 }
 0xe34   : > { %v2115_v30 = vmul.f32 %v2113_v50, %v2110_v49 }
 0xe36   : > { %v5676_v23 = vadd.f32 %v2116_v51, %v2115_v30 }
 0xe38   : > { %v5683_v53 = vsel %vm2166_vm6, %v5676_v23, %v5636_v4 }
 0xe39   : > { %2191 = vrot.lane.b32.xlu1 %v5683_v53, %s6460_s29 }
 0xe9c   : > { %v2398_v27 = vpop.f32.mrf.mxu1 }
 0xe9d   : > { %v2399_v63 = vadd.f32 %v5495_v14, %v2398_v27 }
 0xe9f   : > { %2464 = vrot.lane.b32.xlu0 %v2399_v63, %s4931_s30  ;;  %2441 = vrot.lane.b32.xlu2 %v2399_v63, %s4930_s27 }
 0xeab   : > { %v2192_v54 = vpop.permute.xlu1 %2191 }
 0xeac   : > { %4490 = vmatmul.msk.f32.vlgmr.msrb.gmra.mxu2 %vm662_vm2, %v2192_v54 }
 0xead   : > { %2853 = vmatpush.msrb.mxu2 %v5475_v8 }
 0xeaf   : > { %2854 = vmatpush.msrb.mxu2 %v5482_v13 }
 0xef9   : > { %v2442_v4 = vpop.permute.xlu2 %2441 }
 0xefa   : > { %v2444_v32 = vadd.f32 %v2442_v4, %v2350_v56 }
 0xefc   : > { %v4497_v57 = vmul.f32 -1.442695, %v2444_v32 }
 0xefe   : > { %4701 = vpow2.f32 %v4497_v57 }
 0xf04   : > { %v4702_v58 = vpop.eup %4701 }
 0xf05   : > { %v2448_v10 = vadd.f32 1.0, %v4702_v58 }
 0xf07   : > { %4703 = vrcp.f32 %v2448_v10  ;;  %v2460_v5 = vand.u32 2147483648, %v2448_v10  ;;  %v2458_v15 = vand.u32 2147483647, %v2448_v10  ;;  %vm2454_vm8 = vweird.f32 %v2448_v10 }
 0xf09   : > { %v2461_v8 = vor.u32 1.1754944e-38, %v2460_v5  ;;  %vm2459_vm10 = vcmp.eq.f32.partialorder %v2458_v15, 8.507059e+37 }
 0xf0d   : > { %v4704_v38 = vpop.eup %4703 }
 0xf0e   : > { %v2450_v47 = vmul.f32 %v4704_v38, %v2448_v10  ;;  %vm2455_vm7 = vweird.f32 %v4704_v38 }
 0xf0f   : > { %vm2456_vm9 = vmor %vm2454_vm8, %vm2455_vm7 }
 0xf10   : > { %v2451_v3 = vsub.f32 1.0, %v2450_v47 }
 0xf11   : > { %v2465_v11 = vpop.permute.xlu0 %2464 }
 0xf12   : > { %v2452_v7 = vmul.f32 %v4704_v38, %v2451_v3 }
 0xf14   : > { %v2453_v6 = vadd.f32 %v4704_v38, %v2452_v7 }
 0xf16   : > { %v2457_v13 = vsel %vm2456_vm9, %v4704_v38, %v2453_v6  ;;  %vm2321_vm9 = vcmp.gt.s32.totalorder %v5527_v0, 3 }
 0xf17   : > { %v2462_v18 = vsel %vm2459_vm10, %v2461_v8, %v2457_v13  ;;  %v2323_v50 = vsel %vm2321_vm9, 1, %v4933_v1  ;;  %v5735_v8 = vld [vmem:[%s6445_s16 + $0x8] sm:$0xff]  ;;  %v5741_v13 = vld [vmem:[%s6445_s16] sm:$0xff]  ;;  %vm2644_vm9 = vcmp.gt.s32.totalorder %v5527_v0, 10 }
 0xf18   : > { %v2467_v19 = vmul.f32 %v2465_v11, %v2462_v18  ;;  %v2474_v54 = vsub.f32 1.0, %v2462_v18  ;;  %v2480_v32 = vmul.f32 %v2462_v18, %v5665_v43  ;;  %v5748_v11 = vld [vmem:[%s6443_s14 + $0x8] sm:$0xff]  ;;  %v5754_v18 = vld [vmem:[%s6443_s14] sm:$0xff] }
 0xf1a   : > { %2469 = vrot.lane.b32.xlu1 %v2467_v19, %s6462_s23 }
 0xf22   : > { %2497 = vperm.xlu1 %4615, %v2495_v20  }
 0xf2f   : > { %v2212_v21 = vpop.f32.mrf.mxu2 }
 0xf30   : > { %v2213_v12 = vadd.f32 %v5558_v17, %v2212_v21 }
 0xf32   : > { %2261 = vrot.lane.b32.xlu2 %v2213_v12, %s4935_s1  ;;  %v2240_v46 = vadd.f32 %v2213_v12, %v2187_v60 }
 0xf34   : > { %v4492_v29 = vmul.f32 -1.442695, %v2240_v46 }
 0xf36   : > { %4705 = vpow2.f32 %v4492_v29 }
 0xf3c   : > { %v4706_v33 = vpop.eup %4705 }
 0xf3d   : > { %v2244_v62 = vadd.f32 1.0, %v4706_v33 }
 0xf3f   : > { %4707 = vrcp.f32 %v2244_v62  ;;  %v2256_v52 = vand.u32 2147483648, %v2244_v62  ;;  %vm2250_vm4 = vweird.f32 %v2244_v62  ;;  %v2254_v40 = vand.u32 2147483647, %v2244_v62 }
 0xf41   : > { %v2257_v42 = vor.u32 1.1754944e-38, %v2256_v52  ;;  %vm2255_vm8 = vcmp.eq.f32.partialorder %v2254_v40, 8.507059e+37 }
 0xf45   : > { %v4708_v31 = vpop.eup %4707 }
 0xf46   : > { %v2246_v34 = vmul.f32 %v4708_v31, %v2244_v62  ;;  %vm2251_vm14 = vweird.f32 %v4708_v31 }
 0xf47   : > { %vm2252_vm7 = vmor %vm2250_vm4, %vm2251_vm14 }
 0xf48   : > { %v2247_v2 = vsub.f32 1.0, %v2246_v34 }
 0xf4a   : > { %v2248_v36 = vmul.f32 %v4708_v31, %v2247_v2 }
 0xf4c   : > { %v2249_v37 = vadd.f32 %v4708_v31, %v2248_v36 }
 0xf4e   : > { %v2253_v41 = vsel %vm2252_vm7, %v4708_v31, %v2249_v37 }
 0xf4f   : > { %v2258_v45 = vsel %vm2255_vm8, %v2257_v42, %v2253_v41 }
 0xf50   : > { %v2271_v38 = vsub.f32 1.0, %v2258_v45  ;;  %v2277_v5 = vmul.f32 %v2258_v45, %v5683_v53 }
 0xf8c   : > { %v2470_v44 = vpop.permute.xlu1 %2469  ;;  %v2262_v59 = vpop.permute.xlu2 %2261 }
 0xf8d   : > { %v2472_v48 = vadd.f32 %v2470_v44, %v2350_v56  ;;  %v2264_v49 = vmul.f32 %v2262_v59, %v2258_v45 }
 0xf8f   : > { %4709 = vtanh.f32 %v2472_v48  ;;  %2266 = vrot.lane.b32.xlu2 %v2264_v49, %s6462_s23  ;;  %v2348_v48 = vld [vmem:[#allocation5 + $0x4] ss:$16 sm:$0x3]  ;;  %s6495_s23 = smov 112  }
 0xf94   : > { %v5703_v4 = vpop.permute.xlu1 %2497 }
 0xf95   : > { %v4710_v51 = vpop.eup %4709  ;;  %vm2499_vm10 = vcmp.eq.s32.totalorder %v5703_v4, 1 }
 0xf96   : > { %2476 = vrot.lane.b32.xlu0 %v4710_v51, %s6460_s29 }
 0xf97   : > { %2325 = vperm.xlu2 %4614, %v2323_v50   ;;  %v2656_v50 = vsel %vm2644_vm9, 1, %v4933_v1  ;;  %vm2482_vm9 = vcmp.gt.s32.totalorder %v5527_v0, 4 }
 0xfe9   : > { %v2267_v30 = vpop.permute.xlu2 %2266 }
 0xfea   : > { %v2269_v27 = vadd.f32 %v2267_v30, %v2187_v60  ;;  %v2511_v60 = vld [vmem:[#allocation5 + $0xa] ss:$16 sm:$0x3] }
 0xfec   : > { %4711 = vtanh.f32 %v2269_v27 }
 0xff1   : > { %v5717_v3 = vpop.permute.xlu2 %2325 }
 0xff2   : > { %v4712_v63 = vpop.eup %4711  ;;  %vm2327_vm12 = vcmp.eq.s32.totalorder %v5717_v3, 1 }
 0xff3   : > { %2273 = vrot.lane.b32.xlu1 %v4712_v63, %s6460_s29 }
0x1008   : > { %v2477_v56 = vpop.permute.xlu0 %2476 }
0x1009   : > { %v2479_v57 = vmul.f32 %v2477_v56, %v2474_v54 }
0x100b   : > { %v5706_v58 = vadd.f32 %v2480_v32, %v2479_v57 }
0x100d   : > { %v5713_v10 = vsel %vm2499_vm10, %v5706_v58, %v5665_v43 }
0x100e   : > { %2538 = vrot.lane.b32.xlu0 %v5713_v10, %s6458_s28  ;;  %s6496_s28 = smov 64  }
0x1065   : > { %v2274_v47 = vpop.permute.xlu1 %2273 }
0x1066   : > { %v2276_v7 = vmul.f32 %v2274_v47, %v2271_v38 }
0x1068   : > { %v5720_v15 = vadd.f32 %v2277_v5, %v2276_v7 }
0x106a   : > { %v5727_v43 = vsel %vm2327_vm12, %v5720_v15, %v5683_v53 }
0x106b   : > { %2352 = vrot.lane.b32.xlu0 %v5727_v43, %s6460_s29  ;;  %s6494_s29 = smov 32  }
0x1080   : > { %v2539_v6 = vpop.permute.xlu0 %2538 }
0x1081   : > { %4499 = vmatmul.msk.f32.vlgmr.msra.gmra.mxu3 %vm662_vm2, %v2539_v6 }
0x1082   : > { %3184 = vmatpush.msra.mxu3 %v5735_v8 }
0x1084   : > { %3185 = vmatpush.msra.mxu3 %v5741_v13 }
0x10dd   : > { %v2353_v53 = vpop.permute.xlu0 %2352 }
0x10de   : > { %4494 = vmatmul.msk.f32.vlgmr.msra.gmra.mxu0 %vm662_vm2, %v2353_v53 }
0x10df   : > { %3012 = vmatpush.msra.mxu0 %v5748_v11 }
0x10e1   : > { %3013 = vmatpush.msra.mxu0 %v5754_v18 }
0x1104   : > { %v2559_v19 = vpop.f32.mrf.mxu3 }
0x1105   : > { %v2560_v20 = vadd.f32 %v5495_v14, %v2559_v19 }
0x1107   : > { %2625 = vrot.lane.b32.xlu2 %v2560_v20, %s4931_s30  ;;  %2602 = vrot.lane.b32.xlu1 %v2560_v20, %s4930_s27 }
0x115b   : > { %v2373_v21 = vpop.f32.mrf.mxu0 }
0x115c   : > { %v2374_v12 = vadd.f32 %v5558_v17, %v2373_v21 }
0x115e   : > { %2422 = vrot.lane.b32.xlu0 %v2374_v12, %s4935_s1  ;;  %v2401_v49 = vadd.f32 %v2374_v12, %v2348_v48 }
0x1160   : > { %v4496_v51 = vmul.f32 -1.442695, %v2401_v49 }
0x1161   : > { %v2626_v44 = vpop.permute.xlu2 %2625 }
0x1179   : > { %v2603_v46 = vpop.permute.xlu1 %2602 }
0x117a   : > { %v2605_v29 = vadd.f32 %v2603_v46, %v2511_v60  ;;  %v2484_v46 = vsel %vm2482_vm9, 1, %v4933_v1 }
0x117c   : > { %v4501_v33 = vmul.f32 -1.442695, %v2605_v29 }
0x117e   : > { %4713 = vpow2.f32 %v4501_v33 }
0x1184   : > { %v4714_v62 = vpop.eup %4713 }
0x1185   : > { %v2609_v31 = vadd.f32 1.0, %v4714_v62 }
0x1187   : > { %4715 = vrcp.f32 %v2609_v31  ;;  %v2621_v36 = vand.u32 2147483648, %v2609_v31  ;;  %v2619_v52 = vand.u32 2147483647, %v2609_v31  ;;  %vm2615_vm4 = vweird.f32 %v2609_v31 }
0x1188   : > { %4717 = vpow2.f32 %v4496_v51 }
0x1189   : > { %v2622_v41 = vor.u32 1.1754944e-38, %v2621_v36  ;;  %vm2620_vm8 = vcmp.eq.f32.partialorder %v2619_v52, 8.507059e+37 }
0x118d   : > { %v4716_v34 = vpop.eup %4715 }
0x118e   : > { %v2611_v2 = vmul.f32 %v4716_v34, %v2609_v31  ;;  %vm2616_vm14 = vweird.f32 %v4716_v34  ;;  %v4718_v30 = vpop.eup %4717 }
0x118f   : > { %vm2617_vm7 = vmor %vm2615_vm4, %vm2616_vm14  ;;  %v2405_v27 = vadd.f32 1.0, %v4718_v30  ;;  %v2509_v30 = vld [vmem:[#allocation5 + $0x5] ss:$16 sm:$0x3] }
0x1190   : > { %v2612_v14 = vsub.f32 1.0, %v2611_v2 }
0x1191   : > { %4719 = vrcp.f32 %v2405_v27  ;;  %v2417_v38 = vand.u32 2147483648, %v2405_v27  ;;  %vm2411_vm4 = vweird.f32 %v2405_v27  ;;  %v2415_v47 = vand.u32 2147483647, %v2405_v27 }
0x1192   : > { %v2613_v37 = vmul.f32 %v4716_v34, %v2612_v14 }
0x1193   : > { %v2418_v7 = vor.u32 1.1754944e-38, %v2417_v38 }
0x1194   : > { %v2614_v40 = vadd.f32 %v4716_v34, %v2613_v37 }
0x1196   : > { %v2618_v42 = vsel %vm2617_vm7, %v4716_v34, %v2614_v40 }
0x1197   : > { %v2623_v45 = vsel %vm2620_vm8, %v2622_v41, %v2618_v42  ;;  %v4720_v63 = vpop.eup %4719  ;;  %vm2416_vm8 = vcmp.eq.f32.partialorder %v2415_v47, 8.507059e+37 }
0x1198   : > { %v2628_v59 = vmul.f32 %v2626_v44, %v2623_v45  ;;  %v2407_v54 = vmul.f32 %v4720_v63, %v2405_v27  ;;  %vm2412_vm14 = vweird.f32 %v4720_v63  ;;  %v2635_v31 = vsub.f32 1.0, %v2623_v45 }
0x1199   : > { %vm2413_vm7 = vmor %vm2411_vm4, %vm2412_vm14 }
0x119a   : > { %2630 = vrot.lane.b32.xlu1 %v2628_v59, %s6494_s29  ;;  %v2408_v56 = vsub.f32 1.0, %v2407_v54 }
0x119c   : > { %v2409_v32 = vmul.f32 %v4720_v63, %v2408_v56 }
0x119e   : > { %v2410_v57 = vadd.f32 %v4720_v63, %v2409_v32 }
0x11a0   : > { %v2414_v5 = vsel %vm2413_vm7, %v4720_v63, %v2410_v57 }
0x11a1   : > { %v2419_v53 = vsel %vm2416_vm8, %v2418_v7, %v2414_v5 }
0x11a2   : > { %2658 = vperm.xlu1 %4615, %v2656_v50   ;;  %v2432_v37 = vsub.f32 1.0, %v2419_v53  ;;  %v2438_v41 = vmul.f32 %v2419_v53, %v5727_v43  ;;  %v5809_v50 = vld [vmem:[%s6446_s17] ss:$0 sm:$0xff] }
0x11d0   : > { %v2423_v6 = vpop.permute.xlu0 %2422 }
0x11d1   : > { %v2425_v19 = vmul.f32 %v2423_v6, %v2419_v53 }
0x11d3   : > { %2427 = vrot.lane.b32.xlu2 %v2425_v19, %s6494_s29 }
0x120c   : > { %v2631_v20 = vpop.permute.xlu1 %2630 }
0x120d   : > { %v2633_v21 = vadd.f32 %v2631_v20, %v2511_v60  ;;  %v2641_v60 = vmul.f32 %v2623_v45, %v5713_v10 }
0x120f   : > { %4721 = vtanh.f32 %v2633_v21 }
0x1214   : > { %v5770_v2 = vpop.permute.xlu1 %2658 }
0x1215   : > { %v4722_v12 = vpop.eup %4721  ;;  %vm2660_vm14 = vcmp.eq.s32.totalorder %v5770_v2, 1 }
0x1216   : > { %2637 = vrot.lane.b32.xlu0 %v4722_v12, %s6495_s23  ;;  %v5816_v12 = vld [vmem:[%s5524_s25] sm:$0x3] }
0x1217   : > { %vm2643_vm15 = vcmp.gt.s32.totalorder %v5816_v12, 5  ;;  %vm2965_vm13 = vcmp.gt.s32.totalorder %v5816_v12, 7 }
0x121e   : > { %2486 = vperm.xlu0 %4616, %v2484_v46   ;;  %v2645_v46 = vsel %vm2643_vm15, 1, %v4933_v1 }
0x122d   : > { %v2428_v29 = vpop.permute.xlu2 %2427 }
0x122e   : > { %v2430_v33 = vadd.f32 %v2428_v29, %v2348_v48  ;;  %v2672_v29 = vld [vmem:[#allocation5 + $0x9] ss:$16 sm:$0x3] }
0x1230   : > { %4723 = vtanh.f32 %v2430_v33 }
0x1236   : > { %v4724_v62 = vpop.eup %4723 }
0x1237   : > { %2434 = vrot.lane.b32.xlu2 %v4724_v62, %s6495_s23 }
0x1288   : > { %v2638_v34 = vpop.permute.xlu0 %2637 }
0x1289   : > { %v2640_v14 = vmul.f32 %v2638_v34, %v2635_v31 }
0x128b   : > { %v5773_v36 = vadd.f32 %v2641_v60, %v2640_v14 }
0x128d   : > { %v5780_v0 = vsel %vm2660_vm14, %v5773_v36, %v5713_v10 }
0x128e   : > { %2699 = vrot.lane.b32.xlu1 %v5780_v0, %s6496_s28 }
0x1290   : > { %v5784_v40 = vpop.permute.xlu0 %2486 }
0x1291   : > { %v2435_v52 = vpop.permute.xlu2 %2434  ;;  %vm2488_vm4 = vcmp.eq.s32.totalorder %v5784_v40, 1 }
0x1292   : > { %v2437_v42 = vmul.f32 %v2435_v52, %v2432_v37 }
0x1294   : > { %v5787_v44 = vadd.f32 %v2438_v41, %v2437_v42 }
0x1296   : > { %v5794_v10 = vsel %vm2488_vm4, %v5787_v44, %v5727_v43 }
0x1297   : > { %2513 = vrot.lane.b32.xlu2 %v5794_v10, %s6495_s23 }
0x12f1   : > { %v2514_v45 = vpop.permute.xlu2 %2513 }
0x12f2   : > { %4498 = vmatmul.msk.f32.vlgmr.msra.gmra.mxu2 %vm662_vm2, %v2514_v45 }
0x12f3   : > { %3159 = vmatpush.msra.mxu2 %v5748_v11 }
0x12f5   : > { %3160 = vmatpush.msra.mxu2 %v5754_v18 }
0x1300   : > { %v2700_v59 = vpop.permute.xlu1 %2699 }
0x1301   : > { %4503 = vmatmul.msk.f32.vlgmr.msrb.gmra.mxu1 %vm662_vm2, %v2700_v59 }
0x1302   : > { %3331 = vmatpush.msrb.mxu1 %v5735_v8 }
0x1304   : > { %3332 = vmatpush.msrb.mxu1 %v5741_v13 }
0x1375   : > { %v2534_v48 = vpop.f32.mrf.mxu2 }
0x1376   : > { %v2535_v43 = vadd.f32 %v5558_v17, %v2534_v48 }
0x1378   : > { %2583 = vrot.lane.b32.xlu1 %v2535_v43, %s4935_s1  ;;  %v2562_v27 = vadd.f32 %v2535_v43, %v2509_v30 }
0x137a   : > { %v4500_v63 = vmul.f32 -1.442695, %v2562_v27 }
0x137c   : > { %4725 = vpow2.f32 %v4500_v63 }
0x137e   : > { %v2720_v49 = vpop.f32.mrf.mxu1 }
0x137f   : > { %v2721_v51 = vadd.f32 %v5809_v50, %v2720_v49 }
0x1381   : > { %2763 = vrot.lane.b32.xlu0 %v2721_v51, %s4930_s27  ;;  %2786 = vrot.lane.b32.xlu2 %v2721_v51, %s4931_s30 }
0x1382   : > { %v4726_v54 = vpop.eup %4725 }
0x1383   : > { %v2566_v17 = vadd.f32 1.0, %v4726_v54 }
0x1385   : > { %4727 = vrcp.f32 %v2566_v17  ;;  %v2578_v5 = vand.u32 2147483648, %v2566_v17  ;;  %vm2572_vm8 = vweird.f32 %v2566_v17  ;;  %v2576_v7 = vand.u32 2147483647, %v2566_v17 }
0x1387   : > { %v2579_v53 = vor.u32 1.1754944e-38, %v2578_v5  ;;  %vm2577_vm3 = vcmp.eq.f32.partialorder %v2576_v7, 8.507059e+37 }
0x138b   : > { %v4728_v56 = vpop.eup %4727 }
0x138c   : > { %v2568_v32 = vmul.f32 %v4728_v56, %v2566_v17  ;;  %vm2573_vm7 = vweird.f32 %v4728_v56 }
0x138d   : > { %vm2574_vm9 = vmor %vm2572_vm8, %vm2573_vm7 }
0x138e   : > { %v2569_v57 = vsub.f32 1.0, %v2568_v32 }
0x1390   : > { %v2570_v38 = vmul.f32 %v4728_v56, %v2569_v57 }
0x1392   : > { %v2571_v47 = vadd.f32 %v4728_v56, %v2570_v38 }
0x1394   : > { %v2575_v6 = vsel %vm2574_vm9, %v4728_v56, %v2571_v47  ;;  %vm2805_vm9 = vcmp.gt.s32.totalorder %v5816_v12, 9 }
0x1395   : > { %v2580_v20 = vsel %vm2577_vm3, %v2579_v53, %v2575_v6  ;;  %v2817_v56 = vsel %vm2805_vm9, 1, %v4933_v1 }
0x1396   : > { %v2593_v47 = vsub.f32 1.0, %v2580_v20 }
0x13db   : > { %v2787_v49 = vpop.permute.xlu2 %2786 }
0x13ea   : > { %v2584_v19 = vpop.permute.xlu1 %2583 }
0x13eb   : > { %v2586_v21 = vmul.f32 %v2584_v19, %v2580_v20 }
0x13ed   : > { %2588 = vrot.lane.b32.xlu0 %v2586_v21, %s6494_s29 }
0x13f3   : > { %v2764_v33 = vpop.permute.xlu0 %2763 }
0x13f4   : > { %v2766_v62 = vadd.f32 %v2764_v33, %v2672_v29 }
0x13f5   : > { %2647 = vperm.xlu0 %4616, %v2645_v46  }
0x13f6   : > { %v4505_v31 = vmul.f32 -1.442695, %v2766_v62 }
0x13f8   : > { %4729 = vpow2.f32 %v4505_v31 }
0x13fe   : > { %v4730_v34 = vpop.eup %4729 }
0x13ff   : > { %v2770_v60 = vadd.f32 1.0, %v4730_v34 }
0x1401   : > { %4731 = vrcp.f32 %v2770_v60  ;;  %v2782_v41 = vand.u32 2147483648, %v2770_v60  ;;  %v2780_v45 = vand.u32 2147483647, %v2770_v60  ;;  %vm2776_vm7 = vweird.f32 %v2770_v60 }
0x1403   : > { %v2783_v48 = vor.u32 1.1754944e-38, %v2782_v41  ;;  %vm2781_vm15 = vcmp.eq.f32.partialorder %v2780_v45, 8.507059e+37 }
0x1407   : > { %v4732_v14 = vpop.eup %4731 }
0x1408   : > { %v2772_v37 = vmul.f32 %v4732_v14, %v2770_v60  ;;  %vm2777_vm3 = vweird.f32 %v4732_v14 }
0x1409   : > { %vm2778_vm8 = vmor %vm2776_vm7, %vm2777_vm3 }
0x140a   : > { %v2773_v52 = vsub.f32 1.0, %v2772_v37  ;;  %v2670_v37 = vld [vmem:[#allocation5 + $0x6] ss:$16 sm:$0x3] }
0x140c   : > { %v2774_v42 = vmul.f32 %v4732_v14, %v2773_v52 }
0x140e   : > { %v2775_v59 = vadd.f32 %v4732_v14, %v2774_v42 }
0x1410   : > { %v2779_v43 = vsel %vm2778_vm8, %v4732_v14, %v2775_v59  ;;  %vm2804_vm8 = vcmp.gt.s32.totalorder %v5816_v12, 6 }
0x1411   : > { %v2784_v51 = vsel %vm2781_vm15, %v2783_v48, %v2779_v43  ;;  %vm2966_vm15 = vcmp.gt.s32.totalorder %v5816_v12, 8 }
0x1412   : > { %v2789_v27 = vmul.f32 %v2787_v49, %v2784_v51  ;;  %v2796_v21 = vsub.f32 1.0, %v2784_v51 }
0x1414   : > { %2791 = vrot.lane.b32.xlu1 %v2789_v27, %s6494_s29 }
0x145f   : > { %v2589_v63 = vpop.permute.xlu0 %2588 }
0x1460   : > { %v2591_v54 = vadd.f32 %v2589_v63, %v2509_v30  ;;  %v2599_v30 = vmul.f32 %v2580_v20, %v5794_v10  ;;  %v2802_v20 = vmul.f32 %v2784_v51, %v5780_v0  ;;  %v2806_v51 = vsel %vm2804_vm8, 1, %v4933_v1 }
0x1462   : > { %4733 = vtanh.f32 %v2591_v54  ;;  %v2978_v54 = vsel %vm2966_vm15, 1, %v4933_v1 }
0x1467   : > { %v5825_v7 = vpop.permute.xlu0 %2647 }
0x1468   : > { %v4734_v17 = vpop.eup %4733  ;;  %vm2649_vm3 = vcmp.eq.s32.totalorder %v5825_v7, 1 }
0x1469   : > { %2595 = vrot.lane.b32.xlu2 %v4734_v17, %s6495_s23 }
0x1471   : > { %2819 = vperm.xlu2 %4614, %v2817_v56  }
0x1486   : > { %v2792_v32 = vpop.permute.xlu1 %2791 }
0x1487   : > { %v2794_v57 = vadd.f32 %v2792_v32, %v2672_v29 }
0x1489   : > { %4735 = vtanh.f32 %v2794_v57 }
0x148f   : > { %v4736_v38 = vpop.eup %4735 }
0x1490   : > { %2798 = vrot.lane.b32.xlu1 %v4736_v38, %s6495_s23 }
0x14c3   : > { %v2596_v5 = vpop.permute.xlu2 %2595 }
0x14c4   : > { %v2598_v6 = vmul.f32 %v2596_v5, %v2593_v47 }
0x14c6   : > { %v5828_v53 = vadd.f32 %v2599_v30, %v2598_v6  ;;  %v2833_v6 = vld [vmem:[#allocation5 + $0x8] ss:$16 sm:$0x3] }
0x14c8   : > { %v5835_v19 = vsel %vm2649_vm3, %v5828_v53, %v5794_v10  ;;  %v2650_v3 = vsel %vm2649_vm3, %v5828_v53, 0.0 }
0x14c9   : > { %2674 = vrot.lane.b32.xlu0 %v5835_v19, %s6495_s23 }
0x14cb   : > { %v5839_v29 = vpop.permute.xlu2 %2819 }
0x14cc   : > { %vm6470_vm7 = vcmp.eq.s32.totalorder %v5839_v29, 1 }
0x1502   : > { %v2799_v46 = vpop.permute.xlu1 %2798 }
0x1503   : > { %v2801_v33 = vmul.f32 %v2799_v46, %v2796_v21 }
0x1505   : > { %v5842_v62 = vadd.f32 %v2802_v20, %v2801_v33 }
0x1507   : > { %v5849_v10 = vsel %vm6470_vm7, %v5842_v62, %v5780_v0  ;;  %v5862_v0 = vld [vmem:[%s6444_s15] ss:$0 sm:$0xff] }
0x1508   : > { %2860 = vrot.lane.b32.xlu1 %v5849_v10, %s6496_s28 }
0x153b   : > { %v2675_v31 = vpop.permute.xlu0 %2674 }
0x153c   : > { %4502 = vmatmul.msk.f32.vlgmr.msrb.gmra.mxu0 %vm662_vm2, %v2675_v31 }
0x153d   : > { %3306 = vmatpush.msrb.mxu0 %v5748_v11 }
0x153f   : > { %3307 = vmatpush.msrb.mxu0 %v5754_v18 }
0x157a   : > { %v2861_v34 = vpop.permute.xlu1 %2860 }
0x157b   : > { %4507 = vmatmul.msk.f32.vlgmr.msrb.gmra.mxu3 %vm662_vm2, %v2861_v34 }
0x157c   : > { %3478 = vmatpush.msrb.mxu3 %v5735_v8 }
0x157e   : > { %3479 = vmatpush.msrb.mxu3 %v5741_v13 }
0x15b9   : > { %v2695_v60 = vpop.f32.mrf.mxu0 }
0x15ba   : > { %v2696_v14 = vadd.f32 %v5862_v0, %v2695_v60 }
0x15bc   : > { %2744 = vrot.lane.b32.xlu2 %v2696_v14, %s4935_s1  ;;  %v2723_v52 = vadd.f32 %v2696_v14, %v2670_v37 }
0x15be   : > { %v4504_v41 = vmul.f32 -1.442695, %v2723_v52 }
0x15c0   : > { %4737 = vpow2.f32 %v4504_v41 }
0x15c6   : > { %v4738_v42 = vpop.eup %4737 }
0x15c7   : > { %v2727_v45 = vadd.f32 1.0, %v4738_v42 }
0x15c9   : > { %4739 = vrcp.f32 %v2727_v45  ;;  %v2739_v56 = vand.u32 2147483648, %v2727_v45  ;;  %vm2733_vm1 = vweird.f32 %v2727_v45  ;;  %v2737_v32 = vand.u32 2147483647, %v2727_v45 }
0x15cb   : > { %v2740_v38 = vor.u32 1.1754944e-38, %v2739_v56  ;;  %vm2738_vm0 = vcmp.eq.f32.partialorder %v2737_v32, 8.507059e+37 }
0x15cf   : > { %v4740_v43 = vpop.eup %4739 }
0x15d0   : > { %v2729_v49 = vmul.f32 %v4740_v43, %v2727_v45  ;;  %vm2734_vm9 = vweird.f32 %v4740_v43 }
0x15d1   : > { %vm2735_vm11 = vmor %vm2733_vm1, %vm2734_vm9 }
0x15d2   : > { %v2730_v27 = vsub.f32 1.0, %v2729_v49 }
0x15d4   : > { %v2731_v63 = vmul.f32 %v4740_v43, %v2730_v27 }
0x15d6   : > { %v2732_v17 = vadd.f32 %v4740_v43, %v2731_v63 }
0x15d8   : > { %v2736_v57 = vsel %vm2735_vm11, %v4740_v43, %v2732_v17 }
0x15d9   : > { %v2741_v47 = vsel %vm2738_vm0, %v2740_v38, %v2736_v57 }
0x15da   : > { %v2760_v38 = vmul.f32 %v2741_v47, %v5835_v19 }
0x15fe   : > { %v2881_v59 = vpop.f32.mrf.mxu3 }
0x15ff   : > { %v2882_v48 = vadd.f32 %v5809_v50, %v2881_v59 }
0x1601   : > { %2947 = vrot.lane.b32.xlu2 %v2882_v48, %s4931_s30  ;;  %2924 = vrot.lane.b32.xlu0 %v2882_v48, %s4930_s27 }
0x1609   : > { %2808 = vperm.xlu2 %4614, %v2806_v51  }
0x1611   : > { %2980 = vperm.xlu2 %4614, %v2978_v54  }
0x1616   : > { %v2745_v5 = vpop.permute.xlu2 %2744 }
0x1617   : > { %v2747_v30 = vmul.f32 %v2745_v5, %v2741_v47 }
0x1619   : > { %2749 = vrot.lane.b32.xlu1 %v2747_v30, %s6494_s29 }
0x165b   : > { %v2948_v51 = vpop.permute.xlu2 %2947 }
0x1663   : > { %v5876_v57 = vpop.permute.xlu2 %2808 }
0x1664   : > { %vm2810_vm15 = vcmp.eq.s32.totalorder %v5876_v57, 1 }
0x1673   : > { %v2925_v21 = vpop.permute.xlu0 %2924 }
0x1674   : > { %v2927_v46 = vadd.f32 %v2925_v21, %v2833_v6 }
0x1676   : > { %v4509_v20 = vmul.f32 -1.442695, %v2927_v46 }
0x1678   : > { %4741 = vpow2.f32 %v4509_v20 }
0x167e   : > { %v4742_v33 = vpop.eup %4741 }
0x167f   : > { %v2931_v31 = vadd.f32 1.0, %v4742_v33  ;;  %v5893_v33 = vpop.permute.xlu2 %2980 }
0x1680   : > { %vm2982_vm9 = vcmp.eq.s32.totalorder %v5893_v33, 1 }
0x1681   : > { %4743 = vrcp.f32 %v2931_v31  ;;  %v2943_v41 = vand.u32 2147483648, %v2931_v31  ;;  %v2941_v59 = vand.u32 2147483647, %v2931_v31  ;;  %vm2937_vm11 = vweird.f32 %v2931_v31 }
0x1683   : > { %v2944_v43 = vor.u32 1.1754944e-38, %v2943_v41  ;;  %vm2942_vm8 = vcmp.eq.f32.partialorder %v2941_v59, 8.507059e+37 }
0x1687   : > { %v4744_v34 = vpop.eup %4743 }
0x1688   : > { %v2933_v60 = vmul.f32 %v4744_v34, %v2931_v31  ;;  %vm2938_vm1 = vweird.f32 %v4744_v34 }
0x1689   : > { %vm2939_vm0 = vmor %vm2937_vm11, %vm2938_vm1 }
0x168a   : > { %v2934_v14 = vsub.f32 1.0, %v2933_v60 }
0x168b   : > { %v2750_v52 = vpop.permute.xlu1 %2749 }
0x168c   : > { %v2752_v42 = vadd.f32 %v2750_v52, %v2670_v37  ;;  %v2935_v45 = vmul.f32 %v4744_v34, %v2934_v14  ;;  %v2754_v37 = vsub.f32 1.0, %v2741_v47 }
0x168e   : > { %4745 = vtanh.f32 %v2752_v42  ;;  %v2936_v48 = vadd.f32 %v4744_v34, %v2935_v45  ;;  %v2831_v42 = vld [vmem:[#allocation5 + $0x7] ss:$16 sm:$0x3] }
0x1690   : > { %v2940_v49 = vsel %vm2939_vm0, %v4744_v34, %v2936_v48 }
0x1691   : > { %v2945_v27 = vsel %vm2942_vm8, %v2944_v43, %v2940_v49 }
0x1692   : > { %v2950_v63 = vmul.f32 %v2948_v51, %v2945_v27  ;;  %v2957_v47 = vsub.f32 1.0, %v2945_v27  ;;  %v2963_v31 = vmul.f32 %v2945_v27, %v5849_v10 }
0x1694   : > { %v4746_v54 = vpop.eup %4745  ;;  %2952 = vrot.lane.b32.xlu0 %v2950_v63, %s6494_s29 }
0x1695   : > { %2756 = vrot.lane.b32.xlu1 %v4746_v54, %s6495_s23 }
0x1706   : > { %v2953_v17 = vpop.permute.xlu0 %2952 }
0x1707   : > { %v2955_v56 = vadd.f32 %v2953_v17, %v2833_v6  ;;  %v2757_v32 = vpop.permute.xlu1 %2756 }
0x1708   : > { %v2759_v5 = vmul.f32 %v2757_v32, %v2754_v37 }
0x1709   : > { %4747 = vtanh.f32 %v2955_v56 }
0x170a   : > { %v5879_v30 = vadd.f32 %v2760_v38, %v2759_v5 }
0x170c   : > { %v5886_v21 = vsel %vm2810_vm15, %v5879_v30, %v5835_v19 }
0x170d   : > { %2835 = vrot.lane.b32.xlu1 %v5886_v21, %s6495_s23 }
0x170f   : > { %v4748_v6 = vpop.eup %4747 }
0x1710   : > { %2959 = vrot.lane.b32.xlu0 %v4748_v6, %s6495_s23 }
0x177f   : > { %v2836_v46 = vpop.permute.xlu1 %2835 }
0x1780   : > { %4506 = vmatmul.msk.f32.vlgmr.msrb.gmra.mxu2 %vm662_vm2, %v2836_v46 }
0x1781   : > { %3453 = vmatpush.msrb.mxu2 %v5748_v11 }
0x1782   : > { %v2960_v20 = vpop.permute.xlu0 %2959 }
0x1783   : > { %v2962_v34 = vmul.f32 %v2960_v20, %v2957_v47  ;;  %3454 = vmatpush.msrb.mxu2 %v5754_v18  ;;  %v2967_v47 = vsel %vm2965_vm13, 1, %v4933_v1  ;;  %v2992_v20 = vld [vmem:[#allocation5 + $0x7] ss:$16 sm:$0x3] }
0x1785   : > { %v5897_v19 = vadd.f32 %v2963_v31, %v2962_v34 }
0x1787   : > { %v5904_v60 = vsel %vm2982_vm9, %v5897_v19, %v5849_v10  ;;  %v2983_v57 = vsel %vm2982_vm9, %v5897_v19, 0.0 }
0x1788   : > { %3019 = vrot.lane.b32.xlu0 %v5904_v60, %s6496_s28 }
0x17fa   : > { %v3020_v14 = vpop.permute.xlu0 %3019 }
0x17fb   : > { %4511 = vmatmul.msk.f32.vlgmr.msra.gmra.mxu1 %vm662_vm2, %v3020_v14 }
0x17fc   : > { %3625 = vmatpush.msra.mxu1 %v5735_v8 }
0x17fe   : > { %3626 = vmatpush.msra.mxu1 %v5741_v13 }
0x1803   : > { %v2856_v52 = vpop.f32.mrf.mxu2 }
0x1804   : > { %v2857_v41 = vadd.f32 %v5862_v0, %v2856_v52 }
0x1806   : > { %2905 = vrot.lane.b32.xlu1 %v2857_v41, %s4935_s1  ;;  %v2884_v45 = vadd.f32 %v2857_v41, %v2831_v42 }
0x1808   : > { %v4508_v59 = vmul.f32 -1.442695, %v2884_v45 }
0x180a   : > { %4749 = vpow2.f32 %v4508_v59 }
0x1810   : > { %v4750_v10 = vpop.eup %4749 }
0x1811   : > { %v2888_v48 = vadd.f32 1.0, %v4750_v10 }
0x1813   : > { %4751 = vrcp.f32 %v2888_v48  ;;  %v2900_v54 = vand.u32 2147483648, %v2888_v48  ;;  %vm2894_vm11 = vweird.f32 %v2888_v48  ;;  %v2898_v17 = vand.u32 2147483647, %v2888_v48 }
0x1815   : > { %v2901_v56 = vor.u32 1.1754944e-38, %v2900_v54  ;;  %vm2899_vm8 = vcmp.eq.f32.partialorder %v2898_v17, 8.507059e+37 }
0x1819   : > { %v4752_v43 = vpop.eup %4751 }
0x181a   : > { %v2890_v49 = vmul.f32 %v4752_v43, %v2888_v48  ;;  %vm2895_vm1 = vweird.f32 %v4752_v43 }
0x181b   : > { %vm2896_vm0 = vmor %vm2894_vm11, %vm2895_vm1 }
0x181c   : > { %v2891_v51 = vsub.f32 1.0, %v2890_v49 }
0x181e   : > { %v2892_v27 = vmul.f32 %v4752_v43, %v2891_v51 }
0x1820   : > { %v2893_v63 = vadd.f32 %v4752_v43, %v2892_v27 }
0x1822   : > { %v2897_v37 = vsel %vm2896_vm0, %v4752_v43, %v2893_v63 }
0x1823   : > { %v2902_v38 = vsel %vm2899_vm8, %v2901_v56, %v2897_v37 }
0x1878   : > { %v2906_v32 = vpop.permute.xlu1 %2905  ;;  %v3040_v5 = vpop.f32.mrf.mxu1 }
0x1879   : > { %v2908_v6 = vmul.f32 %v2906_v32, %v2902_v38  ;;  %v3041_v46 = vadd.f32 %v5809_v50, %v3040_v5  ;;  %v2915_v32 = vsub.f32 1.0, %v2902_v38 }
0x187b   : > { %2910 = vrot.lane.b32.xlu0 %v2908_v6, %s6494_s29  ;;  %3106 = vrot.lane.b32.xlu1 %v3041_v46, %s4931_s30  ;;  %v2921_v6 = vmul.f32 %v2902_v38, %v5886_v21 }
0x187c   : > { %3083 = vrot.lane.b32.xlu2 %v3041_v46, %s4930_s27 }
0x1883   : > { %2969 = vperm.xlu0 %4616, %v2967_v47  }
0x18d6   : > { %v3084_v31 = vpop.permute.xlu2 %3083 }
0x18d7   : > { %v3086_v34 = vadd.f32 %v3084_v31, %v2992_v20 }
0x18d9   : > { %v4513_v14 = vmul.f32 -1.442695, %v3086_v34 }
0x18db   : > { %4753 = vpow2.f32 %v4513_v14 }
0x18e1   : > { %v4754_v52 = vpop.eup %4753 }
0x18e2   : > { %v3090_v41 = vadd.f32 1.0, %v4754_v52 }
0x18e4   : > { %4755 = vrcp.f32 %v3090_v41  ;;  %v3102_v43 = vand.u32 2147483648, %v3090_v41  ;;  %v3100_v12 = vand.u32 2147483647, %v3090_v41  ;;  %vm3096_vm13 = vweird.f32 %v3090_v41 }
0x18e6   : > { %v3103_v27 = vor.u32 1.1754944e-38, %v3102_v43  ;;  %vm3101_vm0 = vcmp.eq.f32.partialorder %v3100_v12, 8.507059e+37 }
0x18ea   : > { %v4756_v45 = vpop.eup %4755 }
0x18eb   : > { %v3092_v59 = vmul.f32 %v4756_v45, %v3090_v41  ;;  %vm3097_vm1 = vweird.f32 %v4756_v45 }
0x18ec   : > { %vm3098_vm11 = vmor %vm3096_vm13, %vm3097_vm1 }
0x18ed   : > { %v3093_v10 = vsub.f32 1.0, %v3092_v59  ;;  %v2911_v48 = vpop.permute.xlu0 %2910  ;;  %v3107_v54 = vpop.permute.xlu1 %3106 }
0x18ee   : > { %v2913_v49 = vadd.f32 %v2911_v48, %v2831_v42 }
0x18ef   : > { %v3094_v51 = vmul.f32 %v4756_v45, %v3093_v10 }
0x18f0   : > { %4757 = vtanh.f32 %v2913_v49  ;;  %v2991_v49 = vld [vmem:[#allocation5 + $0x8] ss:$16 sm:$0x3] }
0x18f1   : > { %v3095_v1 = vadd.f32 %v4756_v45, %v3094_v51 }
0x18f3   : > { %v3099_v63 = vsel %vm3098_vm11, %v4756_v45, %v3095_v1 }
0x18f4   : > { %v3104_v17 = vsel %vm3101_vm0, %v3103_v27, %v3099_v63 }
0x18f5   : > { %v3109_v37 = vmul.f32 %v3107_v54, %v3104_v17  ;;  %v5921_v5 = vpop.permute.xlu0 %2969  ;;  %v3116_v41 = vsub.f32 1.0, %v3104_v17 }
0x18f6   : > { %v4758_v56 = vpop.eup %4757  ;;  %vm2971_vm8 = vcmp.eq.s32.totalorder %v5921_v5, 1 }
0x18f7   : > { %3111 = vrot.lane.b32.xlu1 %v3109_v37, %s6494_s29  ;;  %2917 = vrot.lane.b32.xlu2 %v4758_v56, %s6495_s23 }
0x1951   : > { %v2918_v42 = vpop.permute.xlu2 %2917 }
0x1952   : > { %v2920_v46 = vmul.f32 %v2918_v42, %v2915_v32 }
0x1954   : > { %v5924_v47 = vadd.f32 %v2921_v6, %v2920_v46 }
0x1956   : > { %v5931_v31 = vsel %vm2971_vm8, %v5924_v47, %v5886_v21  ;;  %v3122_v21 = vmul.f32 %v3104_v17, %v5904_v60 }
0x1957   : > { %2994 = vrot.lane.b32.xlu2 %v5931_v31, %s6495_s23 }
0x1969   : > { %v3112_v34 = vpop.permute.xlu1 %3111 }
0x196a   : > { %v3114_v14 = vadd.f32 %v3112_v34, %v2992_v20 }
0x196c   : > { %4759 = vtanh.f32 %v3114_v14 }
0x1972   : > { %v4760_v52 = vpop.eup %4759 }
0x1973   : > { %3118 = vrot.lane.b32.xlu0 %v4760_v52, %s6495_s23 }
0x19b1   : > { %v2995_v38 = vpop.permute.xlu2 %2994 }
0x19b2   : > { %4510 = vmatmul.msk.f32.vlgmr.msra.gmra.mxu0 %vm662_vm2, %v2995_v38 }
0x19b3   : > { %3600 = vmatpush.msra.mxu0 %v5748_v11 }
0x19b5   : > { %3601 = vmatpush.msra.mxu0 %v5754_v18 }
0x19e5   : > { %v3119_v45 = vpop.permute.xlu0 %3118 }
0x19e6   : > { %v3121_v59 = vmul.f32 %v3119_v45, %v3116_v41 }
0x19e8   : > { %v5940_v10 = vadd.f32 %v3122_v21, %v3121_v59 }
0x19ea   : > { %v5946_v20 = vsel %vm2971_vm8, %v5940_v10, %v5904_v60 }
0x19eb   : > { %3166 = vrot.lane.b32.xlu1 %v5946_v20, %s6496_s28 }
0x1a2f   : > { %v3015_v48 = vpop.f32.mrf.mxu0 }
0x1a30   : > { %v3016_v43 = vadd.f32 %v5862_v0, %v3015_v48  ;;  %v3139_v48 = vld [vmem:[#allocation5 + $0x6] ss:$16 sm:$0x3] }
0x1a32   : > { %3064 = vrot.lane.b32.xlu2 %v3016_v43, %s4935_s1  ;;  %v3043_v51 = vadd.f32 %v3016_v43, %v2991_v49 }
0x1a34   : > { %v4512_v1 = vmul.f32 -1.442695, %v3043_v51 }
0x1a36   : > { %4761 = vpow2.f32 %v4512_v1 }
0x1a3c   : > { %v4762_v60 = vpop.eup %4761 }
0x1a3d   : > { %v3047_v27 = vadd.f32 1.0, %v4762_v60 }
0x1a3f   : > { %4763 = vrcp.f32 %v3047_v27  ;;  %v3059_v32 = vand.u32 2147483648, %v3047_v27  ;;  %vm3053_vm13 = vweird.f32 %v3047_v27  ;;  %v3057_v42 = vand.u32 2147483647, %v3047_v27 }
0x1a41   : > { %v3060_v46 = vor.u32 1.1754944e-38, %v3059_v32  ;;  %vm3058_vm0 = vcmp.eq.f32.partialorder %v3057_v42, 8.507059e+37 }
0x1a45   : > { %v4764_v63 = vpop.eup %4763 }
0x1a46   : > { %v3049_v54 = vmul.f32 %v4764_v63, %v3047_v27  ;;  %vm3054_vm1 = vweird.f32 %v4764_v63 }
0x1a47   : > { %vm3055_vm11 = vmor %vm3053_vm13, %vm3054_vm1 }
0x1a48   : > { %v3050_v17 = vsub.f32 1.0, %v3049_v54 }
0x1a4a   : > { %v3051_v37 = vmul.f32 %v4764_v63, %v3050_v17 }
0x1a4c   : > { %v3052_v56 = vadd.f32 %v4764_v63, %v3051_v37 }
0x1a4e   : > { %v3056_v6 = vsel %vm3055_vm11, %v4764_v63, %v3052_v56 }
0x1a4f   : > { %v3061_v14 = vsel %vm3058_vm0, %v3060_v46, %v3056_v6 }
0x1a50   : > { %v3074_v27 = vsub.f32 1.0, %v3061_v14  ;;  %v3080_v54 = vmul.f32 %v3061_v14, %v5931_v31 }
0x1a5d   : > { %v3167_v12 = vpop.permute.xlu1 %3166 }
0x1a5e   : > { %4515 = vmatmul.msk.f32.vlgmr.msra.gmra.mxu3 %vm662_vm2, %v3167_v12 }
0x1a5f   : > { %3772 = vmatpush.msra.mxu3 %v5735_v8 }
0x1a61   : > { %3773 = vmatpush.msra.mxu3 %v5741_v13 }
0x1a8c   : > { %v3065_v34 = vpop.permute.xlu2 %3064 }
0x1a8d   : > { %v3067_v52 = vmul.f32 %v3065_v34, %v3061_v14 }
0x1a8f   : > { %3069 = vrot.lane.b32.xlu0 %v3067_v52, %s6494_s29 }
0x1ae1   : > { %v3187_v38 = vpop.f32.mrf.mxu3 }
0x1ae2   : > { %v3188_v41 = vadd.f32 %v5809_v50, %v3187_v38 }
0x1ae4   : > { %3253 = vrot.lane.b32.xlu0 %v3188_v41, %s4931_s30  ;;  %3230 = vrot.lane.b32.xlu1 %v3188_v41, %s4930_s27 }
0x1b01   : > { %v3070_v45 = vpop.permute.xlu0 %3069 }
0x1b02   : > { %v3072_v21 = vadd.f32 %v3070_v45, %v2991_v49 }
0x1b04   : > { %4765 = vtanh.f32 %v3072_v21 }
0x1b0a   : > { %v4766_v59 = vpop.eup %4765 }
0x1b0b   : > { %3076 = vrot.lane.b32.xlu2 %v4766_v59, %s6495_s23 }
0x1b56   : > { %v3231_v43 = vpop.permute.xlu1 %3230  ;;  %v3254_v45 = vpop.permute.xlu0 %3253 }
0x1b57   : > { %v3233_v51 = vadd.f32 %v3231_v43, %v3139_v48 }
0x1b59   : > { %v4517_v12 = vmul.f32 -1.442695, %v3233_v51 }
0x1b5b   : > { %4767 = vpow2.f32 %v4517_v12 }
0x1b61   : > { %v4768_v1 = vpop.eup %4767 }
0x1b62   : > { %v3237_v60 = vadd.f32 1.0, %v4768_v1 }
0x1b64   : > { %4769 = vrcp.f32 %v3237_v60  ;;  %v3249_v6 = vand.u32 2147483648, %v3237_v60  ;;  %v3247_v34 = vand.u32 2147483647, %v3237_v60  ;;  %vm3243_vm13 = vweird.f32 %v3237_v60 }
0x1b65   : > { %v3077_v63 = vpop.permute.xlu2 %3076 }
0x1b66   : > { %v3079_v17 = vmul.f32 %v3077_v63, %v3074_v27  ;;  %v3250_v52 = vor.u32 1.1754944e-38, %v3249_v6  ;;  %vm3248_vm0 = vcmp.eq.f32.partialorder %v3247_v34, 8.507059e+37 }
0x1b68   : > { %v5961_v37 = vadd.f32 %v3080_v54, %v3079_v17 }
0x1b6a   : > { %v4770_v49 = vpop.eup %4769  ;;  %v5967_v56 = vsel %vm2982_vm9, %v5961_v37, %v5931_v31 }
0x1b6b   : > { %v3239_v32 = vmul.f32 %v4770_v49, %v3237_v60  ;;  %3141 = vrot.lane.b32.xlu1 %v5967_v56, %s6495_s23  ;;  %vm3244_vm1 = vweird.f32 %v4770_v49 }
0x1b6c   : > { %vm3245_vm11 = vmor %vm3243_vm13, %vm3244_vm1 }
0x1b6d   : > { %v3240_v42 = vsub.f32 1.0, %v3239_v32 }
0x1b6f   : > { %v3241_v46 = vmul.f32 %v4770_v49, %v3240_v42 }
0x1b71   : > { %v3242_v14 = vadd.f32 %v4770_v49, %v3241_v46 }
0x1b73   : > { %v3246_v38 = vsel %vm3245_vm11, %v4770_v49, %v3242_v14 }
0x1b74   : > { %v3251_v41 = vsel %vm3248_vm0, %v3250_v52, %v3246_v38 }
0x1b75   : > { %v3256_v21 = vmul.f32 %v3254_v45, %v3251_v41  ;;  %v3263_v12 = vsub.f32 1.0, %v3251_v41  ;;  %v3269_v60 = vmul.f32 %v3251_v41, %v5946_v20 }
0x1b77   : > { %3258 = vrot.lane.b32.xlu2 %v3256_v21, %s6494_s29 }
0x1bd1   : > { %v3259_v31 = vpop.permute.xlu2 %3258 }
0x1bd2   : > { %v3261_v59 = vadd.f32 %v3259_v31, %v3139_v48 }
0x1bd4   : > { %4771 = vtanh.f32 %v3261_v59 }
0x1bda   : > { %v4772_v43 = vpop.eup %4771 }
0x1bdb   : > { %3265 = vrot.lane.b32.xlu0 %v4772_v43, %s6495_s23 }
0x1bdd   : > { %v3142_v51 = vpop.permute.xlu1 %3141 }
0x1bde   : > { %4514 = vmatmul.msk.f32.vlgmr.msra.gmra.mxu2 %vm662_vm2, %v3142_v51 }
0x1bdf   : > { %3747 = vmatpush.msra.mxu2 %v5748_v11 }
0x1be1   : > { %3748 = vmatpush.msra.mxu2 %v5754_v18  ;;  %v3138_v18 = vld [vmem:[#allocation5 + $0x9] ss:$16 sm:$0x3] }
0x1c4d   : > { %v3266_v1 = vpop.permute.xlu0 %3265 }
0x1c4e   : > { %v3268_v27 = vmul.f32 %v3266_v1, %v3263_v12 }
0x1c50   : > { %v5977_v63 = vadd.f32 %v3269_v60, %v3268_v27 }
0x1c52   : > { %v5983_v48 = vsel %vm2810_vm15, %v5977_v63, %v5946_v20 }
0x1c53   : > { %3313 = vrot.lane.b32.xlu1 %v5983_v48, %s6496_s28 }
0x1c61   : > { %v3162_v54 = vpop.f32.mrf.mxu2 }
0x1c62   : > { %v3163_v11 = vadd.f32 %v5862_v0, %v3162_v54  ;;  %v3286_v54 = vld [vmem:[#allocation5 + $0x5] ss:$16 sm:$0x3] }
0x1c64   : > { %3211 = vrot.lane.b32.xlu2 %v3163_v11, %s4935_s1  ;;  %v3190_v17 = vadd.f32 %v3163_v11, %v3138_v18 }
0x1c66   : > { %v4516_v49 = vmul.f32 -1.442695, %v3190_v17 }
0x1c68   : > { %4773 = vpow2.f32 %v4516_v49 }
0x1c6e   : > { %v4774_v32 = vpop.eup %4773 }
0x1c6f   : > { %v3194_v42 = vadd.f32 1.0, %v4774_v32 }
0x1c71   : > { %4775 = vrcp.f32 %v3194_v42  ;;  %v3206_v52 = vand.u32 2147483648, %v3194_v42  ;;  %vm3200_vm13 = vweird.f32 %v3194_v42  ;;  %v3204_v38 = vand.u32 2147483647, %v3194_v42 }
0x1c73   : > { %v3207_v45 = vor.u32 1.1754944e-38, %v3206_v52  ;;  %vm3205_vm0 = vcmp.eq.f32.partialorder %v3204_v38, 8.507059e+37 }
0x1c77   : > { %v4776_v6 = vpop.eup %4775 }
0x1c78   : > { %v3196_v46 = vmul.f32 %v4776_v6, %v3194_v42  ;;  %vm3201_vm1 = vweird.f32 %v4776_v6 }
0x1c79   : > { %vm3202_vm11 = vmor %vm3200_vm13, %vm3201_vm1 }
0x1c7a   : > { %v3197_v34 = vsub.f32 1.0, %v3196_v46 }
0x1c7c   : > { %v3198_v20 = vmul.f32 %v4776_v6, %v3197_v34 }
0x1c7e   : > { %v3199_v14 = vadd.f32 %v4776_v6, %v3198_v20 }
0x1c80   : > { %v3203_v41 = vsel %vm3202_vm11, %v4776_v6, %v3199_v14 }
0x1c81   : > { %v3208_v21 = vsel %vm3205_vm0, %v3207_v45, %v3203_v41 }
0x1c82   : > { %v3227_v42 = vmul.f32 %v3208_v21, %v5967_v56 }
0x1cbe   : > { %v3212_v31 = vpop.permute.xlu2 %3211 }
0x1cbf   : > { %v3214_v59 = vmul.f32 %v3212_v31, %v3208_v21 }
0x1cc1   : > { %3216 = vrot.lane.b32.xlu0 %v3214_v59, %s6494_s29 }
0x1cc5   : > { %v3314_v43 = vpop.permute.xlu1 %3313 }
0x1cc6   : > { %4519 = vmatmul.msk.f32.vlgmr.msrb.gmra.mxu1 %vm662_vm2, %v3314_v43 }
0x1cc7   : > { %3919 = vmatpush.msrb.mxu1 %v5735_v8 }
0x1cc9   : > { %3920 = vmatpush.msrb.mxu1 %v5741_v13 }
0x1d33   : > { %v3217_v51 = vpop.permute.xlu0 %3216 }
0x1d34   : > { %v3219_v12 = vadd.f32 %v3217_v51, %v3138_v18  ;;  %v3221_v18 = vsub.f32 1.0, %v3208_v21 }
0x1d36   : > { %4777 = vtanh.f32 %v3219_v12 }
0x1d3c   : > { %v4778_v1 = vpop.eup %4777 }
0x1d3d   : > { %3223 = vrot.lane.b32.xlu1 %v4778_v1, %s6495_s23 }
0x1d43   : > { %v3334_v60 = vpop.f32.mrf.mxu1 }
0x1d44   : > { %v3335_v27 = vadd.f32 %v5809_v50, %v3334_v60 }
0x1d46   : > { %3377 = vrot.lane.b32.xlu2 %v3335_v27, %s4930_s27  ;;  %3400 = vrot.lane.b32.xlu0 %v3335_v27, %s4931_s30 }
0x1da0   : > { %v3378_v11 = vpop.permute.xlu2 %3377 }
0x1da1   : > { %v3380_v17 = vadd.f32 %v3378_v11, %v3286_v54  ;;  %v6014_v11 = vld [vmem:[%s6443_s14 + $0x8] sm:$0xff] }
0x1da3   : > { %v4521_v49 = vmul.f32 -1.442695, %v3380_v17  ;;  %v6020_v17 = vld [vmem:[%s6443_s14] sm:$0xff] }
0x1da5   : > { %4779 = vpow2.f32 %v4521_v49 }
0x1dab   : > { %v4780_v8 = vpop.eup %4779 }
0x1dac   : > { %v3384_v13 = vadd.f32 1.0, %v4780_v8 }
0x1dae   : > { %4781 = vrcp.f32 %v3384_v13  ;;  %v3396_v38 = vand.u32 2147483648, %v3384_v13  ;;  %v3394_v45 = vand.u32 2147483647, %v3384_v13  ;;  %vm3390_vm13 = vweird.f32 %v3384_v13 }
0x1daf   : > { %v3224_v32 = vpop.permute.xlu1 %3223 }
0x1db0   : > { %v3226_v6 = vmul.f32 %v3224_v32, %v3221_v18  ;;  %v3397_v31 = vor.u32 1.1754944e-38, %v3396_v38  ;;  %vm3395_vm0 = vcmp.eq.f32.partialorder %v3394_v45, 8.507059e+37 }
0x1db2   : > { %v5998_v46 = vadd.f32 %v3227_v42, %v3226_v6 }
0x1db4   : > { %v4782_v34 = vpop.eup %4781  ;;  %v6004_v20 = vsel %vm6470_vm7, %v5998_v46, %v5967_v56 }
0x1db5   : > { %3288 = vrot.lane.b32.xlu1 %v6004_v20, %s6495_s23  ;;  %v3386_v14 = vmul.f32 %v4782_v34, %v3384_v13  ;;  %vm3391_vm1 = vweird.f32 %v4782_v34 }
0x1db6   : > { %vm3392_vm11 = vmor %vm3390_vm13, %vm3391_vm1 }
0x1db7   : > { %v3387_v52 = vsub.f32 1.0, %v3386_v14 }
0x1db8   : > { %v3401_v43 = vpop.permute.xlu0 %3400 }
0x1db9   : > { %v3388_v41 = vmul.f32 %v4782_v34, %v3387_v52 }
0x1dbb   : > { %v3389_v21 = vadd.f32 %v4782_v34, %v3388_v41 }
0x1dbd   : > { %v3393_v59 = vsel %vm3392_vm11, %v4782_v34, %v3389_v21  ;;  %v3285_v34 = vld [vmem:[#allocation5 + $0xa] ss:$16 sm:$0x3] }
0x1dbe   : > { %v3398_v51 = vsel %vm3395_vm0, %v3397_v31, %v3393_v59 }
0x1dbf   : > { %v3403_v12 = vmul.f32 %v3401_v43, %v3398_v51  ;;  %v3416_v8 = vmul.f32 %v3398_v51, %v5983_v48 }
0x1dc1   : > { %3405 = vrot.lane.b32.xlu2 %v3403_v12, %s6494_s29 }
0x1e1b   : > { %v3406_v56 = vpop.permute.xlu2 %3405 }
0x1e1c   : > { %v3408_v1 = vadd.f32 %v3406_v56, %v3286_v54  ;;  %v3410_v54 = vsub.f32 1.0, %v3398_v51 }
0x1e1e   : > { %4783 = vtanh.f32 %v3408_v1 }
0x1e24   : > { %v4784_v60 = vpop.eup %4783 }
0x1e25   : > { %3412 = vrot.lane.b32.xlu0 %v4784_v60, %s6495_s23 }
0x1e27   : > { %v3289_v27 = vpop.permute.xlu1 %3288 }
0x1e28   : > { %4518 = vmatmul.msk.f32.vlgmr.msrb.gmra.mxu0 %vm662_vm2, %v3289_v27 }
0x1e29   : > { %3894 = vmatpush.msrb.mxu0 %v6014_v11 }
0x1e2b   : > { %3895 = vmatpush.msrb.mxu0 %v6020_v17 }
0x1e97   : > { %v3413_v49 = vpop.permute.xlu0 %3412 }
0x1e98   : > { %v3415_v13 = vmul.f32 %v3413_v49, %v3410_v54  ;;  %v4860_v49 = vld [vmem:[%s6445_s16 + $0x8] sm:$0xff] }
0x1e9a   : > { %v6024_v18 = vadd.f32 %v3416_v8, %v3415_v13  ;;  %v4861_v8 = vld [vmem:[%s6445_s16] sm:$0xff] }
0x1e9c   : > { %v6030_v32 = vsel %vm2649_vm3, %v6024_v18, %v5983_v48 }
0x1e9d   : > { %3460 = vrot.lane.b32.xlu1 %v6030_v32, %s6496_s28 }
0x1ea5   : > { %v3309_v42 = vpop.f32.mrf.mxu0 }
0x1ea6   : > { %v3310_v6 = vadd.f32 %v5862_v0, %v3309_v42 }
0x1ea8   : > { %3358 = vrot.lane.b32.xlu2 %v3310_v6, %s4935_s1  ;;  %v3337_v14 = vadd.f32 %v3310_v6, %v3285_v34 }
0x1eaa   : > { %v4520_v52 = vmul.f32 -1.442695, %v3337_v14 }
0x1eac   : > { %4785 = vpow2.f32 %v4520_v52 }
0x1eb2   : > { %v4786_v38 = vpop.eup %4785 }
0x1eb3   : > { %v3341_v41 = vadd.f32 1.0, %v4786_v38  ;;  %v3433_v38 = vld [vmem:[#allocation5 + $0x4] ss:$16 sm:$0x3] }
0x1eb5   : > { %4787 = vrcp.f32 %v3341_v41  ;;  %v3353_v43 = vand.u32 2147483648, %v3341_v41  ;;  %vm3347_vm13 = vweird.f32 %v3341_v41  ;;  %v3351_v51 = vand.u32 2147483647, %v3341_v41 }
0x1eb7   : > { %v3354_v56 = vor.u32 1.1754944e-38, %v3353_v43  ;;  %vm3352_vm0 = vcmp.eq.f32.partialorder %v3351_v51, 8.507059e+37 }
0x1ebb   : > { %v4788_v45 = vpop.eup %4787 }
0x1ebc   : > { %v3343_v21 = vmul.f32 %v4788_v45, %v3341_v41  ;;  %vm3348_vm1 = vweird.f32 %v4788_v45 }
0x1ebd   : > { %vm3349_vm11 = vmor %vm3347_vm13, %vm3348_vm1 }
0x1ebe   : > { %v3344_v31 = vsub.f32 1.0, %v3343_v21 }
0x1ec0   : > { %v3345_v48 = vmul.f32 %v4788_v45, %v3344_v31 }
0x1ec2   : > { %v3346_v59 = vadd.f32 %v4788_v45, %v3345_v48 }
0x1ec4   : > { %v3350_v12 = vsel %vm3349_vm11, %v4788_v45, %v3346_v59 }
0x1ec5   : > { %v3355_v1 = vsel %vm3352_vm0, %v3354_v56, %v3350_v12 }
0x1ec6   : > { %v3368_v21 = vsub.f32 1.0, %v3355_v1  ;;  %v3374_v59 = vmul.f32 %v3355_v1, %v6004_v20 }
0x1f02   : > { %v3359_v60 = vpop.permute.xlu2 %3358 }
0x1f03   : > { %v3361_v27 = vmul.f32 %v3359_v60, %v3355_v1 }
0x1f05   : > { %3363 = vrot.lane.b32.xlu0 %v3361_v27, %s6494_s29 }
0x1f0f   : > { %v3461_v54 = vpop.permute.xlu1 %3460 }
0x1f10   : > { %4523 = vmatmul.msk.f32.vlgmr.msrb.gmra.mxu3 %vm662_vm2, %v3461_v54 }
0x1f11   : > { %4066 = vmatpush.msrb.mxu3 %v4860_v49 }
0x1f13   : > { %4067 = vmatpush.msrb.mxu3 %v4861_v8 }
0x1f77   : > { %v3364_v13 = vpop.permute.xlu0 %3363 }
0x1f78   : > { %v3366_v42 = vadd.f32 %v3364_v13, %v3285_v34 }
0x1f7a   : > { %4789 = vtanh.f32 %v3366_v42 }
0x1f80   : > { %v4790_v6 = vpop.eup %4789 }
0x1f81   : > { %3370 = vrot.lane.b32.xlu1 %v4790_v6, %s6495_s23 }
0x1f93   : > { %v3481_v14 = vpop.f32.mrf.mxu3 }
0x1f94   : > { %v3482_v52 = vadd.f32 %v5809_v50, %v3481_v14 }
0x1f96   : > { %3524 = vrot.lane.b32.xlu2 %v3482_v52, %s4930_s27  ;;  %3547 = vrot.lane.b32.xlu1 %v3482_v52, %s4931_s30 }
0x1ff0   : > { %v3525_v41 = vpop.permute.xlu2 %3524 }
0x1ff1   : > { %v3527_v45 = vadd.f32 %v3525_v41, %v3433_v38 }
0x1ff3   : > { %v4525_v31 = vmul.f32 -1.442695, %v3527_v45  ;;  %v3371_v48 = vpop.permute.xlu1 %3370 }
0x1ff4   : > { %v3373_v34 = vmul.f32 %v3371_v48, %v3368_v21 }
0x1ff5   : > { %4791 = vpow2.f32 %v4525_v31 }
0x1ff6   : > { %v6049_v43 = vadd.f32 %v3374_v59, %v3373_v34 }
0x1ff8   : > { %v6055_v50 = vsel %vm2660_vm14, %v6049_v43, %v6004_v20  ;;  %v3418_v33 = vsel %vm2660_vm14, %v6049_v43, 0.0 }
0x1ff9   : > { %3435 = vrot.lane.b32.xlu0 %v6055_v50, %s6495_s23 }
0x1ffb   : > { %v4792_v51 = vpop.eup %4791 }
0x1ffc   : > { %v3531_v12 = vadd.f32 1.0, %v4792_v51 }
0x1ffe   : > { %4793 = vrcp.f32 %v3531_v12  ;;  %v3543_v1 = vand.u32 2147483648, %v3531_v12  ;;  %v3541_v49 = vand.u32 2147483647, %v3531_v12  ;;  %vm3537_vm13 = vweird.f32 %v3531_v12 }
0x2000   : > { %v3544_v13 = vor.u32 1.1754944e-38, %v3543_v1  ;;  %vm3542_vm0 = vcmp.eq.f32.partialorder %v3541_v49, 8.507059e+37 }
0x2004   : > { %v4794_v56 = vpop.eup %4793 }
0x2005   : > { %v3533_v60 = vmul.f32 %v4794_v56, %v3531_v12  ;;  %vm3538_vm1 = vweird.f32 %v4794_v56  ;;  %v3432_v12 = vld [vmem:[#allocation5 + $0xb] ss:$16 sm:$0x3] }
0x2006   : > { %vm3539_vm11 = vmor %vm3537_vm13, %vm3538_vm1 }
0x2007   : > { %v3534_v27 = vsub.f32 1.0, %v3533_v60 }
0x2008   : > { %v3548_v20 = vpop.permute.xlu1 %3547 }
0x2009   : > { %v3535_v54 = vmul.f32 %v4794_v56, %v3534_v27 }
0x200b   : > { %v3536_v8 = vadd.f32 %v4794_v56, %v3535_v54 }
0x200d   : > { %v3540_v42 = vsel %vm3539_vm11, %v4794_v56, %v3536_v8 }
0x200e   : > { %v3545_v6 = vsel %vm3542_vm0, %v3544_v13, %v3540_v42 }
0x200f   : > { %v3550_v14 = vmul.f32 %v3548_v20, %v3545_v6  ;;  %v3557_v31 = vsub.f32 1.0, %v3545_v6  ;;  %v3563_v59 = vmul.f32 %v3545_v6, %v6030_v32 }
0x2011   : > { %3552 = vrot.lane.b32.xlu2 %v3550_v14, %s6494_s29 }
0x206b   : > { %v3553_v52 = vpop.permute.xlu2 %3552  ;;  %v3436_v41 = vpop.permute.xlu0 %3435 }
0x206c   : > { %v3555_v45 = vadd.f32 %v3553_v52, %v3433_v38  ;;  %4522 = vmatmul.msk.f32.vlgmr.msrb.gmra.mxu2 %vm662_vm2, %v3436_v41 }
0x206d   : > { %4041 = vmatpush.msrb.mxu2 %v6014_v11 }
0x206e   : > { %4795 = vtanh.f32 %v3555_v45 }
0x206f   : > { %4042 = vmatpush.msrb.mxu2 %v6020_v17 }
0x2074   : > { %v4796_v21 = vpop.eup %4795 }
0x2075   : > { %3559 = vrot.lane.b32.xlu0 %v4796_v21, %s6495_s23 }
0x20e7   : > { %v3560_v48 = vpop.permute.xlu0 %3559 }
0x20e8   : > { %v3562_v34 = vmul.f32 %v3560_v48, %v3557_v31 }
0x20ea   : > { %v6065_v51 = vadd.f32 %v3563_v59, %v3562_v34  ;;  %v6083_v34 = vld [vmem:[%s6446_s17] ss:$0 sm:$0xff] }
0x20ec   : > { %v6071_v38 = vsel %vm2488_vm4, %v6065_v51, %v6030_v32 }
0x20ed   : > { %3607 = vrot.lane.b32.xlu1 %v6071_v38, %s6496_s28 }
0x20ef   : > { %v3456_v11 = vpop.f32.mrf.mxu2 }
0x20f0   : > { %v3457_v17 = vadd.f32 %v5862_v0, %v3456_v11 }
0x20f2   : > { %3505 = vrot.lane.b32.xlu2 %v3457_v17, %s4935_s1  ;;  %v3484_v56 = vadd.f32 %v3457_v17, %v3432_v12 }
0x20f4   : > { %v4524_v60 = vmul.f32 -1.442695, %v3484_v56 }
0x20f6   : > { %4797 = vpow2.f32 %v4524_v60 }
0x20fc   : > { %v4798_v27 = vpop.eup %4797 }
0x20fd   : > { %v3488_v1 = vadd.f32 1.0, %v4798_v27 }
0x20ff   : > { %4799 = vrcp.f32 %v3488_v1  ;;  %v3500_v42 = vand.u32 2147483648, %v3488_v1  ;;  %vm3494_vm13 = vweird.f32 %v3488_v1  ;;  %v3498_v20 = vand.u32 2147483647, %v3488_v1 }
0x2101   : > { %v3501_v6 = vor.u32 1.1754944e-38, %v3500_v42  ;;  %vm3499_vm0 = vcmp.eq.f32.partialorder %v3498_v20, 8.507059e+37 }
0x2105   : > { %v4800_v54 = vpop.eup %4799 }
0x2106   : > { %v3490_v49 = vmul.f32 %v4800_v54, %v3488_v1  ;;  %vm3495_vm1 = vweird.f32 %v4800_v54 }
0x2107   : > { %vm3496_vm11 = vmor %vm3494_vm13, %vm3495_vm1 }
0x2108   : > { %v3491_v8 = vsub.f32 1.0, %v3490_v49 }
0x210a   : > { %v3492_v32 = vmul.f32 %v4800_v54, %v3491_v8 }
0x210c   : > { %v3493_v13 = vadd.f32 %v4800_v54, %v3492_v32 }
0x210e   : > { %v3497_v0 = vsel %vm3496_vm11, %v4800_v54, %v3493_v13  ;;  %v3580_v54 = vld [vmem:[#allocation5 + $0x3] ss:$16 sm:$0x3] }
0x210f   : > { %v3502_v14 = vsel %vm3499_vm0, %v3501_v6, %v3497_v0 }
0x2110   : > { %v3515_v17 = vsub.f32 1.0, %v3502_v14 }
0x214c   : > { %v3506_v52 = vpop.permute.xlu2 %3505 }
0x214d   : > { %v3508_v41 = vmul.f32 %v3506_v52, %v3502_v14 }
0x214f   : > { %3510 = vrot.lane.b32.xlu0 %v3508_v41, %s6494_s29 }
0x215f   : > { %v3608_v45 = vpop.permute.xlu1 %3607 }
0x2160   : > { %4527 = vmatmul.msk.f32.vlgmr.msra.gmra.mxu1 %vm662_vm2, %v3608_v45 }
0x21c1   : > { %v3511_v21 = vpop.permute.xlu0 %3510 }
0x21c2   : > { %v3513_v31 = vadd.f32 %v3511_v21, %v3432_v12  ;;  %v3521_v12 = vmul.f32 %v3502_v14, %v6055_v50 }
0x21c4   : > { %4801 = vtanh.f32 %v3513_v31 }
0x21ca   : > { %v4802_v48 = vpop.eup %4801 }
0x21cb   : > { %3517 = vrot.lane.b32.xlu1 %v4802_v48, %s6495_s23 }
0x21dd   : > { %v3628_v59 = vpop.f32.mrf.mxu1 }
0x21de   : > { %v3629_v11 = vadd.f32 %v6083_v34, %v3628_v59 }
0x21e0   : > { %3671 = vrot.lane.b32.xlu0 %v3629_v11, %s4930_s27  ;;  %3694 = vrot.lane.b32.xlu1 %v3629_v11, %s4931_s30 }
0x223d   : > { %v3518_v56 = vpop.permute.xlu1 %3517 }
0x223e   : > { %v3520_v60 = vmul.f32 %v3518_v56, %v3515_v17 }
0x2240   : > { %v6089_v27 = vadd.f32 %v3521_v12, %v3520_v60 }
0x2242   : > { %v6095_v1 = vsel %vm2499_vm10, %v6089_v27, %v6055_v50 }
0x2243   : > { %3582 = vrot.lane.b32.xlu2 %v6095_v1, %s6495_s23 }
0x2252   : > { %v3672_v49 = vpop.permute.xlu0 %3671  ;;  %v3695_v31 = vpop.permute.xlu1 %3694 }
0x2253   : > { %v3674_v8 = vadd.f32 %v3672_v49, %v3580_v54  ;;  %v6105_v49 = vld [vmem:[%s6444_s15] ss:$0 sm:$0xff] }
0x2255   : > { %v4529_v32 = vmul.f32 -1.442695, %v3674_v8 }
0x2257   : > { %4803 = vpow2.f32 %v4529_v32 }
0x225d   : > { %v4804_v13 = vpop.eup %4803 }
0x225e   : > { %v3678_v42 = vadd.f32 1.0, %v4804_v13 }
0x2260   : > { %4805 = vrcp.f32 %v3678_v42  ;;  %v3690_v14 = vand.u32 2147483648, %v3678_v42  ;;  %v3688_v41 = vand.u32 2147483647, %v3678_v42  ;;  %vm3684_vm13 = vweird.f32 %v3678_v42 }
0x2262   : > { %v3691_v45 = vor.u32 1.1754944e-38, %v3690_v14  ;;  %vm3689_vm0 = vcmp.eq.f32.partialorder %v3688_v41, 8.507059e+37 }
0x2266   : > { %v4806_v20 = vpop.eup %4805 }
0x2267   : > { %v3680_v0 = vmul.f32 %v4806_v20, %v3678_v42  ;;  %vm3685_vm1 = vweird.f32 %v4806_v20 }
0x2268   : > { %vm3686_vm11 = vmor %vm3684_vm13, %vm3685_vm1 }
0x2269   : > { %v3681_v6 = vsub.f32 1.0, %v3680_v0 }
0x226b   : > { %v3682_v52 = vmul.f32 %v4806_v20, %v3681_v6  ;;  %v3579_v6 = vld [vmem:[#allocation5 + $0xc] ss:$16 sm:$0x3] }
0x226d   : > { %v3683_v50 = vadd.f32 %v4806_v20, %v3682_v52 }
0x226f   : > { %v3687_v21 = vsel %vm3686_vm11, %v4806_v20, %v3683_v50 }
0x2270   : > { %v3692_v48 = vsel %vm3689_vm0, %v3691_v45, %v3687_v21 }
0x2271   : > { %v3697_v59 = vmul.f32 %v3695_v31, %v3692_v48  ;;  %v3704_v32 = vsub.f32 1.0, %v3692_v48  ;;  %v3710_v42 = vmul.f32 %v3692_v48, %v6071_v38 }
0x2273   : > { %3699 = vrot.lane.b32.xlu2 %v3697_v59, %s6494_s29 }
0x229d   : > { %v3583_v11 = vpop.permute.xlu2 %3582 }
0x229e   : > { %4526 = vmatmul.msk.f32.vlgmr.msra.gmra.mxu0 %vm662_vm2, %v3583_v11 }
0x229f   : > { %4203 = vmatpush.msra.mxu0 %v4176_v55 }
0x22cd   : > { %v3700_v17 = vpop.permute.xlu2 %3699 }
0x22ce   : > { %v3702_v56 = vadd.f32 %v3700_v17, %v3580_v54 }
0x22d0   : > { %4807 = vtanh.f32 %v3702_v56 }
0x22d6   : > { %v4808_v12 = vpop.eup %4807 }
0x22d7   : > { %3706 = vrot.lane.b32.xlu0 %v4808_v12, %s6495_s23 }
0x231b   : > { %v3603_v60 = vpop.f32.mrf.mxu0 }
0x231c   : > { %v3604_v8 = vadd.f32 %v6105_v49, %v3603_v60 }
0x231e   : > { %3652 = vrot.lane.b32.xlu1 %v3604_v8, %s4935_s1  ;;  %v3631_v14 = vadd.f32 %v3604_v8, %v3579_v6 }
0x2320   : > { %v4528_v52 = vmul.f32 -1.442695, %v3631_v14 }
0x2322   : > { %4809 = vpow2.f32 %v4528_v52 }
0x2328   : > { %v4810_v41 = vpop.eup %4809 }
0x2329   : > { %v3635_v50 = vadd.f32 1.0, %v4810_v41 }
0x232b   : > { %4811 = vrcp.f32 %v3635_v50  ;;  %v3647_v11 = vand.u32 2147483648, %v3635_v50  ;;  %vm3641_vm13 = vweird.f32 %v3635_v50 }
0x232d   : > { %v3648_v56 = vor.u32 1.1754944e-38, %v3647_v11 }
0x2331   : > { %v4812_v45 = vpop.eup %4811 }
0x2332   : > { %v3637_v21 = vmul.f32 %v4812_v45, %v3635_v50  ;;  %vm3642_vm1 = vweird.f32 %v4812_v45 }
0x2333   : > { %vm3643_vm11 = vmor %vm3641_vm13, %vm3642_vm1 }
0x2334   : > { %v3638_v31 = vsub.f32 1.0, %v3637_v21 }
0x2336   : > { %v3639_v48 = vmul.f32 %v4812_v45, %v3638_v31 }
0x2338   : > { %v3640_v59 = vadd.f32 %v4812_v45, %v3639_v48  ;;  %v3727_v48 = vld [vmem:[#allocation5 + $0x2] ss:$16 sm:$0x3] }
0x233a   : > { %v3644_v17 = vsel %vm3643_vm11, %v4812_v45, %v3640_v59 }
0x2349   : > { %v3707_v13 = vpop.permute.xlu0 %3706 }
0x234a   : > { %v3709_v20 = vmul.f32 %v3707_v13, %v3704_v32 }
0x234c   : > { %v6110_v54 = vadd.f32 %v3710_v42, %v3709_v20 }
0x234e   : > { %v6116_v0 = vsel %vm2327_vm12, %v6110_v54, %v6071_v38  ;;  %v3645_v38 = vand.u32 2147483647, %v3635_v50 }
0x234f   : > { %3754 = vrot.lane.b32.xlu2 %v6116_v0, %s6496_s28 }
0x2350   : > { %vm3646_vm0 = vcmp.eq.f32.partialorder %v3645_v38, 8.507059e+37 }
0x2351   : > { %v3649_v12 = vsel %vm3646_vm0, %v3648_v56, %v3644_v17 }
0x2352   : > { %v3662_v41 = vsub.f32 1.0, %v3649_v12  ;;  %v3668_v45 = vmul.f32 %v3649_v12, %v6095_v1 }
0x2390   : > { %v3653_v60 = vpop.permute.xlu1 %3652 }
0x2391   : > { %v3655_v8 = vmul.f32 %v3653_v60, %v3649_v12 }
0x2393   : > { %3657 = vrot.lane.b32.xlu0 %v3655_v8, %s6494_s29 }
0x23a9   : > { %v3755_v32 = vpop.permute.xlu2 %3754 }
0x23aa   : > { %4531 = vmatmul.msk.f32.vlgmr.msra.gmra.mxu3 %vm662_vm2, %v3755_v32 }
0x2405   : > { %v3658_v13 = vpop.permute.xlu0 %3657 }
0x2406   : > { %v3660_v42 = vadd.f32 %v3658_v13, %v3579_v6 }
0x2408   : > { %4813 = vtanh.f32 %v3660_v42 }
0x240e   : > { %v4814_v20 = vpop.eup %4813 }
0x240f   : > { %3664 = vrot.lane.b32.xlu1 %v4814_v20, %s6495_s23 }
0x242d   : > { %v3775_v14 = vpop.f32.mrf.mxu3 }
0x242e   : > { %v3776_v52 = vadd.f32 %v6083_v34, %v3775_v14 }
0x2430   : > { %3818 = vrot.lane.b32.xlu0 %v3776_v52, %s4930_s27  ;;  %3841 = vrot.lane.b32.xlu1 %v3776_v52, %s4931_s30 }
0x2481   : > { %v3665_v50 = vpop.permute.xlu1 %3664 }
0x2482   : > { %v3667_v21 = vmul.f32 %v3665_v50, %v3662_v41 }
0x2484   : > { %v6127_v31 = vadd.f32 %v3668_v45, %v3667_v21 }
0x2486   : > { %v6133_v6 = vsel %vm2338_vm5, %v6127_v31, %v6095_v1 }
0x2487   : > { %3729 = vrot.lane.b32.xlu2 %v6133_v6, %s6495_s23 }
0x24a2   : > { %v3819_v59 = vpop.permute.xlu0 %3818  ;;  %v3842_v52 = vpop.permute.xlu1 %3841 }
0x24a3   : > { %v3821_v11 = vadd.f32 %v3819_v59, %v3727_v48 }
0x24a5   : > { %v4533_v38 = vmul.f32 -1.442695, %v3821_v11 }
0x24a7   : > { %4815 = vpow2.f32 %v4533_v38 }
0x24ad   : > { %v4816_v17 = vpop.eup %4815 }
0x24ae   : > { %v3825_v56 = vadd.f32 1.0, %v4816_v17 }
0x24b0   : > { %4817 = vrcp.f32 %v3825_v56  ;;  %v3837_v32 = vand.u32 2147483648, %v3825_v56  ;;  %v3835_v42 = vand.u32 2147483647, %v3825_v56  ;;  %vm3831_vm13 = vweird.f32 %v3825_v56 }
0x24b2   : > { %v3838_v20 = vor.u32 1.1754944e-38, %v3837_v32  ;;  %vm3836_vm0 = vcmp.eq.f32.partialorder %v3835_v42, 8.507059e+37 }
0x24b6   : > { %v4818_v12 = vpop.eup %4817 }
0x24b7   : > { %v3827_v60 = vmul.f32 %v4818_v12, %v3825_v56  ;;  %vm3832_vm1 = vweird.f32 %v4818_v12 }
0x24b8   : > { %vm3833_vm11 = vmor %vm3831_vm13, %vm3832_vm1 }
0x24b9   : > { %v3828_v8 = vsub.f32 1.0, %v3827_v60 }
0x24bb   : > { %v3829_v13 = vmul.f32 %v4818_v12, %v3828_v8 }
0x24bd   : > { %v3830_v1 = vadd.f32 %v4818_v12, %v3829_v13  ;;  %v3726_v13 = vld [vmem:[#allocation5 + $0xd] ss:$16 sm:$0x3] }
0x24bf   : > { %v3834_v14 = vsel %vm3833_vm11, %v4818_v12, %v3830_v1 }
0x24c0   : > { %v3839_v41 = vsel %vm3836_vm0, %v3838_v20, %v3834_v14 }
0x24c1   : > { %v3844_v50 = vmul.f32 %v3842_v52, %v3839_v41  ;;  %v3851_v56 = vsub.f32 1.0, %v3839_v41  ;;  %v3857_v60 = vmul.f32 %v3839_v41, %v6116_v0 }
0x24c3   : > { %3846 = vrot.lane.b32.xlu2 %v3844_v50, %s6494_s29 }
0x24e1   : > { %v3730_v45 = vpop.permute.xlu2 %3729 }
0x24e2   : > { %4530 = vmatmul.msk.f32.vlgmr.msra.gmra.mxu2 %vm662_vm2, %v3730_v45 }
0x251d   : > { %v3847_v21 = vpop.permute.xlu2 %3846 }
0x251e   : > { %v3849_v59 = vadd.f32 %v3847_v21, %v3727_v48 }
0x2520   : > { %4819 = vtanh.f32 %v3849_v59 }
0x2526   : > { %v4820_v11 = vpop.eup %4819 }
0x2527   : > { %3853 = vrot.lane.b32.xlu1 %v4820_v11, %s6495_s23 }
0x2565   : > { %v3750_v38 = vpop.f32.mrf.mxu2 }
0x2566   : > { %v3751_v17 = vadd.f32 %v6105_v49, %v3750_v38 }
0x2568   : > { %3799 = vrot.lane.b32.xlu0 %v3751_v17, %s4935_s1  ;;  %v3778_v42 = vadd.f32 %v3751_v17, %v3726_v13 }
0x256a   : > { %v4532_v1 = vmul.f32 -1.442695, %v3778_v42 }
0x256c   : > { %4821 = vpow2.f32 %v4532_v1 }
0x2572   : > { %v4822_v20 = vpop.eup %4821 }
0x2573   : > { %v3782_v14 = vadd.f32 1.0, %v4822_v20 }
0x2575   : > { %4823 = vrcp.f32 %v3782_v14  ;;  %v3794_v59 = vand.u32 2147483648, %v3782_v14  ;;  %vm3788_vm13 = vweird.f32 %v3782_v14 }
0x2577   : > { %v3795_v38 = vor.u32 1.1754944e-38, %v3794_v59  ;;  %v3874_v59 = vld [vmem:[#allocation5 + $0x1] ss:$16 sm:$0x3] }
0x257b   : > { %v4824_v52 = vpop.eup %4823 }
0x257c   : > { %v3784_v41 = vmul.f32 %v4824_v52, %v3782_v14  ;;  %vm3789_vm1 = vweird.f32 %v4824_v52 }
0x257d   : > { %vm3790_vm11 = vmor %vm3788_vm13, %vm3789_vm1  ;;  %vm6497_vm1 = vcmp.eq.s32.totalorder %v5606_v9, 1 }
0x257e   : > { %v3785_v50 = vsub.f32 1.0, %v3784_v41 }
0x2580   : > { %v3786_v45 = vmul.f32 %v4824_v52, %v3785_v50 }
0x2582   : > { %v3787_v21 = vadd.f32 %v4824_v52, %v3786_v45 }
0x2584   : > { %v3791_v11 = vsel %vm3790_vm11, %v4824_v52, %v3787_v21 }
0x2599   : > { %v3854_v12 = vpop.permute.xlu1 %3853 }
0x259a   : > { %v3856_v8 = vmul.f32 %v3854_v12, %v3851_v56 }
0x259c   : > { %v6143_v32 = vadd.f32 %v3857_v60, %v3856_v8 }
0x259e   : > { %v6149_v48 = vsel %vm2166_vm6, %v6143_v32, %v6116_v0  ;;  %v3792_v0 = vand.u32 2147483647, %v3782_v14 }
0x259f   : > { %3901 = vrot.lane.b32.xlu0 %v6149_v48, %s6496_s28 }
0x25a0   : > { %vm3793_vm0 = vcmp.eq.f32.partialorder %v3792_v0, 8.507059e+37 }
0x25a1   : > { %v3796_v56 = vsel %vm3793_vm0, %v3795_v38, %v3791_v11 }
0x25a2   : > { %v3809_v52 = vsub.f32 1.0, %v3796_v56  ;;  %v3815_v50 = vmul.f32 %v3796_v56, %v6133_v6 }
0x25da   : > { %v3800_v17 = vpop.permute.xlu0 %3799 }
0x25db   : > { %v3802_v12 = vmul.f32 %v3800_v17, %v3796_v56 }
0x25dd   : > { %3804 = vrot.lane.b32.xlu2 %v3802_v12, %s6494_s29 }
0x2611   : > { %v3902_v60 = vpop.permute.xlu0 %3901 }
0x2612   : > { %4535 = vmatmul.msk.f32.vlgmr.msrb.gmra.mxu1 %vm662_vm2, %v3902_v60 }
0x2637   : > { %v3805_v8 = vpop.permute.xlu2 %3804 }
0x2638   : > { %v3807_v42 = vadd.f32 %v3805_v8, %v3726_v13 }
0x263a   : > { %4825 = vtanh.f32 %v3807_v42 }
0x2640   : > { %v4826_v1 = vpop.eup %4825 }
0x2641   : > { %3811 = vrot.lane.b32.xlu1 %v4826_v1, %s6495_s23 }
0x268f   : > { %v3922_v20 = vpop.f32.mrf.mxu1 }
0x2690   : > { %v3923_v14 = vadd.f32 %v6083_v34, %v3922_v20 }
0x2692   : > { %3988 = vrot.lane.b32.xlu1 %v3923_v14, %s4931_s30  ;;  %3965 = vrot.lane.b32.xlu0 %v3923_v14, %s4930_s27 }
0x26b3   : > { %v3812_v41 = vpop.permute.xlu1 %3811 }
0x26b4   : > { %v3814_v45 = vmul.f32 %v3812_v41, %v3809_v52 }
0x26b6   : > { %v6160_v21 = vadd.f32 %v3815_v50, %v3814_v45 }
0x26b8   : > { %v6166_v13 = vsel %vm6497_vm1, %v6160_v21, %v6133_v6 }
0x26b9   : > { %3876 = vrot.lane.b32.xlu2 %v6166_v13, %s6495_s23 }
0x2704   : > { %v3966_v0 = vpop.permute.xlu0 %3965  ;;  %v3989_v50 = vpop.permute.xlu1 %3988 }
0x2705   : > { %v3968_v11 = vadd.f32 %v3966_v0, %v3874_v59 }
0x2707   : > { %v4537_v38 = vmul.f32 -1.442695, %v3968_v11 }
0x2709   : > { %4827 = vpow2.f32 %v4537_v38 }
0x270f   : > { %v4828_v17 = vpop.eup %4827 }
0x2710   : > { %v3972_v12 = vadd.f32 1.0, %v4828_v17 }
0x2712   : > { %4829 = vrcp.f32 %v3972_v12  ;;  %v3984_v1 = vand.u32 2147483648, %v3972_v12  ;;  %v3982_v20 = vand.u32 2147483647, %v3972_v12  ;;  %vm3978_vm11 = vweird.f32 %v3972_v12 }
0x2713   : > { %v3877_v56 = vpop.permute.xlu2 %3876 }
0x2714   : > { %4534 = vmatmul.msk.f32.vlgmr.msrb.gmra.mxu0 %vm662_vm2, %v3877_v56  ;;  %v3985_v52 = vor.u32 1.1754944e-38, %v3984_v1  ;;  %vm3983_vm1 = vcmp.eq.f32.partialorder %v3982_v20, 8.507059e+37 }
0x2718   : > { %v4830_v60 = vpop.eup %4829 }
0x2719   : > { %v3974_v8 = vmul.f32 %v4830_v60, %v3972_v12  ;;  %vm3979_vm13 = vweird.f32 %v4830_v60  ;;  %v3873_v12 = vld [vmem:[#allocation5 + $0xe] ss:$16 sm:$0x3] }
0x271a   : > { %vm3980_vm0 = vmor %vm3978_vm11, %vm3979_vm13  ;;  %vm6498_vm11 = vcmp.eq.s32.totalorder %v5626_v35, 1 }
0x271b   : > { %v3975_v42 = vsub.f32 1.0, %v3974_v8 }
0x271d   : > { %v3976_v6 = vmul.f32 %v4830_v60, %v3975_v42 }
0x271f   : > { %v3977_v14 = vadd.f32 %v4830_v60, %v3976_v6 }
0x2721   : > { %v3981_v41 = vsel %vm3980_vm0, %v4830_v60, %v3977_v14 }
0x2722   : > { %v3986_v45 = vsel %vm3983_vm1, %v3985_v52, %v3981_v41 }
0x2723   : > { %v3991_v0 = vmul.f32 %v3989_v50, %v3986_v45 }
0x2725   : > { %3993 = vrot.lane.b32.xlu2 %v3991_v0, %s6494_s29  ;;  %v4004_v0 = vmul.f32 %v3986_v45, %v6149_v48 }
0x277f   : > { %v3994_v11 = vpop.permute.xlu2 %3993 }
0x2780   : > { %v3996_v38 = vadd.f32 %v3994_v11, %v3874_v59  ;;  %v3998_v59 = vsub.f32 1.0, %v3986_v45 }
0x2782   : > { %4831 = vtanh.f32 %v3996_v38 }
0x2788   : > { %v4832_v17 = vpop.eup %4831 }
0x2789   : > { %4000 = vrot.lane.b32.xlu1 %v4832_v17, %s6495_s23 }
0x2791   : > { %v3897_v56 = vpop.f32.mrf.mxu0 }
0x2792   : > { %v3898_v8 = vadd.f32 %v6105_v49, %v3897_v56 }
0x2794   : > { %3946 = vrot.lane.b32.xlu0 %v3898_v8, %s4935_s1  ;;  %v3925_v42 = vadd.f32 %v3898_v8, %v3873_v12 }
0x2796   : > { %v4536_v60 = vmul.f32 -1.442695, %v3925_v42 }
0x2798   : > { %4833 = vpow2.f32 %v4536_v60 }
0x279e   : > { %v4834_v1 = vpop.eup %4833 }
0x279f   : > { %v3929_v6 = vadd.f32 1.0, %v4834_v1 }
0x27a1   : > { %4835 = vrcp.f32 %v3929_v6  ;;  %v3941_v8 = vand.u32 2147483648, %v3929_v6  ;;  %vm3935_vm0 = vweird.f32 %v3929_v6  ;;  %v3939_v42 = vand.u32 2147483647, %v3929_v6 }
0x27a3   : > { %v3942_v45 = vor.u32 1.1754944e-38, %v3941_v8  ;;  %vm3940_vm7 = vcmp.eq.f32.partialorder %v3939_v42, 8.507059e+37 }
0x27a7   : > { %v4836_v20 = vpop.eup %4835 }
0x27a8   : > { %v3931_v14 = vmul.f32 %v4836_v20, %v3929_v6  ;;  %vm3936_vm13 = vweird.f32 %v4836_v20 }
0x27a9   : > { %vm3937_vm1 = vmor %vm3935_vm0, %vm3936_vm13 }
0x27aa   : > { %v3932_v52 = vsub.f32 1.0, %v3931_v14 }
0x27ac   : > { %v3933_v50 = vmul.f32 %v4836_v20, %v3932_v52 }
0x27ae   : > { %v3934_v17 = vadd.f32 %v4836_v20, %v3933_v50 }
0x27b0   : > { %v3938_v60 = vsel %vm3937_vm1, %v4836_v20, %v3934_v17 }
0x27b1   : > { %v3943_v1 = vsel %vm3940_vm7, %v3942_v45, %v3938_v60  ;;  %vm6499_vm7 = vcmp.eq.s32.totalorder %v5562_v24, 1  ;;  %v4021_v45 = vld [vmem:[#allocation5] ss:$16 sm:$0x3] }
0x27b2   : > { %v3962_v20 = vmul.f32 %v3943_v1, %v6166_v13 }
0x27fb   : > { %v4001_v41 = vpop.permute.xlu1 %4000 }
0x27fc   : > { %v4003_v11 = vmul.f32 %v4001_v41, %v3998_v59 }
0x27fe   : > { %v6176_v38 = vadd.f32 %v4004_v0, %v4003_v11  ;;  %v3956_v0 = vsub.f32 1.0, %v3943_v1 }
0x2800   : > { %v6182_v56 = vsel %vm6498_vm11, %v6176_v38, %v6149_v48 }
0x2801   : > { %4048 = vrot.lane.b32.xlu0 %v6182_v56, %s6496_s28 }
0x2806   : > { %v3947_v14 = vpop.permute.xlu0 %3946 }
0x2807   : > { %v3949_v52 = vmul.f32 %v3947_v14, %v3943_v1 }
0x2809   : > { %3951 = vrot.lane.b32.xlu2 %v3949_v52, %s6494_s29 }
0x2863   : > { %v3952_v59 = vpop.permute.xlu2 %3951 }
0x2864   : > { %v3954_v41 = vadd.f32 %v3952_v59, %v3873_v12 }
0x2866   : > { %4837 = vtanh.f32 %v3954_v41 }
0x286c   : > { %v4838_v48 = vpop.eup %4837 }
0x286d   : > { %3958 = vrot.lane.b32.xlu1 %v4838_v48, %s6495_s23 }
0x2873   : > { %v4049_v50 = vpop.permute.xlu0 %4048 }
0x2874   : > { %4539 = vmatmul.msk.f32.vlgmr.msrb.gmra.mxu3 %vm662_vm2, %v4049_v50 }
0x28df   : > { %v3959_v6 = vpop.permute.xlu1 %3958 }
0x28e0   : > { %v3961_v11 = vmul.f32 %v3959_v6, %v3956_v0 }
0x28e2   : > { %v6190_v17 = vadd.f32 %v3962_v20, %v3961_v11 }
0x28e4   : > { %v6196_v8 = vsel %vm6499_vm7, %v6190_v17, %v6166_v13 }
0x28e5   : > { %4023 = vrot.lane.b32.xlu2 %v6196_v8, %s6495_s23 }
0x28f7   : > { %v4069_v12 = vpop.f32.mrf.mxu3 }
0x28f8   : > { %v4070_v42 = vadd.f32 %v6083_v34, %v4069_v12 }
0x28fa   : > { %4135 = vrot.lane.b32.xlu1 %v4070_v42, %s4931_s30  ;;  %4112 = vrot.lane.b32.xlu0 %v4070_v42, %s4930_s27  ;;  %s636_s27 = sand.u32 1, %s4918_s22  }
0x28fb   : > { %s4378_s30 = sshll.u32 %s636_s27, 5  ;;  %s4284_s21 = scalar_lea.sflag [#allocation10], %s636_s27 }
0x293f   : > { %v4024_v60 = vpop.permute.xlu2 %4023 }
0x2940   : > { %4538 = vmatmul.msk.f32.vlgmr.msrb.gmra.mxu2 %vm662_vm2, %v4024_v60 }
0x296c   : > { %v4113_v1 = vpop.permute.xlu0 %4112  ;;  %v4136_v42 = vpop.permute.xlu1 %4135 }
0x296d   : > { %v4115_v14 = vadd.f32 %v4113_v1, %v4021_v45 }
0x296f   : > { %v4541_v52 = vmul.f32 -1.442695, %v4115_v14 }
0x2971   : > { %4839 = vpow2.f32 %v4541_v52 }
0x2977   : > { %v4840_v13 = vpop.eup %4839 }
0x2978   : > { %v4119_v59 = vadd.f32 1.0, %v4840_v13  ;;  %v2167_v13 = vsel %vm2166_vm6, %v5676_v23, 0.0  ;;  %v3865_v23 = vsel %vm2166_vm6, %v6143_v32, 0.0  ;;  %vm6500_vm6 = vcmask 123904  }
0x297a   : > { %4841 = vrcp.f32 %v4119_v59  ;;  %v4131_v0 = vand.u32 2147483648, %v4119_v59  ;;  %v4129_v6 = vand.u32 2147483647, %v4119_v59  ;;  %vm4125_vm11 = vweird.f32 %v4119_v59 }
0x297c   : > { %v4132_v11 = vor.u32 1.1754944e-38, %v4131_v0  ;;  %vm4130_vm1 = vcmp.eq.f32.partialorder %v4129_v6, 8.507059e+37 }
0x2980   : > { %v4842_v41 = vpop.eup %4841 }
0x2981   : > { %v4121_v48 = vmul.f32 %v4842_v41, %v4119_v59  ;;  %vm4126_vm13 = vweird.f32 %v4842_v41  ;;  %v6214_v59 = vld [vmem:[#allocation5 + $0xf] ss:$16 sm:$0x3] }
0x2982   : > { %vm4127_vm0 = vmor %vm4125_vm11, %vm4126_vm13 }
0x2983   : > { %v4122_v50 = vsub.f32 1.0, %v4121_v48 }
0x2985   : > { %v4123_v34 = vmul.f32 %v4842_v41, %v4122_v50 }
0x2987   : > { %v4124_v20 = vadd.f32 %v4842_v41, %v4123_v34 }
0x2989   : > { %v4128_v12 = vsel %vm4127_vm0, %v4842_v41, %v4124_v20 }
0x298a   : > { %v6204_v60 = vsel %vm4130_vm1, %v4132_v11, %v4128_v12  ;;  %vm6501_vm1 = vcmp.eq.s32.totalorder %v5626_v35, 1 }
0x298b   : > { %v4138_v1 = vmul.f32 %v4136_v42, %v6204_v60  ;;  %v4151_v4 = vmul.f32 %v6204_v60, %v6182_v56 }
0x298d   : > { %4140 = vrot.lane.b32.xlu0 %v4138_v1, %s6494_s29  ;;  %v2489_v1 = vsel %vm2488_vm4, %v5787_v44, 0.0 }
0x29c3   : > { %v4044_v14 = vpop.f32.mrf.mxu2 }
0x29c4   : > { %v4045_v52 = vadd.f32 %v6105_v49, %v4044_v14 }
0x29c6   : > { %4093 = vrot.lane.b32.xlu2 %v4045_v52, %s4935_s1  ;;  %v4072_v41 = vadd.f32 %v4045_v52, %v6214_v59  ;;  %s638_s1 = scalar_lea.vmem [#allocation9], %s4378_s30 }
0x29c7   : > { %s4297_s25 = sshll.u32 %s638_s1, 4  ;;  %s4298_s25 = int_to_ptr.vmem [resolvable:$true] %s4297_s25 }
0x29c8   : > { %v4540_v48 = vmul.f32 -1.442695, %v4072_v41 }
0x29ca   : > { %4843 = vpow2.f32 %v4540_v48  ;;  %v2972_v48 = vsel %vm2971_vm8, %v5924_v47, 0.0  ;;  %v2661_v47 = vsel %vm2660_vm14, %v5773_v36, 0.0  ;;  %v3565_v36 = vsel %vm2499_vm10, %v6089_v27, 0.0  ;;  %vm6509_vm14 = vmmov %vm6500_vm6 }
0x29ce   : > { %2169 = vrot.lane.b32.xlu2 %v2167_v13, %s6495_s23 }
0x29d0   : > { %v4844_v50 = vpop.eup %4843 }
0x29d1   : > { %v4076_v34 = vadd.f32 1.0, %v4844_v50 }
0x29d3   : > { %v4088_v14 = vand.u32 2147483648, %v4076_v34  ;;  %vm4082_vm13 = vweird.f32 %v4076_v34  ;;  %v4086_v52 = vand.u32 2147483647, %v4076_v34 }
0x29d5   : > { %v4089_v41 = vor.u32 1.1754944e-38, %v4088_v14  ;;  %vm4087_vm0 = vcmp.eq.f32.partialorder %v4086_v52, 8.507059e+37 }
0x29ff   : > { %v4141_v0 = vpop.permute.xlu0 %4140 }
0x2a00   : > { %v4143_v6 = vadd.f32 %v4141_v0, %v4021_v45  ;;  %v3424_v0 = vsel %vm2649_vm3, %v6024_v18, 0.0  ;;  %v3718_v18 = vsel %vm2327_vm12, %v6110_v54, 0.0  ;;  %v3277_v54 = vsel %vm2810_vm15, %v5977_v63, 0.0 }
0x2a01   : > { %vm6521_vm3 = vcmp.eq.s32.totalorder %v5839_v29, 1 }
0x2a02   : > { %4845 = vtanh.f32 %v4143_v6  ;;  %v3124_v6 = vsel %vm2982_vm9, %v5961_v37, 0.0  ;;  %v2339_v37 = vsel %vm2338_vm5, %v5658_v26, 0.0  ;;  %v4145_v26 = vsub.f32 1.0, %v6204_v60  ;;  %vm6505_vm9 = vmmov %vm6500_vm6 }
0x2a03   : > { %4847 = vrcp.f32 %v4076_v34  ;;  %v2822_v7 = vsel %vm6521_vm3, %v5842_v62, 0.0  ;;  %v3712_v62 = vsel %vm2338_vm5, %v6127_v31, 0.0  ;;  %vm6527_vm5 = vcmp.eq.s32.totalorder %v5535_v16, 1 }
0x2a08   : > { %v4846_v49 = vpop.eup %4845 }
0x2a09   : > { %4147 = vrot.lane.b32.xlu2 %v4846_v49, %s6495_s23  ;;  %v4848_v20 = vpop.eup %4847 }
0x2a0a   : > { %v4078_v11 = vmul.f32 %v4848_v20, %v4076_v34  ;;  %vm4083_vm7 = vweird.f32 %v4848_v20  ;;  %v2006_v34 = vsel %vm6501_vm1, %v5630_v39, 0.0  ;;  %v2811_v39 = vsel %vm2810_vm15, %v5879_v30, 0.0  ;;  %vm6504_vm15 = vmmov %vm6500_vm6 }
0x2a0b   : > { %vm4084_vm11 = vmor %vm4082_vm13, %vm4083_vm7  ;;  %v2500_v30 = vsel %vm2499_vm10, %v5706_v58, 0.0  ;;  %vm6502_vm7 = vcmp.eq.s32.totalorder %v5562_v24, 1  ;;  %vm6503_vm10 = vcmp.eq.s32.totalorder %v5583_v22, 1  ;;  %vm6506_vm13 = vcmp.eq.s32.totalorder %v5606_v9, 1 }
0x2a0c   : > { %v4079_v12 = vsub.f32 1.0, %v4078_v11  ;;  %v4006_v27 = vsel %vm6502_vm7, %v6190_v17, 0.0  ;;  %v2178_v56 = vsel %vm6506_vm13, %v5609_v25, 0.0  ;;  %vm6510_vm1 = vmmov %vm6500_vm6 }
0x2a0d   : > { %vm6511_vm7 = vmmov %vm6510_vm1 }
0x2a0e   : > { %v4080_v42 = vmul.f32 %v4848_v20, %v4079_v12 }
0x2a10   : > { %v4081_v45 = vadd.f32 %v4848_v20, %v4080_v42 }
0x2a11   : > { %3867 = vrot.lane.b32.xlu2 %v3865_v23, %s6496_s28 }
0x2a12   : > { %v4085_v13 = vsel %vm4084_vm11, %v4848_v20, %v4081_v45  ;;  %vm6507_vm11 = vmmov %vm6500_vm6 }
0x2a13   : > { %v6226_v32 = vsel %vm4087_vm0, %v4089_v41, %v4085_v13  ;;  %vm6508_vm0 = vmmov %vm6506_vm13  ;;  %v3130_v41 = vsel %vm2971_vm8, %v5940_v10, 0.0 }
0x2a14   : > { %v3859_v60 = vsel %vm6508_vm0, %v6160_v21, 0.0  ;;  %vm6515_vm13 = vmmov %vm6510_vm1  ;;  %vm6517_vm0 = vcmp.eq.s32.totalorder %v5626_v35, 1  ;;  %v4103_v31 = vsub.f32 1.0, %v6226_v32 }
0x2a15   : > { %v4012_v52 = vsel %vm6517_vm0, %v6176_v38, 0.0  ;;  %v3571_v38 = vsel %vm2488_vm4, %v6065_v51, 0.0  ;;  %vm6522_vm8 = vmmov %vm6521_vm3  ;;  %vm6523_vm4 = vcmp.eq.s32.totalorder %v5562_v24, 1  ;;  %v4170_v24 = vld [vmem:[%s6447_s18 + $0x8] sm:$0xff]  ;;  %v4175_v51 = vld [vmem:[%s6447_s18 + $0x10] sm:$0xff] }
0x2a16   : > { %v3271_v53 = vsel %vm6522_vm8, %v5998_v46, 0.0  ;;  %v2017_v40 = vsel %vm6523_vm4, %v5565_v61, 0.0  ;;  %v4169_v61 = vld [vmem:[%s6447_s18] sm:$0xff]  ;;  %4244 = vmatpush.msra.mxu1 %v4170_v24  ;;  %4204 = vmatpush.msra.mxu0 %v4175_v51  ;;  %vm6531_vm0 = vmmov %vm6510_vm1 }
0x2a17   : > { %vm6535_vm3 = vmmov %vm6531_vm0 }
0x2a18   : > { %4245 = vmatpush.msra.mxu1 %v4169_v61  ;;  %vm6536_vm8 = vmmov %vm6531_vm0 }
0x2a19   : > { %2491 = vrot.lane.b32.xlu2 %v2489_v1, %s6495_s23 }
0x2a20   : > { %v4094_v28 = vpop.permute.xlu2 %4093 }
0x2a21   : > { %v4096_v44 = vmul.f32 %v4094_v28, %v6226_v32  ;;  %2974 = vrot.lane.b32.xlu2 %v2972_v48, %s6495_s23  ;;  %v4109_v48 = vmul.f32 %v6226_v32, %v6196_v8 }
0x2a23   : > { %4098 = vrot.lane.b32.xlu1 %v4096_v44, %s6494_s29  ;;  %s4560_s29 = sshll.u32 %s5064_s2, 5 }
0x2a24   : > { %s4296_s0 = scalar_lea.hbm %s6449_s20, %s4560_s29  ;;  %s4884_s29 = scalar_lea.hbm %s6449_s20, 64 }
0x2a28   : > { %v2170_v50 = vpop.permute.xlu2 %2169 }
0x2a29   : > { %2172 = vst.msk [vmem:[#allocation6 + $0x4] sm:$0x3] %vm6500_vm6, %v2170_v50  ;;  %3426 = vrot.lane.b32.xlu2 %v3424_v0, %s6496_s28 }
0x2a2b   : > { %2008 = vrot.lane.b32.xlu1 %v2006_v34, %s6495_s23 }
0x2a31   : > { %2663 = vrot.lane.b32.xlu2 %v2661_v47, %s6496_s28 }
0x2a33   : > { %3720 = vrot.lane.b32.xlu1 %v3718_v18, %s6496_s28 }
0x2a39   : > { %3126 = vrot.lane.b32.xlu2 %v3124_v6, %s6495_s23 }
0x2a3b   : > { %2813 = vrot.lane.b32.xlu1 %v2811_v39, %s6495_s23 }
0x2a41   : > { %3567 = vrot.lane.b32.xlu2 %v3565_v36, %s6495_s23 }
0x2a43   : > { %3279 = vrot.lane.b32.xlu1 %v3277_v54, %s6496_s28 }
0x2a49   : > { %2341 = vrot.lane.b32.xlu2 %v2339_v37, %s6496_s28 }
0x2a4b   : > { %2502 = vrot.lane.b32.xlu1 %v2500_v30, %s6496_s28 }
0x2a51   : > { %4008 = vrot.lane.b32.xlu2 %v4006_v27, %s6495_s23 }
0x2a53   : > { %2985 = vrot.lane.b32.xlu1 %v2983_v57, %s6496_s28 }
0x2a63   : > { %v4148_v63 = vpop.permute.xlu2 %4147 }
0x2a64   : > { %v4150_v58 = vmul.f32 %v4148_v63, %v4145_v26 }
0x2a66   : > { %v4152_v49 = vadd.f32 %v4151_v4, %v4150_v58 }
0x2a68   : > { %v4159_v20 = vsel %vm6503_vm10, %v4152_v49, 0.0  ;;  %vm6512_vm10 = vmmov %vm6510_vm1  ;;  %v4626_v49 = vld [vmem:[%s6448_s19] ss:$0 sm:$0xff] }
0x2a69   : > { %4161 = vrot.lane.b32.xlu1 %v4159_v20, %s6496_s28 }
0x2a6b   : > { %v3868_v17 = vpop.permute.xlu2 %3867 }
0x2a6c   : > { %3870 = vst.msk [vmem:[#allocation7 + $0x4] sm:$0x3] %vm6504_vm15, %v3868_v17  ;;  %vm6513_vm15 = vmmov %vm6510_vm1 }
0x2a71   : > { %3420 = vrot.lane.b32.xlu1 %v3418_v33, %s6495_s23 }
0x2a73   : > { %v2492_v19 = vpop.permute.xlu2 %2491 }
0x2a74   : > { %2494 = vst.msk [vmem:[#allocation6 + $0x8] sm:$0x3] %vm6505_vm9, %v2492_v19  ;;  %vm6514_vm9 = vmmov %vm6510_vm1 }
0x2a79   : > { %2180 = vrot.lane.b32.xlu1 %v2178_v56, %s6496_s28 }
0x2a7b   : > { %v2975_v22 = vpop.permute.xlu2 %2974 }
0x2a7c   : > { %2977 = vst.msk [vmem:[#allocation6 + $0xe] sm:$0x3] %vm6507_vm11, %v2975_v22  ;;  %vm6516_vm11 = vmmov %vm6510_vm1 }
0x2a81   : > { %3861 = vrot.lane.b32.xlu1 %v3859_v60, %s6495_s23 }
0x2a83   : > { %v3427_v2 = vpop.permute.xlu2 %3426 }
0x2a84   : > { %3429 = vst.msk [vmem:[#allocation7 + $0xa] sm:$0x3] %vm6509_vm14, %v3427_v2  ;;  %vm6518_vm14 = vmmov %vm6510_vm1 }
0x2a8b   : > { %v2664_v43 = vpop.permute.xlu2 %2663 }
0x2a8c   : > { %2666 = vst.msk [vmem:[#allocation7 + $0x14] sm:$0x3] %vm6500_vm6, %v2664_v43  ;;  %vm6520_vm6 = vmmov %vm6510_vm1 }
0x2a93   : > { %v3127_v11 = vpop.permute.xlu2 %3126 }
0x2a94   : > { %3129 = vst.msk [vmem:[#allocation6 + $0x10] sm:$0x3] %vm6510_vm1, %v3127_v11 }
0x2a95   : > { %v4099_v25 = vpop.permute.xlu1 %4098 }
0x2a96   : > { %v4101_v23 = vadd.f32 %v4099_v25, %v6214_v59  ;;  %v2328_v59 = vsel %vm2327_vm12, %v5720_v15, 0.0  ;;  %vm6519_vm12 = vmmov %vm6510_vm1 }
0x2a98   : > { %4849 = vtanh.f32 %v4101_v23 }
0x2a9b   : > { %v3568_v12 = vpop.permute.xlu2 %3567 }
0x2a9c   : > { %3570 = vst.msk [vmem:[#allocation6 + $0x16] sm:$0x3] %vm6511_vm7, %v3568_v12  ;;  %vm6524_vm7 = vmmov %vm6510_vm1 }
0x2a9d   : > { %v2009_v9 = vpop.permute.xlu1 %2008 }
0x2a9e   : > { %v4850_v21 = vpop.eup %4849  ;;  %2011 = vst.msk [vmem:[#allocation6 + $0x2] sm:$0x3] %vm6512_vm10, %v2009_v9  ;;  %vm6525_vm10 = vmmov %vm6510_vm1 }
0x2a9f   : > { %4105 = vrot.lane.b32.xlu0 %v4850_v21, %s6495_s23 }
0x2aa3   : > { %v2342_v42 = vpop.permute.xlu2 %2341 }
0x2aa4   : > { %2344 = vst.msk [vmem:[#allocation7 + $0x18] sm:$0x3] %vm6513_vm15, %v2342_v42  ;;  %vm6526_vm15 = vmmov %vm6510_vm1 }
0x2aa5   : > { %v3721_v1 = vpop.permute.xlu1 %3720 }
0x2aa6   : > { %3723 = vst.msk [vmem:[#allocation7 + $0x6] sm:$0x3] %vm6514_vm9, %v3721_v1  ;;  %vm6528_vm9 = vmmov %vm6510_vm1 }
0x2aa7   : > { %2330 = vrot.lane.b32.xlu0 %v2328_v59, %s6495_s23 }
0x2aab   : > { %v4009_v45 = vpop.permute.xlu2 %4008 }
0x2aac   : > { %4011 = vst.msk [vmem:[#allocation6 + $0x1c] sm:$0x3] %vm6515_vm13, %v4009_v45  ;;  %vm6529_vm13 = vmmov %vm6510_vm1 }
0x2aad   : > { %v2814_v14 = vpop.permute.xlu1 %2813 }
0x2aae   : > { %2816 = vst.msk [vmem:[#allocation6 + $0xc] sm:$0x3] %vm6516_vm11, %v2814_v14  ;;  %vm6530_vm11 = vmmov %vm6510_vm1 }
0x2aaf   : > { %4014 = vrot.lane.b32.xlu0 %v4012_v52, %s6496_s28 }
0x2ab5   : > { %v3280_v13 = vpop.permute.xlu1 %3279 }
0x2ab6   : > { %3282 = vst.msk [vmem:[#allocation7 + $0xc] sm:$0x3] %vm6518_vm14, %v3280_v13  ;;  %vm6532_vm14 = vmmov %vm6531_vm0 }
0x2ab7   : > { %2652 = vrot.lane.b32.xlu0 %v2650_v3, %s6495_s23 }
0x2abd   : > { %v2503_v15 = vpop.permute.xlu1 %2502 }
0x2abe   : > { %2505 = vst.msk [vmem:[#allocation7 + $0x16] sm:$0x3] %vm6519_vm12, %v2503_v15  ;;  %vm6533_vm12 = vmmov %vm6531_vm0 }
0x2abf   : > { %3132 = vrot.lane.b32.xlu0 %v3130_v41, %s6496_s28 }
0x2ac5   : > { %v2986_v35 = vpop.permute.xlu1 %2985 }
0x2ac6   : > { %2988 = vst.msk [vmem:[#allocation7 + $0x10] sm:$0x3] %vm6520_vm6, %v2986_v35  ;;  %vm6534_vm6 = vmmov %vm6531_vm0 }
0x2ac7   : > { %3573 = vrot.lane.b32.xlu0 %v3571_v38, %s6496_s28 }
0x2acf   : > { %2824 = vrot.lane.b32.xlu0 %v2822_v7, %s6496_s28 }
0x2ad7   : > { %3273 = vrot.lane.b32.xlu0 %v3271_v53, %s6495_s23 }
0x2adb   : > { %v4162_v5 = vpop.permute.xlu1 %4161 }
0x2adc   : > { %4164 = vst.msk [vmem:[#allocation7] sm:$0x3] %vm6510_vm1, %v4162_v5  ;;  %vm6537_vm1 = vmmov %vm6531_vm0 }
0x2adf   : > { %2019 = vrot.lane.b32.xlu0 %v2017_v40, %s6496_s28 }
0x2ae3   : > { %v3421_v10 = vpop.permute.xlu1 %3420 }
0x2ae4   : > { %3423 = vst.msk [vmem:[#allocation6 + $0x14] sm:$0x3] %vm6524_vm7, %v3421_v10 }
0x2ae7   : > { %3714 = vrot.lane.b32.xlu0 %v3712_v62, %s6495_s23 }
0x2aeb   : > { %v2181_v29 = vpop.permute.xlu1 %2180 }
0x2aec   : > { %2183 = vst.msk [vmem:[#allocation7 + $0x1a] sm:$0x3] %vm6525_vm10, %v2181_v29 }
0x2af3   : > { %v3862_v46 = vpop.permute.xlu1 %3861 }
0x2af4   : > { %3864 = vst.msk [vmem:[#allocation6 + $0x1a] sm:$0x3] %vm6526_vm15, %v3862_v46 }
0x2b11   : > { %v4106_v28 = vpop.permute.xlu0 %4105 }
0x2b12   : > { %v4108_v44 = vmul.f32 %v4106_v28, %v4103_v31 }
0x2b14   : > { %v4110_v50 = vadd.f32 %v4109_v48, %v4108_v44 }
0x2b16   : > { %v4153_v0 = vsel %vm6527_vm5, %v4110_v50, 0.0 }
0x2b17   : > { %4155 = vrot.lane.b32.xlu0 %v4153_v0, %s6495_s23  ;;  %s4299_s23 = sshll.u32 %s4296_s0, 4  ;;  %s4300_s23 = int_to_ptr.hbm [resolvable:$true] %s4299_s23 }
0x2b18   : > { %s4878_s30 = sshra.s32 %s4300_s23, 4  ;;  %s4879_s30 = int_to_ptr.hbm [resolvable:$true] %s4878_s30 }
0x2b19   : > { %v2331_v34 = vpop.permute.xlu0 %2330  ;;  %s4880_s5 = scalar_lea.hbm %s4879_s30, 32  ;;  %p4885_p1 = scmp.lt.s32.totalorder %s4879_s30, %s6449_s20 }
0x2b1a   : > { %2333 = vst.msk [vmem:[#allocation6 + $0x6] sm:$0x3] %vm6528_vm9, %v2331_v34  ;;  %p4881_p12 = scmp.ne.s32.totalorder %s4879_s30, %s4880_s5  ;;  %p4886_p2 = scmp.lt.s32.totalorder %s4884_s29, %s4880_s5 }
0x2b1c   : > { %p4882_p13 = pnand %p4881_p12, %p5081_p5  ;;  %p4887_p3 = por %p4886_p2, %p4885_p1 }
0x2b1e   : > { %p4883_p0 = pneg %p4882_p13 }
0x2b20   : > { %p4888_p4 = pnand %p4887_p3, %p4883_p0 }
0x2b21   : > { %v4015_v47 = vpop.permute.xlu0 %4014  ;;  %v4165_v18 = vld [vmem:[#allocation6] sm:$0xff] }
0x2b22   : > { %4017 = vst.msk [vmem:[#allocation7 + $0x2] sm:$0x3] %vm6529_vm13, %v4015_v47  ;;  %4546 = vmatmul.msk.f32.vlgmr.msra.gmra.mxu1 %vm662_vm2, %v4165_v18 }
0x2b29   : > { %v2653_v6 = vpop.permute.xlu0 %2652  ;;  %v4171_v39 = vld [vmem:[#allocation7] sm:$0xff] }
0x2b2a   : > { %2655 = vst.msk [vmem:[#allocation6 + $0xa] sm:$0x3] %vm6530_vm11, %v2653_v6  ;;  %4542 = vmatmul.msk.f32.vlgmr.msra.gmra.mxu0 %vm662_vm2, %v4171_v39 }
0x2b31   : > { %v3133_v8 = vpop.permute.xlu0 %3132  ;;  %v4166_v16 = vld [vmem:[#allocation6 + $0x8] sm:$0xff] }
0x2b32   : > { %3135 = vst.msk [vmem:[#allocation7 + $0xe] sm:$0x3] %vm6531_vm0, %v3133_v8  ;;  %4547 = vmatmul.msk.f32.gmra.mxu1 %vm662_vm2, %v4166_v16 }
0x2b39   : > { %v3574_v32 = vpop.permute.xlu0 %3573 }
0x2b3a   : > { %3576 = vst.msk [vmem:[#allocation7 + $0x8] sm:$0x3] %vm6532_vm14, %v3574_v32 }
0x2b41   : > { %v2825_v36 = vpop.permute.xlu0 %2824  ;;  %v4172_v54 = vld [vmem:[#allocation7 + $0x8] sm:$0xff] }
0x2b42   : > { %2827 = vst.msk [vmem:[#allocation7 + $0x12] sm:$0x3] %vm6533_vm12, %v2825_v36  ;;  %4543 = vmatmul.msk.f32.gmra.mxu0 %vm662_vm2, %v4172_v54 }
0x2b49   : > { %v3274_v37 = vpop.permute.xlu0 %3273  ;;  %v4173_v30 = vld [vmem:[#allocation7 + $0x10] sm:$0xff] }
0x2b4a   : > { %3276 = vst.msk [vmem:[#allocation6 + $0x12] sm:$0x3] %vm6534_vm6, %v3274_v37  ;;  %4544 = vmatmul.msk.f32.gmra.mxu0 %vm662_vm2, %v4173_v30 }
0x2b51   : > { %v2020_v27 = vpop.permute.xlu0 %2019  ;;  %v4167_v57 = vld [vmem:[#allocation6 + $0x10] sm:$0xff] }
0x2b52   : > { %2022 = vst.msk [vmem:[#allocation7 + $0x1c] sm:$0x3] %vm6535_vm3, %v2020_v27  ;;  %4548 = vmatmul.msk.f32.gmra.mxu1 %vm662_vm2, %v4167_v57 }
0x2b59   : > { %v3715_v26 = vpop.permute.xlu0 %3714  ;;  %v4174_v63 = vld [vmem:[#allocation7 + $0x18] sm:$0xff] }
0x2b5a   : > { %3717 = vst.msk [vmem:[#allocation6 + $0x18] sm:$0x3] %vm6536_vm8, %v3715_v26  ;;  %4545 = vmatmul.msk.f32.gmra.mxu0 %vm662_vm2, %v4174_v63 }
0x2b89   : > { %v4156_v4 = vpop.permute.xlu0 %4155 }
0x2b8a   : > { %4158 = vst.msk [vmem:[#allocation6 + $0x1e] sm:$0x3] %vm6537_vm1, %v4156_v4 }
0x2b91   : > { %v4168_v58 = vld [vmem:[#allocation6 + $0x18] sm:$0xff] }
0x2b92   : > { %4549 = vmatmul.msk.f32.gmra.mxu1 %vm662_vm2, %v4168_v58 }
0x2b9f   : > { %v4247_v20 = vpop.f32.mrf.mxu1 }
0x2ba7   : > { %v4206_v17 = vpop.f32.mrf.mxu0 }
0x2ba8   : > { %v4248_v33 = vadd.f32 %v4247_v20, %v4206_v17 }
0x2baa   : > { %v4263_v19 = vadd.f32 %v4626_v49, %v4248_v33 }
0x2bac   : > { %4267 = vst [vmem:[#allocation8] sm:$0xff] %v4263_v19 }
0x2baf   : > { %v4250_v56 = vpop.f32.mrf.mxu1 }
0x2bbf   : > { %v4209_v22 = vpop.f32.mrf.mxu0 }
0x2bc0   : > { %v4251_v60 = vadd.f32 %v4250_v56, %v4209_v22 }
0x2bc2   : > { %v4264_v2 = vadd.f32 %v4626_v49, %v4251_v60 }
0x2bc4   : > { %4268 = vst [vmem:[#allocation8 + $0x8] sm:$0xff] %v4264_v2 }
0x2bc7   : > { %v4212_v25 = vpop.f32.mrf.mxu0 }
0x2bcb   : > { %v4271_v43 = vld [vmem:[#allocation8] ss:$2 sm:$0xff]  ;;  %v4277_v11 = vld [vmem:[#allocation8 + $0x1] ss:$2 sm:$0xff] }
0x2bcc   : > { %4274 = vst [vmem:[%s638_s1] sm:$0xff] %v4271_v43 }
0x2bcd   : > { %4550 = vst [vmem:[%s638_s1 + $0x10] sm:$0xff] %v4277_v11 }
0x2bcf   : > { %v4253_v23 = vpop.f32.mrf.mxu1 }
0x2bd0   : > { %v4254_v12 = vadd.f32 %v4253_v23, %v4212_v25 }
0x2bd2   : > { %v4265_v9 = vadd.f32 %v4626_v49, %v4254_v12 }
0x2bd4   : > { %4269 = vst [vmem:[#allocation8 + $0x10] sm:$0xff] %v4265_v9 }
0x2bd7   : > { %v4215_v21 = vpop.f32.mrf.mxu0 }
0x2c0f   : > { %v4256_v42 = vpop.f32.mrf.mxu1 }
0x2c10   : > { %v4257_v1 = vadd.f32 %v4256_v42, %v4215_v21 }
0x2c12   : > { %v4266_v59 = vadd.f32 %v4626_v49, %v4257_v1 }
0x2c14   : > { %4270 = vst [vmem:[#allocation8 + $0x18] sm:$0xff] %v4266_v59 }
0x2c1b   : > { %v4273_v45 = vld [vmem:[#allocation8 + $0x10] ss:$2 sm:$0xff]  ;;  %v4279_v14 = vld [vmem:[#allocation8 + $0x11] ss:$2 sm:$0xff] }
0x2c1c   : > { %4275 = vst [vmem:[%s638_s1 + $0x8] sm:$0xff] %v4273_v45 }
0x2c1d   : > { %4551 = vst [vmem:[%s638_s1 + $0x18] sm:$0xff] %v4279_v14 }
0x2c1e   : > { %4891 = shalt.err (!%p4888_p4)
}
0x2c1f   : > { %s4936_s27 = smov 128   ;;  %s4937_s1 = smov 8  }
0x2c20   : > { %4565 = dma.vmem_to_hbm [thread:$0]  (%p5081_p5), %s4298_s25, 512, %s4300_s23, %s4284_s21, %s4936_s27, %s4936_s27, %s4937_s1  }
0x2c21 PF: > { %s6538_s0 = sld [smem:[#allocation12_spill]]  ;;  %p4571_p7 = scmp.ge.s32.totalorder %s4926_s24, 2 }
0x2c23   : > { %p4568_p8 = pnand %p4571_p7, %p5085_p6 }
0x2c25   : > { %p4569_p9 = pneg %p4568_p8 }
0x2c27   : > { %s4314_s6 = sand.u32 1, %s6538_s0  }
0x2c28   : > { %s4315_s2 = scalar_lea.sflag [#allocation10], %s4314_s6 }
0x2c29   : > { %4909 = dma.done.wait (%p4569_p9), %s4315_s2, 512  }
0x2c2a   : > { %4911 = vsyncadd (%p4569_p9), %s4315_s2, 4294966784  ;;  %s6540_s24 = sld [smem:[#allocation14_spill]]  ;;  %s6543_s1 = smov %s4918_s22 }
0x2c2b   : > { %s6541_s5 = sld [smem:[#allocation13_spill]] }
0x2c2c   : > { %s6542_s23 = sld [smem:[#allocation15_spill]] }
0x2c30   : > { %p30_p10 = scmp.ge.s32.totalorder %s6540_s24, 4  }
0x2c31   : > { %s6544_s22 = smov %s6541_s5 }
0x2c32   :  { %32 = sbr.rel (!%p30_p10) target bundleno = 12 (0xc), region = 166 }
0x2c37   :  { %4321 = vsyncpa [#allocation10], 1 }
0x2c38   :  { %4323 = vsyncpa [#allocation10 + $0x1], 1 }

</bundles_post_ra>
